<compile_context>
chip_gen: v7x
topology: tpu7x:2x2x1
jax: 0.10.0
libtpu: 0.0.40
codegen_flags: <defaults>
</compile_context>

<pallas_src>
import jax
import jax.numpy as jnp
from jax.experimental import pallas as pl
from jax.experimental.pallas import tpu as pltpu

NUM_JOINTS = 17        # Config.num_keypoints (COCO keypoints)
KERNEL_NUM = 256
IN_CH = 2048
BN_EPS = 1e-5
FINAL_PAD = 128        # final 1x1 conv output channels padded 17 -> 128

# 2x2 im2col tap order (row offset a, col offset c) into the zero-padded input.
TAPS = ((0, 0), (0, 1), (1, 0), (1, 1))


# ----------------------------------------------------------------------------- #
# Pallas kernels
# ----------------------------------------------------------------------------- #
def _deconv_mm_acc_kernel(a_ref, w_ref, scale_ref, shift_ref, o_ref, acc_ref):
    """Layer 1: K streamed over the last grid axis; BN+ReLU fused at the end."""
    @pl.when(pl.program_id(1) == 0)
    def _init():
        acc_ref[...] = jnp.zeros_like(acc_ref)

    acc_ref[...] += jnp.dot(a_ref[...], w_ref[...],
                            preferred_element_type=jnp.float32)

    @pl.when(pl.program_id(1) == pl.num_programs(1) - 1)
    def _finalize():
        y = acc_ref[...] * scale_ref[...] + shift_ref[...]
        o_ref[...] = jnp.maximum(y, 0.0).astype(o_ref.dtype)


def _deconv_mm_kernel(a_ref, w_ref, scale_ref, shift_ref, o_ref):
    """Layers 2: single-K matmul with fused BN+ReLU epilogue."""
    y = jnp.dot(a_ref[...], w_ref[...], preferred_element_type=jnp.float32)
    y = y * scale_ref[...] + shift_ref[...]
    o_ref[...] = jnp.maximum(y, 0.0).astype(o_ref.dtype)


def _deconv_mm_head_kernel(a_ref, w_ref, scale_ref, shift_ref,
                           wf_ref, bf_ref, o_ref):
    """Layer 3 + final 1x1 conv, one parity group per grid step:
    o = relu(bn(a @ w_parity)) @ wf + bias."""
    y = jnp.dot(a_ref[...], w_ref[...], preferred_element_type=jnp.float32)
    y = jnp.maximum(y * scale_ref[...] + shift_ref[...], 0.0)
    z = jnp.dot(y.astype(wf_ref.dtype), wf_ref[...],
                preferred_element_type=jnp.float32)
    o_ref[...] = (z + bf_ref[...]).astype(o_ref.dtype)


# ----------------------------------------------------------------------------- #
# pallas_call wrappers
# ----------------------------------------------------------------------------- #
def _layer1_matmul(a, w, scale, shift, *, tn=512, tk=2048):
    """a:(M, 8192) bf16, w:(8192, 1024) bf16. K streamed, grid (N/tn, K/tk)."""
    M, K = a.shape
    _, N = w.shape
    assert K % tk == 0 and N % tn == 0
    return pl.pallas_call(
        _deconv_mm_acc_kernel,
        out_shape=jax.ShapeDtypeStruct((M, N), jnp.bfloat16),
        grid=(N // tn, K // tk),
        in_specs=[
            pl.BlockSpec((M, tk), lambda j, k: (0, k)),
            pl.BlockSpec((tk, tn), lambda j, k: (k, j)),
            pl.BlockSpec((1, tn), lambda j, k: (0, j)),
            pl.BlockSpec((1, tn), lambda j, k: (0, j)),
        ],
        out_specs=pl.BlockSpec((M, tn), lambda j, k: (0, j)),
        scratch_shapes=[pltpu.VMEM((M, tn), jnp.float32)],
        compiler_params=pltpu.CompilerParams(
            dimension_semantics=("parallel", "arbitrary")),
    )(a, w, scale, shift)


def _layer2_matmul(a, w, scale, shift, *, tn=512):
    """a:(M, 1024) bf16, w:(1024, 1024) bf16. Single K block, grid (N/tn,)."""
    M, K = a.shape
    _, N = w.shape
    assert N % tn == 0
    return pl.pallas_call(
        _deconv_mm_kernel,
        out_shape=jax.ShapeDtypeStruct((M, N), jnp.bfloat16),
        grid=(N // tn,),
        in_specs=[
            pl.BlockSpec((M, K), lambda j: (0, 0)),
            pl.BlockSpec((K, tn), lambda j: (0, j)),
            pl.BlockSpec((1, tn), lambda j: (0, j)),
            pl.BlockSpec((1, tn), lambda j: (0, j)),
        ],
        out_specs=pl.BlockSpec((M, tn), lambda j: (0, j)),
        compiler_params=pltpu.CompilerParams(
            dimension_semantics=("parallel",)),
    )(a, w, scale, shift)


def _layer3_head_matmul(a, w, scale, shift, wf, bf):
    """Layer 3 + fused final conv.  Grid of 4 parity groups; output is the
    parity-packed heatmaps (M, 4*FINAL_PAD) in f32."""
    M, K = a.shape
    _, N = w.shape
    tn = N // 4                       # one parity group (=KERNEL_NUM cols) per step
    return pl.pallas_call(
        _deconv_mm_head_kernel,
        out_shape=jax.ShapeDtypeStruct((M, 4 * FINAL_PAD), jnp.float32),
        grid=(4,),
        in_specs=[
            pl.BlockSpec((M, K), lambda p: (0, 0)),
            pl.BlockSpec((K, tn), lambda p: (0, p)),
            pl.BlockSpec((1, tn), lambda p: (0, p)),
            pl.BlockSpec((1, tn), lambda p: (0, p)),
            pl.BlockSpec((KERNEL_NUM, FINAL_PAD), lambda p: (0, 0)),
            pl.BlockSpec((1, FINAL_PAD), lambda p: (0, 0)),
        ],
        out_specs=pl.BlockSpec((M, FINAL_PAD), lambda p: (0, p)),
        compiler_params=pltpu.CompilerParams(
            dimension_semantics=("parallel",)),
    )(a, w, scale, shift, wf, bf)


# ----------------------------------------------------------------------------- #
# Lightweight XLA glue (each side fuses into ~one small data-movement op)
# ----------------------------------------------------------------------------- #
def _im2col(x):
    """x: (B,H,W,C) -> patches (B*(H+1)*(W+1), 4C) over the zero-padded input."""
    B, H, W, C = x.shape
    xp = jnp.pad(x, ((0, 0), (1, 1), (1, 1), (0, 0)))
    patches = jnp.concatenate(
        [xp[:, a:a + H + 1, c:c + W + 1, :] for (a, c) in TAPS], axis=-1)
    return patches.reshape(B * (H + 1) * (W + 1), 4 * C)


def _recombine(y, B, H, W, Cout):
    """Parity recombination: out[b, 2m+ph, 2n+pw] = y[b, m+ph, n+pw, 2*ph+pw]."""
    y = y.reshape(B, H + 1, W + 1, 4, Cout)
    e00 = y[:, :H, :W, 0]
    e01 = y[:, :H, 1:, 1]
    e10 = y[:, 1:, :W, 2]
    e11 = y[:, 1:, 1:, 3]
    row0 = jnp.stack([e00, e01], axis=3)          # (B, H, W, 2, Cout)
    row1 = jnp.stack([e10, e11], axis=3)
    out = jnp.stack([row0, row1], axis=2)         # (B, H, 2, W, 2, Cout)
    return out.reshape(B, 2 * H, 2 * W, Cout)


# ----------------------------------------------------------------------------- #
# Forward pass
# ----------------------------------------------------------------------------- #
@jax.jit
def deconv_forward(x_nchw, prep):
    """Full Deconv.forward. Input NCHW (PyTorch convention), output NCHW f32."""
    x = jnp.transpose(x_nchw, (0, 2, 3, 1)).astype(jnp.bfloat16)   # -> NHWC

    # Block 1: ConvT(2048->256) + BN + ReLU (16 MiB weight streamed over K).
    B, H, W, _ = x.shape
    y = _layer1_matmul(_im2col(x), prep["w1"], prep["scale1"], prep["shift1"])
    x = _recombine(y, B, H, W, KERNEL_NUM)

    # Block 2: ConvT(256->256) + BN + ReLU (single-K kernel).
    B, H, W, _ = x.shape
    y = _layer2_matmul(_im2col(x), prep["w2"], prep["scale2"], prep["shift2"])
    x = _recombine(y, B, H, W, KERNEL_NUM)

    # Block 3: ConvT(256->256) + BN + ReLU + final 1x1 conv, fused in one kernel.
    B, H, W, _ = x.shape
    y = _layer3_head_matmul(_im2col(x), prep["w3"], prep["scale3"],
                            prep["shift3"], prep["wf"], prep["shift_f"])
    hm = _recombine(y, B, H, W, FINAL_PAD)        # (B, 2H, 2W, 128) f32
    hm = hm[..., :NUM_JOINTS]
    return jnp.transpose(hm, (0, 3, 1, 2))        # -> NCHW


# ----------------------------------------------------------------------------- #
# One-time parameter preparation (hoisted out of the hot path)
# ----------------------------------------------------------------------------- #
def prepare_params(p):
    """Repack ConvTranspose weights into parity-packed bf16 matrices and fold
    conv bias + eval-mode BN into a per-column (scale, shift) affine."""
    prep = {}
    for i in (1, 2, 3):
        w = p[f"w{i}"]                                   # (Cin, Cout, 4, 4)
        cols = []
        for ph in (0, 1):
            for pw in (0, 1):
                rows = []
                for (a, c) in TAPS:
                    kh = (3 if ph == 0 else 2) - 2 * a
                    kw = (3 if pw == 0 else 2) - 2 * c
                    rows.append(w[:, :, kh, kw])         # (Cin, Cout)
                cols.append(jnp.concatenate(rows, axis=0))   # (4*Cin, Cout)
        prep[f"w{i}"] = jnp.concatenate(cols, axis=1).astype(jnp.bfloat16)

        inv_std = 1.0 / jnp.sqrt(p[f"bn{i}_var"] + BN_EPS)
        scale = p[f"bn{i}_gamma"] * inv_std
        shift = p[f"bn{i}_beta"] + scale * (p[f"b{i}"] - p[f"bn{i}_mean"])
        prep[f"scale{i}"] = jnp.tile(scale, 4).reshape(1, -1).astype(jnp.float32)
        prep[f"shift{i}"] = jnp.tile(shift, 4).reshape(1, -1).astype(jnp.float32)

    # Final 1x1 conv: weight (17, 256, 1, 1) -> (256, 17) -> pad cols to 128.
    # Padded weight columns and bias entries are zero, so channels 17..127 stay 0.
    wf = p["wf"].reshape(NUM_JOINTS, KERNEL_NUM).T
    n_pad = FINAL_PAD - NUM_JOINTS
    prep["wf"] = jnp.pad(wf, ((0, 0), (0, n_pad))).astype(jnp.bfloat16)
    prep["shift_f"] = jnp.pad(p["bf"], (0, n_pad)).reshape(1, -1).astype(jnp.float32)
    return prep


# ----------------------------------------------------------------------------- #
# Deterministic parameter construction (synthetic, matches __init__ shapes)
# ----------------------------------------------------------------------------- #
def make_params(key):
    keys = jax.random.split(key, 16)
    p = {}

    def normal(k, shape, std):
        return std * jax.random.normal(k, shape, jnp.float32)

    # ConvTranspose2d weights: (in_channels, out_channels, kH, kW)
    p["w1"] = normal(keys[0], (IN_CH, KERNEL_NUM, 4, 4), 0.01)
    p["b1"] = normal(keys[1], (KERNEL_NUM,), 0.01)
    p["w2"] = normal(keys[2], (KERNEL_NUM, KERNEL_NUM, 4, 4), 0.02)
    p["b2"] = normal(keys[3], (KERNEL_NUM,), 0.01)
    p["w3"] = normal(keys[4], (KERNEL_NUM, KERNEL_NUM, 4, 4), 0.02)
    p["b3"] = normal(keys[5], (KERNEL_NUM,), 0.01)

    for i, kk in zip((1, 2, 3), (keys[6], keys[7], keys[8])):
        k1, k2, k3, k4 = jax.random.split(kk, 4)
        p[f"bn{i}_gamma"] = 1.0 + 0.1 * jax.random.normal(k1, (KERNEL_NUM,), jnp.float32)
        p[f"bn{i}_beta"] = 0.1 * jax.random.normal(k2, (KERNEL_NUM,), jnp.float32)
        p[f"bn{i}_mean"] = 0.05 * jax.random.normal(k3, (KERNEL_NUM,), jnp.float32)
        p[f"bn{i}_var"] = 1.0 + 0.1 * jnp.abs(jax.random.normal(k4, (KERNEL_NUM,), jnp.float32))

    # final Conv2d(256 -> num_joints, 1x1): weight (out, in, 1, 1)
    p["wf"] = normal(keys[9], (NUM_JOINTS, KERNEL_NUM, 1, 1), 0.05)
    p["bf"] = normal(keys[10], (NUM_JOINTS,), 0.01)
    return p


if __name__ == "__main__":
    key = jax.random.PRNGKey(0)
    k_param, k_x = jax.random.split(key)

    params = make_params(k_param)
    prep = prepare_params(params)   # one-time weight repack / BN fold

    # Small backbone-feature-like input: batch=2, channels=2048, spatial=4x4.
    x = jax.random.normal(k_x, (2, IN_CH, 4, 4), jnp.float32)

    out = deconv_forward(x, prep)
    out = jax.block_until_ready(out)

    assert out.shape == (2, NUM_JOINTS, 32, 32), out.shape
    assert jnp.isfinite(out).all()
    print("KERNEL_OK")
</pallas_src>

<mosaic_0001>
module attributes {stable_mosaic.version = 11 : i64} {
  func.func @_deconv_mm_acc_kernel(%arg0: i32, %arg1: i32, %arg2: memref<50x2048xbf16, #tpu.memory_space<vmem>>, %arg3: memref<2048x512xbf16, #tpu.memory_space<vmem>>, %arg4: memref<1x512xf32, #tpu.memory_space<vmem>>, %arg5: memref<1x512xf32, #tpu.memory_space<vmem>>, %arg6: memref<50x512xbf16, #tpu.memory_space<vmem>>, %arg7: memref<50x512xf32, #tpu.memory_space<vmem>>) attributes {dimension_semantics = [#tpu.dimension_semantics<parallel>, #tpu.dimension_semantics<arbitrary>], iteration_bounds = array<i64: 2, 4>, scalar_prefetch = 0 : i64, scratch_operands = 1 : i64, tpu.core_type = #tpu.core_type<tc>, window_params = [{transform_indices = @transform_0, window_bounds = array<i64: 50, 2048>}, {transform_indices = @transform_1, window_bounds = array<i64: 2048, 512>}, {transform_indices = @transform_2, window_bounds = array<i64: 1, 512>}, {transform_indices = @transform_3, window_bounds = array<i64: 1, 512>}, {transform_indices = @transform_4, window_bounds = array<i64: 50, 512>}]} {
    %c0_i32 = arith.constant 0 : i32
    %0 = arith.cmpi eq, %arg1, %c0_i32 : i32
    %1 = arith.extui %0 : i1 to i32
    %c0_i32_0 = arith.constant 0 : i32
    %2 = arith.cmpi ne, %1, %c0_i32_0 : i32
    scf.if %2 {
      %cst_9 = arith.constant 0.000000e+00 : f32
      %12 = vector.broadcast %cst_9 : f32 to vector<50x512xf32>
      %c0_10 = arith.constant 0 : index
      %c0_11 = arith.constant 0 : index
      %13 = vector.load %arg7[%c0_10, %c0_11] : memref<50x512xf32, #tpu.memory_space<vmem>>, vector<50x512xf32>
      tpu.vector_store %arg7[%c0_10, %c0_11], %12 {strides = array<i32>} : memref<50x512xf32, #tpu.memory_space<vmem>>, vector<50x512xf32>,
    } else {
    }
    %c0 = arith.constant 0 : index
    %c0_1 = arith.constant 0 : index
    %3 = vector.load %arg7[%c0, %c0_1] : memref<50x512xf32, #tpu.memory_space<vmem>>, vector<50x512xf32>
    %c0_2 = arith.constant 0 : index
    %c0_3 = arith.constant 0 : index
    %4 = vector.load %arg2[%c0_2, %c0_3] : memref<50x2048xbf16, #tpu.memory_space<vmem>>, vector<50x2048xbf16>
    %c0_4 = arith.constant 0 : index
    %c0_5 = arith.constant 0 : index
    %5 = vector.load %arg3[%c0_4, %c0_5] : memref<2048x512xbf16, #tpu.memory_space<vmem>>, vector<2048x512xbf16>
    %cst = arith.constant dense<0.000000e+00> : vector<50x512xf32>
    %6 = tpu.matmul %4, %5, %cst {dimension_numbers = #tpu.dot_dimension_numbers<[1], [0], [0], [1], [0, 0, 1, 1], [], []>} : vector<50x2048xbf16>, vector<2048x512xbf16>, vector<50x512xf32> -> vector<50x512xf32>
    %7 = arith.addf %3, %6 : vector<50x512xf32>
    %c0_6 = arith.constant 0 : index
    %c0_7 = arith.constant 0 : index
    %8 = vector.load %arg7[%c0_6, %c0_7] : memref<50x512xf32, #tpu.memory_space<vmem>>, vector<50x512xf32>
    tpu.vector_store %arg7[%c0_6, %c0_7], %7 {strides = array<i32>} : memref<50x512xf32, #tpu.memory_space<vmem>>, vector<50x512xf32>,
    %c3_i32 = arith.constant 3 : i32
    %9 = arith.cmpi eq, %arg1, %c3_i32 : i32
    %10 = arith.extui %9 : i1 to i32
    %c0_i32_8 = arith.constant 0 : i32
    %11 = arith.cmpi ne, %10, %c0_i32_8 : i32
    scf.if %11 {
      %c0_9 = arith.constant 0 : index
      %c0_10 = arith.constant 0 : index
      %12 = vector.load %arg7[%c0_9, %c0_10] : memref<50x512xf32, #tpu.memory_space<vmem>>, vector<50x512xf32>
      %c0_11 = arith.constant 0 : index
      %c0_12 = arith.constant 0 : index
      %13 = vector.load %arg4[%c0_11, %c0_12] : memref<1x512xf32, #tpu.memory_space<vmem>>, vector<1x512xf32>
      %14 = vector.broadcast %13 : vector<1x512xf32> to vector<50x512xf32>
      %15 = arith.mulf %12, %14 : vector<50x512xf32>
      %c0_13 = arith.constant 0 : index
      %c0_14 = arith.constant 0 : index
      %16 = vector.load %arg5[%c0_13, %c0_14] : memref<1x512xf32, #tpu.memory_space<vmem>>, vector<1x512xf32>
      %17 = vector.broadcast %16 : vector<1x512xf32> to vector<50x512xf32>
      %18 = arith.addf %15, %17 : vector<50x512xf32>
      %cst_15 = arith.constant 0.000000e+00 : f32
      %19 = vector.broadcast %cst_15 : f32 to vector<50x512xf32>
      %20 = arith.maximumf %18, %19 : vector<50x512xf32>
      %21 = arith.truncf %20 : vector<50x512xf32> to vector<50x512xbf16>
      %c0_16 = arith.constant 0 : index
      %c0_17 = arith.constant 0 : index
      %22 = vector.load %arg6[%c0_16, %c0_17] : memref<50x512xbf16, #tpu.memory_space<vmem>>, vector<50x512xbf16>
      tpu.vector_store %arg6[%c0_16, %c0_17], %21 {strides = array<i32>} : memref<50x512xbf16, #tpu.memory_space<vmem>>, vector<50x512xbf16>,
    } else {
    }
    return
  }
  func.func @transform_0(%arg0: i32, %arg1: i32) -> (i32, i32) {
    %c0_i32 = arith.constant 0 : i32
    %c0_i32_0 = arith.constant 0 : i32
    return %c0_i32, %arg1 : i32, i32
  }
  func.func @transform_1(%arg0: i32, %arg1: i32) -> (i32, i32) {
    %c0_i32 = arith.constant 0 : i32
    return %arg1, %arg0 : i32, i32
  }
  func.func @transform_2(%arg0: i32, %arg1: i32) -> (i32, i32) {
    %c0_i32 = arith.constant 0 : i32
    %c0_i32_0 = arith.constant 0 : i32
    return %c0_i32, %arg0 : i32, i32
  }
  func.func @transform_3(%arg0: i32, %arg1: i32) -> (i32, i32) {
    %c0_i32 = arith.constant 0 : i32
    %c0_i32_0 = arith.constant 0 : i32
    return %c0_i32, %arg0 : i32, i32
  }
  func.func @transform_4(%arg0: i32, %arg1: i32) -> (i32, i32) {
    %c0_i32 = arith.constant 0 : i32
    %c0_i32_0 = arith.constant 0 : i32
    return %c0_i32, %arg0 : i32, i32
  }
}

module attributes {stable_mosaic.version = 11 : i64} {
  func.func @_deconv_mm_kernel(%arg0: i32, %arg1: memref<162x1024xbf16, #tpu.memory_space<vmem>>, %arg2: memref<1024x512xbf16, #tpu.memory_space<vmem>>, %arg3: memref<1x512xf32, #tpu.memory_space<vmem>>, %arg4: memref<1x512xf32, #tpu.memory_space<vmem>>, %arg5: memref<162x512xbf16, #tpu.memory_space<vmem>>) attributes {dimension_semantics = [#tpu.dimension_semantics<parallel>], iteration_bounds = array<i64: 2>, scalar_prefetch = 0 : i64, scratch_operands = 0 : i64, tpu.core_type = #tpu.core_type<tc>, window_params = [{pipeline_mode = #tpu.pipeline_mode<synchronous>, transform_indices = @transform_0, window_bounds = array<i64: 162, 1024>}, {transform_indices = @transform_1, window_bounds = array<i64: 1024, 512>}, {transform_indices = @transform_2, window_bounds = array<i64: 1, 512>}, {transform_indices = @transform_3, window_bounds = array<i64: 1, 512>}, {transform_indices = @transform_4, window_bounds = array<i64: 162, 512>}]} {
    %c0 = arith.constant 0 : index
    %c0_0 = arith.constant 0 : index
    %0 = vector.load %arg1[%c0, %c0_0] : memref<162x1024xbf16, #tpu.memory_space<vmem>>, vector<162x1024xbf16>
    %c0_1 = arith.constant 0 : index
    %c0_2 = arith.constant 0 : index
    %1 = vector.load %arg2[%c0_1, %c0_2] : memref<1024x512xbf16, #tpu.memory_space<vmem>>, vector<1024x512xbf16>
    %cst = arith.constant dense<0.000000e+00> : vector<162x512xf32>
    %2 = tpu.matmul %0, %1, %cst {dimension_numbers = #tpu.dot_dimension_numbers<[1], [0], [0], [1], [0, 0, 1, 1], [], []>} : vector<162x1024xbf16>, vector<1024x512xbf16>, vector<162x512xf32> -> vector<162x512xf32>
    %c0_3 = arith.constant 0 : index
    %c0_4 = arith.constant 0 : index
    %3 = vector.load %arg3[%c0_3, %c0_4] : memref<1x512xf32, #tpu.memory_space<vmem>>, vector<1x512xf32>
    %4 = vector.broadcast %3 : vector<1x512xf32> to vector<162x512xf32>
    %5 = arith.mulf %2, %4 : vector<162x512xf32>
    %c0_5 = arith.constant 0 : index
    %c0_6 = arith.constant 0 : index
    %6 = vector.load %arg4[%c0_5, %c0_6] : memref<1x512xf32, #tpu.memory_space<vmem>>, vector<1x512xf32>
    %7 = vector.broadcast %6 : vector<1x512xf32> to vector<162x512xf32>
    %8 = arith.addf %5, %7 : vector<162x512xf32>
    %cst_7 = arith.constant 0.000000e+00 : f32
    %9 = vector.broadcast %cst_7 : f32 to vector<162x512xf32>
    %10 = arith.maximumf %8, %9 : vector<162x512xf32>
    %11 = arith.truncf %10 : vector<162x512xf32> to vector<162x512xbf16>
    %c0_8 = arith.constant 0 : index
    %c0_9 = arith.constant 0 : index
    %12 = vector.load %arg5[%c0_8, %c0_9] : memref<162x512xbf16, #tpu.memory_space<vmem>>, vector<162x512xbf16>
    tpu.vector_store %arg5[%c0_8, %c0_9], %11 {strides = array<i32>} : memref<162x512xbf16, #tpu.memory_space<vmem>>, vector<162x512xbf16>,
    return
  }
  func.func @transform_0(%arg0: i32) -> (i32, i32) {
    %c0_i32 = arith.constant 0 : i32
    %c0_i32_0 = arith.constant 0 : i32
    %c0_i32_1 = arith.constant 0 : i32
    return %c0_i32, %c0_i32_0 : i32, i32
  }
  func.func @transform_1(%arg0: i32) -> (i32, i32) {
    %c0_i32 = arith.constant 0 : i32
    %c0_i32_0 = arith.constant 0 : i32
    return %c0_i32, %arg0 : i32, i32
  }
  func.func @transform_2(%arg0: i32) -> (i32, i32) {
    %c0_i32 = arith.constant 0 : i32
    %c0_i32_0 = arith.constant 0 : i32
    return %c0_i32, %arg0 : i32, i32
  }
  func.func @transform_3(%arg0: i32) -> (i32, i32) {
    %c0_i32 = arith.constant 0 : i32
    %c0_i32_0 = arith.constant 0 : i32
    return %c0_i32, %arg0 : i32, i32
  }
  func.func @transform_4(%arg0: i32) -> (i32, i32) {
    %c0_i32 = arith.constant 0 : i32
    %c0_i32_0 = arith.constant 0 : i32
    return %c0_i32, %arg0 : i32, i32
  }
}

module attributes {stable_mosaic.version = 11 : i64} {
  func.func @_deconv_mm_head_kernel(%arg0: i32, %arg1: memref<578x1024xbf16, #tpu.memory_space<vmem>>, %arg2: memref<1024x256xbf16, #tpu.memory_space<vmem>>, %arg3: memref<1x256xf32, #tpu.memory_space<vmem>>, %arg4: memref<1x256xf32, #tpu.memory_space<vmem>>, %arg5: memref<256x128xbf16, #tpu.memory_space<vmem>>, %arg6: memref<1x128xf32, #tpu.memory_space<vmem>>, %arg7: memref<578x128xf32, #tpu.memory_space<vmem>>) attributes {dimension_semantics = [#tpu.dimension_semantics<parallel>], iteration_bounds = array<i64: 4>, scalar_prefetch = 0 : i64, scratch_operands = 0 : i64, tpu.core_type = #tpu.core_type<tc>, window_params = [{pipeline_mode = #tpu.pipeline_mode<synchronous>, transform_indices = @transform_0, window_bounds = array<i64: 578, 1024>}, {transform_indices = @transform_1, window_bounds = array<i64: 1024, 256>}, {transform_indices = @transform_2, window_bounds = array<i64: 1, 256>}, {transform_indices = @transform_3, window_bounds = array<i64: 1, 256>}, {pipeline_mode = #tpu.pipeline_mode<synchronous>, transform_indices = @transform_4, window_bounds = array<i64: 256, 128>}, {pipeline_mode = #tpu.pipeline_mode<synchronous>, transform_indices = @transform_5, window_bounds = array<i64: 1, 128>}, {transform_indices = @transform_6, window_bounds = array<i64: 578, 128>}]} {
    %c0 = arith.constant 0 : index
    %c0_0 = arith.constant 0 : index
    %0 = vector.load %arg1[%c0, %c0_0] : memref<578x1024xbf16, #tpu.memory_space<vmem>>, vector<578x1024xbf16>
    %c0_1 = arith.constant 0 : index
    %c0_2 = arith.constant 0 : index
    %1 = vector.load %arg2[%c0_1, %c0_2] : memref<1024x256xbf16, #tpu.memory_space<vmem>>, vector<1024x256xbf16>
    %cst = arith.constant dense<0.000000e+00> : vector<578x256xf32>
    %2 = tpu.matmul %0, %1, %cst {dimension_numbers = #tpu.dot_dimension_numbers<[1], [0], [0], [1], [0, 0, 1, 1], [], []>} : vector<578x1024xbf16>, vector<1024x256xbf16>, vector<578x256xf32> -> vector<578x256xf32>
    %c0_3 = arith.constant 0 : index
    %c0_4 = arith.constant 0 : index
    %3 = vector.load %arg3[%c0_3, %c0_4] : memref<1x256xf32, #tpu.memory_space<vmem>>, vector<1x256xf32>
    %4 = vector.broadcast %3 : vector<1x256xf32> to vector<578x256xf32>
    %5 = arith.mulf %2, %4 : vector<578x256xf32>
    %c0_5 = arith.constant 0 : index
    %c0_6 = arith.constant 0 : index
    %6 = vector.load %arg4[%c0_5, %c0_6] : memref<1x256xf32, #tpu.memory_space<vmem>>, vector<1x256xf32>
    %7 = vector.broadcast %6 : vector<1x256xf32> to vector<578x256xf32>
    %8 = arith.addf %5, %7 : vector<578x256xf32>
    %cst_7 = arith.constant 0.000000e+00 : f32
    %9 = vector.broadcast %cst_7 : f32 to vector<578x256xf32>
    %10 = arith.maximumf %8, %9 : vector<578x256xf32>
    %11 = arith.truncf %10 : vector<578x256xf32> to vector<578x256xbf16>
    %c0_8 = arith.constant 0 : index
    %c0_9 = arith.constant 0 : index
    %12 = vector.load %arg5[%c0_8, %c0_9] : memref<256x128xbf16, #tpu.memory_space<vmem>>, vector<256x128xbf16>
    %cst_10 = arith.constant dense<0.000000e+00> : vector<578x128xf32>
    %13 = tpu.matmul %11, %12, %cst_10 {dimension_numbers = #tpu.dot_dimension_numbers<[1], [0], [0], [1], [0, 0, 1, 1], [], []>} : vector<578x256xbf16>, vector<256x128xbf16>, vector<578x128xf32> -> vector<578x128xf32>
    %c0_11 = arith.constant 0 : index
    %c0_12 = arith.constant 0 : index
    %14 = vector.load %arg6[%c0_11, %c0_12] : memref<1x128xf32, #tpu.memory_space<vmem>>, vector<1x128xf32>
    %15 = vector.broadcast %14 : vector<1x128xf32> to vector<578x128xf32>
    %16 = arith.addf %13, %15 : vector<578x128xf32>
    %c0_13 = arith.constant 0 : index
    %c0_14 = arith.constant 0 : index
    %17 = vector.load %arg7[%c0_13, %c0_14] : memref<578x128xf32, #tpu.memory_space<vmem>>, vector<578x128xf32>
    tpu.vector_store %arg7[%c0_13, %c0_14], %16 {strides = array<i32>} : memref<578x128xf32, #tpu.memory_space<vmem>>, vector<578x128xf32>,
    return
  }
  func.func @transform_0(%arg0: i32) -> (i32, i32) {
    %c0_i32 = arith.constant 0 : i32
    %c0_i32_0 = arith.constant 0 : i32
    %c0_i32_1 = arith.constant 0 : i32
    return %c0_i32, %c0_i32_0 : i32, i32
  }
  func.func @transform_1(%arg0: i32) -> (i32, i32) {
    %c0_i32 = arith.constant 0 : i32
    %c0_i32_0 = arith.constant 0 : i32
    return %c0_i32, %arg0 : i32, i32
  }
  func.func @transform_2(%arg0: i32) -> (i32, i32) {
    %c0_i32 = arith.constant 0 : i32
    %c0_i32_0 = arith.constant 0 : i32
    return %c0_i32, %arg0 : i32, i32
  }
  func.func @transform_3(%arg0: i32) -> (i32, i32) {
    %c0_i32 = arith.constant 0 : i32
    %c0_i32_0 = arith.constant 0 : i32
    return %c0_i32, %arg0 : i32, i32
  }
  func.func @transform_4(%arg0: i32) -> (i32, i32) {
    %c0_i32 = arith.constant 0 : i32
    %c0_i32_0 = arith.constant 0 : i32
    %c0_i32_1 = arith.constant 0 : i32
    return %c0_i32, %c0_i32_0 : i32, i32
  }
  func.func @transform_5(%arg0: i32) -> (i32, i32) {
    %c0_i32 = arith.constant 0 : i32
    %c0_i32_0 = arith.constant 0 : i32
    %c0_i32_1 = arith.constant 0 : i32
    return %c0_i32, %c0_i32_0 : i32, i32
  }
  func.func @transform_6(%arg0: i32) -> (i32, i32) {
    %c0_i32 = arith.constant 0 : i32
    %c0_i32_0 = arith.constant 0 : i32
    return %c0_i32, %arg0 : i32, i32
  }
}

</mosaic_0001>

<bundles_post_ra>
// kernel: deconv_forward.3
= control target key start
LH: loop header
LB: loop body
LE: loop exit
PB: predicated region body
PF: predicated region fallthrough
CT: control target
= control target key end

     0   :  { %s8502_s0 = inlined_call_operand.vmem [shape: bf16[50,8192], index: 0, kind: input, shape index: {}]   ;;  %s8503_s1 = inlined_call_operand.hbm [shape: bf16[8192,1024], index: 1, kind: input, shape index: {}]   ;;  %s8504_s2 = inlined_call_operand.vmem [shape: f32[1,1024], index: 2, kind: input, shape index: {}]   ;;  %s8505_s3 = inlined_call_operand.vmem [shape: f32[1,1024], index: 3, kind: input, shape index: {}]   ;;  %s8506_s4 = inlined_call_operand.vmem [shape: bf16[50,1024], index: 4, kind: output, shape index: {}]  }
   0x1   :  { %8511 = sst [smem:[#allocation13_spill]] %s8502_s0 }
   0x2   :  { %9 = vsyncpa [#allocation5], 0 }
   0x3   :  { %11 = vsyncpa [#allocation5 + $0x1], 0  ;;  %s7367_s15 = smov 0   ;;  %s7369_s16 = smov 0  }
   0x4   :  { %s7371_s17 = smov 0   ;;  %s7373_s18 = smov 0  }
   0x5   :  { %s7375_s19 = smov 0   ;;  %s7377_s20 = smov 0  }
   0x6   :  { %s7379_s21 = smov 0   ;;  %s7381_s22 = smov 0  }
   0x7   :  { %s7383_s23 = smov 0   ;;  %s7385_s24 = smov 0  }
   0x8   :  { %s7387_s25 = smov 0   ;;  %s7389_s26 = smov 0  }
   0x9 LB: > { %8512 = sst [smem:[#allocation8_spill]] %s7315_s21  ;;  %s5524_s27 = sadd.s32 4294967295, %s7335_s26   ;;  %s7335_s26 = sphi %s7389_s26, %s17_s26   ;;  %s7331_s25 = sphi %s7387_s25, %s8527_s25   ;;  %s7327_s24 = sphi %s7385_s24, %s8534_s24   ;;  %s7323_s23 = sphi %s7383_s23, %s8525_s23   ;;  %s7319_s22 = sphi %s7381_s22, %s8533_s22   ;;  %s7315_s21 = sphi %s7379_s21, %s8524_s21   ;;  %s7311_s20 = sphi %s7377_s20, %s8523_s20   ;;  %s7307_s19 = sphi %s7375_s19, %s8532_s19   ;;  %s7303_s18 = sphi %s7373_s18, %s8531_s18   ;;  %s7299_s17 = sphi %s7371_s17, %s8530_s17   ;;  %s7295_s16 = sphi %s7369_s16, %s8529_s16   ;;  %s7291_s15 = sphi %s7367_s15, %s8528_s15  }
   0xa   : > { %8513 = sst [smem:[#allocation9_spill]] %s7331_s25  ;;  %s26_s28 = sadd.s32 1, %s7327_s24 }
   0xb   : > { %p27_p0 = scmp.ge.s32.totalorder %s26_s28, 4  ;;  %s29_s29 = sadd.s32 1, %s7331_s25 }
   0xc   : > { %s36_s30 = sadd.s32 1, %s7315_s21  ;;  %p43_p1 = scmp.ne.s32.totalorder %s7315_s21, %s7311_s20 }
   0xd   : > { %s8536_s28 = smov (%p27_p0, %s26_s28), 0  ;;  %s8538_s29 = smov (!%p27_p0, %s29_s29), %s7331_s25 }
   0xe   : > { %8514 = sst [smem:[#allocation10_spill]] %s8536_s28  ;;  %s33_s5 = ssub.s32 %s7327_s24, %s8536_s28 }
   0xf   : > { %p44_p2 = scmp.eq.s32.totalorder %s7335_s26, 0  ;;  %p31_p3 = scmp.ge.s32.totalorder %s8538_s29, 2 }
  0x10   : > { %p34_p4 = scmp.eq.s32.totalorder %s33_s5, 0  ;;  %s64_s7 = sadd.s32 1, %s7307_s19 }
  0x11   : > { %p7439_p5 = por %p44_p2, %p43_p1  ;;  %s8540_s29 = smov (%p31_p3, %s8538_s29), 0 }
  0x12   : > { %8516 = sst [smem:[#allocation11_spill]] %s8540_s29  ;;  %s60_s9 = ssub.s32 %s7331_s25, %s8540_s29 }
  0x13   : > { %s7447_s8 = scalar_select %p34_p4, %s7315_s21, %s36_s30  }
  0x14   : > { %p71_p6 = scmp.ne.s32.totalorder %s7307_s19, %s7303_s18  ;;  %s61_s10 = sor.u32 %s60_s9, %s33_s5 }
  0x15   : > { %8517 = sst [smem:[#allocation12_spill]] %s7447_s8  ;;  %p77_p7 = scmp.ne.s32.totalorder %s7303_s18, %s7299_s17 }
  0x16   : > { %p62_p8 = scmp.eq.s32.totalorder %s61_s10, 0  ;;  %p7455_p9 = por %p71_p6, %p44_p2 }
  0x17   : > { %p78_p10 = scmp.eq.s32.totalorder %s5524_s27, 0  ;;  %p140_p11 = scmp.eq.s32.totalorder %s60_s9, 0 }
  0x18   : > { %s7462_s12 = scalar_select %p62_p8, %s7307_s19, %s64_s7  }
  0x19   : > { %p7464_p12 = por %p78_p10, %p77_p7  ;;  %s142_s14 = sadd.s32 1, %s7295_s16 }
  0x1a   : > { %s7470_s30 = scalar_select %p140_p11, %s7295_s16, %s142_s14  }
  0x1b   : > { %p152_p13 = scmp.ne.s32.totalorder %s7295_s16, %s7291_s15  ;;  %p153_p0 = scmp.eq.s32.totalorder %s5524_s27, 7 }
  0x1c   : > { %p5527_p2 = scmp.ge.s32.totalorder %s7335_s26, 8 }
  0x1d   : > { %p7476_p1 = por %p153_p0, %p152_p13 }
  0x1e   : > { %175 = sbr.rel (%p5527_p2) target bundleno = 105 (0x69), region = 16 }
  0x1f   : > { %s8520_s17 = scalar_select %p7476_p1, 1, 0 }
  0x25   : > { %178 = sbr.rel (!%p7439_p5) target bundleno = 76 (0x4c), region = 20  ;;  %s180_s5 = sand.u32 (%p7439_p5), 1, %s7315_s21  }
  0x26   : > { %s6135_s7 = sshll.u32 (%p7439_p5), %s7327_s24, 6  ;;  %s6320_s9 = smul.u32 (%p7439_p5), 448, %s180_s5 }
  0x27   : > { %s8521_s0 = sld [smem:[#allocation13_spill]] (%p7439_p5) }
  0x28   : > { %s7496_s27 = scalar_lea.vmem (%p7439_p5), [#allocation3], %s6320_s9 }
  0x2d   : > { %s7488_s29 = scalar_lea.vmem %s8521_s0, %s6135_s7 }
  0x2e   : > { %v198_v0 = vld [vmem:[%s7488_s29] sm:$0xff]  ;;  %v200_v1 = vld [vmem:[%s7488_s29 + $0x8] sm:$0xff]  ;;  %v202_v2 = vld [vmem:[%s7488_s29 + $0x10] sm:$0xff] }
  0x2f   : > { %v204_v3 = vld [vmem:[%s7488_s29 + $0x18] sm:$0xff]  ;;  %v206_v4 = vld [vmem:[%s7488_s29 + $0x20] sm:$0xff]  ;;  %v208_v5 = vld [vmem:[%s7488_s29 + $0x28] sm:$0xff]  ;;  %199 = vst [vmem:[%s7496_s27] sm:$0xff] %v198_v0 }
  0x30   : > { %201 = vst [vmem:[%s7496_s27 + $0x8] sm:$0xff] %v200_v1  ;;  %203 = vst [vmem:[%s7496_s27 + $0x10] sm:$0xff] %v202_v2  ;;  %v210_v6 = vld [vmem:[%s7488_s29 + $0x30] sm:$0xff]  ;;  %v212_v7 = vld [vmem:[%s7488_s29 + $0x38] sm:$0xff] }
  0x31   : > { %205 = vst [vmem:[%s7496_s27 + $0x18] sm:$0xff] %v204_v3  ;;  %207 = vst [vmem:[%s7496_s27 + $0x20] sm:$0xff] %v206_v4  ;;  %v214_v8 = vld [vmem:[%s7488_s29 + $0x100] sm:$0xff]  ;;  %v216_v9 = vld [vmem:[%s7488_s29 + $0x108] sm:$0xff] }
  0x32   : > { %209 = vst [vmem:[%s7496_s27 + $0x28] sm:$0xff] %v208_v5  ;;  %211 = vst [vmem:[%s7496_s27 + $0x30] sm:$0xff] %v210_v6  ;;  %v218_v10 = vld [vmem:[%s7488_s29 + $0x110] sm:$0xff]  ;;  %v220_v11 = vld [vmem:[%s7488_s29 + $0x118] sm:$0xff] }
  0x33   : > { %213 = vst [vmem:[%s7496_s27 + $0x38] sm:$0xff] %v212_v7  ;;  %215 = vst [vmem:[%s7496_s27 + $0x40] sm:$0xff] %v214_v8  ;;  %v222_v12 = vld [vmem:[%s7488_s29 + $0x120] sm:$0xff]  ;;  %v224_v13 = vld [vmem:[%s7488_s29 + $0x128] sm:$0xff] }
  0x34   : > { %217 = vst [vmem:[%s7496_s27 + $0x48] sm:$0xff] %v216_v9  ;;  %219 = vst [vmem:[%s7496_s27 + $0x50] sm:$0xff] %v218_v10  ;;  %v226_v14 = vld [vmem:[%s7488_s29 + $0x130] sm:$0xff]  ;;  %v228_v15 = vld [vmem:[%s7488_s29 + $0x138] sm:$0xff] }
  0x35   : > { %221 = vst [vmem:[%s7496_s27 + $0x58] sm:$0xff] %v220_v11  ;;  %223 = vst [vmem:[%s7496_s27 + $0x60] sm:$0xff] %v222_v12  ;;  %v230_v16 = vld [vmem:[%s7488_s29 + $0x200] sm:$0xff]  ;;  %v232_v17 = vld [vmem:[%s7488_s29 + $0x208] sm:$0xff] }
  0x36   : > { %225 = vst [vmem:[%s7496_s27 + $0x68] sm:$0xff] %v224_v13  ;;  %227 = vst [vmem:[%s7496_s27 + $0x70] sm:$0xff] %v226_v14  ;;  %v234_v18 = vld [vmem:[%s7488_s29 + $0x210] sm:$0xff]  ;;  %v236_v19 = vld [vmem:[%s7488_s29 + $0x218] sm:$0xff] }
  0x37   : > { %229 = vst [vmem:[%s7496_s27 + $0x78] sm:$0xff] %v228_v15  ;;  %231 = vst [vmem:[%s7496_s27 + $0x80] sm:$0xff] %v230_v16  ;;  %v238_v20 = vld [vmem:[%s7488_s29 + $0x220] sm:$0xff]  ;;  %v240_v21 = vld [vmem:[%s7488_s29 + $0x228] sm:$0xff] }
  0x38   : > { %233 = vst [vmem:[%s7496_s27 + $0x88] sm:$0xff] %v232_v17  ;;  %235 = vst [vmem:[%s7496_s27 + $0x90] sm:$0xff] %v234_v18  ;;  %v242_v22 = vld [vmem:[%s7488_s29 + $0x230] sm:$0xff]  ;;  %v244_v23 = vld [vmem:[%s7488_s29 + $0x238] sm:$0xff] }
  0x39   : > { %237 = vst [vmem:[%s7496_s27 + $0x98] sm:$0xff] %v236_v19  ;;  %239 = vst [vmem:[%s7496_s27 + $0xa0] sm:$0xff] %v238_v20  ;;  %v246_v24 = vld [vmem:[%s7488_s29 + $0x300] sm:$0xff]  ;;  %v248_v25 = vld [vmem:[%s7488_s29 + $0x308] sm:$0xff] }
  0x3a   : > { %241 = vst [vmem:[%s7496_s27 + $0xa8] sm:$0xff] %v240_v21  ;;  %243 = vst [vmem:[%s7496_s27 + $0xb0] sm:$0xff] %v242_v22  ;;  %v250_v26 = vld [vmem:[%s7488_s29 + $0x310] sm:$0xff]  ;;  %v252_v27 = vld [vmem:[%s7488_s29 + $0x318] sm:$0xff] }
  0x3b   : > { %245 = vst [vmem:[%s7496_s27 + $0xb8] sm:$0xff] %v244_v23  ;;  %247 = vst [vmem:[%s7496_s27 + $0xc0] sm:$0xff] %v246_v24  ;;  %v254_v28 = vld [vmem:[%s7488_s29 + $0x320] sm:$0xff]  ;;  %v256_v29 = vld [vmem:[%s7488_s29 + $0x328] sm:$0xff] }
  0x3c   : > { %249 = vst [vmem:[%s7496_s27 + $0xc8] sm:$0xff] %v248_v25  ;;  %251 = vst [vmem:[%s7496_s27 + $0xd0] sm:$0xff] %v250_v26  ;;  %v258_v30 = vld [vmem:[%s7488_s29 + $0x330] sm:$0xff]  ;;  %v260_v31 = vld [vmem:[%s7488_s29 + $0x338] sm:$0xff] }
  0x3d   : > { %253 = vst [vmem:[%s7496_s27 + $0xd8] sm:$0xff] %v252_v27  ;;  %255 = vst [vmem:[%s7496_s27 + $0xe0] sm:$0xff] %v254_v28  ;;  %v262_v32 = vld [vmem:[%s7488_s29 + $0x400] sm:$0xff]  ;;  %v264_v33 = vld [vmem:[%s7488_s29 + $0x408] sm:$0xff] }
  0x3e   : > { %257 = vst [vmem:[%s7496_s27 + $0xe8] sm:$0xff] %v256_v29  ;;  %259 = vst [vmem:[%s7496_s27 + $0xf0] sm:$0xff] %v258_v30  ;;  %v266_v34 = vld [vmem:[%s7488_s29 + $0x410] sm:$0xff]  ;;  %v268_v35 = vld [vmem:[%s7488_s29 + $0x418] sm:$0xff] }
  0x3f   : > { %261 = vst [vmem:[%s7496_s27 + $0xf8] sm:$0xff] %v260_v31  ;;  %263 = vst [vmem:[%s7496_s27 + $0x100] sm:$0xff] %v262_v32  ;;  %v270_v36 = vld [vmem:[%s7488_s29 + $0x420] sm:$0xff]  ;;  %v272_v37 = vld [vmem:[%s7488_s29 + $0x428] sm:$0xff] }
  0x40   : > { %265 = vst [vmem:[%s7496_s27 + $0x108] sm:$0xff] %v264_v33  ;;  %267 = vst [vmem:[%s7496_s27 + $0x110] sm:$0xff] %v266_v34  ;;  %v274_v38 = vld [vmem:[%s7488_s29 + $0x430] sm:$0xff]  ;;  %v276_v39 = vld [vmem:[%s7488_s29 + $0x438] sm:$0xff] }
  0x41   : > { %269 = vst [vmem:[%s7496_s27 + $0x118] sm:$0xff] %v268_v35  ;;  %271 = vst [vmem:[%s7496_s27 + $0x120] sm:$0xff] %v270_v36  ;;  %v278_v40 = vld [vmem:[%s7488_s29 + $0x500] sm:$0xff]  ;;  %v280_v41 = vld [vmem:[%s7488_s29 + $0x508] sm:$0xff] }
  0x42   : > { %273 = vst [vmem:[%s7496_s27 + $0x128] sm:$0xff] %v272_v37  ;;  %275 = vst [vmem:[%s7496_s27 + $0x130] sm:$0xff] %v274_v38  ;;  %v282_v42 = vld [vmem:[%s7488_s29 + $0x510] sm:$0xff]  ;;  %v284_v43 = vld [vmem:[%s7488_s29 + $0x518] sm:$0xff] }
  0x43   : > { %277 = vst [vmem:[%s7496_s27 + $0x138] sm:$0xff] %v276_v39  ;;  %279 = vst [vmem:[%s7496_s27 + $0x140] sm:$0xff] %v278_v40  ;;  %v286_v44 = vld [vmem:[%s7488_s29 + $0x520] sm:$0xff]  ;;  %v288_v45 = vld [vmem:[%s7488_s29 + $0x528] sm:$0xff] }
  0x44   : > { %281 = vst [vmem:[%s7496_s27 + $0x148] sm:$0xff] %v280_v41  ;;  %283 = vst [vmem:[%s7496_s27 + $0x150] sm:$0xff] %v282_v42  ;;  %v290_v46 = vld [vmem:[%s7488_s29 + $0x530] sm:$0xff]  ;;  %v292_v47 = vld [vmem:[%s7488_s29 + $0x538] sm:$0xff] }
  0x45   : > { %285 = vst [vmem:[%s7496_s27 + $0x158] sm:$0xff] %v284_v43  ;;  %287 = vst [vmem:[%s7496_s27 + $0x160] sm:$0xff] %v286_v44  ;;  %v294_v48 = vld [vmem:[%s7488_s29 + $0x600] sm:$0xff]  ;;  %v296_v49 = vld [vmem:[%s7488_s29 + $0x608] sm:$0xff] }
  0x46   : > { %289 = vst [vmem:[%s7496_s27 + $0x168] sm:$0xff] %v288_v45  ;;  %291 = vst [vmem:[%s7496_s27 + $0x170] sm:$0xff] %v290_v46  ;;  %v298_v50 = vld [vmem:[%s7488_s29 + $0x610] sm:$0xff]  ;;  %v300_v51 = vld [vmem:[%s7488_s29 + $0x618] sm:$0xff] }
  0x47   : > { %293 = vst [vmem:[%s7496_s27 + $0x178] sm:$0xff] %v292_v47  ;;  %295 = vst [vmem:[%s7496_s27 + $0x180] sm:$0xff] %v294_v48  ;;  %v302_v52 = vld [vmem:[%s7488_s29 + $0x620] sm:$0xff]  ;;  %v304_v53 = vld [vmem:[%s7488_s29 + $0x628] sm:$0xff] }
  0x48   : > { %297 = vst [vmem:[%s7496_s27 + $0x188] sm:$0xff] %v296_v49  ;;  %299 = vst [vmem:[%s7496_s27 + $0x190] sm:$0xff] %v298_v50  ;;  %v306_v54 = vld [vmem:[%s7488_s29 + $0x630] sm:$0xff]  ;;  %v308_v55 = vld [vmem:[%s7488_s29 + $0x638] sm:$0xff] }
  0x49   : > { %301 = vst [vmem:[%s7496_s27 + $0x198] sm:$0xff] %v300_v51  ;;  %303 = vst [vmem:[%s7496_s27 + $0x1a0] sm:$0xff] %v302_v52 }
  0x4a   : > { %305 = vst [vmem:[%s7496_s27 + $0x1a8] sm:$0xff] %v304_v53  ;;  %307 = vst [vmem:[%s7496_s27 + $0x1b0] sm:$0xff] %v306_v54 }
  0x4b   : > { %309 = vst [vmem:[%s7496_s27 + $0x1b8] sm:$0xff] %v308_v55 }
  0x4c PF: > { %s316_s6 = sand.u32 1, %s7307_s19   ;;  %s5532_s5 = sshll.u32 %s7331_s25, 2 }
  0x4d   : > { %s5530_s7 = sshll.u32 %s316_s6, 12  ;;  %s6136_s9 = sshll.u32 %s7327_s24, 11 }
  0x4e   : > { %s327_s10 = sadd.s32 %s6136_s9, %s5532_s5  ;;  %s320_s14 = scalar_lea.vmem [#allocation4], %s5530_s7 }
  0x4f   : > { %s330_s0 = sshll.u32 %s320_s14, 4  ;;  %s5534_s28 = sshll.u32 %s327_s10, 6  ;;  %s7607_s0 = int_to_ptr.vmem [resolvable:$true] %s330_s0 }
  0x50   : > { %s7612_s29 = scalar_lea.hbm %s8503_s1, %s5534_s28  ;;  %s7614_s27 = scalar_lea.sflag [#allocation5], %s316_s6 }
  0x51   : > { %s7209_s25 = scalar_lea.hbm %s7612_s29, 65536  ;;  %s7213_s9 = scalar_lea.hbm %s8503_s1, 524288 }
  0x52   : > { %p7210_p3 = scmp.ne.s32.totalorder %s7612_s29, %s7209_s25  ;;  %p7214_p6 = scmp.lt.u32.totalorder %s7612_s29, %s8503_s1 }
  0x53   : > { %p7215_p7 = scmp.lt.u32.totalorder %s7213_s9, %s7209_s25  ;;  %p7217_p10 = scmp.lt.u32.totalorder %s7209_s25, %s7612_s29 }
  0x54   : > { %p7211_p4 = pnand %p7210_p3, %p7455_p9 }
  0x55   : > { %p7216_p8 = por %p7215_p7, %p7214_p6 }
  0x56   : > { %p7212_p5 = pneg %p7211_p4 }
  0x57   : > { %p7218_p11 = por %p7217_p10, %p7216_p8 }
  0x59   : > { %p7219_p13 = pnand %p7218_p11, %p7212_p5 }
  0x5b   : > { %7222 = shalt.err (!%p7219_p13)
}
  0x5c   : > { %s7223_s21 = scalar_lea.vmem %s7607_s0, 65536  ;;  %s7337_s28 = smov [#allocation4]  }
  0x5d   : > { %p7224_p0 = scmp.ne.s32.totalorder %s7607_s0, %s7223_s21  ;;  %s7227_s8 = sshll.u32 %s7337_s28, 4  ;;  %s7228_s8 = int_to_ptr.vmem [resolvable:$false] %s7227_s8 }
  0x5e   : > { %s7229_s6 = scalar_lea.vmem %s7228_s8, 131072  ;;  %p7230_p4 = scmp.lt.s32.totalorder %s7607_s0, %s7228_s8 }
  0x5f   : > { %p7225_p2 = pnand %p7224_p0, %p7455_p9  ;;  %p7231_p1 = scmp.lt.s32.totalorder %s7229_s6, %s7223_s21 }
  0x61   : > { %p7226_p3 = pneg %p7225_p2  ;;  %p7232_p6 = por %p7231_p1, %p7230_p4 }
  0x63   : > { %p7233_p7 = pnand %p7232_p6, %p7226_p3 }
  0x65   : > { %7236 = shalt.err (!%p7233_p7)
}
  0x66   : > { %s7338_s25 = smov 512   ;;  %s7339_s5 = smov 256  }
  0x67   : > { %s7340_s7 = smov 16  }
  0x68   : > { %6323 = dma.hbm_to_vmem [thread:$0]  (%p7455_p9), %s7612_s29, 65536, %s7607_s0, %s7614_s27, %s7338_s25, %s7339_s5, %s7340_s7  }
  0x69 PF: > { %p5535_p5 = scmp.ge.s32.totalorder %s7335_s26, 1  ;;  %p354_p8 = scmp.lt.s32.totalorder %s7335_s26, 9 }
  0x6b   : > { %p355_p10 = pnand %p5535_p5, %p354_p8 }
  0x6c   : > { %s361_s9 = sand.u32 (!%p355_p10), 1, %s7311_s20   ;;  %s367_s10 = sand.u32 (!%p355_p10), 1, %s7303_s18  }
  0x6d   : > { %358 = sbr.rel (%p355_p10) target bundleno = 932 (0x3a4), region = 55  ;;  %s5536_s21 = sshll.u32 (!%p355_p10), %s367_s10, 12 }
  0x6e   : > { %s6321_s14 = smul.u32 (!%p355_p10), 448, %s361_s9  ;;  %s368_s8 = scalar_lea.sflag (!%p355_p10), [#allocation5], %s367_s10 }
  0x6f   : > { %s7644_s6 = scalar_lea.vmem (!%p355_p10), [#allocation4], %s5536_s21 }
  0x70   : > { %s7642_s28 = scalar_lea.vmem (!%p355_p10), [#allocation3], %s6321_s14 }
  0x74   : > { %7286 = dma.done.wait (%p7464_p12), %s368_s8, 65536  }
  0x75   : > { %7288 = vsyncadd (%p7464_p12), %s368_s8, 4294901760  ;;  %s404_s0 = sand.u32 1, %s7291_s15   ;;  %s5537_s11 = sshll.u32 %s7323_s23, 2 }
  0x76   : > { %s6322_s29 = smul.u32 112, %s404_s0  ;;  %p411_p9 = scmp.lt.s32.totalorder %s5537_s11, 7 }
  0x77   : > { %p5539_p12 = scmp.ne.s32.totalorder %s7319_s22, 0 }
  0x78   : > { %s8542_s11 = smov (!%p411_p9, %s5537_s11), 7  ;;  %s7662_s13 = scalar_lea.vmem [#allocation6], %s6322_s29  ;;  %v7341_v56 = vmov (!%p5539_p12), 0.0  }
  0x79   : > { %s413_s25 = scalar_lea.vmem %s8504_s2, %s8542_s11  ;;  %s418_s9 = scalar_lea.vmem %s8505_s3, %s8542_s11  ;;  %425 = vst [vmem:[#allocation2] sm:$0xff] (!%p5539_p12), %v7341_v56  ;;  %426 = vst [vmem:[#allocation2 + $0x8] sm:$0xff] (!%p5539_p12), %v7341_v56 }
  0x7a   : > { %424 = sbr.rel (%p5539_p12) target bundleno = 135 (0x87), region = 67  ;;  %427 = vst [vmem:[#allocation2 + $0x10] sm:$0xff] (!%p5539_p12), %v7341_v56  ;;  %428 = vst [vmem:[#allocation2 + $0x18] sm:$0xff] (!%p5539_p12), %v7341_v56 }
  0x7b   : > { %429 = vst [vmem:[#allocation2 + $0x20] sm:$0xff] (!%p5539_p12), %v7341_v56  ;;  %430 = vst [vmem:[#allocation2 + $0x28] sm:$0xff] (!%p5539_p12), %v7341_v56 }
  0x7c   : > { %431 = vst [vmem:[#allocation2 + $0x30] sm:$0xff] (!%p5539_p12), %v7341_v56  ;;  %432 = vst [vmem:[#allocation2 + $0x38] sm:$0xff] (!%p5539_p12), %v7341_v56 }
  0x7d   : > { %433 = vst [vmem:[#allocation2 + $0x40] sm:$0xff] (!%p5539_p12), %v7341_v56  ;;  %434 = vst [vmem:[#allocation2 + $0x48] sm:$0xff] (!%p5539_p12), %v7341_v56 }
  0x7e   : > { %435 = vst [vmem:[#allocation2 + $0x50] sm:$0xff] (!%p5539_p12), %v7341_v56  ;;  %436 = vst [vmem:[#allocation2 + $0x58] sm:$0xff] (!%p5539_p12), %v7341_v56 }
  0x7f   : > { %437 = vst [vmem:[#allocation2 + $0x60] sm:$0xff] (!%p5539_p12), %v7341_v56  ;;  %438 = vst [vmem:[#allocation2 + $0x68] sm:$0xff] (!%p5539_p12), %v7341_v56 }
  0x80   : > { %439 = vst [vmem:[#allocation2 + $0x70] sm:$0xff] (!%p5539_p12), %v7341_v56  ;;  %440 = vst [vmem:[#allocation2 + $0x78] sm:$0xff] (!%p5539_p12), %v7341_v56 }
  0x81   : > { %441 = vst [vmem:[#allocation2 + $0x80] sm:$0xff] %v7341_v56  ;;  %442 = vst [vmem:[#allocation2 + $0x88] sm:$0xff] %v7341_v56 }
  0x82   : > { %443 = vst [vmem:[#allocation2 + $0x90] sm:$0xff] %v7341_v56  ;;  %444 = vst [vmem:[#allocation2 + $0x98] sm:$0xff] %v7341_v56 }
  0x83   : > { %445 = vst [vmem:[#allocation2 + $0xa0] sm:$0xff] %v7341_v56  ;;  %446 = vst [vmem:[#allocation2 + $0xa8] sm:$0xff] %v7341_v56 }
  0x84   : > { %447 = vst [vmem:[#allocation2 + $0xb0] sm:$0xff] %v7341_v56  ;;  %448 = vst [vmem:[#allocation2 + $0xb8] sm:$0xff] %v7341_v56 }
  0x85   : > { %449 = vst [vmem:[#allocation2 + $0xc0] sm:$0x3] %v7341_v56  ;;  %450 = vst [vmem:[#allocation2 + $0xc8] sm:$0x3] %v7341_v56 }
  0x86   : > { %451 = vst [vmem:[#allocation2 + $0xd0] sm:$0x3] %v7341_v56  ;;  %452 = vst [vmem:[#allocation2 + $0xd8] sm:$0x3] %v7341_v56 }
  0x87 PF: > { %v6425_v57 = vld [vmem:[%s7644_s6 + $0x4] ss:$16 sps:$4 sm:$0xff]   ;;  %v6427_v58 = vld [vmem:[%s7644_s6 + $0xc] ss:$16 sps:$4 sm:$0xff]   ;;  %v6429_v59 = vld [vmem:[%s7644_s6] ss:$16 sps:$4 sm:$0xff]  }
  0x88   : > { %3905 = vmatprep.subr.bf16.mxu0 %v6425_v57  ;;  %v6430_v60 = vld [vmem:[%s7644_s6 + $0x8] ss:$16 sps:$4 sm:$0xff]   ;;  %4473 = vmatprep.subr.bf16.mxu1 %v6427_v58  ;;  %v6431_v61 = vld [vmem:[%s7644_s6 + $0x24] ss:$16 sps:$4 sm:$0xff]   ;;  %v6433_v62 = vld [vmem:[%s7644_s6 + $0x2c] ss:$16 sps:$4 sm:$0xff]  }
  0x89   : > { %3906 = vmatpush1.bf16.msra.mxu0 %v6429_v59  ;;  %4474 = vmatpush1.bf16.msra.mxu1 %v6430_v60  ;;  %v6435_v63 = vld [vmem:[%s7644_s6 + $0x20] ss:$16 sps:$4 sm:$0xff]   ;;  %v6436_v0 = vld [vmem:[%s7644_s6 + $0x28] ss:$16 sps:$4 sm:$0xff]   ;;  %v6437_v1 = vld [vmem:[%s7644_s6 + $0x44] ss:$16 sps:$4 sm:$0xff]  }
  0x8a   : > { %3907 = vmatprep.subr.bf16.mxu0 %v6431_v61  ;;  %4475 = vmatprep.subr.bf16.mxu1 %v6433_v62  ;;  %v6439_v2 = vld [vmem:[%s7644_s6 + $0x4c] ss:$16 sps:$4 sm:$0xff]   ;;  %v6441_v3 = vld [vmem:[%s7644_s6 + $0x40] ss:$16 sps:$4 sm:$0xff]   ;;  %v6442_v4 = vld [vmem:[%s7644_s6 + $0x48] ss:$16 sps:$4 sm:$0xff]  }
  0x8b   : > { %v6443_v5 = vld [vmem:[%s7644_s6 + $0x64] ss:$16 sps:$4 sm:$0xff]   ;;  %v6445_v6 = vld [vmem:[%s7644_s6 + $0x6c] ss:$16 sps:$4 sm:$0xff]   ;;  %v6447_v7 = vld [vmem:[%s7644_s6 + $0x60] ss:$16 sps:$4 sm:$0xff]  }
  0x8c   : > { %v6448_v8 = vld [vmem:[%s7644_s6 + $0x68] ss:$16 sps:$4 sm:$0xff]   ;;  %v6449_v9 = vld [vmem:[%s7644_s6 + $0x84] ss:$16 sps:$4 sm:$0xff]   ;;  %v6451_v10 = vld [vmem:[%s7644_s6 + $0x8c] ss:$16 sps:$4 sm:$0xff]  }
  0x8d   : > { %3908 = vmatpush1.bf16.msra.mxu0 %v6435_v63  ;;  %4476 = vmatpush1.bf16.msra.mxu1 %v6436_v0  ;;  %v6453_v11 = vld [vmem:[%s7644_s6 + $0x80] ss:$16 sps:$4 sm:$0xff]   ;;  %v6454_v12 = vld [vmem:[%s7644_s6 + $0x88] ss:$16 sps:$4 sm:$0xff]   ;;  %v6455_v13 = vld [vmem:[%s7644_s6 + $0xa4] ss:$16 sps:$4 sm:$0xff]  }
  0x8e   : > { %3909 = vmatprep.subr.bf16.mxu0 %v6437_v1  ;;  %4477 = vmatprep.subr.bf16.mxu1 %v6439_v2  ;;  %v6457_v14 = vld [vmem:[%s7644_s6 + $0xac] ss:$16 sps:$4 sm:$0xff]   ;;  %v6459_v15 = vld [vmem:[%s7644_s6 + $0xa0] ss:$16 sps:$4 sm:$0xff]   ;;  %v6460_v16 = vld [vmem:[%s7644_s6 + $0xa8] ss:$16 sps:$4 sm:$0xff]  }
  0x8f   : > { %v6461_v17 = vld [vmem:[%s7644_s6 + $0xc4] ss:$16 sps:$4 sm:$0xff]   ;;  %v6463_v18 = vld [vmem:[%s7644_s6 + $0xcc] ss:$16 sps:$4 sm:$0xff]   ;;  %v6465_v19 = vld [vmem:[%s7644_s6 + $0xc0] ss:$16 sps:$4 sm:$0xff]  }
  0x90   : > { %v6466_v20 = vld [vmem:[%s7644_s6 + $0xc8] ss:$16 sps:$4 sm:$0xff]   ;;  %v6467_v21 = vld [vmem:[%s7644_s6 + $0xe4] ss:$16 sps:$4 sm:$0xff]   ;;  %v6469_v22 = vld [vmem:[%s7644_s6 + $0xec] ss:$16 sps:$4 sm:$0xff]  }
  0x91   : > { %3910 = vmatpush1.bf16.msra.mxu0 %v6441_v3  ;;  %4478 = vmatpush1.bf16.msra.mxu1 %v6442_v4  ;;  %v6471_v23 = vld [vmem:[%s7644_s6 + $0xe0] ss:$16 sps:$4 sm:$0xff]   ;;  %v6472_v24 = vld [vmem:[%s7644_s6 + $0xe8] ss:$16 sps:$4 sm:$0xff]   ;;  %v6473_v25 = vld [vmem:[%s7644_s6 + $0x104] ss:$16 sps:$4 sm:$0xff]  }
  0x92   : > { %3911 = vmatprep.subr.bf16.mxu0 %v6443_v5  ;;  %4479 = vmatprep.subr.bf16.mxu1 %v6445_v6  ;;  %v6475_v26 = vld [vmem:[%s7644_s6 + $0x10c] ss:$16 sps:$4 sm:$0xff]   ;;  %v6477_v27 = vld [vmem:[%s7644_s6 + $0x100] ss:$16 sps:$4 sm:$0xff]   ;;  %v6478_v28 = vld [vmem:[%s7644_s6 + $0x108] ss:$16 sps:$4 sm:$0xff]  }
  0x93   : > { %v6479_v29 = vld [vmem:[%s7644_s6 + $0x124] ss:$16 sps:$4 sm:$0xff]   ;;  %v6481_v30 = vld [vmem:[%s7644_s6 + $0x12c] ss:$16 sps:$4 sm:$0xff]   ;;  %v6483_v31 = vld [vmem:[%s7644_s6 + $0x120] ss:$16 sps:$4 sm:$0xff]  }
  0x94   : > { %v6484_v32 = vld [vmem:[%s7644_s6 + $0x128] ss:$16 sps:$4 sm:$0xff]   ;;  %v6485_v33 = vld [vmem:[%s7644_s6 + $0x144] ss:$16 sps:$4 sm:$0xff]   ;;  %v6487_v34 = vld [vmem:[%s7644_s6 + $0x14c] ss:$16 sps:$4 sm:$0xff]  }
  0x95   : > { %3912 = vmatpush1.bf16.msra.mxu0 %v6447_v7  ;;  %4480 = vmatpush1.bf16.msra.mxu1 %v6448_v8  ;;  %v6489_v35 = vld [vmem:[%s7644_s6 + $0x140] ss:$16 sps:$4 sm:$0xff]   ;;  %v6490_v36 = vld [vmem:[%s7644_s6 + $0x148] ss:$16 sps:$4 sm:$0xff]   ;;  %v6491_v37 = vld [vmem:[%s7644_s6 + $0x164] ss:$16 sps:$4 sm:$0xff]  }
  0x96   : > { %3913 = vmatprep.subr.bf16.mxu0 %v6449_v9  ;;  %4481 = vmatprep.subr.bf16.mxu1 %v6451_v10  ;;  %v6493_v38 = vld [vmem:[%s7644_s6 + $0x16c] ss:$16 sps:$4 sm:$0xff]   ;;  %v481_v39 = vld [vmem:[%s7642_s28] sm:$0xff]  ;;  %v6496_v42 = vld [vmem:[%s7644_s6 + $0x168] ss:$16 sps:$4 sm:$0xff]   ;;  %p6116_p1 = scmp.ne.s32.totalorder %s7319_s22, 3 }
  0x97   : > { %v489_v40 = vld [vmem:[%s7642_s28 + $0x40] sm:$0xff]  ;;  %v6499_v45 = vld [vmem:[%s7644_s6 + $0x18c] ss:$16 sps:$4 sm:$0xff]   ;;  %v6502_v47 = vld [vmem:[%s7644_s6 + $0x188] ss:$16 sps:$4 sm:$0xff]  }
  0x98   : > { %v6495_v41 = vld [vmem:[%s7644_s6 + $0x160] ss:$16 sps:$4 sm:$0xff]   ;;  %v5541_v43 = vcombine.high %v481_v39, %v489_v40  ;;  %v6497_v44 = vld [vmem:[%s7644_s6 + $0x184] ss:$16 sps:$4 sm:$0xff]   ;;  %v6505_v49 = vld [vmem:[%s7644_s6 + $0x1ac] ss:$16 sps:$4 sm:$0xff]   ;;  %v5540_v62 = vcombine.low %v481_v39, %v489_v40 }
  0x99   : > { %3914 = vmatpush1.bf16.msra.mxu0 %v6453_v11  ;;  %4482 = vmatpush1.bf16.msra.mxu1 %v6454_v12  ;;  %v6501_v46 = vld [vmem:[%s7644_s6 + $0x180] ss:$16 sps:$4 sm:$0xff]   ;;  %v6503_v48 = vld [vmem:[%s7644_s6 + $0x1a4] ss:$16 sps:$4 sm:$0xff]   ;;  %v6508_v51 = vld [vmem:[%s7644_s6 + $0x1a8] ss:$16 sps:$4 sm:$0xff]  }
  0x9a   : > { %3915 = vmatprep.subr.bf16.mxu0 %v6455_v13  ;;  %4483 = vmatprep.subr.bf16.mxu1 %v6457_v14  ;;  %v6507_v50 = vld [vmem:[%s7644_s6 + $0x1a0] ss:$16 sps:$4 sm:$0xff]   ;;  %v6509_v52 = vld [vmem:[%s7644_s6 + $0x1c4] ss:$16 sps:$4 sm:$0xff]   ;;  %v6511_v53 = vld [vmem:[%s7644_s6 + $0x1cc] ss:$16 sps:$4 sm:$0xff]  }
  0x9b   : > { %3937 = vmatprep.mubr.bf16.mxu0 %v5541_v43  ;;  %4505 = vmatprep.mubr.bf16.mxu1 %v5541_v43  ;;  %v6513_v54 = vld [vmem:[%s7644_s6 + $0x1c0] ss:$16 sps:$4 sm:$0xff]   ;;  %v6514_v55 = vld [vmem:[%s7644_s6 + $0x1c8] ss:$16 sps:$4 sm:$0xff]   ;;  %v6515_v56 = vld [vmem:[%s7644_s6 + $0x1e4] ss:$16 sps:$4 sm:$0xff]  }
  0x9c   : > { %v6517_v57 = vld [vmem:[%s7644_s6 + $0x1ec] ss:$16 sps:$4 sm:$0xff]   ;;  %v6519_v58 = vld [vmem:[%s7644_s6 + $0x1e0] ss:$16 sps:$4 sm:$0xff]   ;;  %v6520_v59 = vld [vmem:[%s7644_s6 + $0x1e8] ss:$16 sps:$4 sm:$0xff]  }
  0x9d   : > { %3916 = vmatpush1.bf16.msra.mxu0 %v6459_v15  ;;  %4484 = vmatpush1.bf16.msra.mxu1 %v6460_v16  ;;  %v6523_v60 = vld [vmem:[%s7644_s6 + $0x204] ss:$16 sps:$4 sm:$0xff]   ;;  %v6526_v61 = vld [vmem:[%s7644_s6 + $0x20c] ss:$16 sps:$4 sm:$0xff]   ;;  %v6521_v63 = vld [vmem:[%s7644_s6 + $0x200] ss:$16 sps:$4 sm:$0xff]  }
  0x9e   : > { %3917 = vmatprep.subr.bf16.mxu0 %v6461_v17  ;;  %4485 = vmatprep.subr.bf16.mxu1 %v6463_v18  ;;  %v6524_v0 = vld [vmem:[%s7644_s6 + $0x208] ss:$16 sps:$4 sm:$0xff]   ;;  %v6529_v1 = vld [vmem:[%s7644_s6 + $0x224] ss:$16 sps:$4 sm:$0xff]   ;;  %v6532_v2 = vld [vmem:[%s7644_s6 + $0x22c] ss:$16 sps:$4 sm:$0xff]  }
  0x9f   : > { %v6527_v3 = vld [vmem:[%s7644_s6 + $0x220] ss:$16 sps:$4 sm:$0xff]   ;;  %v6530_v4 = vld [vmem:[%s7644_s6 + $0x228] ss:$16 sps:$4 sm:$0xff]   ;;  %v6535_v5 = vld [vmem:[%s7644_s6 + $0x244] ss:$16 sps:$4 sm:$0xff]  }
  0xa0   : > { %v6538_v6 = vld [vmem:[%s7644_s6 + $0x24c] ss:$16 sps:$4 sm:$0xff]   ;;  %v497_v7 = vld [vmem:[%s7642_s28 + $0x80] sm:$0xff]  ;;  %v6536_v10 = vld [vmem:[%s7644_s6 + $0x248] ss:$16 sps:$4 sm:$0xff]  }
  0xa1   : > { %3918 = vmatpush1.bf16.msra.mxu0 %v6465_v19  ;;  %4486 = vmatpush1.bf16.msra.mxu1 %v6466_v20  ;;  %v505_v8 = vld [vmem:[%s7642_s28 + $0xc0] sm:$0xff]  ;;  %v6544_v14 = vld [vmem:[%s7644_s6 + $0x26c] ss:$16 sps:$4 sm:$0xff]   ;;  %v6542_v16 = vld [vmem:[%s7644_s6 + $0x268] ss:$16 sps:$4 sm:$0xff]  }
  0xa2   : > { %3919 = vmatprep.subr.bf16.mxu0 %v6467_v21  ;;  %4487 = vmatprep.subr.bf16.mxu1 %v6469_v22  ;;  %v6533_v9 = vld [vmem:[%s7644_s6 + $0x240] ss:$16 sps:$4 sm:$0xff]   ;;  %v5557_v11 = vcombine.high %v497_v7, %v505_v8  ;;  %v5556_v12 = vcombine.low %v497_v7, %v505_v8  ;;  %v6541_v13 = vld [vmem:[%s7644_s6 + $0x264] ss:$16 sps:$4 sm:$0xff]   ;;  %v6550_v20 = vld [vmem:[%s7644_s6 + $0x28c] ss:$16 sps:$4 sm:$0xff]  }
  0xa3   : > { %v6539_v15 = vld [vmem:[%s7644_s6 + $0x260] ss:$16 sps:$4 sm:$0xff]   ;;  %v6547_v19 = vld [vmem:[%s7644_s6 + $0x284] ss:$16 sps:$4 sm:$0xff]   ;;  %v6568_v39 = vld [vmem:[%s7644_s6 + $0x2ec] ss:$16 sps:$4 sm:$0xff]  }
  0xa4   : > { %v513_v17 = vld [vmem:[%s7642_s28 + $0x100] sm:$0xff]  ;;  %v6618_v8 = vld [vmem:[%s7644_s6 + $0x3ec] ss:$16 sps:$4 sm:$0xff]  }
  0xa5   : > { %3920 = vmatpush1.bf16.msra.mxu0 %v6471_v23  ;;  %4488 = vmatpush1.bf16.msra.mxu1 %v6472_v24  ;;  %v521_v18 = vld [vmem:[%s7642_s28 + $0x140] sm:$0xff]  ;;  %v6548_v24 = vld [vmem:[%s7644_s6 + $0x288] ss:$16 sps:$4 sm:$0xff]  }
  0xa6   : > { %3921 = vmatprep.subr.bf16.mxu0 %v6473_v25  ;;  %4489 = vmatprep.subr.bf16.mxu1 %v6475_v26  ;;  %v5573_v21 = vcombine.high %v513_v17, %v521_v18  ;;  %v5572_v22 = vcombine.low %v513_v17, %v521_v18  ;;  %v6545_v23 = vld [vmem:[%s7644_s6 + $0x280] ss:$16 sps:$4 sm:$0xff]   ;;  %v6553_v25 = vld [vmem:[%s7644_s6 + $0x2a4] ss:$16 sps:$4 sm:$0xff]   ;;  %v6556_v26 = vld [vmem:[%s7644_s6 + $0x2ac] ss:$16 sps:$4 sm:$0xff]  }
  0xa7   : > { %v6571_v43 = vld [vmem:[%s7644_s6 + $0x304] ss:$16 sps:$4 sm:$0xff]   ;;  %v6622_v17 = vld [vmem:[%s7644_s6 + $0x408] ss:$16 sps:$4 sm:$0xff]  }
  0xa8   : > { %v6615_v7 = vld [vmem:[%s7644_s6 + $0x3e4] ss:$16 sps:$4 sm:$0xff]  }
  0xa9   : > { %3922 = vmatpush1.bf16.msra.mxu0 %v6477_v27  ;;  %4490 = vmatpush1.bf16.msra.mxu1 %v6478_v28  ;;  %v529_v27 = vld [vmem:[%s7642_s28 + $0x180] sm:$0x11] }
  0xaa   : > { %3923 = vmatprep.subr.bf16.mxu0 %v6479_v29  ;;  %4491 = vmatprep.subr.bf16.mxu1 %v6481_v30  ;;  %v6551_v28 = vld [vmem:[%s7644_s6 + $0x2a0] ss:$16 sps:$4 sm:$0xff]   ;;  %v5589_v29 = vcombine.high %v529_v27, %v529_v27  ;;  %v6554_v30 = vld [vmem:[%s7644_s6 + $0x2a8] ss:$16 sps:$4 sm:$0xff]   ;;  %v6627_v18 = vld [vmem:[%s7644_s6 + $0x424] ss:$16 sps:$4 sm:$0xff]  }
  0xad   : > { %3924 = vmatpush1.bf16.msra.mxu0 %v6483_v31  ;;  %4492 = vmatpush1.bf16.msra.mxu1 %v6484_v32  ;;  %v6559_v31 = vld [vmem:[%s7644_s6 + $0x2c4] ss:$16 sps:$4 sm:$0xff]   ;;  %v6562_v32 = vld [vmem:[%s7644_s6 + $0x2cc] ss:$16 sps:$4 sm:$0xff]  }
  0xae   : > { %3925 = vmatprep.subr.bf16.mxu0 %v6485_v33  ;;  %4493 = vmatprep.subr.bf16.mxu1 %v6487_v34  ;;  %v6557_v33 = vld [vmem:[%s7644_s6 + $0x2c0] ss:$16 sps:$4 sm:$0xff]   ;;  %v6560_v34 = vld [vmem:[%s7644_s6 + $0x2c8] ss:$16 sps:$4 sm:$0xff]  }
  0xb1   : > { %3926 = vmatpush1.bf16.msra.mxu0 %v6489_v35  ;;  %4494 = vmatpush1.bf16.msra.mxu1 %v6490_v36  ;;  %v5588_v35 = vcombine.low %v529_v27, %v529_v27  ;;  %v7765_v36 = vld [vmem:[%s7642_s28 + $0x8] sm:$0xff] }
  0xb2   : > { %3927 = vmatprep.subr.bf16.mxu0 %v6491_v37  ;;  %4495 = vmatprep.subr.bf16.mxu1 %v6493_v38  ;;  %v7768_v37 = vld [vmem:[%s7642_s28 + $0x48] sm:$0xff]  ;;  %v6565_v38 = vld [vmem:[%s7644_s6 + $0x2e4] ss:$16 sps:$4 sm:$0xff]  }
  0xb3   : > { %v5543_v40 = vcombine.high %v7765_v36, %v7768_v37 }
  0xb5   : > { %3928 = vmatpush1.bf16.msra.mxu0 %v6495_v41  ;;  %4496 = vmatpush1.bf16.msra.mxu1 %v6496_v42  ;;  %v6563_v41 = vld [vmem:[%s7644_s6 + $0x2e0] ss:$16 sps:$4 sm:$0xff]   ;;  %v6566_v42 = vld [vmem:[%s7644_s6 + $0x2e8] ss:$16 sps:$4 sm:$0xff]  }
  0xb6   : > { %3929 = vmatprep.subr.bf16.mxu0 %v6497_v44  ;;  %4497 = vmatprep.subr.bf16.mxu1 %v6499_v45  ;;  %v6574_v44 = vld [vmem:[%s7644_s6 + $0x30c] ss:$16 sps:$4 sm:$0xff]   ;;  %v6569_v45 = vld [vmem:[%s7644_s6 + $0x300] ss:$16 sps:$4 sm:$0xff]  }
  0xb9   : > { %3930 = vmatpush1.bf16.msra.mxu0 %v6501_v46  ;;  %4498 = vmatpush1.bf16.msra.mxu1 %v6502_v47  ;;  %v6572_v46 = vld [vmem:[%s7644_s6 + $0x308] ss:$16 sps:$4 sm:$0xff]   ;;  %v6577_v47 = vld [vmem:[%s7644_s6 + $0x324] ss:$16 sps:$4 sm:$0xff]  }
  0xba   : > { %3931 = vmatprep.subr.bf16.mxu0 %v6503_v48  ;;  %4499 = vmatprep.subr.bf16.mxu1 %v6505_v49  ;;  %v6580_v48 = vld [vmem:[%s7644_s6 + $0x32c] ss:$16 sps:$4 sm:$0xff]   ;;  %v6575_v49 = vld [vmem:[%s7644_s6 + $0x320] ss:$16 sps:$4 sm:$0xff]  }
  0xbd   : > { %3932 = vmatpush1.bf16.msra.mxu0 %v6507_v50  ;;  %4500 = vmatpush1.bf16.msra.mxu1 %v6508_v51  ;;  %v6578_v50 = vld [vmem:[%s7644_s6 + $0x328] ss:$16 sps:$4 sm:$0xff]   ;;  %v6583_v51 = vld [vmem:[%s7644_s6 + $0x344] ss:$16 sps:$4 sm:$0xff]  }
  0xbe   : > { %3933 = vmatprep.subr.bf16.mxu0 %v6509_v52  ;;  %4501 = vmatprep.subr.bf16.mxu1 %v6511_v53  ;;  %v6586_v52 = vld [vmem:[%s7644_s6 + $0x34c] ss:$16 sps:$4 sm:$0xff]   ;;  %v6581_v53 = vld [vmem:[%s7644_s6 + $0x340] ss:$16 sps:$4 sm:$0xff]  }
  0xc1   : > { %3934 = vmatpush1.bf16.msra.mxu0 %v6513_v54  ;;  %4502 = vmatpush1.bf16.msra.mxu1 %v6514_v55  ;;  %v6584_v54 = vld [vmem:[%s7644_s6 + $0x348] ss:$16 sps:$4 sm:$0xff]   ;;  %v6589_v55 = vld [vmem:[%s7644_s6 + $0x364] ss:$16 sps:$4 sm:$0xff]  }
  0xc2   : > { %3935 = vmatprep.subr.bf16.mxu0 %v6515_v56  ;;  %4503 = vmatprep.subr.bf16.mxu1 %v6517_v57  ;;  %v6592_v56 = vld [vmem:[%s7644_s6 + $0x36c] ss:$16 sps:$4 sm:$0xff]   ;;  %v6587_v57 = vld [vmem:[%s7644_s6 + $0x360] ss:$16 sps:$4 sm:$0xff]  }
  0xc5   : > { %3936 = vmatpush1.bf16.msra.mxu0 %v6519_v58  ;;  %4504 = vmatpush1.bf16.msra.mxu1 %v6520_v59  ;;  %v6590_v58 = vld [vmem:[%s7644_s6 + $0x368] ss:$16 sps:$4 sm:$0xff]   ;;  %v6595_v59 = vld [vmem:[%s7644_s6 + $0x384] ss:$16 sps:$4 sm:$0xff]  }
  0xc6   : > { %3976 = vmatprep.subr.bf16.mxu0 %v6523_v60  ;;  %4544 = vmatprep.subr.bf16.mxu1 %v6526_v61  ;;  %v6598_v60 = vld [vmem:[%s7644_s6 + $0x38c] ss:$16 sps:$4 sm:$0xff]   ;;  %v6593_v61 = vld [vmem:[%s7644_s6 + $0x380] ss:$16 sps:$4 sm:$0xff]  }
  0xc8   : > { %3938 = vmatmul.mubr.bf16.vlgmr.msra.gmra.mrb[0].mxu0 %v5540_v62  ;;  %4506 = vmatmul.mubr.bf16.vlgmr.msra.gmra.mrb[0].mxu1 %v5540_v62  ;;  %v6596_v62 = vld [vmem:[%s7644_s6 + $0x388] ss:$16 sps:$4 sm:$0xff]  }
  0xc9   : > { %3977 = vmatpush1.bf16.msra.mxu0 %v6521_v63  ;;  %4545 = vmatpush1.bf16.msra.mxu1 %v6524_v0  ;;  %v6601_v63 = vld [vmem:[%s7644_s6 + $0x3a4] ss:$16 sps:$4 sm:$0xff]   ;;  %v6604_v0 = vld [vmem:[%s7644_s6 + $0x3ac] ss:$16 sps:$4 sm:$0xff]  }
  0xca   : > { %3978 = vmatprep.subr.bf16.mxu0 %v6529_v1  ;;  %4546 = vmatprep.subr.bf16.mxu1 %v6532_v2  ;;  %v6599_v1 = vld [vmem:[%s7644_s6 + $0x3a0] ss:$16 sps:$4 sm:$0xff]   ;;  %v6602_v2 = vld [vmem:[%s7644_s6 + $0x3a8] ss:$16 sps:$4 sm:$0xff]  }
  0xcb   : > { %3947 = vmatprep.mubr.bf16.mxu0 %v5557_v11  ;;  %4515 = vmatprep.mubr.bf16.mxu1 %v5557_v11  ;;  %v6621_v11 = vld [vmem:[%s7644_s6 + $0x404] ss:$16 sps:$4 sm:$0xff]  }
  0xcd   : > { %3979 = vmatpush1.bf16.msra.mxu0 %v6527_v3  ;;  %4547 = vmatpush1.bf16.msra.mxu1 %v6530_v4  ;;  %v6609_v3 = vld [vmem:[%s7644_s6 + $0x3c4] ss:$16 sps:$4 sm:$0xff]   ;;  %v6612_v4 = vld [vmem:[%s7644_s6 + $0x3cc] ss:$16 sps:$4 sm:$0xff]  }
  0xce   : > { %3980 = vmatprep.subr.bf16.mxu0 %v6535_v5  ;;  %4548 = vmatprep.subr.bf16.mxu1 %v6538_v6  ;;  %v6607_v5 = vld [vmem:[%s7644_s6 + $0x3c0] ss:$16 sps:$4 sm:$0xff]   ;;  %v6610_v6 = vld [vmem:[%s7644_s6 + $0x3c8] ss:$16 sps:$4 sm:$0xff]  }
  0xd0   : > { %3948 = vmatmul.mubr.bf16.gmra.mrb[4].mxu0 %v5556_v12  ;;  %4516 = vmatmul.mubr.bf16.gmra.mrb[4].mxu1 %v5556_v12  ;;  %v6624_v12 = vld [vmem:[%s7644_s6 + $0x40c] ss:$16 sps:$4 sm:$0xff]  }
  0xd1   : > { %3981 = vmatpush1.bf16.msra.mxu0 %v6533_v9  ;;  %4549 = vmatpush1.bf16.msra.mxu1 %v6536_v10  ;;  %v6613_v9 = vld [vmem:[%s7644_s6 + $0x3e0] ss:$16 sps:$4 sm:$0xff]   ;;  %v6616_v10 = vld [vmem:[%s7644_s6 + $0x3e8] ss:$16 sps:$4 sm:$0xff]  }
  0xd2   : > { %3982 = vmatprep.subr.bf16.mxu0 %v6541_v13  ;;  %4550 = vmatprep.subr.bf16.mxu1 %v6544_v14  ;;  %v498_v13 = vld [vmem:[%s7642_s28 + $0x88] sm:$0xff]  ;;  %v5542_v14 = vcombine.low %v7765_v36, %v7768_v37 }
  0xd3   : > { %3957 = vmatprep.mubr.bf16.mxu0 %v5573_v21  ;;  %4525 = vmatprep.mubr.bf16.mxu1 %v5573_v21  ;;  %v6625_v21 = vld [vmem:[%s7644_s6 + $0x420] ss:$16 sps:$4 sm:$0xff]   ;;  %v6648_v36 = vld [vmem:[%s7644_s6 + $0x48c] ss:$16 sps:$4 sm:$0xff]  }
  0xd5   : > { %3983 = vmatpush1.bf16.msra.mxu0 %v6539_v15  ;;  %4551 = vmatpush1.bf16.msra.mxu1 %v6542_v16  ;;  %v506_v15 = vld [vmem:[%s7642_s28 + $0xc8] sm:$0xff]  ;;  %v6619_v16 = vld [vmem:[%s7644_s6 + $0x400] ss:$16 sps:$4 sm:$0xff]  }
  0xd6   : > { %3984 = vmatprep.subr.bf16.mxu0 %v6547_v19  ;;  %4552 = vmatprep.subr.bf16.mxu1 %v6550_v20  ;;  %v6630_v19 = vld [vmem:[%s7644_s6 + $0x42c] ss:$16 sps:$4 sm:$0xff]   ;;  %v5559_v20 = vcombine.high %v498_v13, %v506_v15  ;;  %v5558_v27 = vcombine.low %v498_v13, %v506_v15  ;;  %v6696_v13 = vld [vmem:[%s7644_s6 + $0x588] ss:$16 sps:$4 sm:$0xff]  }
  0xd7   : > { %v6704_v15 = vld [vmem:[%s7644_s6 + $0x5ac] ss:$16 sps:$4 sm:$0xff]  }
  0xd8   : > { %3958 = vmatmul.mubr.bf16.gmra.mrb[8].mxu0 %v5572_v22  ;;  %4526 = vmatmul.mubr.bf16.gmra.mrb[8].mxu1 %v5572_v22  ;;  %v6628_v22 = vld [vmem:[%s7644_s6 + $0x428] ss:$16 sps:$4 sm:$0xff]  }
  0xd9   : > { %3985 = vmatpush1.bf16.msra.mxu0 %v6545_v23  ;;  %4553 = vmatpush1.bf16.msra.mxu1 %v6548_v24  ;;  %v6633_v23 = vld [vmem:[%s7644_s6 + $0x444] ss:$16 sps:$4 sm:$0xff]   ;;  %v6636_v24 = vld [vmem:[%s7644_s6 + $0x44c] ss:$16 sps:$4 sm:$0xff]  }
  0xda   : > { %3986 = vmatprep.subr.bf16.mxu0 %v6553_v25  ;;  %4554 = vmatprep.subr.bf16.mxu1 %v6556_v26  ;;  %v6631_v25 = vld [vmem:[%s7644_s6 + $0x440] ss:$16 sps:$4 sm:$0xff]   ;;  %v6634_v26 = vld [vmem:[%s7644_s6 + $0x448] ss:$16 sps:$4 sm:$0xff]  }
  0xdb   : > { %3967 = vmatprep.mubr.bf16.mxu0 %v5589_v29  ;;  %4535 = vmatprep.mubr.bf16.mxu1 %v5589_v29  ;;  %v522_v29 = vld [vmem:[%s7642_s28 + $0x148] sm:$0xff] }
  0xdd   : > { %3987 = vmatpush1.bf16.msra.mxu0 %v6551_v28  ;;  %4555 = vmatpush1.bf16.msra.mxu1 %v6554_v30  ;;  %v514_v28 = vld [vmem:[%s7642_s28 + $0x108] sm:$0xff]  ;;  %v6639_v30 = vld [vmem:[%s7644_s6 + $0x464] ss:$16 sps:$4 sm:$0xff]  }
  0xde   : > { %3988 = vmatprep.subr.bf16.mxu0 %v6559_v31  ;;  %4556 = vmatprep.subr.bf16.mxu1 %v6562_v32  ;;  %v6642_v31 = vld [vmem:[%s7644_s6 + $0x46c] ss:$16 sps:$4 sm:$0xff]   ;;  %v5575_v32 = vcombine.high %v514_v28, %v522_v29  ;;  %v5574_v37 = vcombine.low %v514_v28, %v522_v29  ;;  %v6717_v28 = vld [vmem:[%s7644_s6 + $0x600] ss:$16 sps:$4 sm:$0xff]  }
  0xe0   : > { %3968 = vmatmul.mubr.bf16.gmra.mrb[12].mxu0 %v5588_v35  ;;  %4536 = vmatmul.mubr.bf16.gmra.mrb[12].mxu1 %v5588_v35  ;;  %v6645_v35 = vld [vmem:[%s7644_s6 + $0x484] ss:$16 sps:$4 sm:$0xff]  }
  0xe1   : > { %3989 = vmatpush1.bf16.msra.mxu0 %v6557_v33  ;;  %4557 = vmatpush1.bf16.msra.mxu1 %v6560_v34  ;;  %v6637_v33 = vld [vmem:[%s7644_s6 + $0x460] ss:$16 sps:$4 sm:$0xff]   ;;  %v6640_v34 = vld [vmem:[%s7644_s6 + $0x468] ss:$16 sps:$4 sm:$0xff]  }
  0xe2   : > { %3990 = vmatprep.subr.bf16.mxu0 %v6565_v38  ;;  %4558 = vmatprep.subr.bf16.mxu1 %v6568_v39  ;;  %v530_v38 = vld [vmem:[%s7642_s28 + $0x188] sm:$0x11]  ;;  %v6643_v39 = vld [vmem:[%s7644_s6 + $0x480] ss:$16 sps:$4 sm:$0xff]  }
  0xe3   : > { %4008 = vmatprep.mubr.bf16.mxu0 %v5543_v40  ;;  %4576 = vmatprep.mubr.bf16.mxu1 %v5543_v40  ;;  %v6646_v40 = vld [vmem:[%s7644_s6 + $0x488] ss:$16 sps:$4 sm:$0xff]  }
  0xe5   : > { %3991 = vmatpush1.bf16.msra.mxu0 %v6563_v41  ;;  %4559 = vmatpush1.bf16.msra.mxu1 %v6566_v42  ;;  %v6651_v41 = vld [vmem:[%s7644_s6 + $0x4a4] ss:$16 sps:$4 sm:$0xff]   ;;  %v6654_v42 = vld [vmem:[%s7644_s6 + $0x4ac] ss:$16 sps:$4 sm:$0xff]  }
  0xe6   : > { %3992 = vmatprep.subr.bf16.mxu0 %v6571_v43  ;;  %4560 = vmatprep.subr.bf16.mxu1 %v6574_v44  ;;  %v5591_v43 = vcombine.high %v530_v38, %v530_v38  ;;  %v6649_v44 = vld [vmem:[%s7644_s6 + $0x4a0] ss:$16 sps:$4 sm:$0xff]  }
  0xe9   : > { %3993 = vmatpush1.bf16.msra.mxu0 %v6569_v45  ;;  %4561 = vmatpush1.bf16.msra.mxu1 %v6572_v46  ;;  %v6652_v45 = vld [vmem:[%s7644_s6 + $0x4a8] ss:$16 sps:$4 sm:$0xff]   ;;  %v6659_v46 = vld [vmem:[%s7644_s6 + $0x4c4] ss:$16 sps:$4 sm:$0xff]  }
  0xea   : > { %3994 = vmatprep.subr.bf16.mxu0 %v6577_v47  ;;  %4562 = vmatprep.subr.bf16.mxu1 %v6580_v48  ;;  %v6662_v47 = vld [vmem:[%s7644_s6 + $0x4cc] ss:$16 sps:$4 sm:$0xff]   ;;  %v6657_v48 = vld [vmem:[%s7644_s6 + $0x4c0] ss:$16 sps:$4 sm:$0xff]  }
  0xed   : > { %3995 = vmatpush1.bf16.msra.mxu0 %v6575_v49  ;;  %4563 = vmatpush1.bf16.msra.mxu1 %v6578_v50  ;;  %v7843_v49 = vld [vmem:[%s7642_s28 + $0x10] sm:$0xff]  ;;  %v5590_v50 = vcombine.low %v530_v38, %v530_v38 }
  0xee   : > { %3996 = vmatprep.subr.bf16.mxu0 %v6583_v51  ;;  %4564 = vmatprep.subr.bf16.mxu1 %v6586_v52  ;;  %v7846_v51 = vld [vmem:[%s7642_s28 + $0x50] sm:$0xff]  ;;  %v6660_v52 = vld [vmem:[%s7644_s6 + $0x4c8] ss:$16 sps:$4 sm:$0xff]  }
  0xef   : > { %v5544_v29 = vcombine.low %v7843_v49, %v7846_v51  ;;  %v6731_v38 = vld [vmem:[%s7644_s6 + $0x644] ss:$16 sps:$4 sm:$0xff]  }
  0xf1   : > { %3997 = vmatpush1.bf16.msra.mxu0 %v6581_v53  ;;  %4565 = vmatpush1.bf16.msra.mxu1 %v6584_v54  ;;  %v6665_v53 = vld [vmem:[%s7644_s6 + $0x4e4] ss:$16 sps:$4 sm:$0xff]   ;;  %v6668_v54 = vld [vmem:[%s7644_s6 + $0x4ec] ss:$16 sps:$4 sm:$0xff]  }
  0xf2   : > { %3998 = vmatprep.subr.bf16.mxu0 %v6589_v55  ;;  %4566 = vmatprep.subr.bf16.mxu1 %v6592_v56  ;;  %v5545_v55 = vcombine.high %v7843_v49, %v7846_v51  ;;  %v6663_v56 = vld [vmem:[%s7644_s6 + $0x4e0] ss:$16 sps:$4 sm:$0xff]   ;;  %v6738_v49 = vld [vmem:[%s7644_s6 + $0x668] ss:$16 sps:$4 sm:$0xff]   ;;  %v6746_v51 = vld [vmem:[%s7644_s6 + $0x68c] ss:$16 sps:$4 sm:$0xff]  }
  0xf5   : > { %3999 = vmatpush1.bf16.msra.mxu0 %v6587_v57  ;;  %4567 = vmatpush1.bf16.msra.mxu1 %v6590_v58  ;;  %v6666_v57 = vld [vmem:[%s7644_s6 + $0x4e8] ss:$16 sps:$4 sm:$0xff]   ;;  %v6671_v58 = vld [vmem:[%s7644_s6 + $0x504] ss:$16 sps:$4 sm:$0xff]  }
  0xf6   : > { %4000 = vmatprep.subr.bf16.mxu0 %v6595_v59  ;;  %4568 = vmatprep.subr.bf16.mxu1 %v6598_v60  ;;  %v6674_v59 = vld [vmem:[%s7644_s6 + $0x50c] ss:$16 sps:$4 sm:$0xff]   ;;  %v6669_v60 = vld [vmem:[%s7644_s6 + $0x500] ss:$16 sps:$4 sm:$0xff]  }
  0xf9   : > { %4001 = vmatpush1.bf16.msra.mxu0 %v6593_v61  ;;  %4569 = vmatpush1.bf16.msra.mxu1 %v6596_v62  ;;  %v6672_v61 = vld [vmem:[%s7644_s6 + $0x508] ss:$16 sps:$4 sm:$0xff]   ;;  %v6677_v62 = vld [vmem:[%s7644_s6 + $0x524] ss:$16 sps:$4 sm:$0xff]  }
  0xfa   : > { %4002 = vmatprep.subr.bf16.mxu0 %v6601_v63  ;;  %4570 = vmatprep.subr.bf16.mxu1 %v6604_v0  ;;  %v6680_v63 = vld [vmem:[%s7644_s6 + $0x52c] ss:$16 sps:$4 sm:$0xff]   ;;  %v6675_v0 = vld [vmem:[%s7644_s6 + $0x520] ss:$16 sps:$4 sm:$0xff]  }
  0xfd   : > { %4003 = vmatpush1.bf16.msra.mxu0 %v6599_v1  ;;  %4571 = vmatpush1.bf16.msra.mxu1 %v6602_v2  ;;  %v6678_v1 = vld [vmem:[%s7644_s6 + $0x528] ss:$16 sps:$4 sm:$0xff]   ;;  %v6683_v2 = vld [vmem:[%s7644_s6 + $0x544] ss:$16 sps:$4 sm:$0xff]  }
  0xfe   : > { %4004 = vmatprep.subr.bf16.mxu0 %v6609_v3  ;;  %4572 = vmatprep.subr.bf16.mxu1 %v6612_v4  ;;  %v6686_v3 = vld [vmem:[%s7644_s6 + $0x54c] ss:$16 sps:$4 sm:$0xff]   ;;  %v6681_v4 = vld [vmem:[%s7644_s6 + $0x540] ss:$16 sps:$4 sm:$0xff]  }
 0x101   : > { %4005 = vmatpush1.bf16.msra.mxu0 %v6607_v5  ;;  %4573 = vmatpush1.bf16.msra.mxu1 %v6610_v6  ;;  %v6684_v5 = vld [vmem:[%s7644_s6 + $0x548] ss:$16 sps:$4 sm:$0xff]   ;;  %v6689_v6 = vld [vmem:[%s7644_s6 + $0x564] ss:$16 sps:$4 sm:$0xff]  }
 0x102   : > { %4006 = vmatprep.subr.bf16.mxu0 %v6615_v7  ;;  %4574 = vmatprep.subr.bf16.mxu1 %v6618_v8  ;;  %v6692_v7 = vld [vmem:[%s7644_s6 + $0x56c] ss:$16 sps:$4 sm:$0xff]   ;;  %v6687_v8 = vld [vmem:[%s7644_s6 + $0x560] ss:$16 sps:$4 sm:$0xff]  }
 0x105   : > { %4007 = vmatpush1.bf16.msra.mxu0 %v6613_v9  ;;  %4575 = vmatpush1.bf16.msra.mxu1 %v6616_v10  ;;  %v6690_v9 = vld [vmem:[%s7644_s6 + $0x568] ss:$16 sps:$4 sm:$0xff]   ;;  %v6695_v10 = vld [vmem:[%s7644_s6 + $0x584] ss:$16 sps:$4 sm:$0xff]  }
 0x106   : > { %4047 = vmatprep.subr.bf16.mxu0 %v6621_v11  ;;  %4615 = vmatprep.subr.bf16.mxu1 %v6624_v12  ;;  %v6698_v11 = vld [vmem:[%s7644_s6 + $0x58c] ss:$16 sps:$4 sm:$0xff]   ;;  %v6693_v12 = vld [vmem:[%s7644_s6 + $0x580] ss:$16 sps:$4 sm:$0xff]  }
 0x108   : > { %4009 = vmatmul.mubr.bf16.vlgmr.msra.gmra.mrb[0].mxu0 %v5542_v14  ;;  %4577 = vmatmul.mubr.bf16.vlgmr.msra.gmra.mrb[0].mxu1 %v5542_v14  ;;  %v6701_v14 = vld [vmem:[%s7644_s6 + $0x5a4] ss:$16 sps:$4 sm:$0xff]  }
 0x109   : > { %4048 = vmatpush1.bf16.msra.mxu0 %v6619_v16  ;;  %4616 = vmatpush1.bf16.msra.mxu1 %v6622_v17  ;;  %v6699_v16 = vld [vmem:[%s7644_s6 + $0x5a0] ss:$16 sps:$4 sm:$0xff]   ;;  %v6702_v17 = vld [vmem:[%s7644_s6 + $0x5a8] ss:$16 sps:$4 sm:$0xff]  }
 0x10a   : > { %4049 = vmatprep.subr.bf16.mxu0 %v6627_v18  ;;  %4617 = vmatprep.subr.bf16.mxu1 %v6630_v19  ;;  %v6707_v18 = vld [vmem:[%s7644_s6 + $0x5c4] ss:$16 sps:$4 sm:$0xff]   ;;  %v6710_v19 = vld [vmem:[%s7644_s6 + $0x5cc] ss:$16 sps:$4 sm:$0xff]  }
 0x10b   : > { %4018 = vmatprep.mubr.bf16.mxu0 %v5559_v20  ;;  %4586 = vmatprep.mubr.bf16.mxu1 %v5559_v20  ;;  %v6705_v20 = vld [vmem:[%s7644_s6 + $0x5c0] ss:$16 sps:$4 sm:$0xff]  }
 0x10d   : > { %4050 = vmatpush1.bf16.msra.mxu0 %v6625_v21  ;;  %4618 = vmatpush1.bf16.msra.mxu1 %v6628_v22  ;;  %v6708_v21 = vld [vmem:[%s7644_s6 + $0x5c8] ss:$16 sps:$4 sm:$0xff]   ;;  %v6713_v22 = vld [vmem:[%s7644_s6 + $0x5e4] ss:$16 sps:$4 sm:$0xff]  }
 0x10e   : > { %4051 = vmatprep.subr.bf16.mxu0 %v6633_v23  ;;  %4619 = vmatprep.subr.bf16.mxu1 %v6636_v24  ;;  %v6716_v23 = vld [vmem:[%s7644_s6 + $0x5ec] ss:$16 sps:$4 sm:$0xff]   ;;  %v6711_v24 = vld [vmem:[%s7644_s6 + $0x5e0] ss:$16 sps:$4 sm:$0xff]  }
 0x110   : > { %4019 = vmatmul.mubr.bf16.gmra.mrb[4].mxu0 %v5558_v27  ;;  %4587 = vmatmul.mubr.bf16.gmra.mrb[4].mxu1 %v5558_v27  ;;  %v6722_v27 = vld [vmem:[%s7644_s6 + $0x60c] ss:$16 sps:$4 sm:$0xff]  }
 0x111   : > { %4052 = vmatpush1.bf16.msra.mxu0 %v6631_v25  ;;  %4620 = vmatpush1.bf16.msra.mxu1 %v6634_v26  ;;  %v6714_v25 = vld [vmem:[%s7644_s6 + $0x5e8] ss:$16 sps:$4 sm:$0xff]   ;;  %v6719_v26 = vld [vmem:[%s7644_s6 + $0x604] ss:$16 sps:$4 sm:$0xff]  }
 0x112   : > { %4053 = vmatprep.subr.bf16.mxu0 %v6639_v30  ;;  %4621 = vmatprep.subr.bf16.mxu1 %v6642_v31  ;;  %v499_v30 = vld [vmem:[%s7642_s28 + $0x90] sm:$0xff] }
 0x113   : > { %4028 = vmatprep.mubr.bf16.mxu0 %v5575_v32  ;;  %4596 = vmatprep.mubr.bf16.mxu1 %v5575_v32  ;;  %v507_v31 = vld [vmem:[%s7642_s28 + $0xd0] sm:$0xff]  ;;  %v6720_v32 = vld [vmem:[%s7644_s6 + $0x608] ss:$16 sps:$4 sm:$0xff]  }
 0x115   : > { %4054 = vmatpush1.bf16.msra.mxu0 %v6637_v33  ;;  %4622 = vmatpush1.bf16.msra.mxu1 %v6640_v34  ;;  %v6725_v33 = vld [vmem:[%s7644_s6 + $0x624] ss:$16 sps:$4 sm:$0xff]   ;;  %v6728_v34 = vld [vmem:[%s7644_s6 + $0x62c] ss:$16 sps:$4 sm:$0xff]  }
 0x116   : > { %4055 = vmatprep.subr.bf16.mxu0 %v6645_v35  ;;  %4623 = vmatprep.subr.bf16.mxu1 %v6648_v36  ;;  %v5561_v35 = vcombine.high %v499_v30, %v507_v31  ;;  %v6723_v36 = vld [vmem:[%s7644_s6 + $0x620] ss:$16 sps:$4 sm:$0xff]  }
 0x118   : > { %4029 = vmatmul.mubr.bf16.gmra.mrb[8].mxu0 %v5574_v37  ;;  %4597 = vmatmul.mubr.bf16.gmra.mrb[8].mxu1 %v5574_v37  ;;  %v6726_v37 = vld [vmem:[%s7644_s6 + $0x628] ss:$16 sps:$4 sm:$0xff]  }
 0x119   : > { %4056 = vmatpush1.bf16.msra.mxu0 %v6643_v39  ;;  %4624 = vmatpush1.bf16.msra.mxu1 %v6646_v40  ;;  %v6734_v39 = vld [vmem:[%s7644_s6 + $0x64c] ss:$16 sps:$4 sm:$0xff]   ;;  %v6729_v40 = vld [vmem:[%s7644_s6 + $0x640] ss:$16 sps:$4 sm:$0xff]  }
 0x11a   : > { %4057 = vmatprep.subr.bf16.mxu0 %v6651_v41  ;;  %4625 = vmatprep.subr.bf16.mxu1 %v6654_v42  ;;  %v6732_v41 = vld [vmem:[%s7644_s6 + $0x648] ss:$16 sps:$4 sm:$0xff]   ;;  %v5560_v42 = vcombine.low %v499_v30, %v507_v31  ;;  %v6802_v30 = vld [vmem:[%s7644_s6 + $0x7ac] ss:$16 sps:$4 sm:$0xff]   ;;  %v6797_v31 = vld [vmem:[%s7644_s6 + $0x7a0] ss:$16 sps:$4 sm:$0xff]  }
 0x11b   : > { %4038 = vmatprep.mubr.bf16.mxu0 %v5591_v43  ;;  %4606 = vmatprep.mubr.bf16.mxu1 %v5591_v43  ;;  %v515_v43 = vld [vmem:[%s7642_s28 + $0x110] sm:$0xff] }
 0x11d   : > { %4058 = vmatpush1.bf16.msra.mxu0 %v6649_v44  ;;  %4626 = vmatpush1.bf16.msra.mxu1 %v6652_v45  ;;  %v523_v44 = vld [vmem:[%s7642_s28 + $0x150] sm:$0xff] }
 0x11e   : > { %4059 = vmatprep.subr.bf16.mxu0 %v6659_v46  ;;  %4627 = vmatprep.subr.bf16.mxu1 %v6662_v47  ;;  %v6737_v45 = vld [vmem:[%s7644_s6 + $0x664] ss:$16 sps:$4 sm:$0xff]   ;;  %v6740_v46 = vld [vmem:[%s7644_s6 + $0x66c] ss:$16 sps:$4 sm:$0xff]   ;;  %v5577_v47 = vcombine.high %v515_v43, %v523_v44 }
 0x120   : > { %4039 = vmatmul.mubr.bf16.gmra.mrb[16].mxu0 %v5590_v50  ;;  %4607 = vmatmul.mubr.bf16.gmra.mrb[16].mxu1 %v5590_v50  ;;  %v6743_v50 = vld [vmem:[%s7644_s6 + $0x684] ss:$16 sps:$4 sm:$0xff]  }
 0x121   : > { %4060 = vmatpush1.bf16.msra.mxu0 %v6657_v48  ;;  %4628 = vmatpush1.bf16.msra.mxu1 %v6660_v52  ;;  %v6735_v48 = vld [vmem:[%s7644_s6 + $0x660] ss:$16 sps:$4 sm:$0xff]  }
 0x122   : > { %4061 = vmatprep.subr.bf16.mxu0 %v6665_v53  ;;  %4629 = vmatprep.subr.bf16.mxu1 %v6668_v54  ;;  %v6741_v52 = vld [vmem:[%s7644_s6 + $0x680] ss:$16 sps:$4 sm:$0xff]   ;;  %v5576_v53 = vcombine.low %v515_v43, %v523_v44  ;;  %v6744_v54 = vld [vmem:[%s7644_s6 + $0x688] ss:$16 sps:$4 sm:$0xff]  }
 0x123   : > { %4079 = vmatprep.mubr.bf16.mxu0 %v5545_v55  ;;  %4647 = vmatprep.mubr.bf16.mxu1 %v5545_v55  ;;  %v531_v55 = vld [vmem:[%s7642_s28 + $0x190] sm:$0x11] }
 0x124   : > { %v6815_v43 = vld [vmem:[%s7644_s6 + $0x800] ss:$16 sps:$4 sm:$0xff]  }
 0x125   : > { %4062 = vmatpush1.bf16.msra.mxu0 %v6663_v56  ;;  %4630 = vmatpush1.bf16.msra.mxu1 %v6666_v57  ;;  %v6749_v56 = vld [vmem:[%s7644_s6 + $0x6a4] ss:$16 sps:$4 sm:$0xff]   ;;  %v6752_v57 = vld [vmem:[%s7644_s6 + $0x6ac] ss:$16 sps:$4 sm:$0xff]  }
 0x126   : > { %4063 = vmatprep.subr.bf16.mxu0 %v6671_v58  ;;  %4631 = vmatprep.subr.bf16.mxu1 %v6674_v59  ;;  %v5593_v58 = vcombine.high %v531_v55, %v531_v55  ;;  %v6747_v59 = vld [vmem:[%s7644_s6 + $0x6a0] ss:$16 sps:$4 sm:$0xff]  }
 0x129   : > { %4064 = vmatpush1.bf16.msra.mxu0 %v6669_v60  ;;  %4632 = vmatpush1.bf16.msra.mxu1 %v6672_v61  ;;  %v6750_v60 = vld [vmem:[%s7644_s6 + $0x6a8] ss:$16 sps:$4 sm:$0xff]   ;;  %v6757_v61 = vld [vmem:[%s7644_s6 + $0x6c4] ss:$16 sps:$4 sm:$0xff]  }
 0x12a   : > { %4065 = vmatprep.subr.bf16.mxu0 %v6677_v62  ;;  %4633 = vmatprep.subr.bf16.mxu1 %v6680_v63  ;;  %v6760_v62 = vld [vmem:[%s7644_s6 + $0x6cc] ss:$16 sps:$4 sm:$0xff]   ;;  %v6755_v63 = vld [vmem:[%s7644_s6 + $0x6c0] ss:$16 sps:$4 sm:$0xff]  }
 0x12d   : > { %4066 = vmatpush1.bf16.msra.mxu0 %v6675_v0  ;;  %4634 = vmatpush1.bf16.msra.mxu1 %v6678_v1  ;;  %v6758_v0 = vld [vmem:[%s7644_s6 + $0x6c8] ss:$16 sps:$4 sm:$0xff]   ;;  %v5592_v1 = vcombine.low %v531_v55, %v531_v55  ;;  %v6827_v55 = vld [vmem:[%s7644_s6 + $0x840] ss:$16 sps:$4 sm:$0xff]  }
 0x12e   : > { %4067 = vmatprep.subr.bf16.mxu0 %v6683_v2  ;;  %4635 = vmatprep.subr.bf16.mxu1 %v6686_v3  ;;  %v7923_v2 = vld [vmem:[%s7642_s28 + $0x18] sm:$0xff] }
 0x12f   : > { %v7926_v3 = vld [vmem:[%s7642_s28 + $0x58] sm:$0xff] }
 0x130   : > { %v5546_v44 = vcombine.low %v7923_v2, %v7926_v3 }
 0x131   : > { %4068 = vmatpush1.bf16.msra.mxu0 %v6681_v4  ;;  %4636 = vmatpush1.bf16.msra.mxu1 %v6684_v5  ;;  %v6763_v4 = vld [vmem:[%s7644_s6 + $0x6e4] ss:$16 sps:$4 sm:$0xff]   ;;  %v6766_v5 = vld [vmem:[%s7644_s6 + $0x6ec] ss:$16 sps:$4 sm:$0xff]  }
 0x132   : > { %4069 = vmatprep.subr.bf16.mxu0 %v6689_v6  ;;  %4637 = vmatprep.subr.bf16.mxu1 %v6692_v7  ;;  %v5547_v6 = vcombine.high %v7923_v2, %v7926_v3  ;;  %v6761_v7 = vld [vmem:[%s7644_s6 + $0x6e0] ss:$16 sps:$4 sm:$0xff]   ;;  %v6844_v2 = vld [vmem:[%s7644_s6 + $0x88c] ss:$16 sps:$4 sm:$0xff]  }
 0x133   : > { %v6839_v3 = vld [vmem:[%s7644_s6 + $0x880] ss:$16 sps:$4 sm:$0xff]  }
 0x135   : > { %4070 = vmatpush1.bf16.msra.mxu0 %v6687_v8  ;;  %4638 = vmatpush1.bf16.msra.mxu1 %v6690_v9  ;;  %v6764_v8 = vld [vmem:[%s7644_s6 + $0x6e8] ss:$16 sps:$4 sm:$0xff]   ;;  %v6769_v9 = vld [vmem:[%s7644_s6 + $0x704] ss:$16 sps:$4 sm:$0xff]  }
 0x136   : > { %4071 = vmatprep.subr.bf16.mxu0 %v6695_v10  ;;  %4639 = vmatprep.subr.bf16.mxu1 %v6698_v11  ;;  %v6772_v10 = vld [vmem:[%s7644_s6 + $0x70c] ss:$16 sps:$4 sm:$0xff]   ;;  %v6767_v11 = vld [vmem:[%s7644_s6 + $0x700] ss:$16 sps:$4 sm:$0xff]  }
 0x139   : > { %4072 = vmatpush1.bf16.msra.mxu0 %v6693_v12  ;;  %4640 = vmatpush1.bf16.msra.mxu1 %v6696_v13  ;;  %v6770_v12 = vld [vmem:[%s7644_s6 + $0x708] ss:$16 sps:$4 sm:$0xff]   ;;  %v6775_v13 = vld [vmem:[%s7644_s6 + $0x724] ss:$16 sps:$4 sm:$0xff]  }
 0x13a   : > { %4073 = vmatprep.subr.bf16.mxu0 %v6701_v14  ;;  %4641 = vmatprep.subr.bf16.mxu1 %v6704_v15  ;;  %v6778_v14 = vld [vmem:[%s7644_s6 + $0x72c] ss:$16 sps:$4 sm:$0xff]   ;;  %v6773_v15 = vld [vmem:[%s7644_s6 + $0x720] ss:$16 sps:$4 sm:$0xff]  }
 0x13d   : > { %4074 = vmatpush1.bf16.msra.mxu0 %v6699_v16  ;;  %4642 = vmatpush1.bf16.msra.mxu1 %v6702_v17  ;;  %v6776_v16 = vld [vmem:[%s7644_s6 + $0x728] ss:$16 sps:$4 sm:$0xff]   ;;  %v6781_v17 = vld [vmem:[%s7644_s6 + $0x744] ss:$16 sps:$4 sm:$0xff]  }
 0x13e   : > { %4075 = vmatprep.subr.bf16.mxu0 %v6707_v18  ;;  %4643 = vmatprep.subr.bf16.mxu1 %v6710_v19  ;;  %v6784_v18 = vld [vmem:[%s7644_s6 + $0x74c] ss:$16 sps:$4 sm:$0xff]   ;;  %v6779_v19 = vld [vmem:[%s7644_s6 + $0x740] ss:$16 sps:$4 sm:$0xff]  }
 0x141   : > { %4076 = vmatpush1.bf16.msra.mxu0 %v6705_v20  ;;  %4644 = vmatpush1.bf16.msra.mxu1 %v6708_v21  ;;  %v6782_v20 = vld [vmem:[%s7644_s6 + $0x748] ss:$16 sps:$4 sm:$0xff]   ;;  %v6787_v21 = vld [vmem:[%s7644_s6 + $0x764] ss:$16 sps:$4 sm:$0xff]  }
 0x142   : > { %4077 = vmatprep.subr.bf16.mxu0 %v6713_v22  ;;  %4645 = vmatprep.subr.bf16.mxu1 %v6716_v23  ;;  %v6790_v22 = vld [vmem:[%s7644_s6 + $0x76c] ss:$16 sps:$4 sm:$0xff]   ;;  %v6785_v23 = vld [vmem:[%s7644_s6 + $0x760] ss:$16 sps:$4 sm:$0xff]  }
 0x145   : > { %4078 = vmatpush1.bf16.msra.mxu0 %v6711_v24  ;;  %4646 = vmatpush1.bf16.msra.mxu1 %v6714_v25  ;;  %v6788_v24 = vld [vmem:[%s7644_s6 + $0x768] ss:$16 sps:$4 sm:$0xff]   ;;  %v6793_v25 = vld [vmem:[%s7644_s6 + $0x784] ss:$16 sps:$4 sm:$0xff]  }
 0x146   : > { %4118 = vmatprep.subr.bf16.mxu0 %v6719_v26  ;;  %4686 = vmatprep.subr.bf16.mxu1 %v6722_v27  ;;  %v6796_v26 = vld [vmem:[%s7644_s6 + $0x78c] ss:$16 sps:$4 sm:$0xff]   ;;  %v6791_v27 = vld [vmem:[%s7644_s6 + $0x780] ss:$16 sps:$4 sm:$0xff]  }
 0x148   : > { %4080 = vmatmul.mubr.bf16.vlgmr.msra.gmra.mrb[0].mxu0 %v5544_v29  ;;  %4648 = vmatmul.mubr.bf16.vlgmr.msra.gmra.mrb[0].mxu1 %v5544_v29  ;;  %v6799_v29 = vld [vmem:[%s7644_s6 + $0x7a4] ss:$16 sps:$4 sm:$0xff]  }
 0x149   : > { %4119 = vmatpush1.bf16.msra.mxu0 %v6717_v28  ;;  %4687 = vmatpush1.bf16.msra.mxu1 %v6720_v32  ;;  %v6794_v28 = vld [vmem:[%s7644_s6 + $0x788] ss:$16 sps:$4 sm:$0xff]  }
 0x14a   : > { %4120 = vmatprep.subr.bf16.mxu0 %v6725_v33  ;;  %4688 = vmatprep.subr.bf16.mxu1 %v6728_v34  ;;  %v6800_v32 = vld [vmem:[%s7644_s6 + $0x7a8] ss:$16 sps:$4 sm:$0xff]   ;;  %v6805_v33 = vld [vmem:[%s7644_s6 + $0x7c4] ss:$16 sps:$4 sm:$0xff]   ;;  %v6808_v34 = vld [vmem:[%s7644_s6 + $0x7cc] ss:$16 sps:$4 sm:$0xff]  }
 0x14b   : > { %4089 = vmatprep.mubr.bf16.mxu0 %v5561_v35  ;;  %4657 = vmatprep.mubr.bf16.mxu1 %v5561_v35  ;;  %v6803_v35 = vld [vmem:[%s7644_s6 + $0x7c0] ss:$16 sps:$4 sm:$0xff]  }
 0x14d   : > { %4121 = vmatpush1.bf16.msra.mxu0 %v6723_v36  ;;  %4689 = vmatpush1.bf16.msra.mxu1 %v6726_v37  ;;  %v6806_v36 = vld [vmem:[%s7644_s6 + $0x7c8] ss:$16 sps:$4 sm:$0xff]   ;;  %v6811_v37 = vld [vmem:[%s7644_s6 + $0x7e4] ss:$16 sps:$4 sm:$0xff]  }
 0x14e   : > { %4122 = vmatprep.subr.bf16.mxu0 %v6731_v38  ;;  %4690 = vmatprep.subr.bf16.mxu1 %v6734_v39  ;;  %v6814_v38 = vld [vmem:[%s7644_s6 + $0x7ec] ss:$16 sps:$4 sm:$0xff]   ;;  %v6809_v39 = vld [vmem:[%s7644_s6 + $0x7e0] ss:$16 sps:$4 sm:$0xff]  }
 0x150   : > { %4090 = vmatmul.mubr.bf16.gmra.mrb[4].mxu0 %v5560_v42  ;;  %4658 = vmatmul.mubr.bf16.gmra.mrb[4].mxu1 %v5560_v42  ;;  %v6820_v42 = vld [vmem:[%s7644_s6 + $0x80c] ss:$16 sps:$4 sm:$0xff]  }
 0x151   : > { %4123 = vmatpush1.bf16.msra.mxu0 %v6729_v40  ;;  %4691 = vmatpush1.bf16.msra.mxu1 %v6732_v41  ;;  %v6812_v40 = vld [vmem:[%s7644_s6 + $0x7e8] ss:$16 sps:$4 sm:$0xff]   ;;  %v6817_v41 = vld [vmem:[%s7644_s6 + $0x804] ss:$16 sps:$4 sm:$0xff]  }
 0x152   : > { %4124 = vmatprep.subr.bf16.mxu0 %v6737_v45  ;;  %4692 = vmatprep.subr.bf16.mxu1 %v6740_v46  ;;  %v500_v45 = vld [vmem:[%s7642_s28 + $0x98] sm:$0xff] }
 0x153   : > { %4099 = vmatprep.mubr.bf16.mxu0 %v5577_v47  ;;  %4667 = vmatprep.mubr.bf16.mxu1 %v5577_v47  ;;  %v508_v46 = vld [vmem:[%s7642_s28 + $0xd8] sm:$0xff] }
 0x154   : > { %v6818_v47 = vld [vmem:[%s7644_s6 + $0x808] ss:$16 sps:$4 sm:$0xff]  }
 0x155   : > { %4125 = vmatpush1.bf16.msra.mxu0 %v6735_v48  ;;  %4693 = vmatpush1.bf16.msra.mxu1 %v6738_v49  ;;  %v6823_v48 = vld [vmem:[%s7644_s6 + $0x824] ss:$16 sps:$4 sm:$0xff]   ;;  %v6826_v49 = vld [vmem:[%s7644_s6 + $0x82c] ss:$16 sps:$4 sm:$0xff]  }
 0x156   : > { %4126 = vmatprep.subr.bf16.mxu0 %v6743_v50  ;;  %4694 = vmatprep.subr.bf16.mxu1 %v6746_v51  ;;  %v5563_v50 = vcombine.high %v500_v45, %v508_v46  ;;  %v6821_v51 = vld [vmem:[%s7644_s6 + $0x820] ss:$16 sps:$4 sm:$0xff]  }
 0x158   : > { %4100 = vmatmul.mubr.bf16.gmra.mrb[8].mxu0 %v5576_v53  ;;  %4668 = vmatmul.mubr.bf16.gmra.mrb[8].mxu1 %v5576_v53  ;;  %v6829_v53 = vld [vmem:[%s7644_s6 + $0x844] ss:$16 sps:$4 sm:$0xff]  }
 0x159   : > { %4127 = vmatpush1.bf16.msra.mxu0 %v6741_v52  ;;  %4695 = vmatpush1.bf16.msra.mxu1 %v6744_v54  ;;  %v6824_v52 = vld [vmem:[%s7644_s6 + $0x828] ss:$16 sps:$4 sm:$0xff]   ;;  %v6832_v54 = vld [vmem:[%s7644_s6 + $0x84c] ss:$16 sps:$4 sm:$0xff]  }
 0x15a   : > { %4128 = vmatprep.subr.bf16.mxu0 %v6749_v56  ;;  %4696 = vmatprep.subr.bf16.mxu1 %v6752_v57  ;;  %v5562_v56 = vcombine.low %v500_v45, %v508_v46  ;;  %v516_v57 = vld [vmem:[%s7642_s28 + $0x118] sm:$0xff]  ;;  %v6889_v46 = vld [vmem:[%s7644_s6 + $0x980] ss:$16 sps:$4 sm:$0xff]  }
 0x15b   : > { %4109 = vmatprep.mubr.bf16.mxu0 %v5593_v58  ;;  %4677 = vmatprep.mubr.bf16.mxu1 %v5593_v58  ;;  %v524_v58 = vld [vmem:[%s7642_s28 + $0x158] sm:$0xff] }
 0x15d   : > { %4129 = vmatpush1.bf16.msra.mxu0 %v6747_v59  ;;  %4697 = vmatpush1.bf16.msra.mxu1 %v6750_v60  ;;  %v6830_v59 = vld [vmem:[%s7644_s6 + $0x848] ss:$16 sps:$4 sm:$0xff]   ;;  %v6835_v60 = vld [vmem:[%s7644_s6 + $0x864] ss:$16 sps:$4 sm:$0xff]  }
 0x15e   : > { %4130 = vmatprep.subr.bf16.mxu0 %v6757_v61  ;;  %4698 = vmatprep.subr.bf16.mxu1 %v6760_v62  ;;  %v6838_v61 = vld [vmem:[%s7644_s6 + $0x86c] ss:$16 sps:$4 sm:$0xff]   ;;  %v5579_v62 = vcombine.high %v516_v57, %v524_v58 }
 0x160   : > { %4110 = vmatmul.mubr.bf16.gmra.mrb[20].mxu0 %v5592_v1  ;;  %4678 = vmatmul.mubr.bf16.gmra.mrb[20].mxu1 %v5592_v1  ;;  %v6841_v1 = vld [vmem:[%s7644_s6 + $0x884] ss:$16 sps:$4 sm:$0xff]  }
 0x161   : > { %4131 = vmatpush1.bf16.msra.mxu0 %v6755_v63  ;;  %4699 = vmatpush1.bf16.msra.mxu1 %v6758_v0  ;;  %v6833_v63 = vld [vmem:[%s7644_s6 + $0x860] ss:$16 sps:$4 sm:$0xff]   ;;  %v6836_v0 = vld [vmem:[%s7644_s6 + $0x868] ss:$16 sps:$4 sm:$0xff]  }
 0x162   : > { %4132 = vmatprep.subr.bf16.mxu0 %v6763_v4  ;;  %4700 = vmatprep.subr.bf16.mxu1 %v6766_v5  ;;  %v5578_v4 = vcombine.low %v516_v57, %v524_v58  ;;  %v532_v5 = vld [vmem:[%s7642_s28 + $0x198] sm:$0x11]  ;;  %v6901_v58 = vld [vmem:[%s7644_s6 + $0x9c0] ss:$16 sps:$4 sm:$0xff]  }
 0x163   : > { %4150 = vmatprep.mubr.bf16.mxu0 %v5547_v6  ;;  %4718 = vmatprep.mubr.bf16.mxu1 %v5547_v6  ;;  %v6842_v6 = vld [vmem:[%s7644_s6 + $0x888] ss:$16 sps:$4 sm:$0xff]   ;;  %v6906_v57 = vld [vmem:[%s7644_s6 + $0x9cc] ss:$16 sps:$4 sm:$0xff]  }
 0x165   : > { %4133 = vmatpush1.bf16.msra.mxu0 %v6761_v7  ;;  %4701 = vmatpush1.bf16.msra.mxu1 %v6764_v8  ;;  %v6847_v7 = vld [vmem:[%s7644_s6 + $0x8a4] ss:$16 sps:$4 sm:$0xff]   ;;  %v6850_v8 = vld [vmem:[%s7644_s6 + $0x8ac] ss:$16 sps:$4 sm:$0xff]  }
 0x166   : > { %4134 = vmatprep.subr.bf16.mxu0 %v6769_v9  ;;  %4702 = vmatprep.subr.bf16.mxu1 %v6772_v10  ;;  %v5595_v9 = vcombine.high %v532_v5, %v532_v5  ;;  %v6845_v10 = vld [vmem:[%s7644_s6 + $0x8a0] ss:$16 sps:$4 sm:$0xff]  }
 0x169   : > { %4135 = vmatpush1.bf16.msra.mxu0 %v6767_v11  ;;  %4703 = vmatpush1.bf16.msra.mxu1 %v6770_v12  ;;  %v6848_v11 = vld [vmem:[%s7644_s6 + $0x8a8] ss:$16 sps:$4 sm:$0xff]   ;;  %v6855_v12 = vld [vmem:[%s7644_s6 + $0x8c4] ss:$16 sps:$4 sm:$0xff]  }
 0x16a   : > { %4136 = vmatprep.subr.bf16.mxu0 %v6775_v13  ;;  %4704 = vmatprep.subr.bf16.mxu1 %v6778_v14  ;;  %v6858_v13 = vld [vmem:[%s7644_s6 + $0x8cc] ss:$16 sps:$4 sm:$0xff]   ;;  %v5594_v14 = vcombine.low %v532_v5, %v532_v5  ;;  %v501_v5 = vld [vmem:[%s7642_s28 + $0xa0] sm:$0xff] }
 0x16d   : > { %4137 = vmatpush1.bf16.msra.mxu0 %v6773_v15  ;;  %4705 = vmatpush1.bf16.msra.mxu1 %v6776_v16  ;;  %v6853_v15 = vld [vmem:[%s7644_s6 + $0x8c0] ss:$16 sps:$4 sm:$0xff]  }
 0x16e   : > { %4138 = vmatprep.subr.bf16.mxu0 %v6781_v17  ;;  %4706 = vmatprep.subr.bf16.mxu1 %v6784_v18  ;;  %v8001_v16 = vld [vmem:[%s7642_s28 + $0x20] sm:$0xff]  ;;  %v6856_v18 = vld [vmem:[%s7644_s6 + $0x8c8] ss:$16 sps:$4 sm:$0xff]  }
 0x16f   : > { %v8004_v17 = vld [vmem:[%s7642_s28 + $0x60] sm:$0xff] }
 0x171   : > { %4139 = vmatpush1.bf16.msra.mxu0 %v6779_v19  ;;  %4707 = vmatpush1.bf16.msra.mxu1 %v6782_v20  ;;  %v6861_v19 = vld [vmem:[%s7644_s6 + $0x8e4] ss:$16 sps:$4 sm:$0xff]   ;;  %v6864_v20 = vld [vmem:[%s7644_s6 + $0x8ec] ss:$16 sps:$4 sm:$0xff]  }
 0x172   : > { %4140 = vmatprep.subr.bf16.mxu0 %v6787_v21  ;;  %4708 = vmatprep.subr.bf16.mxu1 %v6790_v22  ;;  %v5549_v21 = vcombine.high %v8001_v16, %v8004_v17  ;;  %v6859_v22 = vld [vmem:[%s7644_s6 + $0x8e0] ss:$16 sps:$4 sm:$0xff]  }
 0x175   : > { %4141 = vmatpush1.bf16.msra.mxu0 %v6785_v23  ;;  %4709 = vmatpush1.bf16.msra.mxu1 %v6788_v24  ;;  %v6862_v23 = vld [vmem:[%s7644_s6 + $0x8e8] ss:$16 sps:$4 sm:$0xff]   ;;  %v6867_v24 = vld [vmem:[%s7644_s6 + $0x904] ss:$16 sps:$4 sm:$0xff]  }
 0x176   : > { %4142 = vmatprep.subr.bf16.mxu0 %v6793_v25  ;;  %4710 = vmatprep.subr.bf16.mxu1 %v6796_v26  ;;  %v6870_v25 = vld [vmem:[%s7644_s6 + $0x90c] ss:$16 sps:$4 sm:$0xff]   ;;  %v6865_v26 = vld [vmem:[%s7644_s6 + $0x900] ss:$16 sps:$4 sm:$0xff]  }
 0x179   : > { %4143 = vmatpush1.bf16.msra.mxu0 %v6791_v27  ;;  %4711 = vmatpush1.bf16.msra.mxu1 %v6794_v28  ;;  %v6868_v27 = vld [vmem:[%s7644_s6 + $0x908] ss:$16 sps:$4 sm:$0xff]   ;;  %v6873_v28 = vld [vmem:[%s7644_s6 + $0x924] ss:$16 sps:$4 sm:$0xff]  }
 0x17a   : > { %4144 = vmatprep.subr.bf16.mxu0 %v6799_v29  ;;  %4712 = vmatprep.subr.bf16.mxu1 %v6802_v30  ;;  %v6876_v29 = vld [vmem:[%s7644_s6 + $0x92c] ss:$16 sps:$4 sm:$0xff]   ;;  %v6871_v30 = vld [vmem:[%s7644_s6 + $0x920] ss:$16 sps:$4 sm:$0xff]  }
 0x17d   : > { %4145 = vmatpush1.bf16.msra.mxu0 %v6797_v31  ;;  %4713 = vmatpush1.bf16.msra.mxu1 %v6800_v32  ;;  %v6874_v31 = vld [vmem:[%s7644_s6 + $0x928] ss:$16 sps:$4 sm:$0xff]   ;;  %v6879_v32 = vld [vmem:[%s7644_s6 + $0x944] ss:$16 sps:$4 sm:$0xff]  }
 0x17e   : > { %4146 = vmatprep.subr.bf16.mxu0 %v6805_v33  ;;  %4714 = vmatprep.subr.bf16.mxu1 %v6808_v34  ;;  %v6882_v33 = vld [vmem:[%s7644_s6 + $0x94c] ss:$16 sps:$4 sm:$0xff]   ;;  %v6877_v34 = vld [vmem:[%s7644_s6 + $0x940] ss:$16 sps:$4 sm:$0xff]  }
 0x181   : > { %4147 = vmatpush1.bf16.msra.mxu0 %v6803_v35  ;;  %4715 = vmatpush1.bf16.msra.mxu1 %v6806_v36  ;;  %v6880_v35 = vld [vmem:[%s7644_s6 + $0x948] ss:$16 sps:$4 sm:$0xff]   ;;  %v6885_v36 = vld [vmem:[%s7644_s6 + $0x964] ss:$16 sps:$4 sm:$0xff]  }
 0x182   : > { %4148 = vmatprep.subr.bf16.mxu0 %v6811_v37  ;;  %4716 = vmatprep.subr.bf16.mxu1 %v6814_v38  ;;  %v6888_v37 = vld [vmem:[%s7644_s6 + $0x96c] ss:$16 sps:$4 sm:$0xff]   ;;  %v6883_v38 = vld [vmem:[%s7644_s6 + $0x960] ss:$16 sps:$4 sm:$0xff]  }
 0x185   : > { %4149 = vmatpush1.bf16.msra.mxu0 %v6809_v39  ;;  %4717 = vmatpush1.bf16.msra.mxu1 %v6812_v40  ;;  %v6886_v39 = vld [vmem:[%s7644_s6 + $0x968] ss:$16 sps:$4 sm:$0xff]   ;;  %v6891_v40 = vld [vmem:[%s7644_s6 + $0x984] ss:$16 sps:$4 sm:$0xff]  }
 0x186   : > { %4189 = vmatprep.subr.bf16.mxu0 %v6817_v41  ;;  %4757 = vmatprep.subr.bf16.mxu1 %v6820_v42  ;;  %v6894_v41 = vld [vmem:[%s7644_s6 + $0x98c] ss:$16 sps:$4 sm:$0xff]  }
 0x188   : > { %4151 = vmatmul.mubr.bf16.vlgmr.msra.gmra.mrb[0].mxu0 %v5546_v44  ;;  %4719 = vmatmul.mubr.bf16.vlgmr.msra.gmra.mrb[0].mxu1 %v5546_v44 }
 0x189   : > { %4190 = vmatpush1.bf16.msra.mxu0 %v6815_v43  ;;  %4758 = vmatpush1.bf16.msra.mxu1 %v6818_v47  ;;  %v6892_v47 = vld [vmem:[%s7644_s6 + $0x988] ss:$16 sps:$4 sm:$0xff]  }
 0x18a   : > { %4191 = vmatprep.subr.bf16.mxu0 %v6823_v48  ;;  %4759 = vmatprep.subr.bf16.mxu1 %v6826_v49 }
 0x18b   : > { %4160 = vmatprep.mubr.bf16.mxu0 %v5563_v50  ;;  %4728 = vmatprep.mubr.bf16.mxu1 %v5563_v50  ;;  %v6897_v50 = vld [vmem:[%s7644_s6 + $0x9a4] ss:$16 sps:$4 sm:$0xff]  }
 0x18d   : > { %4192 = vmatpush1.bf16.msra.mxu0 %v6821_v51  ;;  %4760 = vmatpush1.bf16.msra.mxu1 %v6824_v52  ;;  %v6900_v51 = vld [vmem:[%s7644_s6 + $0x9ac] ss:$16 sps:$4 sm:$0xff]  }
 0x18e   : > { %4193 = vmatprep.subr.bf16.mxu0 %v6829_v53  ;;  %4761 = vmatprep.subr.bf16.mxu1 %v6832_v54  ;;  %v6895_v54 = vld [vmem:[%s7644_s6 + $0x9a0] ss:$16 sps:$4 sm:$0xff]  }
 0x190   : > { %4161 = vmatmul.mubr.bf16.gmra.mrb[4].mxu0 %v5562_v56  ;;  %4729 = vmatmul.mubr.bf16.gmra.mrb[4].mxu1 %v5562_v56  ;;  %v6903_v56 = vld [vmem:[%s7644_s6 + $0x9c4] ss:$16 sps:$4 sm:$0xff]  }
 0x191   : > { %4194 = vmatpush1.bf16.msra.mxu0 %v6827_v55  ;;  %4762 = vmatpush1.bf16.msra.mxu1 %v6830_v59  ;;  %v6898_v55 = vld [vmem:[%s7644_s6 + $0x9a8] ss:$16 sps:$4 sm:$0xff]  }
 0x192   : > { %4195 = vmatprep.subr.bf16.mxu0 %v6835_v60  ;;  %4763 = vmatprep.subr.bf16.mxu1 %v6838_v61  ;;  %v6904_v59 = vld [vmem:[%s7644_s6 + $0x9c8] ss:$16 sps:$4 sm:$0xff]   ;;  %v6909_v60 = vld [vmem:[%s7644_s6 + $0x9e4] ss:$16 sps:$4 sm:$0xff]   ;;  %v6912_v61 = vld [vmem:[%s7644_s6 + $0x9ec] ss:$16 sps:$4 sm:$0xff]  }
 0x193   : > { %4170 = vmatprep.mubr.bf16.mxu0 %v5579_v62  ;;  %4738 = vmatprep.mubr.bf16.mxu1 %v5579_v62  ;;  %v6907_v62 = vld [vmem:[%s7644_s6 + $0x9e0] ss:$16 sps:$4 sm:$0xff]  }
 0x195   : > { %4196 = vmatpush1.bf16.msra.mxu0 %v6833_v63  ;;  %4764 = vmatpush1.bf16.msra.mxu1 %v6836_v0  ;;  %v6910_v63 = vld [vmem:[%s7644_s6 + $0x9e8] ss:$16 sps:$4 sm:$0xff]   ;;  %v6915_v0 = vld [vmem:[%s7644_s6 + $0xa04] ss:$16 sps:$4 sm:$0xff]  }
 0x196   : > { %4197 = vmatprep.subr.bf16.mxu0 %v6841_v1  ;;  %4765 = vmatprep.subr.bf16.mxu1 %v6844_v2  ;;  %v6918_v1 = vld [vmem:[%s7644_s6 + $0xa0c] ss:$16 sps:$4 sm:$0xff]   ;;  %v6913_v2 = vld [vmem:[%s7644_s6 + $0xa00] ss:$16 sps:$4 sm:$0xff]  }
 0x198   : > { %4171 = vmatmul.mubr.bf16.gmra.mrb[8].mxu0 %v5578_v4  ;;  %4739 = vmatmul.mubr.bf16.gmra.mrb[8].mxu1 %v5578_v4  ;;  %v5548_v4 = vcombine.low %v8001_v16, %v8004_v17  ;;  %v517_v17 = vld [vmem:[%s7642_s28 + $0x120] sm:$0xff] }
 0x199   : > { %4198 = vmatpush1.bf16.msra.mxu0 %v6839_v3  ;;  %4766 = vmatpush1.bf16.msra.mxu1 %v6842_v6  ;;  %v6916_v3 = vld [vmem:[%s7644_s6 + $0xa08] ss:$16 sps:$4 sm:$0xff]   ;;  %v509_v6 = vld [vmem:[%s7642_s28 + $0xe0] sm:$0xff] }
 0x19a   : > { %4199 = vmatprep.subr.bf16.mxu0 %v6847_v7  ;;  %4767 = vmatprep.subr.bf16.mxu1 %v6850_v8  ;;  %v6921_v7 = vld [vmem:[%s7644_s6 + $0xa24] ss:$16 sps:$4 sm:$0xff]   ;;  %v6924_v8 = vld [vmem:[%s7644_s6 + $0xa2c] ss:$16 sps:$4 sm:$0xff]   ;;  %v5564_v16 = vcombine.low %v501_v5, %v509_v6 }
 0x19b   : > { %4180 = vmatprep.mubr.bf16.mxu0 %v5595_v9  ;;  %4748 = vmatprep.mubr.bf16.mxu1 %v5595_v9  ;;  %v5565_v9 = vcombine.high %v501_v5, %v509_v6 }
 0x19d   : > { %4200 = vmatpush1.bf16.msra.mxu0 %v6845_v10  ;;  %4768 = vmatpush1.bf16.msra.mxu1 %v6848_v11  ;;  %v6919_v10 = vld [vmem:[%s7644_s6 + $0xa20] ss:$16 sps:$4 sm:$0xff]   ;;  %v6922_v11 = vld [vmem:[%s7644_s6 + $0xa28] ss:$16 sps:$4 sm:$0xff]  }
 0x19e   : > { %4201 = vmatprep.subr.bf16.mxu0 %v6855_v12  ;;  %4769 = vmatprep.subr.bf16.mxu1 %v6858_v13  ;;  %v6927_v12 = vld [vmem:[%s7644_s6 + $0xa44] ss:$16 sps:$4 sm:$0xff]   ;;  %v6930_v13 = vld [vmem:[%s7644_s6 + $0xa4c] ss:$16 sps:$4 sm:$0xff]  }
 0x1a0   : > { %4181 = vmatmul.mubr.bf16.gmra.mrb[24].mxu0 %v5594_v14  ;;  %4749 = vmatmul.mubr.bf16.gmra.mrb[24].mxu1 %v5594_v14  ;;  %v6925_v14 = vld [vmem:[%s7644_s6 + $0xa40] ss:$16 sps:$4 sm:$0xff]  }
 0x1a1   : > { %4202 = vmatpush1.bf16.msra.mxu0 %v6853_v15  ;;  %4770 = vmatpush1.bf16.msra.mxu1 %v6856_v18  ;;  %v6928_v15 = vld [vmem:[%s7644_s6 + $0xa48] ss:$16 sps:$4 sm:$0xff]   ;;  %v525_v18 = vld [vmem:[%s7642_s28 + $0x160] sm:$0xff] }
 0x1a2   : > { %4203 = vmatprep.subr.bf16.mxu0 %v6861_v19  ;;  %4771 = vmatprep.subr.bf16.mxu1 %v6864_v20  ;;  %v6933_v19 = vld [vmem:[%s7644_s6 + $0xa64] ss:$16 sps:$4 sm:$0xff]   ;;  %v6936_v20 = vld [vmem:[%s7644_s6 + $0xa6c] ss:$16 sps:$4 sm:$0xff]  }
 0x1a3   : > { %4221 = vmatprep.mubr.bf16.mxu0 %v5549_v21  ;;  %4789 = vmatprep.mubr.bf16.mxu1 %v5549_v21  ;;  %v5581_v21 = vcombine.high %v517_v17, %v525_v18 }
 0x1a5   : > { %4204 = vmatpush1.bf16.msra.mxu0 %v6859_v22  ;;  %4772 = vmatpush1.bf16.msra.mxu1 %v6862_v23  ;;  %v6931_v22 = vld [vmem:[%s7644_s6 + $0xa60] ss:$16 sps:$4 sm:$0xff]   ;;  %v6934_v23 = vld [vmem:[%s7644_s6 + $0xa68] ss:$16 sps:$4 sm:$0xff]  }
 0x1a6   : > { %4205 = vmatprep.subr.bf16.mxu0 %v6867_v24  ;;  %4773 = vmatprep.subr.bf16.mxu1 %v6870_v25  ;;  %v6939_v24 = vld [vmem:[%s7644_s6 + $0xa84] ss:$16 sps:$4 sm:$0xff]   ;;  %v6942_v25 = vld [vmem:[%s7644_s6 + $0xa8c] ss:$16 sps:$4 sm:$0xff]  }
 0x1a9   : > { %4206 = vmatpush1.bf16.msra.mxu0 %v6865_v26  ;;  %4774 = vmatpush1.bf16.msra.mxu1 %v6868_v27  ;;  %v6937_v26 = vld [vmem:[%s7644_s6 + $0xa80] ss:$16 sps:$4 sm:$0xff]   ;;  %v5580_v27 = vcombine.low %v517_v17, %v525_v18  ;;  %v6996_v18 = vld [vmem:[%s7644_s6 + $0xba8] ss:$16 sps:$4 sm:$0xff]  }
 0x1aa   : > { %4207 = vmatprep.subr.bf16.mxu0 %v6873_v28  ;;  %4775 = vmatprep.subr.bf16.mxu1 %v6876_v29  ;;  %v6940_v28 = vld [vmem:[%s7644_s6 + $0xa88] ss:$16 sps:$4 sm:$0xff]   ;;  %v533_v29 = vld [vmem:[%s7642_s28 + $0x1a0] sm:$0x11] }
 0x1ad   : > { %4208 = vmatpush1.bf16.msra.mxu0 %v6871_v30  ;;  %4776 = vmatpush1.bf16.msra.mxu1 %v6874_v31  ;;  %v6945_v30 = vld [vmem:[%s7644_s6 + $0xaa4] ss:$16 sps:$4 sm:$0xff]   ;;  %v6948_v31 = vld [vmem:[%s7644_s6 + $0xaac] ss:$16 sps:$4 sm:$0xff]  }
 0x1ae   : > { %4209 = vmatprep.subr.bf16.mxu0 %v6879_v32  ;;  %4777 = vmatprep.subr.bf16.mxu1 %v6882_v33  ;;  %v6943_v32 = vld [vmem:[%s7644_s6 + $0xaa0] ss:$16 sps:$4 sm:$0xff]   ;;  %v5597_v33 = vcombine.high %v533_v29, %v533_v29 }
 0x1b1   : > { %4210 = vmatpush1.bf16.msra.mxu0 %v6877_v34  ;;  %4778 = vmatpush1.bf16.msra.mxu1 %v6880_v35  ;;  %v6946_v34 = vld [vmem:[%s7644_s6 + $0xaa8] ss:$16 sps:$4 sm:$0xff]   ;;  %v6953_v35 = vld [vmem:[%s7644_s6 + $0xac4] ss:$16 sps:$4 sm:$0xff]  }
 0x1b2   : > { %4211 = vmatprep.subr.bf16.mxu0 %v6885_v36  ;;  %4779 = vmatprep.subr.bf16.mxu1 %v6888_v37  ;;  %v6956_v36 = vld [vmem:[%s7644_s6 + $0xacc] ss:$16 sps:$4 sm:$0xff]  }
 0x1b3   : > { %v8031_v42 = vpop.f32.mrb[12].mxu0  ;;  %v8033_v43 = vpop.f32.mrb[12].mxu1  ;;  %v8087_v37 = vld [vmem:[%s7642_s28 + $0x28] sm:$0xff] }
 0x1b4   : > { %v8035_v44 = vpop.f32.mrb[13].mxu0  ;;  %v8037_v45 = vpop.f32.mrb[13].mxu1 }
 0x1b5   : > { %4212 = vmatpush1.bf16.msra.mxu0 %v6883_v38  ;;  %4780 = vmatpush1.bf16.msra.mxu1 %v6886_v39  ;;  %v3973_v48 = vpop.f32.mrb[14].mxu0  ;;  %v4541_v49 = vpop.f32.mrb[14].mxu1  ;;  %v6951_v38 = vld [vmem:[%s7644_s6 + $0xac0] ss:$16 sps:$4 sm:$0xff]   ;;  %v6954_v39 = vld [vmem:[%s7644_s6 + $0xac8] ss:$16 sps:$4 sm:$0xff]  }
 0x1b6   : > { %4213 = vmatprep.subr.bf16.mxu0 %v6891_v40  ;;  %4781 = vmatprep.subr.bf16.mxu1 %v6894_v41  ;;  %v3974_v52 = vpop.f32.mrb[15].mxu0  ;;  %v4542_v53 = vpop.f32.mrb[15].mxu1  ;;  %v5596_v40 = vcombine.low %v533_v29, %v533_v29  ;;  %v8092_v41 = vld [vmem:[%s7642_s28 + $0x68] sm:$0xff]  ;;  %v6957_v49 = vld [vmem:[%s7644_s6 + $0xae0] ss:$16 sps:$4 sm:$0xff]  }
 0x1b7   : > { %v5551_v48 = vcombine.high %v8087_v37, %v8092_v41  ;;  %v6968_v52 = vld [vmem:[%s7644_s6 + $0xb0c] ss:$16 sps:$4 sm:$0xff]   ;;  %v6963_v53 = vld [vmem:[%s7644_s6 + $0xb00] ss:$16 sps:$4 sm:$0xff]   ;;  %v5550_v29 = vcombine.low %v8087_v37, %v8092_v41 }
 0x1b8   : > { %v7017_v37 = vld [vmem:[%s7644_s6 + $0xc20] ss:$16 sps:$4 sm:$0xff]  }
 0x1b9   : > { %4214 = vmatpush1.bf16.msra.mxu0 %v6889_v46  ;;  %4782 = vmatpush1.bf16.msra.mxu1 %v6892_v47  ;;  %v6959_v46 = vld [vmem:[%s7644_s6 + $0xae4] ss:$16 sps:$4 sm:$0xff]   ;;  %v6962_v47 = vld [vmem:[%s7644_s6 + $0xaec] ss:$16 sps:$4 sm:$0xff]  }
 0x1ba   : > { %4215 = vmatprep.subr.bf16.mxu0 %v6897_v50  ;;  %4783 = vmatprep.subr.bf16.mxu1 %v6900_v51  ;;  %v6960_v50 = vld [vmem:[%s7644_s6 + $0xae8] ss:$16 sps:$4 sm:$0xff]   ;;  %v6965_v51 = vld [vmem:[%s7644_s6 + $0xb04] ss:$16 sps:$4 sm:$0xff]  }
 0x1bd   : > { %4216 = vmatpush1.bf16.msra.mxu0 %v6895_v54  ;;  %4784 = vmatpush1.bf16.msra.mxu1 %v6898_v55  ;;  %v6966_v54 = vld [vmem:[%s7644_s6 + $0xb08] ss:$16 sps:$4 sm:$0xff]   ;;  %v6971_v55 = vld [vmem:[%s7644_s6 + $0xb24] ss:$16 sps:$4 sm:$0xff]  }
 0x1be   : > { %4217 = vmatprep.subr.bf16.mxu0 %v6903_v56  ;;  %4785 = vmatprep.subr.bf16.mxu1 %v6906_v57  ;;  %v6974_v56 = vld [vmem:[%s7644_s6 + $0xb2c] ss:$16 sps:$4 sm:$0xff]   ;;  %v6969_v57 = vld [vmem:[%s7644_s6 + $0xb20] ss:$16 sps:$4 sm:$0xff]  }
 0x1c1   : > { %4218 = vmatpush1.bf16.msra.mxu0 %v6901_v58  ;;  %4786 = vmatpush1.bf16.msra.mxu1 %v6904_v59  ;;  %v6972_v58 = vld [vmem:[%s7644_s6 + $0xb28] ss:$16 sps:$4 sm:$0xff]   ;;  %v6977_v59 = vld [vmem:[%s7644_s6 + $0xb44] ss:$16 sps:$4 sm:$0xff]  }
 0x1c2   : > { %4219 = vmatprep.subr.bf16.mxu0 %v6909_v60  ;;  %4787 = vmatprep.subr.bf16.mxu1 %v6912_v61  ;;  %v6980_v60 = vld [vmem:[%s7644_s6 + $0xb4c] ss:$16 sps:$4 sm:$0xff]   ;;  %v6975_v61 = vld [vmem:[%s7644_s6 + $0xb40] ss:$16 sps:$4 sm:$0xff]  }
 0x1c5   : > { %4220 = vmatpush1.bf16.msra.mxu0 %v6907_v62  ;;  %4788 = vmatpush1.bf16.msra.mxu1 %v6910_v63  ;;  %v6978_v62 = vld [vmem:[%s7644_s6 + $0xb48] ss:$16 sps:$4 sm:$0xff]   ;;  %v6983_v63 = vld [vmem:[%s7644_s6 + $0xb64] ss:$16 sps:$4 sm:$0xff]  }
 0x1c6   : > { %4260 = vmatprep.subr.bf16.mxu0 %v6915_v0  ;;  %4828 = vmatprep.subr.bf16.mxu1 %v6918_v1  ;;  %v6986_v0 = vld [vmem:[%s7644_s6 + $0xb6c] ss:$16 sps:$4 sm:$0xff]   ;;  %v6981_v1 = vld [vmem:[%s7644_s6 + $0xb60] ss:$16 sps:$4 sm:$0xff]  }
 0x1c8   : > { %4222 = vmatmul.mubr.bf16.vlgmr.msra.gmra.mrb[0].mxu0 %v5548_v4  ;;  %4790 = vmatmul.mubr.bf16.vlgmr.msra.gmra.mrb[0].mxu1 %v5548_v4  ;;  %v6992_v4 = vld [vmem:[%s7644_s6 + $0xb8c] ss:$16 sps:$4 sm:$0xff]  }
 0x1c9   : > { %4261 = vmatpush1.bf16.msra.mxu0 %v6913_v2  ;;  %4829 = vmatpush1.bf16.msra.mxu1 %v6916_v3  ;;  %v6984_v2 = vld [vmem:[%s7644_s6 + $0xb68] ss:$16 sps:$4 sm:$0xff]   ;;  %v6989_v3 = vld [vmem:[%s7644_s6 + $0xb84] ss:$16 sps:$4 sm:$0xff]  }
 0x1ca   : > { %4262 = vmatprep.subr.bf16.mxu0 %v6921_v7  ;;  %4830 = vmatprep.subr.bf16.mxu1 %v6924_v8 }
 0x1cb   : > { %4231 = vmatprep.mubr.bf16.mxu0 %v5565_v9  ;;  %4799 = vmatprep.mubr.bf16.mxu1 %v5565_v9 }
 0x1cd   : > { %4263 = vmatpush1.bf16.msra.mxu0 %v6919_v10  ;;  %4831 = vmatpush1.bf16.msra.mxu1 %v6922_v11 }
 0x1ce   : > { %4264 = vmatprep.subr.bf16.mxu0 %v6927_v12  ;;  %4832 = vmatprep.subr.bf16.mxu1 %v6930_v13  ;;  %v6987_v13 = vld [vmem:[%s7644_s6 + $0xb80] ss:$16 sps:$4 sm:$0xff]  }
 0x1d0   : > { %4232 = vmatmul.mubr.bf16.gmra.mrb[4].mxu0 %v5564_v16  ;;  %4800 = vmatmul.mubr.bf16.gmra.mrb[4].mxu1 %v5564_v16 }
 0x1d1   : > { %4265 = vmatpush1.bf16.msra.mxu0 %v6925_v14  ;;  %4833 = vmatpush1.bf16.msra.mxu1 %v6928_v15  ;;  %v6990_v14 = vld [vmem:[%s7644_s6 + $0xb88] ss:$16 sps:$4 sm:$0xff]  }
 0x1d2   : > { %4266 = vmatprep.subr.bf16.mxu0 %v6933_v19  ;;  %4834 = vmatprep.subr.bf16.mxu1 %v6936_v20  ;;  %v7001_v19 = vld [vmem:[%s7644_s6 + $0xbc4] ss:$16 sps:$4 sm:$0xff]   ;;  %v7004_v20 = vld [vmem:[%s7644_s6 + $0xbcc] ss:$16 sps:$4 sm:$0xff]  }
 0x1d3   : > { %4241 = vmatprep.mubr.bf16.mxu0 %v5581_v21  ;;  %4809 = vmatprep.mubr.bf16.mxu1 %v5581_v21  ;;  %v6999_v21 = vld [vmem:[%s7644_s6 + $0xbc0] ss:$16 sps:$4 sm:$0xff]  }
 0x1d5   : > { %4267 = vmatpush1.bf16.msra.mxu0 %v6931_v22  ;;  %4835 = vmatpush1.bf16.msra.mxu1 %v6934_v23  ;;  %v7002_v22 = vld [vmem:[%s7644_s6 + $0xbc8] ss:$16 sps:$4 sm:$0xff]   ;;  %v7007_v23 = vld [vmem:[%s7644_s6 + $0xbe4] ss:$16 sps:$4 sm:$0xff]  }
 0x1d6   : > { %4268 = vmatprep.subr.bf16.mxu0 %v6939_v24  ;;  %4836 = vmatprep.subr.bf16.mxu1 %v6942_v25  ;;  %v7010_v24 = vld [vmem:[%s7644_s6 + $0xbec] ss:$16 sps:$4 sm:$0xff]   ;;  %v7005_v25 = vld [vmem:[%s7644_s6 + $0xbe0] ss:$16 sps:$4 sm:$0xff]  }
 0x1d8   : > { %4242 = vmatmul.mubr.bf16.gmra.mrb[8].mxu0 %v5580_v27  ;;  %4810 = vmatmul.mubr.bf16.gmra.mrb[8].mxu1 %v5580_v27  ;;  %v7013_v27 = vld [vmem:[%s7644_s6 + $0xc04] ss:$16 sps:$4 sm:$0xff]  }
 0x1d9   : > { %4269 = vmatpush1.bf16.msra.mxu0 %v6937_v26  ;;  %4837 = vmatpush1.bf16.msra.mxu1 %v6940_v28  ;;  %v7008_v26 = vld [vmem:[%s7644_s6 + $0xbe8] ss:$16 sps:$4 sm:$0xff]   ;;  %v7016_v28 = vld [vmem:[%s7644_s6 + $0xc0c] ss:$16 sps:$4 sm:$0xff]  }
 0x1da   : > { %4270 = vmatprep.subr.bf16.mxu0 %v6945_v30  ;;  %4838 = vmatprep.subr.bf16.mxu1 %v6948_v31  ;;  %v502_v30 = vld [vmem:[%s7642_s28 + $0xa8] sm:$0xff] }
 0x1db   : > { %4251 = vmatprep.mubr.bf16.mxu0 %v5597_v33  ;;  %4819 = vmatprep.mubr.bf16.mxu1 %v5597_v33  ;;  %v510_v31 = vld [vmem:[%s7642_s28 + $0xe8] sm:$0xff] }
 0x1dc   : > { %v7014_v33 = vld [vmem:[%s7644_s6 + $0xc08] ss:$16 sps:$4 sm:$0xff]   ;;  %v5566_v41 = vcombine.low %v502_v30, %v510_v31 }
 0x1dd   : > { %4271 = vmatpush1.bf16.msra.mxu0 %v6943_v32  ;;  %4839 = vmatpush1.bf16.msra.mxu1 %v6946_v34  ;;  %v7011_v32 = vld [vmem:[%s7644_s6 + $0xc00] ss:$16 sps:$4 sm:$0xff]   ;;  %v7019_v34 = vld [vmem:[%s7644_s6 + $0xc24] ss:$16 sps:$4 sm:$0xff]  }
 0x1de   : > { %4272 = vmatprep.subr.bf16.mxu0 %v6953_v35  ;;  %4840 = vmatprep.subr.bf16.mxu1 %v6956_v36  ;;  %v7022_v35 = vld [vmem:[%s7644_s6 + $0xc2c] ss:$16 sps:$4 sm:$0xff]   ;;  %v5567_v36 = vcombine.high %v502_v30, %v510_v31  ;;  %v7087_v30 = vld [vmem:[%s7644_s6 + $0xd84] ss:$16 sps:$4 sm:$0xff]  }
 0x1df   : > { %v7090_v31 = vld [vmem:[%s7644_s6 + $0xd8c] ss:$16 sps:$4 sm:$0xff]  }
 0x1e0   : > { %4252 = vmatmul.mubr.bf16.gmra.mrb[28].mxu0 %v5596_v40  ;;  %4820 = vmatmul.mubr.bf16.gmra.mrb[28].mxu1 %v5596_v40  ;;  %v7028_v40 = vld [vmem:[%s7644_s6 + $0xc4c] ss:$16 sps:$4 sm:$0xff]  }
 0x1e1   : > { %4273 = vmatpush1.bf16.msra.mxu0 %v6951_v38  ;;  %4841 = vmatpush1.bf16.msra.mxu1 %v6954_v39  ;;  %v7020_v38 = vld [vmem:[%s7644_s6 + $0xc28] ss:$16 sps:$4 sm:$0xff]   ;;  %v7025_v39 = vld [vmem:[%s7644_s6 + $0xc44] ss:$16 sps:$4 sm:$0xff]  }
 0x1e2   : > { %4274 = vmatprep.subr.bf16.mxu0 %v6959_v46  ;;  %4842 = vmatprep.subr.bf16.mxu1 %v6962_v47  ;;  %v518_v46 = vld [vmem:[%s7642_s28 + $0x128] sm:$0xff] }
 0x1e3   : > { %4292 = vmatprep.mubr.bf16.mxu0 %v5551_v48  ;;  %4860 = vmatprep.mubr.bf16.mxu1 %v5551_v48  ;;  %v526_v47 = vld [vmem:[%s7642_s28 + $0x168] sm:$0xff]  ;;  %v7023_v48 = vld [vmem:[%s7644_s6 + $0xc40] ss:$16 sps:$4 sm:$0xff]  }
 0x1e5   : > { %4275 = vmatpush1.bf16.msra.mxu0 %v6957_v49  ;;  %4843 = vmatpush1.bf16.msra.mxu1 %v6960_v50  ;;  %v7026_v49 = vld [vmem:[%s7644_s6 + $0xc48] ss:$16 sps:$4 sm:$0xff]   ;;  %v7031_v50 = vld [vmem:[%s7644_s6 + $0xc64] ss:$16 sps:$4 sm:$0xff]  }
 0x1e6   : > { %4276 = vmatprep.subr.bf16.mxu0 %v6965_v51  ;;  %4844 = vmatprep.subr.bf16.mxu1 %v6968_v52  ;;  %v7034_v51 = vld [vmem:[%s7644_s6 + $0xc6c] ss:$16 sps:$4 sm:$0xff]   ;;  %v5583_v52 = vcombine.high %v518_v46, %v526_v47 }
 0x1e9   : > { %4277 = vmatpush1.bf16.msra.mxu0 %v6963_v53  ;;  %4845 = vmatpush1.bf16.msra.mxu1 %v6966_v54  ;;  %v7029_v53 = vld [vmem:[%s7644_s6 + $0xc60] ss:$16 sps:$4 sm:$0xff]   ;;  %v7032_v54 = vld [vmem:[%s7644_s6 + $0xc68] ss:$16 sps:$4 sm:$0xff]  }
 0x1ea   : > { %4278 = vmatprep.subr.bf16.mxu0 %v6971_v55  ;;  %4846 = vmatprep.subr.bf16.mxu1 %v6974_v56  ;;  %v7037_v55 = vld [vmem:[%s7644_s6 + $0xc84] ss:$16 sps:$4 sm:$0xff]   ;;  %v7040_v56 = vld [vmem:[%s7644_s6 + $0xc8c] ss:$16 sps:$4 sm:$0xff]  }
 0x1ed   : > { %4279 = vmatpush1.bf16.msra.mxu0 %v6969_v57  ;;  %4847 = vmatpush1.bf16.msra.mxu1 %v6972_v58  ;;  %v5582_v57 = vcombine.low %v518_v46, %v526_v47  ;;  %v534_v58 = vld [vmem:[%s7642_s28 + $0x1a8] sm:$0x11] }
 0x1ee   : > { %4280 = vmatprep.subr.bf16.mxu0 %v6977_v59  ;;  %4848 = vmatprep.subr.bf16.mxu1 %v6980_v60  ;;  %v7035_v59 = vld [vmem:[%s7644_s6 + $0xc80] ss:$16 sps:$4 sm:$0xff]   ;;  %v7038_v60 = vld [vmem:[%s7644_s6 + $0xc88] ss:$16 sps:$4 sm:$0xff]  }
 0x1f1   : > { %4281 = vmatpush1.bf16.msra.mxu0 %v6975_v61  ;;  %4849 = vmatpush1.bf16.msra.mxu1 %v6978_v62  ;;  %v7043_v61 = vld [vmem:[%s7644_s6 + $0xca4] ss:$16 sps:$4 sm:$0xff]   ;;  %v7046_v62 = vld [vmem:[%s7644_s6 + $0xcac] ss:$16 sps:$4 sm:$0xff]  }
 0x1f2   : > { %4282 = vmatprep.subr.bf16.mxu0 %v6983_v63  ;;  %4850 = vmatprep.subr.bf16.mxu1 %v6986_v0  ;;  %v5599_v63 = vcombine.high %v534_v58, %v534_v58  ;;  %v7041_v0 = vld [vmem:[%s7644_s6 + $0xca0] ss:$16 sps:$4 sm:$0xff]  }
 0x1f3   : > { %v4040_v5 = vpop.f32.mrb[16].mxu0  ;;  %v4608_v6 = vpop.f32.mrb[16].mxu1 }
 0x1f4   : > { %v8119_v7 = vadd.f32 %v4040_v5, %v8031_v42  ;;  %v8122_v8 = vadd.f32 %v4608_v6, %v8033_v43  ;;  %v4042_v9 = vpop.f32.mrb[17].mxu0  ;;  %v4610_v10 = vpop.f32.mrb[17].mxu1  ;;  %v6995_v43 = vld [vmem:[%s7644_s6 + $0xba4] ss:$16 sps:$4 sm:$0xff]  }
 0x1f5   : > { %v8125_v11 = vadd.f32 %v4042_v9, %v8035_v44  ;;  %v8128_v12 = vadd.f32 %v4610_v10, %v8037_v45  ;;  %4283 = vmatpush1.bf16.msra.mxu0 %v6981_v1  ;;  %4851 = vmatpush1.bf16.msra.mxu1 %v6984_v2  ;;  %v4044_v42 = vpop.f32.mrb[18].mxu0  ;;  %v4612_v15 = vpop.f32.mrb[18].mxu1  ;;  %v6998_v44 = vld [vmem:[%s7644_s6 + $0xbac] ss:$16 sps:$4 sm:$0xff]   ;;  %v6993_v45 = vld [vmem:[%s7644_s6 + $0xba0] ss:$16 sps:$4 sm:$0xff]  }
 0x1f6   : > { %4284 = vmatprep.subr.bf16.mxu0 %v6989_v3  ;;  %4852 = vmatprep.subr.bf16.mxu1 %v6992_v4  ;;  %v4045_v16 = vpop.f32.mrb[19].mxu0  ;;  %v4613_v17 = vpop.f32.mrb[19].mxu1  ;;  %v7044_v1 = vld [vmem:[%s7644_s6 + $0xca8] ss:$16 sps:$4 sm:$0xff]   ;;  %v7051_v2 = vld [vmem:[%s7644_s6 + $0xcc4] ss:$16 sps:$4 sm:$0xff]   ;;  %v5598_v4 = vcombine.low %v534_v58, %v534_v58 }
 0x1f7   : > { %v7054_v3 = vld [vmem:[%s7644_s6 + $0xccc] ss:$16 sps:$4 sm:$0xff]   ;;  %v8178_v5 = vld [vmem:[%s7642_s28 + $0x30] sm:$0xff]  ;;  %v7052_v10 = vld [vmem:[%s7644_s6 + $0xcc8] ss:$16 sps:$4 sm:$0xff]  }
 0x1f8   : > { %v8181_v6 = vld [vmem:[%s7642_s28 + $0x70] sm:$0xff]  ;;  %v7066_v16 = vld [vmem:[%s7644_s6 + $0xd0c] ss:$16 sps:$4 sm:$0xff]  }
 0x1f9   : > { %4285 = vmatpush1.bf16.msra.mxu0 %v6987_v13  ;;  %4853 = vmatpush1.bf16.msra.mxu1 %v6990_v14  ;;  %v7049_v9 = vld [vmem:[%s7644_s6 + $0xcc0] ss:$16 sps:$4 sm:$0xff]   ;;  %v7057_v13 = vld [vmem:[%s7644_s6 + $0xce4] ss:$16 sps:$4 sm:$0xff]   ;;  %v7060_v14 = vld [vmem:[%s7644_s6 + $0xcec] ss:$16 sps:$4 sm:$0xff]   ;;  %v5553_v42 = vcombine.high %v8178_v5, %v8181_v6 }
 0x1fa   : > { %4286 = vmatprep.subr.bf16.mxu0 %v6995_v43  ;;  %4854 = vmatprep.subr.bf16.mxu1 %v6998_v44  ;;  %v7055_v15 = vld [vmem:[%s7644_s6 + $0xce0] ss:$16 sps:$4 sm:$0xff]   ;;  %v7058_v43 = vld [vmem:[%s7644_s6 + $0xce8] ss:$16 sps:$4 sm:$0xff]   ;;  %v7063_v44 = vld [vmem:[%s7644_s6 + $0xd04] ss:$16 sps:$4 sm:$0xff]  }
 0x1fb   : > { %v7061_v17 = vld [vmem:[%s7644_s6 + $0xd00] ss:$16 sps:$4 sm:$0xff]   ;;  %v7111_v58 = vld [vmem:[%s7644_s6 + $0xe04] ss:$16 sps:$4 sm:$0xff]  }
 0x1fd   : > { %4287 = vmatpush1.bf16.msra.mxu0 %v6993_v45  ;;  %4855 = vmatpush1.bf16.msra.mxu1 %v6996_v18  ;;  %v7064_v45 = vld [vmem:[%s7644_s6 + $0xd08] ss:$16 sps:$4 sm:$0xff]   ;;  %v7069_v18 = vld [vmem:[%s7644_s6 + $0xd24] ss:$16 sps:$4 sm:$0xff]  }
 0x1fe   : > { %4288 = vmatprep.subr.bf16.mxu0 %v7001_v19  ;;  %4856 = vmatprep.subr.bf16.mxu1 %v7004_v20  ;;  %v7072_v19 = vld [vmem:[%s7644_s6 + $0xd2c] ss:$16 sps:$4 sm:$0xff]   ;;  %v7067_v20 = vld [vmem:[%s7644_s6 + $0xd20] ss:$16 sps:$4 sm:$0xff]  }
 0x201   : > { %4289 = vmatpush1.bf16.msra.mxu0 %v6999_v21  ;;  %4857 = vmatpush1.bf16.msra.mxu1 %v7002_v22  ;;  %v7070_v21 = vld [vmem:[%s7644_s6 + $0xd28] ss:$16 sps:$4 sm:$0xff]   ;;  %v7075_v22 = vld [vmem:[%s7644_s6 + $0xd44] ss:$16 sps:$4 sm:$0xff]  }
 0x202   : > { %4290 = vmatprep.subr.bf16.mxu0 %v7007_v23  ;;  %4858 = vmatprep.subr.bf16.mxu1 %v7010_v24  ;;  %v7078_v23 = vld [vmem:[%s7644_s6 + $0xd4c] ss:$16 sps:$4 sm:$0xff]   ;;  %v7073_v24 = vld [vmem:[%s7644_s6 + $0xd40] ss:$16 sps:$4 sm:$0xff]  }
 0x205   : > { %4291 = vmatpush1.bf16.msra.mxu0 %v7005_v25  ;;  %4859 = vmatpush1.bf16.msra.mxu1 %v7008_v26  ;;  %v7076_v25 = vld [vmem:[%s7644_s6 + $0xd48] ss:$16 sps:$4 sm:$0xff]   ;;  %v7081_v26 = vld [vmem:[%s7644_s6 + $0xd64] ss:$16 sps:$4 sm:$0xff]  }
 0x206   : > { %4331 = vmatprep.subr.bf16.mxu0 %v7013_v27  ;;  %4899 = vmatprep.subr.bf16.mxu1 %v7016_v28  ;;  %v7084_v27 = vld [vmem:[%s7644_s6 + $0xd6c] ss:$16 sps:$4 sm:$0xff]   ;;  %v7079_v28 = vld [vmem:[%s7644_s6 + $0xd60] ss:$16 sps:$4 sm:$0xff]  }
 0x208   : > { %4293 = vmatmul.mubr.bf16.vlgmr.msra.gmra.mrb[0].mxu0 %v5550_v29  ;;  %4861 = vmatmul.mubr.bf16.vlgmr.msra.gmra.mrb[0].mxu1 %v5550_v29  ;;  %v7082_v29 = vld [vmem:[%s7644_s6 + $0xd68] ss:$16 sps:$4 sm:$0xff]  }
 0x209   : > { %4332 = vmatpush1.bf16.msra.mxu0 %v7011_v32  ;;  %4900 = vmatpush1.bf16.msra.mxu1 %v7014_v33 }
 0x20a   : > { %4333 = vmatprep.subr.bf16.mxu0 %v7019_v34  ;;  %4901 = vmatprep.subr.bf16.mxu1 %v7022_v35 }
 0x20b   : > { %4302 = vmatprep.mubr.bf16.mxu0 %v5567_v36  ;;  %4870 = vmatprep.mubr.bf16.mxu1 %v5567_v36 }
 0x20d   : > { %4334 = vmatpush1.bf16.msra.mxu0 %v7017_v37  ;;  %4902 = vmatpush1.bf16.msra.mxu1 %v7020_v38 }
 0x20e   : > { %4335 = vmatprep.subr.bf16.mxu0 %v7025_v39  ;;  %4903 = vmatprep.subr.bf16.mxu1 %v7028_v40  ;;  %v7085_v40 = vld [vmem:[%s7644_s6 + $0xd80] ss:$16 sps:$4 sm:$0xff]  }
 0x210   : > { %4303 = vmatmul.mubr.bf16.gmra.mrb[4].mxu0 %v5566_v41  ;;  %4871 = vmatmul.mubr.bf16.gmra.mrb[4].mxu1 %v5566_v41  ;;  %v7088_v41 = vld [vmem:[%s7644_s6 + $0xd88] ss:$16 sps:$4 sm:$0xff]  }
 0x211   : > { %4336 = vmatpush1.bf16.msra.mxu0 %v7023_v48  ;;  %4904 = vmatpush1.bf16.msra.mxu1 %v7026_v49  ;;  %v7094_v49 = vld [vmem:[%s7644_s6 + $0xda8] ss:$16 sps:$4 sm:$0xff]  }
 0x212   : > { %4337 = vmatprep.subr.bf16.mxu0 %v7031_v50  ;;  %4905 = vmatprep.subr.bf16.mxu1 %v7034_v51  ;;  %v7099_v50 = vld [vmem:[%s7644_s6 + $0xdc4] ss:$16 sps:$4 sm:$0xff]   ;;  %v7102_v51 = vld [vmem:[%s7644_s6 + $0xdcc] ss:$16 sps:$4 sm:$0xff]  }
 0x213   : > { %4312 = vmatprep.mubr.bf16.mxu0 %v5583_v52  ;;  %4880 = vmatprep.mubr.bf16.mxu1 %v5583_v52  ;;  %v7097_v52 = vld [vmem:[%s7644_s6 + $0xdc0] ss:$16 sps:$4 sm:$0xff]  }
 0x215   : > { %4338 = vmatpush1.bf16.msra.mxu0 %v7029_v53  ;;  %4906 = vmatpush1.bf16.msra.mxu1 %v7032_v54  ;;  %v7100_v53 = vld [vmem:[%s7644_s6 + $0xdc8] ss:$16 sps:$4 sm:$0xff]   ;;  %v7105_v54 = vld [vmem:[%s7644_s6 + $0xde4] ss:$16 sps:$4 sm:$0xff]  }
 0x216   : > { %4339 = vmatprep.subr.bf16.mxu0 %v7037_v55  ;;  %4907 = vmatprep.subr.bf16.mxu1 %v7040_v56  ;;  %v7108_v55 = vld [vmem:[%s7644_s6 + $0xdec] ss:$16 sps:$4 sm:$0xff]   ;;  %v7103_v56 = vld [vmem:[%s7644_s6 + $0xde0] ss:$16 sps:$4 sm:$0xff]  }
 0x218   : > { %4313 = vmatmul.mubr.bf16.gmra.mrb[8].mxu0 %v5582_v57  ;;  %4881 = vmatmul.mubr.bf16.gmra.mrb[8].mxu1 %v5582_v57  ;;  %v7106_v57 = vld [vmem:[%s7644_s6 + $0xde8] ss:$16 sps:$4 sm:$0xff]  }
 0x219   : > { %4340 = vmatpush1.bf16.msra.mxu0 %v7035_v59  ;;  %4908 = vmatpush1.bf16.msra.mxu1 %v7038_v60  ;;  %v7114_v59 = vld [vmem:[%s7644_s6 + $0xe0c] ss:$16 sps:$4 sm:$0xff]   ;;  %v5552_v60 = vcombine.low %v8178_v5, %v8181_v6  ;;  %v7118_v5 = vld [vmem:[%s7644_s6 + $0xe28] ss:$16 sps:$4 sm:$0xff]   ;;  %v7123_v6 = vld [vmem:[%s7644_s6 + $0xe44] ss:$16 sps:$4 sm:$0xff]  }
 0x21a   : > { %4341 = vmatprep.subr.bf16.mxu0 %v7043_v61  ;;  %4909 = vmatprep.subr.bf16.mxu1 %v7046_v62  ;;  %v503_v61 = vld [vmem:[%s7642_s28 + $0xb0] sm:$0xff] }
 0x21b   : > { %4322 = vmatprep.mubr.bf16.mxu0 %v5599_v63  ;;  %4890 = vmatprep.mubr.bf16.mxu1 %v5599_v63  ;;  %v511_v62 = vld [vmem:[%s7642_s28 + $0xf0] sm:$0xff] }
 0x21c   : > { %v7109_v63 = vld [vmem:[%s7644_s6 + $0xe00] ss:$16 sps:$4 sm:$0xff]  }
 0x21d   : > { %4342 = vmatpush1.bf16.msra.mxu0 %v7041_v0  ;;  %4910 = vmatpush1.bf16.msra.mxu1 %v7044_v1  ;;  %v7112_v0 = vld [vmem:[%s7644_s6 + $0xe08] ss:$16 sps:$4 sm:$0xff]   ;;  %v7117_v1 = vld [vmem:[%s7644_s6 + $0xe24] ss:$16 sps:$4 sm:$0xff]  }
 0x21e   : > { %4343 = vmatprep.subr.bf16.mxu0 %v7051_v2  ;;  %4911 = vmatprep.subr.bf16.mxu1 %v7054_v3  ;;  %v7120_v2 = vld [vmem:[%s7644_s6 + $0xe2c] ss:$16 sps:$4 sm:$0xff]   ;;  %v5569_v3 = vcombine.high %v503_v61, %v511_v62 }
 0x220   : > { %4323 = vmatmul.mubr.bf16.gmra.mrb[32].mxu0 %v5598_v4  ;;  %4891 = vmatmul.mubr.bf16.gmra.mrb[32].mxu1 %v5598_v4  ;;  %v7115_v4 = vld [vmem:[%s7644_s6 + $0xe20] ss:$16 sps:$4 sm:$0xff]  }
 0x221   : > { %4344 = vmatpush1.bf16.msra.mxu0 %v7049_v9  ;;  %4912 = vmatpush1.bf16.msra.mxu1 %v7052_v10  ;;  %v7126_v9 = vld [vmem:[%s7644_s6 + $0xe4c] ss:$16 sps:$4 sm:$0xff]   ;;  %v5568_v10 = vcombine.low %v503_v61, %v511_v62  ;;  %v7185_v61 = vld [vmem:[%s7644_s6 + $0xf84] ss:$16 sps:$4 sm:$0xff]  }
 0x222   : > { %4345 = vmatprep.subr.bf16.mxu0 %v7057_v13  ;;  %4913 = vmatprep.subr.bf16.mxu1 %v7060_v14  ;;  %v519_v13 = vld [vmem:[%s7642_s28 + $0x130] sm:$0xff]  ;;  %v7188_v62 = vld [vmem:[%s7644_s6 + $0xf8c] ss:$16 sps:$4 sm:$0xff]  }
 0x223   : > { %4363 = vmatprep.mubr.bf16.mxu0 %v5553_v42  ;;  %4931 = vmatprep.mubr.bf16.mxu1 %v5553_v42  ;;  %v527_v14 = vld [vmem:[%s7642_s28 + $0x170] sm:$0xff] }
 0x224   : > { %v7121_v42 = vld [vmem:[%s7644_s6 + $0xe40] ss:$16 sps:$4 sm:$0xff]  }
 0x225   : > { %4346 = vmatpush1.bf16.msra.mxu0 %v7055_v15  ;;  %4914 = vmatpush1.bf16.msra.mxu1 %v7058_v43  ;;  %v7124_v15 = vld [vmem:[%s7644_s6 + $0xe48] ss:$16 sps:$4 sm:$0xff]   ;;  %v7129_v43 = vld [vmem:[%s7644_s6 + $0xe64] ss:$16 sps:$4 sm:$0xff]  }
 0x226   : > { %4347 = vmatprep.subr.bf16.mxu0 %v7063_v44  ;;  %4915 = vmatprep.subr.bf16.mxu1 %v7066_v16  ;;  %v7132_v44 = vld [vmem:[%s7644_s6 + $0xe6c] ss:$16 sps:$4 sm:$0xff]   ;;  %v5585_v16 = vcombine.high %v519_v13, %v527_v14 }
 0x229   : > { %4348 = vmatpush1.bf16.msra.mxu0 %v7061_v17  ;;  %4916 = vmatpush1.bf16.msra.mxu1 %v7064_v45  ;;  %v7127_v17 = vld [vmem:[%s7644_s6 + $0xe60] ss:$16 sps:$4 sm:$0xff]   ;;  %v7130_v45 = vld [vmem:[%s7644_s6 + $0xe68] ss:$16 sps:$4 sm:$0xff]  }
 0x22a   : > { %4349 = vmatprep.subr.bf16.mxu0 %v7069_v18  ;;  %4917 = vmatprep.subr.bf16.mxu1 %v7072_v19  ;;  %v7135_v18 = vld [vmem:[%s7644_s6 + $0xe84] ss:$16 sps:$4 sm:$0xff]   ;;  %v7138_v19 = vld [vmem:[%s7644_s6 + $0xe8c] ss:$16 sps:$4 sm:$0xff]  }
 0x22d   : > { %4350 = vmatpush1.bf16.msra.mxu0 %v7067_v20  ;;  %4918 = vmatpush1.bf16.msra.mxu1 %v7070_v21  ;;  %v5584_v20 = vcombine.low %v519_v13, %v527_v14  ;;  %v535_v21 = vld [vmem:[%s7642_s28 + $0x1b0] sm:$0x11] }
 0x22e   : > { %4351 = vmatprep.subr.bf16.mxu0 %v7075_v22  ;;  %4919 = vmatprep.subr.bf16.mxu1 %v7078_v23  ;;  %v7133_v22 = vld [vmem:[%s7644_s6 + $0xe80] ss:$16 sps:$4 sm:$0xff]   ;;  %v7136_v23 = vld [vmem:[%s7644_s6 + $0xe88] ss:$16 sps:$4 sm:$0xff]  }
 0x231   : > { %4352 = vmatpush1.bf16.msra.mxu0 %v7073_v24  ;;  %4920 = vmatpush1.bf16.msra.mxu1 %v7076_v25  ;;  %v7141_v24 = vld [vmem:[%s7644_s6 + $0xea4] ss:$16 sps:$4 sm:$0xff]   ;;  %v7144_v25 = vld [vmem:[%s7644_s6 + $0xeac] ss:$16 sps:$4 sm:$0xff]  }
 0x232   : > { %4353 = vmatprep.subr.bf16.mxu0 %v7081_v26  ;;  %4921 = vmatprep.subr.bf16.mxu1 %v7084_v27  ;;  %v5601_v26 = vcombine.high %v535_v21, %v535_v21  ;;  %v7139_v27 = vld [vmem:[%s7644_s6 + $0xea0] ss:$16 sps:$4 sm:$0xff]  }
 0x233   : > { %v4111_v32 = vpop.f32.mrb[20].mxu0  ;;  %v4679_v33 = vpop.f32.mrb[20].mxu1 }
 0x234   : > { %v8210_v34 = vadd.f32 %v4111_v32, %v8119_v7  ;;  %v8213_v35 = vadd.f32 %v4679_v33, %v8122_v8  ;;  %v4113_v36 = vpop.f32.mrb[21].mxu0  ;;  %v4681_v37 = vpop.f32.mrb[21].mxu1  ;;  %v7093_v8 = vld [vmem:[%s7644_s6 + $0xda4] ss:$16 sps:$4 sm:$0xff]   ;;  %v8269_v32 = vld [vmem:[%s7642_s28 + $0x38] sm:$0xff] }
 0x235   : > { %v8216_v38 = vadd.f32 %v4113_v36, %v8125_v11  ;;  %v8219_v39 = vadd.f32 %v4681_v37, %v8128_v12  ;;  %4354 = vmatpush1.bf16.msra.mxu0 %v7079_v28  ;;  %4922 = vmatpush1.bf16.msra.mxu1 %v7082_v29  ;;  %v4115_v7 = vpop.f32.mrb[22].mxu0  ;;  %v4683_v46 = vpop.f32.mrb[22].mxu1  ;;  %v7096_v11 = vld [vmem:[%s7644_s6 + $0xdac] ss:$16 sps:$4 sm:$0xff]   ;;  %v7091_v12 = vld [vmem:[%s7644_s6 + $0xda0] ss:$16 sps:$4 sm:$0xff]  }
 0x236   : > { %4355 = vmatprep.subr.bf16.mxu0 %v7087_v30  ;;  %4923 = vmatprep.subr.bf16.mxu1 %v7090_v31  ;;  %v4116_v47 = vpop.f32.mrb[23].mxu0  ;;  %v4684_v48 = vpop.f32.mrb[23].mxu1  ;;  %v7142_v28 = vld [vmem:[%s7644_s6 + $0xea8] ss:$16 sps:$4 sm:$0xff]   ;;  %v7149_v29 = vld [vmem:[%s7644_s6 + $0xec4] ss:$16 sps:$4 sm:$0xff]   ;;  %v5600_v31 = vcombine.low %v535_v21, %v535_v21 }
 0x237   : > { %v7152_v30 = vld [vmem:[%s7644_s6 + $0xecc] ss:$16 sps:$4 sm:$0xff]   ;;  %v7147_v36 = vld [vmem:[%s7644_s6 + $0xec0] ss:$16 sps:$4 sm:$0xff]   ;;  %v7150_v37 = vld [vmem:[%s7644_s6 + $0xec8] ss:$16 sps:$4 sm:$0xff]  }
 0x238   : > { %v8272_v33 = vld [vmem:[%s7642_s28 + $0x78] sm:$0xff]  ;;  %v7153_v46 = vld [vmem:[%s7644_s6 + $0xee0] ss:$16 sps:$4 sm:$0xff]  }
 0x239   : > { %4356 = vmatpush1.bf16.msra.mxu0 %v7085_v40  ;;  %4924 = vmatpush1.bf16.msra.mxu1 %v7088_v41  ;;  %v7155_v40 = vld [vmem:[%s7644_s6 + $0xee4] ss:$16 sps:$4 sm:$0xff]   ;;  %v7158_v41 = vld [vmem:[%s7644_s6 + $0xeec] ss:$16 sps:$4 sm:$0xff]   ;;  %v5555_v7 = vcombine.high %v8269_v32, %v8272_v33  ;;  %v7159_v48 = vld [vmem:[%s7644_s6 + $0xf00] ss:$16 sps:$4 sm:$0xff]  }
 0x23a   : > { %4357 = vmatprep.subr.bf16.mxu0 %v7093_v8  ;;  %4925 = vmatprep.subr.bf16.mxu1 %v7096_v11  ;;  %v7156_v8 = vld [vmem:[%s7644_s6 + $0xee8] ss:$16 sps:$4 sm:$0xff]   ;;  %v7161_v11 = vld [vmem:[%s7644_s6 + $0xf04] ss:$16 sps:$4 sm:$0xff]   ;;  %v7164_v47 = vld [vmem:[%s7644_s6 + $0xf0c] ss:$16 sps:$4 sm:$0xff]  }
 0x23b   : > { %v504_v21 = vld [vmem:[%s7642_s28 + $0xb8] sm:$0xff] }
 0x23d   : > { %4358 = vmatpush1.bf16.msra.mxu0 %v7091_v12  ;;  %4926 = vmatpush1.bf16.msra.mxu1 %v7094_v49  ;;  %v7162_v12 = vld [vmem:[%s7644_s6 + $0xf08] ss:$16 sps:$4 sm:$0xff]   ;;  %v7167_v49 = vld [vmem:[%s7644_s6 + $0xf24] ss:$16 sps:$4 sm:$0xff]  }
 0x23e   : > { %4359 = vmatprep.subr.bf16.mxu0 %v7099_v50  ;;  %4927 = vmatprep.subr.bf16.mxu1 %v7102_v51  ;;  %v7170_v50 = vld [vmem:[%s7644_s6 + $0xf2c] ss:$16 sps:$4 sm:$0xff]   ;;  %v7165_v51 = vld [vmem:[%s7644_s6 + $0xf20] ss:$16 sps:$4 sm:$0xff]  }
 0x241   : > { %4360 = vmatpush1.bf16.msra.mxu0 %v7097_v52  ;;  %4928 = vmatpush1.bf16.msra.mxu1 %v7100_v53  ;;  %v7168_v52 = vld [vmem:[%s7644_s6 + $0xf28] ss:$16 sps:$4 sm:$0xff]   ;;  %v7173_v53 = vld [vmem:[%s7644_s6 + $0xf44] ss:$16 sps:$4 sm:$0xff]  }
 0x242   : > { %4361 = vmatprep.subr.bf16.mxu0 %v7105_v54  ;;  %4929 = vmatprep.subr.bf16.mxu1 %v7108_v55  ;;  %v7176_v54 = vld [vmem:[%s7644_s6 + $0xf4c] ss:$16 sps:$4 sm:$0xff]   ;;  %v7171_v55 = vld [vmem:[%s7644_s6 + $0xf40] ss:$16 sps:$4 sm:$0xff]  }
 0x245   : > { %4362 = vmatpush1.bf16.msra.mxu0 %v7103_v56  ;;  %4930 = vmatpush1.bf16.msra.mxu1 %v7106_v57  ;;  %v7174_v56 = vld [vmem:[%s7644_s6 + $0xf48] ss:$16 sps:$4 sm:$0xff]   ;;  %v7179_v57 = vld [vmem:[%s7644_s6 + $0xf64] ss:$16 sps:$4 sm:$0xff]  }
 0x246   : > { %4402 = vmatprep.subr.bf16.mxu0 %v7111_v58  ;;  %4970 = vmatprep.subr.bf16.mxu1 %v7114_v59  ;;  %v7182_v58 = vld [vmem:[%s7644_s6 + $0xf6c] ss:$16 sps:$4 sm:$0xff]   ;;  %v7177_v59 = vld [vmem:[%s7644_s6 + $0xf60] ss:$16 sps:$4 sm:$0xff]  }
 0x248   : > { %4364 = vmatmul.mubr.bf16.vlgmr.msra.gmra.mrb[0].mxu0 %v5552_v60  ;;  %4932 = vmatmul.mubr.bf16.vlgmr.msra.gmra.mrb[0].mxu1 %v5552_v60  ;;  %v7180_v60 = vld [vmem:[%s7644_s6 + $0xf68] ss:$16 sps:$4 sm:$0xff]  }
 0x249   : > { %4403 = vmatpush1.bf16.msra.mxu0 %v7109_v63  ;;  %4971 = vmatpush1.bf16.msra.mxu1 %v7112_v0 }
 0x24a   : > { %4404 = vmatprep.subr.bf16.mxu0 %v7117_v1  ;;  %4972 = vmatprep.subr.bf16.mxu1 %v7120_v2 }
 0x24b   : > { %4373 = vmatprep.mubr.bf16.mxu0 %v5569_v3  ;;  %4941 = vmatprep.mubr.bf16.mxu1 %v5569_v3 }
 0x24d   : > { %4405 = vmatpush1.bf16.msra.mxu0 %v7115_v4  ;;  %4973 = vmatpush1.bf16.msra.mxu1 %v7118_v5 }
 0x24e   : > { %4406 = vmatprep.subr.bf16.mxu0 %v7123_v6  ;;  %4974 = vmatprep.subr.bf16.mxu1 %v7126_v9  ;;  %v7183_v9 = vld [vmem:[%s7644_s6 + $0xf80] ss:$16 sps:$4 sm:$0xff]  }
 0x250   : > { %4374 = vmatmul.mubr.bf16.gmra.mrb[4].mxu0 %v5568_v10  ;;  %4942 = vmatmul.mubr.bf16.gmra.mrb[4].mxu1 %v5568_v10  ;;  %v7186_v10 = vld [vmem:[%s7644_s6 + $0xf88] ss:$16 sps:$4 sm:$0xff]  }
 0x251   : > { %4407 = vmatpush1.bf16.msra.mxu0 %v7121_v42  ;;  %4975 = vmatpush1.bf16.msra.mxu1 %v7124_v15  ;;  %v7192_v15 = vld [vmem:[%s7644_s6 + $0xfa8] ss:$16 sps:$4 sm:$0xff]  }
 0x252   : > { %4408 = vmatprep.subr.bf16.mxu0 %v7129_v43  ;;  %4976 = vmatprep.subr.bf16.mxu1 %v7132_v44  ;;  %v7197_v43 = vld [vmem:[%s7644_s6 + $0xfc4] ss:$16 sps:$4 sm:$0xff]   ;;  %v7200_v44 = vld [vmem:[%s7644_s6 + $0xfcc] ss:$16 sps:$4 sm:$0xff]  }
 0x253   : > { %4383 = vmatprep.mubr.bf16.mxu0 %v5585_v16  ;;  %4951 = vmatprep.mubr.bf16.mxu1 %v5585_v16  ;;  %v7195_v16 = vld [vmem:[%s7644_s6 + $0xfc0] ss:$16 sps:$4 sm:$0xff]  }
 0x255   : > { %4409 = vmatpush1.bf16.msra.mxu0 %v7127_v17  ;;  %4977 = vmatpush1.bf16.msra.mxu1 %v7130_v45  ;;  %v7198_v17 = vld [vmem:[%s7644_s6 + $0xfc8] ss:$16 sps:$4 sm:$0xff]   ;;  %v7203_v45 = vld [vmem:[%s7644_s6 + $0xfe4] ss:$16 sps:$4 sm:$0xff]  }
 0x256   : > { %4410 = vmatprep.subr.bf16.mxu0 %v7135_v18  ;;  %4978 = vmatprep.subr.bf16.mxu1 %v7138_v19  ;;  %v7206_v18 = vld [vmem:[%s7644_s6 + $0xfec] ss:$16 sps:$4 sm:$0xff]   ;;  %v7201_v19 = vld [vmem:[%s7644_s6 + $0xfe0] ss:$16 sps:$4 sm:$0xff]  }
 0x258   : > { %4384 = vmatmul.mubr.bf16.gmra.mrb[8].mxu0 %v5584_v20  ;;  %4952 = vmatmul.mubr.bf16.gmra.mrb[8].mxu1 %v5584_v20  ;;  %v7204_v20 = vld [vmem:[%s7644_s6 + $0xfe8] ss:$16 sps:$4 sm:$0xff]  }
 0x259   : > { %4411 = vmatpush1.bf16.msra.mxu0 %v7133_v22  ;;  %4979 = vmatpush1.bf16.msra.mxu1 %v7136_v23  ;;  %v512_v22 = vld [vmem:[%s7642_s28 + $0xf8] sm:$0xff]  ;;  %v5554_v23 = vcombine.low %v8269_v32, %v8272_v33 }
 0x25a   : > { %4412 = vmatprep.subr.bf16.mxu0 %v7141_v24  ;;  %4980 = vmatprep.subr.bf16.mxu1 %v7144_v25  ;;  %v5571_v24 = vcombine.high %v504_v21, %v512_v22  ;;  %v520_v25 = vld [vmem:[%s7642_s28 + $0x138] sm:$0xff] }
 0x25b   : > { %4393 = vmatprep.mubr.bf16.mxu0 %v5601_v26  ;;  %4961 = vmatprep.mubr.bf16.mxu1 %v5601_v26  ;;  %v528_v26 = vld [vmem:[%s7642_s28 + $0x178] sm:$0xff] }
 0x25d   : > { %4413 = vmatpush1.bf16.msra.mxu0 %v7139_v27  ;;  %4981 = vmatpush1.bf16.msra.mxu1 %v7142_v28  ;;  %v5570_v27 = vcombine.low %v504_v21, %v512_v22  ;;  %v5587_v28 = vcombine.high %v520_v25, %v528_v26 }
 0x25e   : > { %4414 = vmatprep.subr.bf16.mxu0 %v7149_v29  ;;  %4982 = vmatprep.subr.bf16.mxu1 %v7152_v30  ;;  %v536_v29 = vld [vmem:[%s7642_s28 + $0x1b8] sm:$0x11]  ;;  %v5586_v30 = vcombine.low %v520_v25, %v528_v26 }
 0x25f   : > { %v5602_v32 = vcombine.low %v536_v29, %v536_v29 }
 0x260   : > { %4394 = vmatmul.mubr.bf16.gmra.mrb[36].mxu0 %v5600_v31  ;;  %4962 = vmatmul.mubr.bf16.gmra.mrb[36].mxu1 %v5600_v31  ;;  %v5603_v31 = vcombine.high %v536_v29, %v536_v29  ;;  %v461_v29 = vld [vmem:[#allocation2 + $0x40] sm:$0xff] }
 0x261   : > { %4415 = vmatpush1.bf16.msra.mxu0 %v7147_v36  ;;  %4983 = vmatpush1.bf16.msra.mxu1 %v7150_v37 }
 0x262   : > { %4416 = vmatprep.subr.bf16.mxu0 %v7155_v40  ;;  %4984 = vmatprep.subr.bf16.mxu1 %v7158_v41 }
 0x263   : > { %4434 = vmatprep.mubr.bf16.mxu0 %v5555_v7  ;;  %5002 = vmatprep.mubr.bf16.mxu1 %v5555_v7 }
 0x265   : > { %4417 = vmatpush1.bf16.msra.mxu0 %v7153_v46  ;;  %4985 = vmatpush1.bf16.msra.mxu1 %v7156_v8 }
 0x266   : > { %4418 = vmatprep.subr.bf16.mxu0 %v7161_v11  ;;  %4986 = vmatprep.subr.bf16.mxu1 %v7164_v47 }
 0x269   : > { %4419 = vmatpush1.bf16.msra.mxu0 %v7159_v48  ;;  %4987 = vmatpush1.bf16.msra.mxu1 %v7162_v12 }
 0x26a   : > { %4420 = vmatprep.subr.bf16.mxu0 %v7167_v49  ;;  %4988 = vmatprep.subr.bf16.mxu1 %v7170_v50 }
 0x26d   : > { %4421 = vmatpush1.bf16.msra.mxu0 %v7165_v51  ;;  %4989 = vmatpush1.bf16.msra.mxu1 %v7168_v52 }
 0x26e   : > { %4422 = vmatprep.subr.bf16.mxu0 %v7173_v53  ;;  %4990 = vmatprep.subr.bf16.mxu1 %v7176_v54 }
 0x271   : > { %4423 = vmatpush1.bf16.msra.mxu0 %v7171_v55  ;;  %4991 = vmatpush1.bf16.msra.mxu1 %v7174_v56 }
 0x272   : > { %4424 = vmatprep.subr.bf16.mxu0 %v7179_v57  ;;  %4992 = vmatprep.subr.bf16.mxu1 %v7182_v58 }
 0x273   : > { %v4182_v63 = vpop.f32.mrb[24].mxu0  ;;  %v4750_v0 = vpop.f32.mrb[24].mxu1 }
 0x274   : > { %v8301_v1 = vadd.f32 %v4182_v63, %v8210_v34  ;;  %v8304_v2 = vadd.f32 %v4750_v0, %v8213_v35  ;;  %v4184_v3 = vpop.f32.mrb[25].mxu0  ;;  %v4752_v4 = vpop.f32.mrb[25].mxu1  ;;  %v7191_v35 = vld [vmem:[%s7644_s6 + $0xfa4] ss:$16 sps:$4 sm:$0xff]  }
 0x275   : > { %v8307_v5 = vadd.f32 %v4184_v3, %v8216_v38  ;;  %v8310_v6 = vadd.f32 %v4752_v4, %v8219_v39  ;;  %4425 = vmatpush1.bf16.msra.mxu0 %v7177_v59  ;;  %4993 = vmatpush1.bf16.msra.mxu1 %v7180_v60  ;;  %v4186_v34 = vpop.f32.mrb[26].mxu0  ;;  %v4754_v13 = vpop.f32.mrb[26].mxu1  ;;  %v7194_v38 = vld [vmem:[%s7644_s6 + $0xfac] ss:$16 sps:$4 sm:$0xff]   ;;  %v7189_v39 = vld [vmem:[%s7644_s6 + $0xfa0] ss:$16 sps:$4 sm:$0xff]  }
 0x276   : > { %4426 = vmatprep.subr.bf16.mxu0 %v7185_v61  ;;  %4994 = vmatprep.subr.bf16.mxu1 %v7188_v62  ;;  %v4187_v14 = vpop.f32.mrb[27].mxu0  ;;  %v4755_v42 = vpop.f32.mrb[27].mxu1  ;;  %v453_v34 = vld [vmem:[#allocation2] sm:$0xff]  ;;  %v455_v13 = vld [vmem:[#allocation2 + $0x10] sm:$0xff] }
 0x279   : > { %4427 = vmatpush1.bf16.msra.mxu0 %v7183_v9  ;;  %4995 = vmatpush1.bf16.msra.mxu1 %v7186_v10 }
 0x27a   : > { %4428 = vmatprep.subr.bf16.mxu0 %v7191_v35  ;;  %4996 = vmatprep.subr.bf16.mxu1 %v7194_v38  ;;  %v454_v35 = vld [vmem:[#allocation2 + $0x8] sm:$0xff]  ;;  %v456_v38 = vld [vmem:[#allocation2 + $0x18] sm:$0xff] }
 0x27d   : > { %4429 = vmatpush1.bf16.msra.mxu0 %v7189_v39  ;;  %4997 = vmatpush1.bf16.msra.mxu1 %v7192_v15  ;;  %v457_v39 = vld [vmem:[#allocation2 + $0x20] sm:$0xff]  ;;  %v459_v15 = vld [vmem:[#allocation2 + $0x30] sm:$0xff] }
 0x27e   : > { %4430 = vmatprep.subr.bf16.mxu0 %v7197_v43  ;;  %4998 = vmatprep.subr.bf16.mxu1 %v7200_v44 }
 0x281   : > { %4431 = vmatpush1.bf16.msra.mxu0 %v7195_v16  ;;  %4999 = vmatpush1.bf16.msra.mxu1 %v7198_v17 }
 0x282   : > { %4432 = vmatprep.subr.bf16.mxu0 %v7203_v45  ;;  %5000 = vmatprep.subr.bf16.mxu1 %v7206_v18  ;;  %v458_v45 = vld [vmem:[#allocation2 + $0x28] sm:$0xff]  ;;  %v460_v18 = vld [vmem:[#allocation2 + $0x38] sm:$0xff] }
 0x285   : > { %4433 = vmatpush1.bf16.msra.mxu0 %v7201_v19  ;;  %5001 = vmatpush1.bf16.msra.mxu1 %v7204_v20 }
 0x288   : > { %4435 = vmatmul.mubr.bf16.vlgmr.msra.gmra.mrb[0].mxu0 %v5554_v23  ;;  %5003 = vmatmul.mubr.bf16.vlgmr.msra.gmra.mrb[0].mxu1 %v5554_v23 }
 0x289   : > { %4444 = vmatprep.mubr.bf16.mxu0 %v5571_v24  ;;  %5012 = vmatprep.mubr.bf16.mxu1 %v5571_v24 }
 0x290   : > { %4445 = vmatmul.mubr.bf16.gmra.mrb[4].mxu0 %v5570_v27  ;;  %5013 = vmatmul.mubr.bf16.gmra.mrb[4].mxu1 %v5570_v27 }
 0x291   : > { %4454 = vmatprep.mubr.bf16.mxu0 %v5587_v28  ;;  %5022 = vmatprep.mubr.bf16.mxu1 %v5587_v28 }
 0x298   : > { %4455 = vmatmul.mubr.bf16.gmra.mrb[8].mxu0 %v5586_v30  ;;  %5023 = vmatmul.mubr.bf16.gmra.mrb[8].mxu1 %v5586_v30  ;;  %v463_v30 = vld [vmem:[#allocation2 + $0x50] sm:$0xff] }
 0x299   : > { %4464 = vmatprep.mubr.bf16.mxu0 %v5603_v31  ;;  %5032 = vmatprep.mubr.bf16.mxu1 %v5603_v31  ;;  %v462_v31 = vld [vmem:[#allocation2 + $0x48] sm:$0xff] }
 0x2a0   : > { %4465 = vmatmul.mubr.bf16.gmra.mrb[40].mxu0 %v5602_v32  ;;  %5033 = vmatmul.mubr.bf16.gmra.mrb[40].mxu1 %v5602_v32  ;;  %v464_v32 = vld [vmem:[#allocation2 + $0x58] sm:$0xff] }
 0x2b3   : > { %v4253_v33 = vpop.f32.mrb[28].mxu0  ;;  %v4821_v36 = vpop.f32.mrb[28].mxu1 }
 0x2b4   : > { %v4254_v37 = vadd.f32 %v4253_v33, %v8301_v1  ;;  %v4822_v40 = vadd.f32 %v4821_v36, %v8304_v2  ;;  %v4255_v41 = vpop.f32.mrb[29].mxu0  ;;  %v4823_v7 = vpop.f32.mrb[29].mxu1 }
 0x2b5   : > { %v4256_v46 = vadd.f32 %v4255_v41, %v8307_v5  ;;  %v4824_v8 = vadd.f32 %v4823_v7, %v8310_v6  ;;  %v4257_v11 = vpop.f32.mrb[30].mxu0  ;;  %v4825_v47 = vpop.f32.mrb[30].mxu1 }
 0x2b6   : > { %v4258_v48 = vpop.f32.mrb[31].mxu0  ;;  %v4826_v12 = vpop.f32.mrb[31].mxu1  ;;  %v466_v11 = vld [vmem:[#allocation2 + $0x68] sm:$0xff]  ;;  %v468_v47 = vld [vmem:[#allocation2 + $0x78] sm:$0xff] }
 0x2f3   : > { %v4324_v49 = vpop.f32.mrb[32].mxu0  ;;  %v4892_v50 = vpop.f32.mrb[32].mxu1 }
 0x2f4   : > { %v4325_v51 = vadd.f32 %v4324_v49, %v4254_v37  ;;  %v4893_v52 = vadd.f32 %v4892_v50, %v4822_v40  ;;  %v4326_v53 = vpop.f32.mrb[33].mxu0  ;;  %v4894_v54 = vpop.f32.mrb[33].mxu1  ;;  %v465_v37 = vld [vmem:[#allocation2 + $0x60] sm:$0xff]  ;;  %v467_v40 = vld [vmem:[#allocation2 + $0x70] sm:$0xff] }
 0x2f5   : > { %v4327_v55 = vadd.f32 %v4326_v53, %v4256_v46  ;;  %v4895_v56 = vadd.f32 %v4894_v54, %v4824_v8  ;;  %v4328_v57 = vpop.f32.mrb[34].mxu0  ;;  %v4896_v58 = vpop.f32.mrb[34].mxu1 }
 0x2f6   : > { %v4329_v59 = vpop.f32.mrb[35].mxu0  ;;  %v4897_v60 = vpop.f32.mrb[35].mxu1  ;;  %v469_v57 = vld [vmem:[#allocation2 + $0x80] sm:$0xff]  ;;  %v471_v58 = vld [vmem:[#allocation2 + $0x90] sm:$0xff] }
 0x2f7   : > { %v470_v59 = vld [vmem:[#allocation2 + $0x88] sm:$0xff]  ;;  %v472_v60 = vld [vmem:[#allocation2 + $0x98] sm:$0xff] }
 0x333   : > { %v4395_v61 = vpop.f32.mrb[36].mxu0  ;;  %v4963_v62 = vpop.f32.mrb[36].mxu1 }
 0x334   : > { %v8337_v63 = vadd.f32 %v4395_v61, %v4325_v51  ;;  %v8339_v0 = vadd.f32 %v4963_v62, %v4893_v52  ;;  %v4397_v1 = vpop.f32.mrb[37].mxu0  ;;  %v4965_v2 = vpop.f32.mrb[37].mxu1 }
 0x335   : > { %v8341_v3 = vadd.f32 %v4397_v1, %v4327_v55  ;;  %v8343_v4 = vadd.f32 %v4965_v2, %v4895_v56  ;;  %v4399_v5 = vpop.f32.mrb[38].mxu0  ;;  %v4967_v6 = vpop.f32.mrb[38].mxu1  ;;  %v473_v1 = vld [vmem:[#allocation2 + $0xa0] sm:$0xff]  ;;  %v475_v2 = vld [vmem:[#allocation2 + $0xb0] sm:$0xff] }
 0x336   : > { %v4400_v9 = vpop.f32.mrb[39].mxu0  ;;  %v4968_v10 = vpop.f32.mrb[39].mxu1 }
 0x35b   : > { %v4436_v14 = vpop.f32.mrb[0].mxu0  ;;  %v5004_v42 = vpop.f32.mrb[0].mxu1 }
 0x35c   : > { %v5041_v43 = vadd.f32 %v4436_v14, %v453_v34  ;;  %v5043_v44 = vadd.f32 %v5004_v42, %v455_v13  ;;  %v4438_v16 = vpop.f32.mrb[1].mxu0  ;;  %v5006_v17 = vpop.f32.mrb[1].mxu1  ;;  %v474_v34 = vld [vmem:[#allocation2 + $0xa8] sm:$0xff]  ;;  %v476_v13 = vld [vmem:[#allocation2 + $0xb8] sm:$0xff] }
 0x35d   : > { %v5042_v19 = vadd.f32 %v4438_v16, %v454_v35  ;;  %v5044_v20 = vadd.f32 %v5006_v17, %v456_v38  ;;  %v4440_v21 = vpop.f32.mrb[2].mxu0  ;;  %v5008_v22 = vpop.f32.mrb[2].mxu1 }
 0x35e   : > { %5069 = vst [vmem:[#allocation2] sm:$0xff] %v5041_v43  ;;  %5071 = vst [vmem:[#allocation2 + $0x10] sm:$0xff] %v5043_v44  ;;  %v5045_v23 = vadd.f32 %v4440_v21, %v457_v39  ;;  %v5047_v24 = vadd.f32 %v5008_v22, %v459_v15  ;;  %v4442_v25 = vpop.f32.mrb[3].mxu0  ;;  %v5010_v26 = vpop.f32.mrb[3].mxu1 }
 0x35f   : > { %5070 = vst [vmem:[#allocation2 + $0x8] sm:$0xff] %v5042_v19  ;;  %5072 = vst [vmem:[#allocation2 + $0x18] sm:$0xff] %v5044_v20  ;;  %v5046_v27 = vadd.f32 %v4442_v25, %v458_v45  ;;  %v5048_v28 = vadd.f32 %v5010_v26, %v460_v18  ;;  %v477_v45 = vld [vmem:[#allocation2 + $0xc0] sm:$0x3]  ;;  %v479_v19 = vld [vmem:[#allocation2 + $0xd0] sm:$0x3] }
 0x360   : > { %5073 = vst [vmem:[#allocation2 + $0x20] sm:$0xff] %v5045_v23  ;;  %5075 = vst [vmem:[#allocation2 + $0x30] sm:$0xff] %v5047_v24  ;;  %v478_v23 = vld [vmem:[#allocation2 + $0xc8] sm:$0x3]  ;;  %v480_v25 = vld [vmem:[#allocation2 + $0xd8] sm:$0x3] }
 0x361   : > { %5074 = vst [vmem:[#allocation2 + $0x28] sm:$0xff] %v5046_v27  ;;  %5076 = vst [vmem:[#allocation2 + $0x38] sm:$0xff] %v5048_v28 }
 0x363   : > { %v4446_v33 = vpop.f32.mrb[4].mxu0  ;;  %v5014_v36 = vpop.f32.mrb[4].mxu1 }
 0x364   : > { %v5049_v41 = vadd.f32 %v4446_v33, %v461_v29  ;;  %v5051_v7 = vadd.f32 %v5014_v36, %v463_v30  ;;  %v4448_v46 = vpop.f32.mrb[5].mxu0  ;;  %v5016_v8 = vpop.f32.mrb[5].mxu1 }
 0x365   : > { %v5050_v48 = vadd.f32 %v4448_v46, %v462_v31  ;;  %v5052_v12 = vadd.f32 %v5016_v8, %v464_v32  ;;  %v4450_v49 = vpop.f32.mrb[6].mxu0  ;;  %v5018_v50 = vpop.f32.mrb[6].mxu1 }
 0x366   : > { %5077 = vst [vmem:[#allocation2 + $0x40] sm:$0xff] %v5049_v41  ;;  %5079 = vst [vmem:[#allocation2 + $0x50] sm:$0xff] %v5051_v7  ;;  %v5053_v51 = vadd.f32 %v4450_v49, %v465_v37  ;;  %v5055_v52 = vadd.f32 %v5018_v50, %v467_v40  ;;  %v4452_v53 = vpop.f32.mrb[7].mxu0  ;;  %v5020_v54 = vpop.f32.mrb[7].mxu1  ;;  %v5101_v41 = vld [vmem:[#allocation2] sm:$0xff] (!%p6116_p1)  ;;  %v5102_v7 = vld [vmem:[#allocation2 + $0x8] sm:$0xff] (!%p6116_p1) }
 0x367   : > { %5078 = vst [vmem:[#allocation2 + $0x48] sm:$0xff] %v5050_v48  ;;  %5080 = vst [vmem:[#allocation2 + $0x58] sm:$0xff] %v5052_v12  ;;  %v5054_v55 = vadd.f32 %v4452_v53, %v466_v11  ;;  %v5056_v56 = vadd.f32 %v5020_v54, %v468_v47  ;;  %v5103_v48 = vld [vmem:[#allocation2 + $0x10] sm:$0xff] (!%p6116_p1)  ;;  %v5105_v12 = vld [vmem:[#allocation2 + $0x20] sm:$0xff] (!%p6116_p1) }
 0x368   : > { %5081 = vst [vmem:[#allocation2 + $0x60] sm:$0xff] %v5053_v51  ;;  %5083 = vst [vmem:[#allocation2 + $0x70] sm:$0xff] %v5055_v52  ;;  %v5106_v49 = vld [vmem:[#allocation2 + $0x28] sm:$0xff] (!%p6116_p1)  ;;  %v5104_v54 = vld [vmem:[#allocation2 + $0x18] sm:$0xff] (!%p6116_p1) }
 0x369   : > { %5082 = vst [vmem:[#allocation2 + $0x68] sm:$0xff] %v5054_v55  ;;  %5084 = vst [vmem:[#allocation2 + $0x78] sm:$0xff] %v5056_v56  ;;  %v5107_v55 = vld [vmem:[#allocation2 + $0x30] sm:$0xff] (!%p6116_p1)  ;;  %v5108_v56 = vld [vmem:[#allocation2 + $0x38] sm:$0xff] (!%p6116_p1) }
 0x36b   : > { %v4456_v61 = vpop.f32.mrb[8].mxu0  ;;  %v5024_v62 = vpop.f32.mrb[8].mxu1 }
 0x36c   : > { %v5057_v5 = vadd.f32 %v4456_v61, %v469_v57  ;;  %v5059_v6 = vadd.f32 %v5024_v62, %v471_v58  ;;  %v4458_v9 = vpop.f32.mrb[9].mxu0  ;;  %v5026_v10 = vpop.f32.mrb[9].mxu1 }
 0x36d   : > { %v5058_v35 = vadd.f32 %v4458_v9, %v470_v59  ;;  %v5060_v38 = vadd.f32 %v5026_v10, %v472_v60  ;;  %v4460_v14 = vpop.f32.mrb[10].mxu0  ;;  %v5028_v42 = vpop.f32.mrb[10].mxu1 }
 0x36e   : > { %5085 = vst [vmem:[#allocation2 + $0x80] sm:$0xff] %v5057_v5  ;;  %5087 = vst [vmem:[#allocation2 + $0x90] sm:$0xff] %v5059_v6  ;;  %v5061_v39 = vadd.f32 %v4460_v14, %v473_v1  ;;  %v5063_v15 = vadd.f32 %v5028_v42, %v475_v2  ;;  %v4462_v43 = vpop.f32.mrb[11].mxu0  ;;  %v5030_v44 = vpop.f32.mrb[11].mxu1 }
 0x36f   : > { %5086 = vst [vmem:[#allocation2 + $0x88] sm:$0xff] %v5058_v35  ;;  %5088 = vst [vmem:[#allocation2 + $0x98] sm:$0xff] %v5060_v38  ;;  %v5062_v16 = vadd.f32 %v4462_v43, %v474_v34  ;;  %v5064_v17 = vadd.f32 %v5030_v44, %v476_v13  ;;  %v5109_v43 = vld [vmem:[#allocation2 + $0x40] sm:$0xff] (!%p6116_p1)  ;;  %v5110_v44 = vld [vmem:[#allocation2 + $0x48] sm:$0xff] (!%p6116_p1) }
 0x370   : > { %5089 = vst [vmem:[#allocation2 + $0xa0] sm:$0xff] %v5061_v39  ;;  %5091 = vst [vmem:[#allocation2 + $0xb0] sm:$0xff] %v5063_v15 }
 0x371   : > { %5090 = vst [vmem:[#allocation2 + $0xa8] sm:$0xff] %v5062_v16  ;;  %5092 = vst [vmem:[#allocation2 + $0xb8] sm:$0xff] %v5064_v17 }
 0x373   : > { %v4466_v18 = vpop.f32.mrb[40].mxu0  ;;  %v5034_v20 = vpop.f32.mrb[40].mxu1  ;;  %5100 = sbr.rel (%p6116_p1) target bundleno = 922 (0x39a), region = 71 }
 0x374   : > { %v4467_v21 = vadd.f32 %v4466_v18, %v8337_v63  ;;  %v5035_v22 = vadd.f32 %v5034_v20, %v8339_v0  ;;  %v4468_v24 = vpop.f32.mrb[41].mxu0  ;;  %v5036_v26 = vpop.f32.mrb[41].mxu1  ;;  %v5131_v63 = vlaneseq (!%p6116_p1)  ;;  %v5112_v20 = vld [vmem:[#allocation2 + $0x58] sm:$0xff] (!%p6116_p1) }
 0x375   : > { %v4469_v27 = vadd.f32 %v4468_v24, %v8341_v3  ;;  %v5037_v28 = vadd.f32 %v5036_v26, %v8343_v4  ;;  %v4470_v29 = vpop.f32.mrb[42].mxu0  ;;  %v5038_v30 = vpop.f32.mrb[42].mxu1  ;;  %v5129_v3 = vld [vmem:[%s413_s25] sm:$0xf] (!%p6116_p1)  ;;  %v5114_v26 = vld [vmem:[#allocation2 + $0x68] sm:$0xff] (!%p6116_p1) }
 0x376   : > { %v5065_v31 = vadd.f32 %v4467_v21, %v477_v45  ;;  %v5067_v32 = vadd.f32 %v5035_v22, %v479_v19  ;;  %v4471_v33 = vpop.f32.mrb[43].mxu0  ;;  %v5039_v36 = vpop.f32.mrb[43].mxu1  ;;  %v5132_v0 = vshrl.u32 (!%p6116_p1), %v5131_v63, 7  ;;  %v5179_v4 = vld [vmem:[%s418_s9] sm:$0xf] (!%p6116_p1)  ;;  %v5111_v19 = vld [vmem:[#allocation2 + $0x50] sm:$0xff] (!%p6116_p1) }
 0x377   : > { %v5066_v37 = vadd.f32 %v4469_v27, %v478_v23  ;;  %v5068_v40 = vadd.f32 %v5037_v28, %v480_v25  ;;  %v5113_v25 = vld [vmem:[#allocation2 + $0x60] sm:$0xff] (!%p6116_p1) }
 0x378   : > { %5093 = vst [vmem:[#allocation2 + $0xc0] sm:$0x3] %v5065_v31  ;;  %5095 = vst [vmem:[#allocation2 + $0xd0] sm:$0x3] %v5067_v32  ;;  %v5133_v46 = vsub.s32 (!%p6116_p1), 0, %v5132_v0  ;;  %v5137_v8 = vsub.s32 (!%p6116_p1), 1, %v5132_v0 }
 0x379   : > { %5094 = vst [vmem:[#allocation2 + $0xc8] sm:$0x3] %v5066_v37  ;;  %5096 = vst [vmem:[#allocation2 + $0xd8] sm:$0x3] %v5068_v40  ;;  %v5141_v11 = vsub.s32 (!%p6116_p1), 2, %v5132_v0  ;;  %v5145_v47 = vsub.s32 (!%p6116_p1), 3, %v5132_v0 }
 0x37a   : > { %v8360_v50 = vrot.slane %v5129_v3, %v5133_v46  ;;  %v8362_v51 = vrot.slane %v5129_v3, %v5137_v8  ;;  %v8364_v52 = vrot.slane %v5179_v4, %v5133_v46  ;;  %v8366_v53 = vrot.slane %v5179_v4, %v5137_v8  ;;  %v5115_v31 = vld [vmem:[#allocation2 + $0x70] sm:$0xff]  ;;  %v5116_v32 = vld [vmem:[#allocation2 + $0x78] sm:$0xff] }
 0x37b   : > { %v8368_v57 = vrot.slane %v5129_v3, %v5141_v11  ;;  %v8370_v58 = vrot.slane %v5129_v3, %v5145_v47  ;;  %v8372_v59 = vrot.slane %v5179_v4, %v5141_v11  ;;  %v8374_v60 = vrot.slane %v5179_v4, %v5145_v47  ;;  %v5117_v11 = vld [vmem:[#allocation2 + $0x80] sm:$0xff] }
 0x37c   : > { %v5151_v61 = vmul.f32 %v8360_v50, %v5101_v41  ;;  %v5152_v62 = vmul.f32 %v8362_v51, %v5102_v7  ;;  %v5155_v1 = vmul.f32 %v8360_v50, %v5105_v12  ;;  %v5156_v2 = vmul.f32 %v8362_v51, %v5106_v49 }
 0x37d   : > { %v5153_v5 = vmul.f32 %v8368_v57, %v5103_v48  ;;  %v5154_v6 = vmul.f32 %v8370_v58, %v5104_v54  ;;  %v5157_v9 = vmul.f32 %v8368_v57, %v5107_v55  ;;  %v5158_v10 = vmul.f32 %v8370_v58, %v5108_v56  ;;  %v5118_v54 = vld [vmem:[#allocation2 + $0x88] sm:$0xff] }
 0x37e   : > { %v5201_v34 = vadd.f32 %v8364_v52, %v5151_v61  ;;  %v5202_v13 = vadd.f32 %v8366_v53, %v5152_v62  ;;  %v5205_v35 = vadd.f32 %v8364_v52, %v5155_v1  ;;  %v5206_v38 = vadd.f32 %v8366_v53, %v5156_v2  ;;  %v5119_v1 = vld [vmem:[#allocation2 + $0x90] sm:$0xff]  ;;  %v5120_v2 = vld [vmem:[#allocation2 + $0x98] sm:$0xff] }
 0x37f   : > { %v5203_v14 = vadd.f32 %v8372_v59, %v5153_v5  ;;  %v5204_v42 = vadd.f32 %v8374_v60, %v5154_v6  ;;  %v5207_v39 = vadd.f32 %v8372_v59, %v5157_v9  ;;  %v5208_v15 = vadd.f32 %v8374_v60, %v5158_v10 }
 0x380   : > { %v5229_v16 = vmax.f32 %v5201_v34, 0.0  ;;  %v5230_v17 = vmax.f32 %v5202_v13, 0.0  ;;  %v5233_v45 = vmax.f32 %v5205_v35, 0.0  ;;  %v5234_v18 = vmax.f32 %v5206_v38, 0.0  ;;  %v5121_v34 = vld [vmem:[#allocation2 + $0xa0] sm:$0xff]  ;;  %v5122_v13 = vld [vmem:[#allocation2 + $0xa8] sm:$0xff] }
 0x381   : > { %v5231_v21 = vmax.f32 %v5203_v14, 0.0  ;;  %v5232_v22 = vmax.f32 %v5204_v42, 0.0  ;;  %v5235_v23 = vmax.f32 %v5207_v39, 0.0  ;;  %v5236_v24 = vmax.f32 %v5208_v15, 0.0  ;;  %v5123_v39 = vld [vmem:[#allocation2 + $0xb0] sm:$0xff] }
 0x382   : > { %v6137_v27 = vpack.c.bf16 %v5230_v17, %v5229_v16  ;;  %v6139_v28 = vpack.c.bf16 %v5234_v18, %v5233_v45  ;;  %v5159_v29 = vmul.f32 %v8360_v50, %v5109_v43  ;;  %v5160_v30 = vmul.f32 %v8362_v51, %v5110_v44  ;;  %v5124_v17 = vld [vmem:[#allocation2 + $0xb8] sm:$0xff] }
 0x383   : > { %v6138_v33 = vpack.c.bf16 %v5232_v22, %v5231_v21  ;;  %v6140_v36 = vpack.c.bf16 %v5236_v24, %v5235_v23  ;;  %v5161_v37 = vmul.f32 %v8368_v57, %v5111_v19  ;;  %v5162_v40 = vmul.f32 %v8370_v58, %v5112_v20  ;;  %v5125_v21 = vld [vmem:[#allocation2 + $0xc0] sm:$0x3] }
 0x384   : > { %5345 = vst [vmem:[%s7662_s13] sm:$0xff] %v6137_v27  ;;  %5347 = vst [vmem:[%s7662_s13 + $0x10] sm:$0xff] %v6139_v28  ;;  %v5209_v63 = vadd.f32 %v8364_v52, %v5159_v29  ;;  %v5210_v0 = vadd.f32 %v8366_v53, %v5160_v30  ;;  %v5163_v3 = vmul.f32 %v8360_v50, %v5113_v25  ;;  %v5126_v30 = vld [vmem:[#allocation2 + $0xc8] sm:$0x3] }
 0x385   : > { %v5164_v4 = vmul.f32 %v8362_v51, %v5114_v26  ;;  %5346 = vst [vmem:[%s7662_s13 + $0x8] sm:$0xff] %v6138_v33  ;;  %5348 = vst [vmem:[%s7662_s13 + $0x18] sm:$0xff] %v6140_v36  ;;  %v5211_v41 = vadd.f32 %v8372_v59, %v5161_v37  ;;  %v5212_v7 = vadd.f32 %v8374_v60, %v5162_v40  ;;  %v5127_v37 = vld [vmem:[#allocation2 + $0xd0] sm:$0x3]  ;;  %v5128_v40 = vld [vmem:[#allocation2 + $0xd8] sm:$0x3] }
 0x386   : > { %v5165_v46 = vmul.f32 %v8368_v57, %v5115_v31  ;;  %v5166_v8 = vmul.f32 %v8370_v58, %v5116_v32  ;;  %v5237_v47 = vmax.f32 %v5209_v63, 0.0  ;;  %v5238_v48 = vmax.f32 %v5210_v0, 0.0 }
 0x387   : > { %v5213_v12 = vadd.f32 %v8364_v52, %v5163_v3  ;;  %v5214_v49 = vadd.f32 %v8366_v53, %v5164_v4  ;;  %v5239_v55 = vmax.f32 %v5211_v41, 0.0  ;;  %v5240_v56 = vmax.f32 %v5212_v7, 0.0 }
 0x388   : > { %v5215_v61 = vadd.f32 %v8372_v59, %v5165_v46  ;;  %v5216_v62 = vadd.f32 %v8374_v60, %v5166_v8  ;;  %v6141_v5 = vpack.c.bf16 %v5238_v48, %v5237_v47  ;;  %v5167_v10 = vmul.f32 %v8360_v50, %v5117_v11 }
 0x389   : > { %v5241_v6 = vmax.f32 %v5213_v12, 0.0  ;;  %v5242_v9 = vmax.f32 %v5214_v49, 0.0  ;;  %v6142_v35 = vpack.c.bf16 %v5240_v56, %v5239_v55  ;;  %v5168_v42 = vmul.f32 %v8362_v51, %v5118_v54 }
 0x38a   : > { %v5243_v38 = vmax.f32 %v5215_v61, 0.0  ;;  %v5244_v14 = vmax.f32 %v5216_v62, 0.0  ;;  %5349 = vst [vmem:[%s7662_s13 + $0x20] sm:$0xff] %v6141_v5  ;;  %v5217_v43 = vadd.f32 %v8364_v52, %v5167_v10  ;;  %v5169_v44 = vmul.f32 %v8368_v57, %v5119_v1 }
 0x38b   : > { %v6143_v15 = vpack.c.bf16 %v5242_v9, %v5241_v6  ;;  %v5170_v16 = vmul.f32 %v8370_v58, %v5120_v2  ;;  %5350 = vst [vmem:[%s7662_s13 + $0x28] sm:$0xff] %v6142_v35  ;;  %v5218_v18 = vadd.f32 %v8366_v53, %v5168_v42  ;;  %v5171_v19 = vmul.f32 %v8360_v50, %v5121_v34 }
 0x38c   : > { %v6144_v45 = vpack.c.bf16 %v5244_v14, %v5243_v38  ;;  %v5172_v20 = vmul.f32 %v8362_v51, %v5122_v13  ;;  %v5245_v22 = vmax.f32 %v5217_v43, 0.0  ;;  %v5219_v23 = vadd.f32 %v8372_v59, %v5169_v44 }
 0x38d   : > { %5351 = vst [vmem:[%s7662_s13 + $0x30] sm:$0xff] %v6143_v15  ;;  %v5220_v24 = vadd.f32 %v8374_v60, %v5170_v16  ;;  %v5173_v25 = vmul.f32 %v8368_v57, %v5123_v39  ;;  %v5246_v26 = vmax.f32 %v5218_v18, 0.0  ;;  %v5221_v27 = vadd.f32 %v8364_v52, %v5171_v19 }
 0x38e   : > { %5352 = vst [vmem:[%s7662_s13 + $0x38] sm:$0xff] %v6144_v45  ;;  %v5222_v28 = vadd.f32 %v8366_v53, %v5172_v20  ;;  %v5174_v29 = vmul.f32 %v8370_v58, %v5124_v17  ;;  %v5247_v31 = vmax.f32 %v5219_v23, 0.0  ;;  %v5175_v36 = vmul.f32 %v8360_v50, %v5125_v21 }
 0x38f   : > { %v5248_v32 = vmax.f32 %v5220_v24, 0.0  ;;  %v5223_v33 = vadd.f32 %v8372_v59, %v5173_v25  ;;  %v6145_v63 = vpack.c.bf16 %v5246_v26, %v5245_v22  ;;  %v5249_v0 = vmax.f32 %v5221_v27, 0.0 }
 0x390   : > { %v5250_v3 = vmax.f32 %v5222_v28, 0.0  ;;  %v5224_v4 = vadd.f32 %v8374_v60, %v5174_v29  ;;  %v5176_v46 = vmul.f32 %v8362_v51, %v5126_v30  ;;  %v5225_v8 = vadd.f32 %v8364_v52, %v5175_v36 }
 0x391   : > { %v6146_v41 = vpack.c.bf16 %v5248_v32, %v5247_v31  ;;  %v5251_v7 = vmax.f32 %v5223_v33, 0.0  ;;  %5353 = vst [vmem:[%s7662_s13 + $0x40] sm:$0xff] %v6145_v63  ;;  %v5177_v50 = vmul.f32 %v8368_v57, %v5127_v37  ;;  %v5178_v48 = vmul.f32 %v8370_v58, %v5128_v40 }
 0x392   : > { %v6147_v11 = vpack.c.bf16 %v5250_v3, %v5249_v0  ;;  %v5252_v47 = vmax.f32 %v5224_v4, 0.0  ;;  %v5226_v12 = vadd.f32 %v8366_v53, %v5176_v46  ;;  %v5253_v49 = vmax.f32 %v5225_v8, 0.0 }
 0x393   : > { %5354 = vst [vmem:[%s7662_s13 + $0x48] sm:$0xff] %v6146_v41  ;;  %v5227_v55 = vadd.f32 %v8372_v59, %v5177_v50  ;;  %v5228_v51 = vadd.f32 %v8374_v60, %v5178_v48 }
 0x394   : > { %5355 = vst [vmem:[%s7662_s13 + $0x50] sm:$0xff] %v6147_v11  ;;  %v6148_v54 = vpack.c.bf16 %v5252_v47, %v5251_v7  ;;  %v5254_v52 = vmax.f32 %v5226_v12, 0.0 }
 0x395   : > { %v5255_v56 = vmax.f32 %v5227_v55, 0.0  ;;  %v5256_v61 = vmax.f32 %v5228_v51, 0.0 }
 0x396   : > { %5356 = vst [vmem:[%s7662_s13 + $0x58] sm:$0xff] %v6148_v54  ;;  %v6149_v62 = vpack.c.bf16 %v5254_v52, %v5253_v49 }
 0x397   : > { %v6150_v1 = vpack.c.bf16 %v5256_v61, %v5255_v56 }
 0x398   : > { %5357 = vst [vmem:[%s7662_s13 + $0x60] sm:$0x11] %v6149_v62 }
 0x399   : > { %5358 = vst [vmem:[%s7662_s13 + $0x68] sm:$0x11] %v6150_v1 }
 0x39a PF: > { %p8522_p11 = scmp.ne.s32.totalorder %s8520_s17, 0 }
 0x39b   : > { %s6151_s22 = sshll.u32 (%p8522_p11), %s7323_s23, 4  ;;  %v5381_v53 = vld [vmem:[%s7662_s13] sm:$0xff] (%p8522_p11)  ;;  %v5383_v57 = vld [vmem:[%s7662_s13 + $0x8] sm:$0xff] (%p8522_p11)  ;;  %v5385_v58 = vld [vmem:[%s7662_s13 + $0x10] sm:$0xff] (%p8522_p11) }
 0x39c   : > { %5365 = sbr.rel (!%p8522_p11) target bundleno = 932 (0x3a4), region = 75  ;;  %s5368_s6 = scalar_lea.vmem (%p8522_p11), %s8506_s4, %s6151_s22  ;;  %v5387_v59 = vld [vmem:[%s7662_s13 + $0x18] sm:$0xff] (%p8522_p11)  ;;  %v5389_v60 = vld [vmem:[%s7662_s13 + $0x20] sm:$0xff] (%p8522_p11)  ;;  %v5391_v2 = vld [vmem:[%s7662_s13 + $0x28] sm:$0xff] (%p8522_p11) }
 0x39d   : > { %5382 = vst [vmem:[%s5368_s6] sm:$0xff] (%p8522_p11), %v5381_v53  ;;  %5384 = vst [vmem:[%s5368_s6 + $0x8] sm:$0xff] (%p8522_p11), %v5383_v57  ;;  %v5393_v5 = vld [vmem:[%s7662_s13 + $0x30] sm:$0xff] (%p8522_p11)  ;;  %v5395_v6 = vld [vmem:[%s7662_s13 + $0x38] sm:$0xff] (%p8522_p11) }
 0x39e   : > { %5386 = vst [vmem:[%s5368_s6 + $0x20] sm:$0xff] (%p8522_p11), %v5385_v58  ;;  %5388 = vst [vmem:[%s5368_s6 + $0x28] sm:$0xff] (%p8522_p11), %v5387_v59  ;;  %v5397_v9 = vld [vmem:[%s7662_s13 + $0x40] sm:$0xff] (%p8522_p11)  ;;  %v5399_v10 = vld [vmem:[%s7662_s13 + $0x48] sm:$0xff] (%p8522_p11) }
 0x39f   : > { %5390 = vst [vmem:[%s5368_s6 + $0x40] sm:$0xff] (%p8522_p11), %v5389_v60  ;;  %5392 = vst [vmem:[%s5368_s6 + $0x48] sm:$0xff] (%p8522_p11), %v5391_v2  ;;  %v5401_v34 = vld [vmem:[%s7662_s13 + $0x50] sm:$0xff] (%p8522_p11)  ;;  %v5403_v13 = vld [vmem:[%s7662_s13 + $0x58] sm:$0xff] (%p8522_p11) }
 0x3a0   : > { %5394 = vst [vmem:[%s5368_s6 + $0x60] sm:$0xff] (%p8522_p11), %v5393_v5  ;;  %5396 = vst [vmem:[%s5368_s6 + $0x68] sm:$0xff] (%p8522_p11), %v5395_v6  ;;  %v5405_v35 = vld [vmem:[%s7662_s13 + $0x60] sm:$0xff] (%p8522_p11)  ;;  %v5407_v38 = vld [vmem:[%s7662_s13 + $0x68] sm:$0xff] (%p8522_p11) }
 0x3a1   : > { %5398 = vst [vmem:[%s5368_s6 + $0x80] sm:$0xff] (%p8522_p11), %v5397_v9  ;;  %5400 = vst [vmem:[%s5368_s6 + $0x88] sm:$0xff] (%p8522_p11), %v5399_v10 }
 0x3a2   : > { %5402 = vst [vmem:[%s5368_s6 + $0xa0] sm:$0xff] (%p8522_p11), %v5401_v34  ;;  %5404 = vst [vmem:[%s5368_s6 + $0xa8] sm:$0xff] (%p8522_p11), %v5403_v13 }
 0x3a3   : > { %5406 = vst [vmem:[%s5368_s6 + $0xc0] sm:$0xff] %v5405_v35  ;;  %5408 = vst [vmem:[%s5368_s6 + $0xc8] sm:$0xff] %v5407_v38 }
 0x3a4 PF: > { %s17_s26 = sadd.s32 1, %s7335_s26   ;;  %s8523_s20 = sld [smem:[#allocation8_spill]] }
 0x3a5   : > { %p14_p13 = scmp.ge.s32.totalorder %s17_s26, 10   ;;  %s8524_s21 = sld [smem:[#allocation12_spill]] }
 0x3a6   : > { %s8525_s23 = sld [smem:[#allocation9_spill]]  ;;  %s8526_s0 = sld [smem:[#allocation10_spill]] }
 0x3a7   : > { %s8527_s25 = sld [smem:[#allocation11_spill]]  ;;  %s8528_s15 = smov %s7295_s16 }
 0x3a8   : > { %s8529_s16 = smov %s7470_s30  ;;  %s8530_s17 = smov %s7303_s18 }
 0x3a9   : > { %s8531_s18 = smov %s7307_s19  ;;  %s8532_s19 = smov %s7462_s12 }
 0x3aa   : > { %s8533_s22 = smov %s7327_s24  ;;  %16 = sbr.rel (!%p14_p13) target bundleno = 9 (0x9), region = 144 }
 0x3ac   : > { %s8534_s24 = smov %s8526_s0 }
 0x3b1   :  { %5424 = vsyncpa [#allocation5], 1 }
 0x3b2   :  { %5426 = vsyncpa [#allocation5 + $0x1], 1 }

// kernel: deconv_forward.4
= control target key start
LH: loop header
LB: loop body
LE: loop exit
PB: predicated region body
PF: predicated region fallthrough
CT: control target
= control target key end

     0   :  { %s5890_s15 = smov 0   ;;  %s5892_s16 = smov 0   ;;  %s7305_s0 = inlined_call_operand.vmem [shape: bf16[162,1024], index: 0, kind: input, shape index: {}]   ;;  %s7306_s1 = inlined_call_operand.vmem [shape: bf16[1024,1024], index: 1, kind: input, shape index: {}]   ;;  %s7307_s2 = inlined_call_operand.vmem [shape: f32[1,1024], index: 2, kind: input, shape index: {}]   ;;  %s7308_s3 = inlined_call_operand.vmem [shape: f32[1,1024], index: 3, kind: input, shape index: {}]   ;;  %s7309_s4 = inlined_call_operand.vmem [shape: bf16[162,1024], index: 4, kind: output, shape index: {}]  }
   0x1   :  { %s5894_s17 = smov 0  }
   0x2 LB: > { %s5906_s18 = sadd.s32 4294967295, %s5863_s17   ;;  %s5909_s19 = sadd.s32 1, %s5863_s17   ;;  %s5863_s17 = sphi %s5894_s17, %s7313_s17   ;;  %s5859_s16 = sphi %s5892_s16, %s7312_s16   ;;  %s5855_s15 = sphi %s5890_s15, %s7311_s15  }
   0x3   : > { %s39_s20 = ssub.s32 %s5863_s17, %s5909_s19  ;;  %s42_s21 = sadd.s32 1, %s5859_s16 }
   0x4   : > { %p40_p0 = scmp.eq.s32.totalorder %s39_s20, 0  ;;  %p49_p1 = scmp.ne.s32.totalorder %s5859_s16, %s5855_s15 }
   0x5   : > { %p50_p2 = scmp.eq.s32.totalorder %s5863_s17, 0  ;;  %p131_p3 = scmp.eq.s32.totalorder %s5906_s18, 1 }
   0x6   : > { %s5919_s22 = scalar_select %p40_p0, %s5859_s16, %s42_s21  }
   0x7   : > { %p51_p4 = por %p50_p2, %p49_p1  ;;  %p5921_p5 = por %p131_p3, %p49_p1 }
   0x8   : > { %p4718_p6 = scmp.ge.s32.totalorder %s5863_s17, 2 }
   0xa   : > { %156 = sbr.rel (%p4718_p6) target bundleno = 149 (0x95), region = 20 }
  0x11   : > { %159 = sbr.rel (!%p51_p4) target bundleno = 149 (0x95), region = 24  ;;  %s161_s24 = sand.u32 (%p51_p4), 1, %s5859_s16  }
  0x12   : > { %s5116_s25 = sshll.u32 (%p51_p4), %s5863_s17, 4  ;;  %s4719_s26 = sshll.u32 (%p51_p4), %s161_s24, 11 }
  0x13   : > { %s5931_s29 = scalar_lea.vmem (%p51_p4), %s7306_s1, %s5116_s25  ;;  %s5936_s30 = scalar_lea.vmem (%p51_p4), [#allocation2], %s4719_s26 }
  0x14   : > { %v179_v0 = vld [vmem:[%s5931_s29] sm:$0xff] (%p51_p4)  ;;  %v181_v1 = vld [vmem:[%s5931_s29 + $0x8] sm:$0xff] (%p51_p4) }
  0x15   : > { %v183_v2 = vld [vmem:[%s5931_s29 + $0x20] sm:$0xff] (%p51_p4)  ;;  %180 = vst [vmem:[%s5936_s30] sm:$0xff] (%p51_p4), %v179_v0  ;;  %182 = vst [vmem:[%s5936_s30 + $0x8] sm:$0xff] (%p51_p4), %v181_v1  ;;  %v185_v3 = vld [vmem:[%s5931_s29 + $0x28] sm:$0xff] (%p51_p4) }
  0x16   : > { %184 = vst [vmem:[%s5936_s30 + $0x10] sm:$0xff] (%p51_p4), %v183_v2  ;;  %v187_v4 = vld [vmem:[%s5931_s29 + $0x40] sm:$0xff] (%p51_p4)  ;;  %v189_v5 = vld [vmem:[%s5931_s29 + $0x48] sm:$0xff] (%p51_p4)  ;;  %186 = vst [vmem:[%s5936_s30 + $0x18] sm:$0xff] (%p51_p4), %v185_v3 }
  0x17   : > { %188 = vst [vmem:[%s5936_s30 + $0x20] sm:$0xff] (%p51_p4), %v187_v4  ;;  %190 = vst [vmem:[%s5936_s30 + $0x28] sm:$0xff] (%p51_p4), %v189_v5  ;;  %v191_v6 = vld [vmem:[%s5931_s29 + $0x60] sm:$0xff] (%p51_p4)  ;;  %v193_v7 = vld [vmem:[%s5931_s29 + $0x68] sm:$0xff] (%p51_p4) }
  0x18   : > { %v195_v8 = vld [vmem:[%s5931_s29 + $0x80] sm:$0xff]  ;;  %192 = vst [vmem:[%s5936_s30 + $0x30] sm:$0xff] %v191_v6  ;;  %194 = vst [vmem:[%s5936_s30 + $0x38] sm:$0xff] %v193_v7  ;;  %v197_v9 = vld [vmem:[%s5931_s29 + $0x88] sm:$0xff] }
  0x19   : > { %196 = vst [vmem:[%s5936_s30 + $0x40] sm:$0xff] %v195_v8  ;;  %v199_v10 = vld [vmem:[%s5931_s29 + $0xa0] sm:$0xff]  ;;  %v201_v11 = vld [vmem:[%s5931_s29 + $0xa8] sm:$0xff]  ;;  %198 = vst [vmem:[%s5936_s30 + $0x48] sm:$0xff] %v197_v9 }
  0x1a   : > { %200 = vst [vmem:[%s5936_s30 + $0x50] sm:$0xff] %v199_v10  ;;  %202 = vst [vmem:[%s5936_s30 + $0x58] sm:$0xff] %v201_v11  ;;  %v203_v12 = vld [vmem:[%s5931_s29 + $0xc0] sm:$0xff]  ;;  %v205_v13 = vld [vmem:[%s5931_s29 + $0xc8] sm:$0xff] }
  0x1b   : > { %v207_v14 = vld [vmem:[%s5931_s29 + $0xe0] sm:$0xff]  ;;  %204 = vst [vmem:[%s5936_s30 + $0x60] sm:$0xff] %v203_v12  ;;  %206 = vst [vmem:[%s5936_s30 + $0x68] sm:$0xff] %v205_v13  ;;  %v209_v15 = vld [vmem:[%s5931_s29 + $0xe8] sm:$0xff] }
  0x1c   : > { %208 = vst [vmem:[%s5936_s30 + $0x70] sm:$0xff] %v207_v14  ;;  %v211_v16 = vld [vmem:[%s5931_s29 + $0x100] sm:$0xff]  ;;  %v213_v17 = vld [vmem:[%s5931_s29 + $0x108] sm:$0xff]  ;;  %210 = vst [vmem:[%s5936_s30 + $0x78] sm:$0xff] %v209_v15 }
  0x1d   : > { %212 = vst [vmem:[%s5936_s30 + $0x80] sm:$0xff] %v211_v16  ;;  %214 = vst [vmem:[%s5936_s30 + $0x88] sm:$0xff] %v213_v17  ;;  %v215_v18 = vld [vmem:[%s5931_s29 + $0x120] sm:$0xff]  ;;  %v217_v19 = vld [vmem:[%s5931_s29 + $0x128] sm:$0xff] }
  0x1e   : > { %v219_v20 = vld [vmem:[%s5931_s29 + $0x140] sm:$0xff]  ;;  %216 = vst [vmem:[%s5936_s30 + $0x90] sm:$0xff] %v215_v18  ;;  %218 = vst [vmem:[%s5936_s30 + $0x98] sm:$0xff] %v217_v19  ;;  %v221_v21 = vld [vmem:[%s5931_s29 + $0x148] sm:$0xff] }
  0x1f   : > { %220 = vst [vmem:[%s5936_s30 + $0xa0] sm:$0xff] %v219_v20  ;;  %v223_v22 = vld [vmem:[%s5931_s29 + $0x160] sm:$0xff]  ;;  %v225_v23 = vld [vmem:[%s5931_s29 + $0x168] sm:$0xff]  ;;  %222 = vst [vmem:[%s5936_s30 + $0xa8] sm:$0xff] %v221_v21 }
  0x20   : > { %224 = vst [vmem:[%s5936_s30 + $0xb0] sm:$0xff] %v223_v22  ;;  %226 = vst [vmem:[%s5936_s30 + $0xb8] sm:$0xff] %v225_v23  ;;  %v227_v24 = vld [vmem:[%s5931_s29 + $0x180] sm:$0xff]  ;;  %v229_v25 = vld [vmem:[%s5931_s29 + $0x188] sm:$0xff] }
  0x21   : > { %v231_v26 = vld [vmem:[%s5931_s29 + $0x1a0] sm:$0xff]  ;;  %228 = vst [vmem:[%s5936_s30 + $0xc0] sm:$0xff] %v227_v24  ;;  %230 = vst [vmem:[%s5936_s30 + $0xc8] sm:$0xff] %v229_v25  ;;  %v233_v27 = vld [vmem:[%s5931_s29 + $0x1a8] sm:$0xff] }
  0x22   : > { %232 = vst [vmem:[%s5936_s30 + $0xd0] sm:$0xff] %v231_v26  ;;  %v235_v28 = vld [vmem:[%s5931_s29 + $0x1c0] sm:$0xff]  ;;  %v237_v29 = vld [vmem:[%s5931_s29 + $0x1c8] sm:$0xff]  ;;  %234 = vst [vmem:[%s5936_s30 + $0xd8] sm:$0xff] %v233_v27 }
  0x23   : > { %236 = vst [vmem:[%s5936_s30 + $0xe0] sm:$0xff] %v235_v28  ;;  %238 = vst [vmem:[%s5936_s30 + $0xe8] sm:$0xff] %v237_v29  ;;  %v239_v30 = vld [vmem:[%s5931_s29 + $0x1e0] sm:$0xff]  ;;  %v241_v31 = vld [vmem:[%s5931_s29 + $0x1e8] sm:$0xff] }
  0x24   : > { %v243_v32 = vld [vmem:[%s5931_s29 + $0x200] sm:$0xff]  ;;  %240 = vst [vmem:[%s5936_s30 + $0xf0] sm:$0xff] %v239_v30  ;;  %242 = vst [vmem:[%s5936_s30 + $0xf8] sm:$0xff] %v241_v31  ;;  %v245_v33 = vld [vmem:[%s5931_s29 + $0x208] sm:$0xff] }
  0x25   : > { %244 = vst [vmem:[%s5936_s30 + $0x100] sm:$0xff] %v243_v32  ;;  %v247_v34 = vld [vmem:[%s5931_s29 + $0x220] sm:$0xff]  ;;  %v249_v35 = vld [vmem:[%s5931_s29 + $0x228] sm:$0xff]  ;;  %246 = vst [vmem:[%s5936_s30 + $0x108] sm:$0xff] %v245_v33 }
  0x26   : > { %248 = vst [vmem:[%s5936_s30 + $0x110] sm:$0xff] %v247_v34  ;;  %250 = vst [vmem:[%s5936_s30 + $0x118] sm:$0xff] %v249_v35  ;;  %v251_v36 = vld [vmem:[%s5931_s29 + $0x240] sm:$0xff]  ;;  %v253_v37 = vld [vmem:[%s5931_s29 + $0x248] sm:$0xff] }
  0x27   : > { %v255_v38 = vld [vmem:[%s5931_s29 + $0x260] sm:$0xff]  ;;  %252 = vst [vmem:[%s5936_s30 + $0x120] sm:$0xff] %v251_v36  ;;  %254 = vst [vmem:[%s5936_s30 + $0x128] sm:$0xff] %v253_v37  ;;  %v257_v39 = vld [vmem:[%s5931_s29 + $0x268] sm:$0xff] }
  0x28   : > { %256 = vst [vmem:[%s5936_s30 + $0x130] sm:$0xff] %v255_v38  ;;  %v259_v40 = vld [vmem:[%s5931_s29 + $0x280] sm:$0xff]  ;;  %v261_v41 = vld [vmem:[%s5931_s29 + $0x288] sm:$0xff]  ;;  %258 = vst [vmem:[%s5936_s30 + $0x138] sm:$0xff] %v257_v39 }
  0x29   : > { %260 = vst [vmem:[%s5936_s30 + $0x140] sm:$0xff] %v259_v40  ;;  %262 = vst [vmem:[%s5936_s30 + $0x148] sm:$0xff] %v261_v41  ;;  %v263_v42 = vld [vmem:[%s5931_s29 + $0x2a0] sm:$0xff]  ;;  %v265_v43 = vld [vmem:[%s5931_s29 + $0x2a8] sm:$0xff] }
  0x2a   : > { %v267_v44 = vld [vmem:[%s5931_s29 + $0x2c0] sm:$0xff]  ;;  %264 = vst [vmem:[%s5936_s30 + $0x150] sm:$0xff] %v263_v42  ;;  %266 = vst [vmem:[%s5936_s30 + $0x158] sm:$0xff] %v265_v43  ;;  %v269_v45 = vld [vmem:[%s5931_s29 + $0x2c8] sm:$0xff] }
  0x2b   : > { %268 = vst [vmem:[%s5936_s30 + $0x160] sm:$0xff] %v267_v44  ;;  %v271_v46 = vld [vmem:[%s5931_s29 + $0x2e0] sm:$0xff]  ;;  %v273_v47 = vld [vmem:[%s5931_s29 + $0x2e8] sm:$0xff]  ;;  %270 = vst [vmem:[%s5936_s30 + $0x168] sm:$0xff] %v269_v45 }
  0x2c   : > { %272 = vst [vmem:[%s5936_s30 + $0x170] sm:$0xff] %v271_v46  ;;  %274 = vst [vmem:[%s5936_s30 + $0x178] sm:$0xff] %v273_v47  ;;  %v275_v48 = vld [vmem:[%s5931_s29 + $0x300] sm:$0xff]  ;;  %v277_v49 = vld [vmem:[%s5931_s29 + $0x308] sm:$0xff] }
  0x2d   : > { %v279_v50 = vld [vmem:[%s5931_s29 + $0x320] sm:$0xff]  ;;  %276 = vst [vmem:[%s5936_s30 + $0x180] sm:$0xff] %v275_v48  ;;  %278 = vst [vmem:[%s5936_s30 + $0x188] sm:$0xff] %v277_v49  ;;  %v281_v51 = vld [vmem:[%s5931_s29 + $0x328] sm:$0xff] }
  0x2e   : > { %280 = vst [vmem:[%s5936_s30 + $0x190] sm:$0xff] %v279_v50  ;;  %v283_v52 = vld [vmem:[%s5931_s29 + $0x340] sm:$0xff]  ;;  %v285_v53 = vld [vmem:[%s5931_s29 + $0x348] sm:$0xff]  ;;  %282 = vst [vmem:[%s5936_s30 + $0x198] sm:$0xff] %v281_v51 }
  0x2f   : > { %284 = vst [vmem:[%s5936_s30 + $0x1a0] sm:$0xff] %v283_v52  ;;  %286 = vst [vmem:[%s5936_s30 + $0x1a8] sm:$0xff] %v285_v53  ;;  %v287_v54 = vld [vmem:[%s5931_s29 + $0x360] sm:$0xff]  ;;  %v289_v55 = vld [vmem:[%s5931_s29 + $0x368] sm:$0xff] }
  0x30   : > { %v291_v56 = vld [vmem:[%s5931_s29 + $0x380] sm:$0xff]  ;;  %288 = vst [vmem:[%s5936_s30 + $0x1b0] sm:$0xff] %v287_v54  ;;  %290 = vst [vmem:[%s5936_s30 + $0x1b8] sm:$0xff] %v289_v55  ;;  %v293_v57 = vld [vmem:[%s5931_s29 + $0x388] sm:$0xff] }
  0x31   : > { %292 = vst [vmem:[%s5936_s30 + $0x1c0] sm:$0xff] %v291_v56  ;;  %v295_v58 = vld [vmem:[%s5931_s29 + $0x3a0] sm:$0xff]  ;;  %v297_v59 = vld [vmem:[%s5931_s29 + $0x3a8] sm:$0xff]  ;;  %294 = vst [vmem:[%s5936_s30 + $0x1c8] sm:$0xff] %v293_v57 }
  0x32   : > { %296 = vst [vmem:[%s5936_s30 + $0x1d0] sm:$0xff] %v295_v58  ;;  %298 = vst [vmem:[%s5936_s30 + $0x1d8] sm:$0xff] %v297_v59  ;;  %v299_v60 = vld [vmem:[%s5931_s29 + $0x3c0] sm:$0xff]  ;;  %v301_v61 = vld [vmem:[%s5931_s29 + $0x3c8] sm:$0xff] }
  0x33   : > { %v303_v62 = vld [vmem:[%s5931_s29 + $0x3e0] sm:$0xff]  ;;  %300 = vst [vmem:[%s5936_s30 + $0x1e0] sm:$0xff] %v299_v60  ;;  %302 = vst [vmem:[%s5936_s30 + $0x1e8] sm:$0xff] %v301_v61  ;;  %v305_v63 = vld [vmem:[%s5931_s29 + $0x3e8] sm:$0xff] }
  0x34   : > { %304 = vst [vmem:[%s5936_s30 + $0x1f0] sm:$0xff] %v303_v62  ;;  %v307_v0 = vld [vmem:[%s5931_s29 + $0x400] sm:$0xff]  ;;  %v309_v1 = vld [vmem:[%s5931_s29 + $0x408] sm:$0xff]  ;;  %306 = vst [vmem:[%s5936_s30 + $0x1f8] sm:$0xff] %v305_v63 }
  0x35   : > { %308 = vst [vmem:[%s5936_s30 + $0x200] sm:$0xff] %v307_v0  ;;  %310 = vst [vmem:[%s5936_s30 + $0x208] sm:$0xff] %v309_v1  ;;  %v311_v2 = vld [vmem:[%s5931_s29 + $0x420] sm:$0xff]  ;;  %v313_v3 = vld [vmem:[%s5931_s29 + $0x428] sm:$0xff] }
  0x36   : > { %v315_v4 = vld [vmem:[%s5931_s29 + $0x440] sm:$0xff]  ;;  %312 = vst [vmem:[%s5936_s30 + $0x210] sm:$0xff] %v311_v2  ;;  %314 = vst [vmem:[%s5936_s30 + $0x218] sm:$0xff] %v313_v3  ;;  %v317_v5 = vld [vmem:[%s5931_s29 + $0x448] sm:$0xff] }
  0x37   : > { %316 = vst [vmem:[%s5936_s30 + $0x220] sm:$0xff] %v315_v4  ;;  %v319_v6 = vld [vmem:[%s5931_s29 + $0x460] sm:$0xff]  ;;  %v321_v7 = vld [vmem:[%s5931_s29 + $0x468] sm:$0xff]  ;;  %318 = vst [vmem:[%s5936_s30 + $0x228] sm:$0xff] %v317_v5 }
  0x38   : > { %320 = vst [vmem:[%s5936_s30 + $0x230] sm:$0xff] %v319_v6  ;;  %322 = vst [vmem:[%s5936_s30 + $0x238] sm:$0xff] %v321_v7  ;;  %v323_v8 = vld [vmem:[%s5931_s29 + $0x480] sm:$0xff]  ;;  %v325_v9 = vld [vmem:[%s5931_s29 + $0x488] sm:$0xff] }
  0x39   : > { %v327_v10 = vld [vmem:[%s5931_s29 + $0x4a0] sm:$0xff]  ;;  %324 = vst [vmem:[%s5936_s30 + $0x240] sm:$0xff] %v323_v8  ;;  %326 = vst [vmem:[%s5936_s30 + $0x248] sm:$0xff] %v325_v9  ;;  %v329_v11 = vld [vmem:[%s5931_s29 + $0x4a8] sm:$0xff] }
  0x3a   : > { %328 = vst [vmem:[%s5936_s30 + $0x250] sm:$0xff] %v327_v10  ;;  %v331_v12 = vld [vmem:[%s5931_s29 + $0x4c0] sm:$0xff]  ;;  %v333_v13 = vld [vmem:[%s5931_s29 + $0x4c8] sm:$0xff]  ;;  %330 = vst [vmem:[%s5936_s30 + $0x258] sm:$0xff] %v329_v11 }
  0x3b   : > { %332 = vst [vmem:[%s5936_s30 + $0x260] sm:$0xff] %v331_v12  ;;  %334 = vst [vmem:[%s5936_s30 + $0x268] sm:$0xff] %v333_v13  ;;  %v335_v14 = vld [vmem:[%s5931_s29 + $0x4e0] sm:$0xff]  ;;  %v337_v15 = vld [vmem:[%s5931_s29 + $0x4e8] sm:$0xff] }
  0x3c   : > { %v339_v16 = vld [vmem:[%s5931_s29 + $0x500] sm:$0xff]  ;;  %336 = vst [vmem:[%s5936_s30 + $0x270] sm:$0xff] %v335_v14  ;;  %338 = vst [vmem:[%s5936_s30 + $0x278] sm:$0xff] %v337_v15  ;;  %v341_v17 = vld [vmem:[%s5931_s29 + $0x508] sm:$0xff] }
  0x3d   : > { %340 = vst [vmem:[%s5936_s30 + $0x280] sm:$0xff] %v339_v16  ;;  %v343_v18 = vld [vmem:[%s5931_s29 + $0x520] sm:$0xff]  ;;  %v345_v19 = vld [vmem:[%s5931_s29 + $0x528] sm:$0xff]  ;;  %342 = vst [vmem:[%s5936_s30 + $0x288] sm:$0xff] %v341_v17 }
  0x3e   : > { %344 = vst [vmem:[%s5936_s30 + $0x290] sm:$0xff] %v343_v18  ;;  %346 = vst [vmem:[%s5936_s30 + $0x298] sm:$0xff] %v345_v19  ;;  %v347_v20 = vld [vmem:[%s5931_s29 + $0x540] sm:$0xff]  ;;  %v349_v21 = vld [vmem:[%s5931_s29 + $0x548] sm:$0xff] }
  0x3f   : > { %v351_v22 = vld [vmem:[%s5931_s29 + $0x560] sm:$0xff]  ;;  %348 = vst [vmem:[%s5936_s30 + $0x2a0] sm:$0xff] %v347_v20  ;;  %350 = vst [vmem:[%s5936_s30 + $0x2a8] sm:$0xff] %v349_v21  ;;  %v353_v23 = vld [vmem:[%s5931_s29 + $0x568] sm:$0xff] }
  0x40   : > { %352 = vst [vmem:[%s5936_s30 + $0x2b0] sm:$0xff] %v351_v22  ;;  %v355_v24 = vld [vmem:[%s5931_s29 + $0x580] sm:$0xff]  ;;  %v357_v25 = vld [vmem:[%s5931_s29 + $0x588] sm:$0xff]  ;;  %354 = vst [vmem:[%s5936_s30 + $0x2b8] sm:$0xff] %v353_v23 }
  0x41   : > { %356 = vst [vmem:[%s5936_s30 + $0x2c0] sm:$0xff] %v355_v24  ;;  %358 = vst [vmem:[%s5936_s30 + $0x2c8] sm:$0xff] %v357_v25  ;;  %v359_v26 = vld [vmem:[%s5931_s29 + $0x5a0] sm:$0xff]  ;;  %v361_v27 = vld [vmem:[%s5931_s29 + $0x5a8] sm:$0xff] }
  0x42   : > { %v363_v28 = vld [vmem:[%s5931_s29 + $0x5c0] sm:$0xff]  ;;  %360 = vst [vmem:[%s5936_s30 + $0x2d0] sm:$0xff] %v359_v26  ;;  %362 = vst [vmem:[%s5936_s30 + $0x2d8] sm:$0xff] %v361_v27  ;;  %v365_v29 = vld [vmem:[%s5931_s29 + $0x5c8] sm:$0xff] }
  0x43   : > { %364 = vst [vmem:[%s5936_s30 + $0x2e0] sm:$0xff] %v363_v28  ;;  %v367_v30 = vld [vmem:[%s5931_s29 + $0x5e0] sm:$0xff]  ;;  %v369_v31 = vld [vmem:[%s5931_s29 + $0x5e8] sm:$0xff]  ;;  %366 = vst [vmem:[%s5936_s30 + $0x2e8] sm:$0xff] %v365_v29 }
  0x44   : > { %368 = vst [vmem:[%s5936_s30 + $0x2f0] sm:$0xff] %v367_v30  ;;  %370 = vst [vmem:[%s5936_s30 + $0x2f8] sm:$0xff] %v369_v31  ;;  %v371_v32 = vld [vmem:[%s5931_s29 + $0x600] sm:$0xff]  ;;  %v373_v33 = vld [vmem:[%s5931_s29 + $0x608] sm:$0xff] }
  0x45   : > { %v375_v34 = vld [vmem:[%s5931_s29 + $0x620] sm:$0xff]  ;;  %372 = vst [vmem:[%s5936_s30 + $0x300] sm:$0xff] %v371_v32  ;;  %374 = vst [vmem:[%s5936_s30 + $0x308] sm:$0xff] %v373_v33  ;;  %v377_v35 = vld [vmem:[%s5931_s29 + $0x628] sm:$0xff] }
  0x46   : > { %376 = vst [vmem:[%s5936_s30 + $0x310] sm:$0xff] %v375_v34  ;;  %v379_v36 = vld [vmem:[%s5931_s29 + $0x640] sm:$0xff]  ;;  %v381_v37 = vld [vmem:[%s5931_s29 + $0x648] sm:$0xff]  ;;  %378 = vst [vmem:[%s5936_s30 + $0x318] sm:$0xff] %v377_v35 }
  0x47   : > { %380 = vst [vmem:[%s5936_s30 + $0x320] sm:$0xff] %v379_v36  ;;  %382 = vst [vmem:[%s5936_s30 + $0x328] sm:$0xff] %v381_v37  ;;  %v383_v38 = vld [vmem:[%s5931_s29 + $0x660] sm:$0xff]  ;;  %v385_v39 = vld [vmem:[%s5931_s29 + $0x668] sm:$0xff] }
  0x48   : > { %v387_v40 = vld [vmem:[%s5931_s29 + $0x680] sm:$0xff]  ;;  %384 = vst [vmem:[%s5936_s30 + $0x330] sm:$0xff] %v383_v38  ;;  %386 = vst [vmem:[%s5936_s30 + $0x338] sm:$0xff] %v385_v39  ;;  %v389_v41 = vld [vmem:[%s5931_s29 + $0x688] sm:$0xff] }
  0x49   : > { %388 = vst [vmem:[%s5936_s30 + $0x340] sm:$0xff] %v387_v40  ;;  %v391_v42 = vld [vmem:[%s5931_s29 + $0x6a0] sm:$0xff]  ;;  %v393_v43 = vld [vmem:[%s5931_s29 + $0x6a8] sm:$0xff]  ;;  %390 = vst [vmem:[%s5936_s30 + $0x348] sm:$0xff] %v389_v41 }
  0x4a   : > { %392 = vst [vmem:[%s5936_s30 + $0x350] sm:$0xff] %v391_v42  ;;  %394 = vst [vmem:[%s5936_s30 + $0x358] sm:$0xff] %v393_v43  ;;  %v395_v44 = vld [vmem:[%s5931_s29 + $0x6c0] sm:$0xff]  ;;  %v397_v45 = vld [vmem:[%s5931_s29 + $0x6c8] sm:$0xff] }
  0x4b   : > { %v399_v46 = vld [vmem:[%s5931_s29 + $0x6e0] sm:$0xff]  ;;  %396 = vst [vmem:[%s5936_s30 + $0x360] sm:$0xff] %v395_v44  ;;  %398 = vst [vmem:[%s5936_s30 + $0x368] sm:$0xff] %v397_v45  ;;  %v401_v47 = vld [vmem:[%s5931_s29 + $0x6e8] sm:$0xff] }
  0x4c   : > { %400 = vst [vmem:[%s5936_s30 + $0x370] sm:$0xff] %v399_v46  ;;  %v403_v48 = vld [vmem:[%s5931_s29 + $0x700] sm:$0xff]  ;;  %v405_v49 = vld [vmem:[%s5931_s29 + $0x708] sm:$0xff]  ;;  %402 = vst [vmem:[%s5936_s30 + $0x378] sm:$0xff] %v401_v47 }
  0x4d   : > { %404 = vst [vmem:[%s5936_s30 + $0x380] sm:$0xff] %v403_v48  ;;  %406 = vst [vmem:[%s5936_s30 + $0x388] sm:$0xff] %v405_v49  ;;  %v407_v50 = vld [vmem:[%s5931_s29 + $0x720] sm:$0xff]  ;;  %v409_v51 = vld [vmem:[%s5931_s29 + $0x728] sm:$0xff] }
  0x4e   : > { %v411_v52 = vld [vmem:[%s5931_s29 + $0x740] sm:$0xff]  ;;  %408 = vst [vmem:[%s5936_s30 + $0x390] sm:$0xff] %v407_v50  ;;  %410 = vst [vmem:[%s5936_s30 + $0x398] sm:$0xff] %v409_v51  ;;  %v413_v53 = vld [vmem:[%s5931_s29 + $0x748] sm:$0xff] }
  0x4f   : > { %412 = vst [vmem:[%s5936_s30 + $0x3a0] sm:$0xff] %v411_v52  ;;  %v415_v54 = vld [vmem:[%s5931_s29 + $0x760] sm:$0xff]  ;;  %v417_v55 = vld [vmem:[%s5931_s29 + $0x768] sm:$0xff]  ;;  %414 = vst [vmem:[%s5936_s30 + $0x3a8] sm:$0xff] %v413_v53 }
  0x50   : > { %416 = vst [vmem:[%s5936_s30 + $0x3b0] sm:$0xff] %v415_v54  ;;  %418 = vst [vmem:[%s5936_s30 + $0x3b8] sm:$0xff] %v417_v55  ;;  %v419_v56 = vld [vmem:[%s5931_s29 + $0x780] sm:$0xff]  ;;  %v421_v57 = vld [vmem:[%s5931_s29 + $0x788] sm:$0xff] }
  0x51   : > { %v423_v58 = vld [vmem:[%s5931_s29 + $0x7a0] sm:$0xff]  ;;  %420 = vst [vmem:[%s5936_s30 + $0x3c0] sm:$0xff] %v419_v56  ;;  %422 = vst [vmem:[%s5936_s30 + $0x3c8] sm:$0xff] %v421_v57  ;;  %v425_v59 = vld [vmem:[%s5931_s29 + $0x7a8] sm:$0xff] }
  0x52   : > { %424 = vst [vmem:[%s5936_s30 + $0x3d0] sm:$0xff] %v423_v58  ;;  %v427_v60 = vld [vmem:[%s5931_s29 + $0x7c0] sm:$0xff]  ;;  %v429_v61 = vld [vmem:[%s5931_s29 + $0x7c8] sm:$0xff]  ;;  %426 = vst [vmem:[%s5936_s30 + $0x3d8] sm:$0xff] %v425_v59 }
  0x53   : > { %428 = vst [vmem:[%s5936_s30 + $0x3e0] sm:$0xff] %v427_v60  ;;  %430 = vst [vmem:[%s5936_s30 + $0x3e8] sm:$0xff] %v429_v61  ;;  %v431_v62 = vld [vmem:[%s5931_s29 + $0x7e0] sm:$0xff]  ;;  %v433_v63 = vld [vmem:[%s5931_s29 + $0x7e8] sm:$0xff] }
  0x54   : > { %v435_v0 = vld [vmem:[%s5931_s29 + $0x800] sm:$0xff]  ;;  %432 = vst [vmem:[%s5936_s30 + $0x3f0] sm:$0xff] %v431_v62  ;;  %434 = vst [vmem:[%s5936_s30 + $0x3f8] sm:$0xff] %v433_v63  ;;  %v437_v1 = vld [vmem:[%s5931_s29 + $0x808] sm:$0xff] }
  0x55   : > { %436 = vst [vmem:[%s5936_s30 + $0x400] sm:$0xff] %v435_v0  ;;  %v439_v2 = vld [vmem:[%s5931_s29 + $0x820] sm:$0xff]  ;;  %v441_v3 = vld [vmem:[%s5931_s29 + $0x828] sm:$0xff]  ;;  %438 = vst [vmem:[%s5936_s30 + $0x408] sm:$0xff] %v437_v1 }
  0x56   : > { %440 = vst [vmem:[%s5936_s30 + $0x410] sm:$0xff] %v439_v2  ;;  %442 = vst [vmem:[%s5936_s30 + $0x418] sm:$0xff] %v441_v3  ;;  %v443_v4 = vld [vmem:[%s5931_s29 + $0x840] sm:$0xff]  ;;  %v445_v5 = vld [vmem:[%s5931_s29 + $0x848] sm:$0xff] }
  0x57   : > { %v447_v6 = vld [vmem:[%s5931_s29 + $0x860] sm:$0xff]  ;;  %444 = vst [vmem:[%s5936_s30 + $0x420] sm:$0xff] %v443_v4  ;;  %446 = vst [vmem:[%s5936_s30 + $0x428] sm:$0xff] %v445_v5  ;;  %v449_v7 = vld [vmem:[%s5931_s29 + $0x868] sm:$0xff] }
  0x58   : > { %448 = vst [vmem:[%s5936_s30 + $0x430] sm:$0xff] %v447_v6  ;;  %v451_v8 = vld [vmem:[%s5931_s29 + $0x880] sm:$0xff]  ;;  %v453_v9 = vld [vmem:[%s5931_s29 + $0x888] sm:$0xff]  ;;  %450 = vst [vmem:[%s5936_s30 + $0x438] sm:$0xff] %v449_v7 }
  0x59   : > { %452 = vst [vmem:[%s5936_s30 + $0x440] sm:$0xff] %v451_v8  ;;  %454 = vst [vmem:[%s5936_s30 + $0x448] sm:$0xff] %v453_v9  ;;  %v455_v10 = vld [vmem:[%s5931_s29 + $0x8a0] sm:$0xff]  ;;  %v457_v11 = vld [vmem:[%s5931_s29 + $0x8a8] sm:$0xff] }
  0x5a   : > { %v459_v12 = vld [vmem:[%s5931_s29 + $0x8c0] sm:$0xff]  ;;  %456 = vst [vmem:[%s5936_s30 + $0x450] sm:$0xff] %v455_v10  ;;  %458 = vst [vmem:[%s5936_s30 + $0x458] sm:$0xff] %v457_v11  ;;  %v461_v13 = vld [vmem:[%s5931_s29 + $0x8c8] sm:$0xff] }
  0x5b   : > { %460 = vst [vmem:[%s5936_s30 + $0x460] sm:$0xff] %v459_v12  ;;  %v463_v14 = vld [vmem:[%s5931_s29 + $0x8e0] sm:$0xff]  ;;  %v465_v15 = vld [vmem:[%s5931_s29 + $0x8e8] sm:$0xff]  ;;  %462 = vst [vmem:[%s5936_s30 + $0x468] sm:$0xff] %v461_v13 }
  0x5c   : > { %464 = vst [vmem:[%s5936_s30 + $0x470] sm:$0xff] %v463_v14  ;;  %466 = vst [vmem:[%s5936_s30 + $0x478] sm:$0xff] %v465_v15  ;;  %v467_v16 = vld [vmem:[%s5931_s29 + $0x900] sm:$0xff]  ;;  %v469_v17 = vld [vmem:[%s5931_s29 + $0x908] sm:$0xff] }
  0x5d   : > { %v471_v18 = vld [vmem:[%s5931_s29 + $0x920] sm:$0xff]  ;;  %468 = vst [vmem:[%s5936_s30 + $0x480] sm:$0xff] %v467_v16  ;;  %470 = vst [vmem:[%s5936_s30 + $0x488] sm:$0xff] %v469_v17  ;;  %v473_v19 = vld [vmem:[%s5931_s29 + $0x928] sm:$0xff] }
  0x5e   : > { %472 = vst [vmem:[%s5936_s30 + $0x490] sm:$0xff] %v471_v18  ;;  %v475_v20 = vld [vmem:[%s5931_s29 + $0x940] sm:$0xff]  ;;  %v477_v21 = vld [vmem:[%s5931_s29 + $0x948] sm:$0xff]  ;;  %474 = vst [vmem:[%s5936_s30 + $0x498] sm:$0xff] %v473_v19 }
  0x5f   : > { %476 = vst [vmem:[%s5936_s30 + $0x4a0] sm:$0xff] %v475_v20  ;;  %478 = vst [vmem:[%s5936_s30 + $0x4a8] sm:$0xff] %v477_v21  ;;  %v479_v22 = vld [vmem:[%s5931_s29 + $0x960] sm:$0xff]  ;;  %v481_v23 = vld [vmem:[%s5931_s29 + $0x968] sm:$0xff] }
  0x60   : > { %v483_v24 = vld [vmem:[%s5931_s29 + $0x980] sm:$0xff]  ;;  %480 = vst [vmem:[%s5936_s30 + $0x4b0] sm:$0xff] %v479_v22  ;;  %482 = vst [vmem:[%s5936_s30 + $0x4b8] sm:$0xff] %v481_v23  ;;  %v485_v25 = vld [vmem:[%s5931_s29 + $0x988] sm:$0xff] }
  0x61   : > { %484 = vst [vmem:[%s5936_s30 + $0x4c0] sm:$0xff] %v483_v24  ;;  %v487_v26 = vld [vmem:[%s5931_s29 + $0x9a0] sm:$0xff]  ;;  %v489_v27 = vld [vmem:[%s5931_s29 + $0x9a8] sm:$0xff]  ;;  %486 = vst [vmem:[%s5936_s30 + $0x4c8] sm:$0xff] %v485_v25 }
  0x62   : > { %488 = vst [vmem:[%s5936_s30 + $0x4d0] sm:$0xff] %v487_v26  ;;  %490 = vst [vmem:[%s5936_s30 + $0x4d8] sm:$0xff] %v489_v27  ;;  %v491_v28 = vld [vmem:[%s5931_s29 + $0x9c0] sm:$0xff]  ;;  %v493_v29 = vld [vmem:[%s5931_s29 + $0x9c8] sm:$0xff] }
  0x63   : > { %v495_v30 = vld [vmem:[%s5931_s29 + $0x9e0] sm:$0xff]  ;;  %492 = vst [vmem:[%s5936_s30 + $0x4e0] sm:$0xff] %v491_v28  ;;  %494 = vst [vmem:[%s5936_s30 + $0x4e8] sm:$0xff] %v493_v29  ;;  %v497_v31 = vld [vmem:[%s5931_s29 + $0x9e8] sm:$0xff] }
  0x64   : > { %496 = vst [vmem:[%s5936_s30 + $0x4f0] sm:$0xff] %v495_v30  ;;  %v499_v32 = vld [vmem:[%s5931_s29 + $0xa00] sm:$0xff]  ;;  %v501_v33 = vld [vmem:[%s5931_s29 + $0xa08] sm:$0xff]  ;;  %498 = vst [vmem:[%s5936_s30 + $0x4f8] sm:$0xff] %v497_v31 }
  0x65   : > { %500 = vst [vmem:[%s5936_s30 + $0x500] sm:$0xff] %v499_v32  ;;  %502 = vst [vmem:[%s5936_s30 + $0x508] sm:$0xff] %v501_v33  ;;  %v503_v34 = vld [vmem:[%s5931_s29 + $0xa20] sm:$0xff]  ;;  %v505_v35 = vld [vmem:[%s5931_s29 + $0xa28] sm:$0xff] }
  0x66   : > { %v507_v36 = vld [vmem:[%s5931_s29 + $0xa40] sm:$0xff]  ;;  %504 = vst [vmem:[%s5936_s30 + $0x510] sm:$0xff] %v503_v34  ;;  %506 = vst [vmem:[%s5936_s30 + $0x518] sm:$0xff] %v505_v35  ;;  %v509_v37 = vld [vmem:[%s5931_s29 + $0xa48] sm:$0xff] }
  0x67   : > { %508 = vst [vmem:[%s5936_s30 + $0x520] sm:$0xff] %v507_v36  ;;  %v511_v38 = vld [vmem:[%s5931_s29 + $0xa60] sm:$0xff]  ;;  %v513_v39 = vld [vmem:[%s5931_s29 + $0xa68] sm:$0xff]  ;;  %510 = vst [vmem:[%s5936_s30 + $0x528] sm:$0xff] %v509_v37 }
  0x68   : > { %512 = vst [vmem:[%s5936_s30 + $0x530] sm:$0xff] %v511_v38  ;;  %514 = vst [vmem:[%s5936_s30 + $0x538] sm:$0xff] %v513_v39  ;;  %v515_v40 = vld [vmem:[%s5931_s29 + $0xa80] sm:$0xff]  ;;  %v517_v41 = vld [vmem:[%s5931_s29 + $0xa88] sm:$0xff] }
  0x69   : > { %v519_v42 = vld [vmem:[%s5931_s29 + $0xaa0] sm:$0xff]  ;;  %516 = vst [vmem:[%s5936_s30 + $0x540] sm:$0xff] %v515_v40  ;;  %518 = vst [vmem:[%s5936_s30 + $0x548] sm:$0xff] %v517_v41  ;;  %v521_v43 = vld [vmem:[%s5931_s29 + $0xaa8] sm:$0xff] }
  0x6a   : > { %520 = vst [vmem:[%s5936_s30 + $0x550] sm:$0xff] %v519_v42  ;;  %v523_v44 = vld [vmem:[%s5931_s29 + $0xac0] sm:$0xff]  ;;  %v525_v45 = vld [vmem:[%s5931_s29 + $0xac8] sm:$0xff]  ;;  %522 = vst [vmem:[%s5936_s30 + $0x558] sm:$0xff] %v521_v43 }
  0x6b   : > { %524 = vst [vmem:[%s5936_s30 + $0x560] sm:$0xff] %v523_v44  ;;  %526 = vst [vmem:[%s5936_s30 + $0x568] sm:$0xff] %v525_v45  ;;  %v527_v46 = vld [vmem:[%s5931_s29 + $0xae0] sm:$0xff]  ;;  %v529_v47 = vld [vmem:[%s5931_s29 + $0xae8] sm:$0xff] }
  0x6c   : > { %v531_v48 = vld [vmem:[%s5931_s29 + $0xb00] sm:$0xff]  ;;  %528 = vst [vmem:[%s5936_s30 + $0x570] sm:$0xff] %v527_v46  ;;  %530 = vst [vmem:[%s5936_s30 + $0x578] sm:$0xff] %v529_v47  ;;  %v533_v49 = vld [vmem:[%s5931_s29 + $0xb08] sm:$0xff] }
  0x6d   : > { %532 = vst [vmem:[%s5936_s30 + $0x580] sm:$0xff] %v531_v48  ;;  %v535_v50 = vld [vmem:[%s5931_s29 + $0xb20] sm:$0xff]  ;;  %v537_v51 = vld [vmem:[%s5931_s29 + $0xb28] sm:$0xff]  ;;  %534 = vst [vmem:[%s5936_s30 + $0x588] sm:$0xff] %v533_v49 }
  0x6e   : > { %536 = vst [vmem:[%s5936_s30 + $0x590] sm:$0xff] %v535_v50  ;;  %538 = vst [vmem:[%s5936_s30 + $0x598] sm:$0xff] %v537_v51  ;;  %v539_v52 = vld [vmem:[%s5931_s29 + $0xb40] sm:$0xff]  ;;  %v541_v53 = vld [vmem:[%s5931_s29 + $0xb48] sm:$0xff] }
  0x6f   : > { %v543_v54 = vld [vmem:[%s5931_s29 + $0xb60] sm:$0xff]  ;;  %540 = vst [vmem:[%s5936_s30 + $0x5a0] sm:$0xff] %v539_v52  ;;  %542 = vst [vmem:[%s5936_s30 + $0x5a8] sm:$0xff] %v541_v53  ;;  %v545_v55 = vld [vmem:[%s5931_s29 + $0xb68] sm:$0xff] }
  0x70   : > { %544 = vst [vmem:[%s5936_s30 + $0x5b0] sm:$0xff] %v543_v54  ;;  %v547_v56 = vld [vmem:[%s5931_s29 + $0xb80] sm:$0xff]  ;;  %v549_v57 = vld [vmem:[%s5931_s29 + $0xb88] sm:$0xff]  ;;  %546 = vst [vmem:[%s5936_s30 + $0x5b8] sm:$0xff] %v545_v55 }
  0x71   : > { %548 = vst [vmem:[%s5936_s30 + $0x5c0] sm:$0xff] %v547_v56  ;;  %550 = vst [vmem:[%s5936_s30 + $0x5c8] sm:$0xff] %v549_v57  ;;  %v551_v58 = vld [vmem:[%s5931_s29 + $0xba0] sm:$0xff]  ;;  %v553_v59 = vld [vmem:[%s5931_s29 + $0xba8] sm:$0xff] }
  0x72   : > { %v555_v60 = vld [vmem:[%s5931_s29 + $0xbc0] sm:$0xff]  ;;  %552 = vst [vmem:[%s5936_s30 + $0x5d0] sm:$0xff] %v551_v58  ;;  %554 = vst [vmem:[%s5936_s30 + $0x5d8] sm:$0xff] %v553_v59  ;;  %v557_v61 = vld [vmem:[%s5931_s29 + $0xbc8] sm:$0xff] }
  0x73   : > { %556 = vst [vmem:[%s5936_s30 + $0x5e0] sm:$0xff] %v555_v60  ;;  %v559_v62 = vld [vmem:[%s5931_s29 + $0xbe0] sm:$0xff]  ;;  %v561_v63 = vld [vmem:[%s5931_s29 + $0xbe8] sm:$0xff]  ;;  %558 = vst [vmem:[%s5936_s30 + $0x5e8] sm:$0xff] %v557_v61 }
  0x74   : > { %560 = vst [vmem:[%s5936_s30 + $0x5f0] sm:$0xff] %v559_v62  ;;  %562 = vst [vmem:[%s5936_s30 + $0x5f8] sm:$0xff] %v561_v63  ;;  %v563_v0 = vld [vmem:[%s5931_s29 + $0xc00] sm:$0xff]  ;;  %v565_v1 = vld [vmem:[%s5931_s29 + $0xc08] sm:$0xff] }
  0x75   : > { %v567_v2 = vld [vmem:[%s5931_s29 + $0xc20] sm:$0xff]  ;;  %564 = vst [vmem:[%s5936_s30 + $0x600] sm:$0xff] %v563_v0  ;;  %566 = vst [vmem:[%s5936_s30 + $0x608] sm:$0xff] %v565_v1  ;;  %v569_v3 = vld [vmem:[%s5931_s29 + $0xc28] sm:$0xff] }
  0x76   : > { %568 = vst [vmem:[%s5936_s30 + $0x610] sm:$0xff] %v567_v2  ;;  %v571_v4 = vld [vmem:[%s5931_s29 + $0xc40] sm:$0xff]  ;;  %v573_v5 = vld [vmem:[%s5931_s29 + $0xc48] sm:$0xff]  ;;  %570 = vst [vmem:[%s5936_s30 + $0x618] sm:$0xff] %v569_v3 }
  0x77   : > { %572 = vst [vmem:[%s5936_s30 + $0x620] sm:$0xff] %v571_v4  ;;  %574 = vst [vmem:[%s5936_s30 + $0x628] sm:$0xff] %v573_v5  ;;  %v575_v6 = vld [vmem:[%s5931_s29 + $0xc60] sm:$0xff]  ;;  %v577_v7 = vld [vmem:[%s5931_s29 + $0xc68] sm:$0xff] }
  0x78   : > { %v579_v8 = vld [vmem:[%s5931_s29 + $0xc80] sm:$0xff]  ;;  %576 = vst [vmem:[%s5936_s30 + $0x630] sm:$0xff] %v575_v6  ;;  %578 = vst [vmem:[%s5936_s30 + $0x638] sm:$0xff] %v577_v7  ;;  %v581_v9 = vld [vmem:[%s5931_s29 + $0xc88] sm:$0xff] }
  0x79   : > { %580 = vst [vmem:[%s5936_s30 + $0x640] sm:$0xff] %v579_v8  ;;  %v583_v10 = vld [vmem:[%s5931_s29 + $0xca0] sm:$0xff]  ;;  %v585_v11 = vld [vmem:[%s5931_s29 + $0xca8] sm:$0xff]  ;;  %582 = vst [vmem:[%s5936_s30 + $0x648] sm:$0xff] %v581_v9 }
  0x7a   : > { %584 = vst [vmem:[%s5936_s30 + $0x650] sm:$0xff] %v583_v10  ;;  %586 = vst [vmem:[%s5936_s30 + $0x658] sm:$0xff] %v585_v11  ;;  %v587_v12 = vld [vmem:[%s5931_s29 + $0xcc0] sm:$0xff]  ;;  %v589_v13 = vld [vmem:[%s5931_s29 + $0xcc8] sm:$0xff] }
  0x7b   : > { %v591_v14 = vld [vmem:[%s5931_s29 + $0xce0] sm:$0xff]  ;;  %588 = vst [vmem:[%s5936_s30 + $0x660] sm:$0xff] %v587_v12  ;;  %590 = vst [vmem:[%s5936_s30 + $0x668] sm:$0xff] %v589_v13  ;;  %v593_v15 = vld [vmem:[%s5931_s29 + $0xce8] sm:$0xff] }
  0x7c   : > { %592 = vst [vmem:[%s5936_s30 + $0x670] sm:$0xff] %v591_v14  ;;  %v595_v16 = vld [vmem:[%s5931_s29 + $0xd00] sm:$0xff]  ;;  %v597_v17 = vld [vmem:[%s5931_s29 + $0xd08] sm:$0xff]  ;;  %594 = vst [vmem:[%s5936_s30 + $0x678] sm:$0xff] %v593_v15 }
  0x7d   : > { %596 = vst [vmem:[%s5936_s30 + $0x680] sm:$0xff] %v595_v16  ;;  %598 = vst [vmem:[%s5936_s30 + $0x688] sm:$0xff] %v597_v17  ;;  %v599_v18 = vld [vmem:[%s5931_s29 + $0xd20] sm:$0xff]  ;;  %v601_v19 = vld [vmem:[%s5931_s29 + $0xd28] sm:$0xff] }
  0x7e   : > { %v603_v20 = vld [vmem:[%s5931_s29 + $0xd40] sm:$0xff]  ;;  %600 = vst [vmem:[%s5936_s30 + $0x690] sm:$0xff] %v599_v18  ;;  %602 = vst [vmem:[%s5936_s30 + $0x698] sm:$0xff] %v601_v19  ;;  %v605_v21 = vld [vmem:[%s5931_s29 + $0xd48] sm:$0xff] }
  0x7f   : > { %604 = vst [vmem:[%s5936_s30 + $0x6a0] sm:$0xff] %v603_v20  ;;  %v607_v22 = vld [vmem:[%s5931_s29 + $0xd60] sm:$0xff]  ;;  %v609_v23 = vld [vmem:[%s5931_s29 + $0xd68] sm:$0xff]  ;;  %606 = vst [vmem:[%s5936_s30 + $0x6a8] sm:$0xff] %v605_v21 }
  0x80   : > { %608 = vst [vmem:[%s5936_s30 + $0x6b0] sm:$0xff] %v607_v22  ;;  %610 = vst [vmem:[%s5936_s30 + $0x6b8] sm:$0xff] %v609_v23  ;;  %v611_v24 = vld [vmem:[%s5931_s29 + $0xd80] sm:$0xff]  ;;  %v613_v25 = vld [vmem:[%s5931_s29 + $0xd88] sm:$0xff] }
  0x81   : > { %v615_v26 = vld [vmem:[%s5931_s29 + $0xda0] sm:$0xff]  ;;  %612 = vst [vmem:[%s5936_s30 + $0x6c0] sm:$0xff] %v611_v24  ;;  %614 = vst [vmem:[%s5936_s30 + $0x6c8] sm:$0xff] %v613_v25  ;;  %v617_v27 = vld [vmem:[%s5931_s29 + $0xda8] sm:$0xff] }
  0x82   : > { %616 = vst [vmem:[%s5936_s30 + $0x6d0] sm:$0xff] %v615_v26  ;;  %v619_v28 = vld [vmem:[%s5931_s29 + $0xdc0] sm:$0xff]  ;;  %v621_v29 = vld [vmem:[%s5931_s29 + $0xdc8] sm:$0xff]  ;;  %618 = vst [vmem:[%s5936_s30 + $0x6d8] sm:$0xff] %v617_v27 }
  0x83   : > { %620 = vst [vmem:[%s5936_s30 + $0x6e0] sm:$0xff] %v619_v28  ;;  %622 = vst [vmem:[%s5936_s30 + $0x6e8] sm:$0xff] %v621_v29  ;;  %v623_v30 = vld [vmem:[%s5931_s29 + $0xde0] sm:$0xff]  ;;  %v625_v31 = vld [vmem:[%s5931_s29 + $0xde8] sm:$0xff] }
  0x84   : > { %v627_v32 = vld [vmem:[%s5931_s29 + $0xe00] sm:$0xff]  ;;  %624 = vst [vmem:[%s5936_s30 + $0x6f0] sm:$0xff] %v623_v30  ;;  %626 = vst [vmem:[%s5936_s30 + $0x6f8] sm:$0xff] %v625_v31  ;;  %v629_v33 = vld [vmem:[%s5931_s29 + $0xe08] sm:$0xff] }
  0x85   : > { %628 = vst [vmem:[%s5936_s30 + $0x700] sm:$0xff] %v627_v32  ;;  %v631_v34 = vld [vmem:[%s5931_s29 + $0xe20] sm:$0xff]  ;;  %v633_v35 = vld [vmem:[%s5931_s29 + $0xe28] sm:$0xff]  ;;  %630 = vst [vmem:[%s5936_s30 + $0x708] sm:$0xff] %v629_v33 }
  0x86   : > { %632 = vst [vmem:[%s5936_s30 + $0x710] sm:$0xff] %v631_v34  ;;  %634 = vst [vmem:[%s5936_s30 + $0x718] sm:$0xff] %v633_v35  ;;  %v635_v36 = vld [vmem:[%s5931_s29 + $0xe40] sm:$0xff]  ;;  %v637_v37 = vld [vmem:[%s5931_s29 + $0xe48] sm:$0xff] }
  0x87   : > { %v639_v38 = vld [vmem:[%s5931_s29 + $0xe60] sm:$0xff]  ;;  %636 = vst [vmem:[%s5936_s30 + $0x720] sm:$0xff] %v635_v36  ;;  %638 = vst [vmem:[%s5936_s30 + $0x728] sm:$0xff] %v637_v37  ;;  %v641_v39 = vld [vmem:[%s5931_s29 + $0xe68] sm:$0xff] }
  0x88   : > { %640 = vst [vmem:[%s5936_s30 + $0x730] sm:$0xff] %v639_v38  ;;  %v643_v40 = vld [vmem:[%s5931_s29 + $0xe80] sm:$0xff]  ;;  %v645_v41 = vld [vmem:[%s5931_s29 + $0xe88] sm:$0xff]  ;;  %642 = vst [vmem:[%s5936_s30 + $0x738] sm:$0xff] %v641_v39 }
  0x89   : > { %644 = vst [vmem:[%s5936_s30 + $0x740] sm:$0xff] %v643_v40  ;;  %646 = vst [vmem:[%s5936_s30 + $0x748] sm:$0xff] %v645_v41  ;;  %v647_v42 = vld [vmem:[%s5931_s29 + $0xea0] sm:$0xff]  ;;  %v649_v43 = vld [vmem:[%s5931_s29 + $0xea8] sm:$0xff] }
  0x8a   : > { %v651_v44 = vld [vmem:[%s5931_s29 + $0xec0] sm:$0xff]  ;;  %648 = vst [vmem:[%s5936_s30 + $0x750] sm:$0xff] %v647_v42  ;;  %650 = vst [vmem:[%s5936_s30 + $0x758] sm:$0xff] %v649_v43  ;;  %v653_v45 = vld [vmem:[%s5931_s29 + $0xec8] sm:$0xff] }
  0x8b   : > { %652 = vst [vmem:[%s5936_s30 + $0x760] sm:$0xff] %v651_v44  ;;  %v655_v46 = vld [vmem:[%s5931_s29 + $0xee0] sm:$0xff]  ;;  %v657_v47 = vld [vmem:[%s5931_s29 + $0xee8] sm:$0xff]  ;;  %654 = vst [vmem:[%s5936_s30 + $0x768] sm:$0xff] %v653_v45 }
  0x8c   : > { %656 = vst [vmem:[%s5936_s30 + $0x770] sm:$0xff] %v655_v46  ;;  %658 = vst [vmem:[%s5936_s30 + $0x778] sm:$0xff] %v657_v47  ;;  %v659_v48 = vld [vmem:[%s5931_s29 + $0xf00] sm:$0xff]  ;;  %v661_v49 = vld [vmem:[%s5931_s29 + $0xf08] sm:$0xff] }
  0x8d   : > { %v663_v50 = vld [vmem:[%s5931_s29 + $0xf20] sm:$0xff]  ;;  %660 = vst [vmem:[%s5936_s30 + $0x780] sm:$0xff] %v659_v48  ;;  %662 = vst [vmem:[%s5936_s30 + $0x788] sm:$0xff] %v661_v49  ;;  %v665_v51 = vld [vmem:[%s5931_s29 + $0xf28] sm:$0xff] }
  0x8e   : > { %664 = vst [vmem:[%s5936_s30 + $0x790] sm:$0xff] %v663_v50  ;;  %v667_v52 = vld [vmem:[%s5931_s29 + $0xf40] sm:$0xff]  ;;  %v669_v53 = vld [vmem:[%s5931_s29 + $0xf48] sm:$0xff]  ;;  %666 = vst [vmem:[%s5936_s30 + $0x798] sm:$0xff] %v665_v51 }
  0x8f   : > { %668 = vst [vmem:[%s5936_s30 + $0x7a0] sm:$0xff] %v667_v52  ;;  %670 = vst [vmem:[%s5936_s30 + $0x7a8] sm:$0xff] %v669_v53  ;;  %v671_v54 = vld [vmem:[%s5931_s29 + $0xf60] sm:$0xff]  ;;  %v673_v55 = vld [vmem:[%s5931_s29 + $0xf68] sm:$0xff] }
  0x90   : > { %v675_v56 = vld [vmem:[%s5931_s29 + $0xf80] sm:$0xff]  ;;  %672 = vst [vmem:[%s5936_s30 + $0x7b0] sm:$0xff] %v671_v54  ;;  %674 = vst [vmem:[%s5936_s30 + $0x7b8] sm:$0xff] %v673_v55  ;;  %v677_v57 = vld [vmem:[%s5931_s29 + $0xf88] sm:$0xff] }
  0x91   : > { %676 = vst [vmem:[%s5936_s30 + $0x7c0] sm:$0xff] %v675_v56  ;;  %v679_v58 = vld [vmem:[%s5931_s29 + $0xfa0] sm:$0xff]  ;;  %v681_v59 = vld [vmem:[%s5931_s29 + $0xfa8] sm:$0xff]  ;;  %678 = vst [vmem:[%s5936_s30 + $0x7c8] sm:$0xff] %v677_v57 }
  0x92   : > { %680 = vst [vmem:[%s5936_s30 + $0x7d0] sm:$0xff] %v679_v58  ;;  %682 = vst [vmem:[%s5936_s30 + $0x7d8] sm:$0xff] %v681_v59  ;;  %v683_v60 = vld [vmem:[%s5931_s29 + $0xfc0] sm:$0xff]  ;;  %v685_v61 = vld [vmem:[%s5931_s29 + $0xfc8] sm:$0xff] }
  0x93   : > { %v687_v62 = vld [vmem:[%s5931_s29 + $0xfe0] sm:$0xff]  ;;  %684 = vst [vmem:[%s5936_s30 + $0x7e0] sm:$0xff] %v683_v60  ;;  %686 = vst [vmem:[%s5936_s30 + $0x7e8] sm:$0xff] %v685_v61  ;;  %v689_v63 = vld [vmem:[%s5931_s29 + $0xfe8] sm:$0xff] }
  0x94   : > { %688 = vst [vmem:[%s5936_s30 + $0x7f0] sm:$0xff] %v687_v62  ;;  %690 = vst [vmem:[%s5936_s30 + $0x7f8] sm:$0xff] %v689_v63 }
  0x95 PF: > { %p4722_p7 = scmp.ge.s32.totalorder %s5863_s17, 1  ;;  %p711_p8 = scmp.lt.s32.totalorder %s5863_s17, 3 }
  0x97   : > { %p712_p9 = pnand %p4722_p7, %p711_p8 }
  0x98   : > { %s718_s5 = sand.u32 (!%p712_p9), 1, %s5855_s15   ;;  %v762_v0 = vld [vmem:[%s7305_s0] sm:$0xff] (!%p712_p9) }
  0x99   : > { %715 = sbr.rel (%p712_p9) target bundleno = 797 (0x31d), region = 55  ;;  %v766_v1 = vld [vmem:[%s7305_s0 + $0x20] sm:$0xff] (!%p712_p9)  ;;  %s4723_s10 = sshll.u32 (!%p712_p9), %s718_s5, 11 }
  0x9a   : > { %v6458_v2 = vcombine.low (!%p712_p9), %v762_v0, %v766_v1  ;;  %v4727_v3 = vcombine.high (!%p712_p9), %v762_v0, %v766_v1  ;;  %s6460_s11 = scalar_lea.vmem (!%p712_p9), [#allocation2], %s4723_s10  ;;  %s4724_s10 = sshll.u32 (!%p712_p9), %s5906_s18, 2 }
  0x9b   : > { %v5449_v4 = vld [vmem:[%s6460_s11 + $0x4] ss:$16 sps:$4 sm:$0xff] (!%p712_p9)   ;;  %v5451_v5 = vld [vmem:[%s6460_s11 + $0xc] ss:$16 sps:$4 sm:$0xff] (!%p712_p9)   ;;  %v5453_v6 = vld [vmem:[%s6460_s11] ss:$16 sps:$4 sm:$0xff] (!%p712_p9)  }
  0x9c   : > { %2842 = vmatprep.mubr.bf16.mxu0 (!%p712_p9), %v4727_v3  ;;  %3406 = vmatprep.mubr.bf16.mxu1 (!%p712_p9), %v4727_v3  ;;  %v5454_v7 = vld [vmem:[%s6460_s11 + $0x8] ss:$16 sps:$4 sm:$0xff] (!%p712_p9)   ;;  %v5455_v8 = vld [vmem:[%s6460_s11 + $0x24] ss:$16 sps:$4 sm:$0xff] (!%p712_p9)   ;;  %v5457_v9 = vld [vmem:[%s6460_s11 + $0x2c] ss:$16 sps:$4 sm:$0xff] (!%p712_p9)  }
  0x9d   : > { %2810 = vmatprep.subr.bf16.mxu0 (!%p712_p9), %v5449_v4  ;;  %3374 = vmatprep.subr.bf16.mxu1 (!%p712_p9), %v5451_v5  ;;  %v5459_v10 = vld [vmem:[%s6460_s11 + $0x20] ss:$16 sps:$4 sm:$0xff] (!%p712_p9)   ;;  %v5460_v11 = vld [vmem:[%s6460_s11 + $0x28] ss:$16 sps:$4 sm:$0xff] (!%p712_p9)   ;;  %v5461_v12 = vld [vmem:[%s6460_s11 + $0x44] ss:$16 sps:$4 sm:$0xff] (!%p712_p9)  }
  0x9e   : > { %2811 = vmatpush1.bf16.msra.mxu0 (!%p712_p9), %v5453_v6  ;;  %3375 = vmatpush1.bf16.msra.mxu1 (!%p712_p9), %v5454_v7  ;;  %v5463_v13 = vld [vmem:[%s6460_s11 + $0x4c] ss:$16 sps:$4 sm:$0xff] (!%p712_p9)   ;;  %v5465_v14 = vld [vmem:[%s6460_s11 + $0x40] ss:$16 sps:$4 sm:$0xff] (!%p712_p9)   ;;  %v5466_v15 = vld [vmem:[%s6460_s11 + $0x48] ss:$16 sps:$4 sm:$0xff] (!%p712_p9)  }
  0x9f   : > { %2812 = vmatprep.subr.bf16.mxu0 (!%p712_p9), %v5455_v8  ;;  %3376 = vmatprep.subr.bf16.mxu1 (!%p712_p9), %v5457_v9  ;;  %v5467_v16 = vld [vmem:[%s6460_s11 + $0x64] ss:$16 sps:$4 sm:$0xff] (!%p712_p9)   ;;  %v5469_v17 = vld [vmem:[%s6460_s11 + $0x6c] ss:$16 sps:$4 sm:$0xff] (!%p712_p9)   ;;  %v5471_v18 = vld [vmem:[%s6460_s11 + $0x60] ss:$16 sps:$4 sm:$0xff] (!%p712_p9)  }
  0xa0   : > { %v5472_v19 = vld [vmem:[%s6460_s11 + $0x68] ss:$16 sps:$4 sm:$0xff]   ;;  %v5473_v20 = vld [vmem:[%s6460_s11 + $0x84] ss:$16 sps:$4 sm:$0xff]   ;;  %v5475_v21 = vld [vmem:[%s6460_s11 + $0x8c] ss:$16 sps:$4 sm:$0xff]  }
  0xa1   : > { %v5477_v22 = vld [vmem:[%s6460_s11 + $0x80] ss:$16 sps:$4 sm:$0xff]   ;;  %v5478_v23 = vld [vmem:[%s6460_s11 + $0x88] ss:$16 sps:$4 sm:$0xff]   ;;  %v5479_v24 = vld [vmem:[%s6460_s11 + $0xa4] ss:$16 sps:$4 sm:$0xff]  }
  0xa2   : > { %2813 = vmatpush1.bf16.msra.mxu0 %v5459_v10  ;;  %3377 = vmatpush1.bf16.msra.mxu1 %v5460_v11  ;;  %v5481_v25 = vld [vmem:[%s6460_s11 + $0xac] ss:$16 sps:$4 sm:$0xff]   ;;  %v5483_v26 = vld [vmem:[%s6460_s11 + $0xa0] ss:$16 sps:$4 sm:$0xff]   ;;  %v5484_v27 = vld [vmem:[%s6460_s11 + $0xa8] ss:$16 sps:$4 sm:$0xff]  }
  0xa3   : > { %2814 = vmatprep.subr.bf16.mxu0 %v5461_v12  ;;  %3378 = vmatprep.subr.bf16.mxu1 %v5463_v13  ;;  %v5485_v28 = vld [vmem:[%s6460_s11 + $0xc4] ss:$16 sps:$4 sm:$0xff]   ;;  %v5487_v29 = vld [vmem:[%s6460_s11 + $0xcc] ss:$16 sps:$4 sm:$0xff]   ;;  %v5489_v30 = vld [vmem:[%s6460_s11 + $0xc0] ss:$16 sps:$4 sm:$0xff]  }
  0xa4   : > { %v5490_v31 = vld [vmem:[%s6460_s11 + $0xc8] ss:$16 sps:$4 sm:$0xff]   ;;  %v5491_v32 = vld [vmem:[%s6460_s11 + $0xe4] ss:$16 sps:$4 sm:$0xff]   ;;  %v5493_v33 = vld [vmem:[%s6460_s11 + $0xec] ss:$16 sps:$4 sm:$0xff]  }
  0xa5   : > { %v5495_v34 = vld [vmem:[%s6460_s11 + $0xe0] ss:$16 sps:$4 sm:$0xff]   ;;  %v5496_v35 = vld [vmem:[%s6460_s11 + $0xe8] ss:$16 sps:$4 sm:$0xff]   ;;  %v5497_v36 = vld [vmem:[%s6460_s11 + $0x104] ss:$16 sps:$4 sm:$0xff]  }
  0xa6   : > { %2815 = vmatpush1.bf16.msra.mxu0 %v5465_v14  ;;  %3379 = vmatpush1.bf16.msra.mxu1 %v5466_v15  ;;  %v5499_v37 = vld [vmem:[%s6460_s11 + $0x10c] ss:$16 sps:$4 sm:$0xff]   ;;  %v5501_v38 = vld [vmem:[%s6460_s11 + $0x100] ss:$16 sps:$4 sm:$0xff]   ;;  %v5502_v39 = vld [vmem:[%s6460_s11 + $0x108] ss:$16 sps:$4 sm:$0xff]  }
  0xa7   : > { %2816 = vmatprep.subr.bf16.mxu0 %v5467_v16  ;;  %3380 = vmatprep.subr.bf16.mxu1 %v5469_v17  ;;  %v5503_v40 = vld [vmem:[%s6460_s11 + $0x124] ss:$16 sps:$4 sm:$0xff]   ;;  %v5505_v41 = vld [vmem:[%s6460_s11 + $0x12c] ss:$16 sps:$4 sm:$0xff]   ;;  %v5507_v42 = vld [vmem:[%s6460_s11 + $0x120] ss:$16 sps:$4 sm:$0xff]  }
  0xa8   : > { %v5508_v43 = vld [vmem:[%s6460_s11 + $0x128] ss:$16 sps:$4 sm:$0xff]   ;;  %v5509_v44 = vld [vmem:[%s6460_s11 + $0x144] ss:$16 sps:$4 sm:$0xff]   ;;  %v5511_v45 = vld [vmem:[%s6460_s11 + $0x14c] ss:$16 sps:$4 sm:$0xff]  }
  0xa9   : > { %v5513_v46 = vld [vmem:[%s6460_s11 + $0x140] ss:$16 sps:$4 sm:$0xff]   ;;  %v5514_v47 = vld [vmem:[%s6460_s11 + $0x148] ss:$16 sps:$4 sm:$0xff]   ;;  %v5515_v48 = vld [vmem:[%s6460_s11 + $0x164] ss:$16 sps:$4 sm:$0xff]  }
  0xaa   : > { %2817 = vmatpush1.bf16.msra.mxu0 %v5471_v18  ;;  %3381 = vmatpush1.bf16.msra.mxu1 %v5472_v19  ;;  %v5517_v49 = vld [vmem:[%s6460_s11 + $0x16c] ss:$16 sps:$4 sm:$0xff]   ;;  %v5519_v50 = vld [vmem:[%s6460_s11 + $0x160] ss:$16 sps:$4 sm:$0xff]   ;;  %v5520_v51 = vld [vmem:[%s6460_s11 + $0x168] ss:$16 sps:$4 sm:$0xff]  }
  0xab   : > { %2818 = vmatprep.subr.bf16.mxu0 %v5473_v20  ;;  %3382 = vmatprep.subr.bf16.mxu1 %v5475_v21  ;;  %v5521_v52 = vld [vmem:[%s6460_s11 + $0x184] ss:$16 sps:$4 sm:$0xff]   ;;  %v5523_v53 = vld [vmem:[%s6460_s11 + $0x18c] ss:$16 sps:$4 sm:$0xff]   ;;  %v5525_v54 = vld [vmem:[%s6460_s11 + $0x180] ss:$16 sps:$4 sm:$0xff]  }
  0xac   : > { %v5526_v55 = vld [vmem:[%s6460_s11 + $0x188] ss:$16 sps:$4 sm:$0xff]   ;;  %v5527_v56 = vld [vmem:[%s6460_s11 + $0x1a4] ss:$16 sps:$4 sm:$0xff]   ;;  %v5529_v57 = vld [vmem:[%s6460_s11 + $0x1ac] ss:$16 sps:$4 sm:$0xff]  }
  0xad   : > { %v5531_v58 = vld [vmem:[%s6460_s11 + $0x1a0] ss:$16 sps:$4 sm:$0xff]   ;;  %v5532_v59 = vld [vmem:[%s6460_s11 + $0x1a8] ss:$16 sps:$4 sm:$0xff]   ;;  %v5533_v60 = vld [vmem:[%s6460_s11 + $0x1c4] ss:$16 sps:$4 sm:$0xff]  }
  0xae   : > { %2819 = vmatpush1.bf16.msra.mxu0 %v5477_v22  ;;  %3383 = vmatpush1.bf16.msra.mxu1 %v5478_v23  ;;  %v5535_v61 = vld [vmem:[%s6460_s11 + $0x1cc] ss:$16 sps:$4 sm:$0xff]   ;;  %v5537_v62 = vld [vmem:[%s6460_s11 + $0x1c0] ss:$16 sps:$4 sm:$0xff]   ;;  %v5538_v63 = vld [vmem:[%s6460_s11 + $0x1c8] ss:$16 sps:$4 sm:$0xff]  }
  0xaf   : > { %2820 = vmatprep.subr.bf16.mxu0 %v5479_v24  ;;  %3384 = vmatprep.subr.bf16.mxu1 %v5481_v25  ;;  %v5539_v0 = vld [vmem:[%s6460_s11 + $0x1e4] ss:$16 sps:$4 sm:$0xff]   ;;  %v5541_v1 = vld [vmem:[%s6460_s11 + $0x1ec] ss:$16 sps:$4 sm:$0xff]   ;;  %v5543_v3 = vld [vmem:[%s6460_s11 + $0x1e0] ss:$16 sps:$4 sm:$0xff]  }
  0xb0   : > { %v5544_v4 = vld [vmem:[%s6460_s11 + $0x1e8] ss:$16 sps:$4 sm:$0xff]   ;;  %v5547_v5 = vld [vmem:[%s6460_s11 + $0x204] ss:$16 sps:$4 sm:$0xff]   ;;  %v5550_v6 = vld [vmem:[%s6460_s11 + $0x20c] ss:$16 sps:$4 sm:$0xff]  }
  0xb1   : > { %v770_v7 = vld [vmem:[%s7305_s0 + $0x40] sm:$0xff]  ;;  %v5548_v10 = vld [vmem:[%s6460_s11 + $0x208] ss:$16 sps:$4 sm:$0xff]   ;;  %v5556_v12 = vld [vmem:[%s6460_s11 + $0x22c] ss:$16 sps:$4 sm:$0xff]   ;;  %p752_p10 = scmp.lt.s32.totalorder %s4724_s10, 7 }
  0xb2   : > { %2821 = vmatpush1.bf16.msra.mxu0 %v5483_v26  ;;  %3385 = vmatpush1.bf16.msra.mxu1 %v5484_v27  ;;  %v5545_v8 = vld [vmem:[%s6460_s11 + $0x200] ss:$16 sps:$4 sm:$0xff]   ;;  %v5553_v11 = vld [vmem:[%s6460_s11 + $0x224] ss:$16 sps:$4 sm:$0xff]   ;;  %v5554_v15 = vld [vmem:[%s6460_s11 + $0x228] ss:$16 sps:$4 sm:$0xff]  }
  0xb3   : > { %2822 = vmatprep.subr.bf16.mxu0 %v5485_v28  ;;  %3386 = vmatprep.subr.bf16.mxu1 %v5487_v29  ;;  %v774_v9 = vld [vmem:[%s7305_s0 + $0x60] sm:$0xff]  ;;  %v5562_v17 = vld [vmem:[%s6460_s11 + $0x24c] ss:$16 sps:$4 sm:$0xff]   ;;  %v5560_v21 = vld [vmem:[%s6460_s11 + $0x248] ss:$16 sps:$4 sm:$0xff]   ;;  %s7315_s10 = smov (!%p752_p10, %s4724_s10), 7 }
  0xb4   : > { %v4735_v13 = vcombine.high %v770_v7, %v774_v9  ;;  %v5551_v14 = vld [vmem:[%s6460_s11 + $0x220] ss:$16 sps:$4 sm:$0xff]   ;;  %v5559_v16 = vld [vmem:[%s6460_s11 + $0x244] ss:$16 sps:$4 sm:$0xff]   ;;  %v4734_v19 = vcombine.low %v770_v7, %v774_v9  ;;  %v5568_v24 = vld [vmem:[%s6460_s11 + $0x26c] ss:$16 sps:$4 sm:$0xff]   ;;  %s754_s14 = scalar_lea.vmem %s7307_s2, %s7315_s10  ;;  %s759_s21 = scalar_lea.vmem %s7308_s3, %s7315_s10 }
  0xb5   : > { %v778_v18 = vld [vmem:[%s7305_s0 + $0x80] sm:$0xff]  ;;  %v5566_v28 = vld [vmem:[%s6460_s11 + $0x268] ss:$16 sps:$4 sm:$0xff]   ;;  %v5616_v9 = vld [vmem:[%s6460_s11 + $0x36c] ss:$16 sps:$4 sm:$0xff]   ;;  %s5424_s24 = smul.u32 336, %s718_s5 }
  0xb6   : > { %2823 = vmatpush1.bf16.msra.mxu0 %v5489_v30  ;;  %3387 = vmatpush1.bf16.msra.mxu1 %v5490_v31  ;;  %v5557_v20 = vld [vmem:[%s6460_s11 + $0x240] ss:$16 sps:$4 sm:$0xff]   ;;  %v5565_v23 = vld [vmem:[%s6460_s11 + $0x264] ss:$16 sps:$4 sm:$0xff]   ;;  %v5574_v30 = vld [vmem:[%s6460_s11 + $0x28c] ss:$16 sps:$4 sm:$0xff]  }
  0xb7   : > { %2824 = vmatprep.subr.bf16.mxu0 %v5491_v32  ;;  %3388 = vmatprep.subr.bf16.mxu1 %v5493_v33  ;;  %v786_v25 = vld [vmem:[%s7305_s0 + $0xc0] sm:$0xff]  ;;  %v5572_v33 = vld [vmem:[%s6460_s11 + $0x288] ss:$16 sps:$4 sm:$0xff]   ;;  %s7009_s15 = scalar_lea.vmem [#allocation3], %s5424_s24  ;;  %s5159_s5 = sshll.u32 (%p5921_p5), %s5906_s18, 4 }
  0xb8   : > { %v790_v26 = vld [vmem:[%s7305_s0 + $0xe0] sm:$0xff]  ;;  %v5608_v7 = vld [vmem:[%s6460_s11 + $0x348] ss:$16 sps:$4 sm:$0xff]   ;;  %s7212_s27 = scalar_lea.vmem (%p5921_p5), %s7309_s4, %s5159_s5 }
  0xb9   : > { %v5563_v27 = vld [vmem:[%s6460_s11 + $0x260] ss:$16 sps:$4 sm:$0xff]   ;;  %v5571_v29 = vld [vmem:[%s6460_s11 + $0x284] ss:$16 sps:$4 sm:$0xff]  }
  0xba   : > { %2825 = vmatpush1.bf16.msra.mxu0 %v5495_v34  ;;  %3389 = vmatpush1.bf16.msra.mxu1 %v5496_v35  ;;  %v5569_v32 = vld [vmem:[%s6460_s11 + $0x280] ss:$16 sps:$4 sm:$0xff]   ;;  %v4751_v34 = vcombine.high %v786_v25, %v790_v26  ;;  %v5577_v35 = vld [vmem:[%s6460_s11 + $0x2a4] ss:$16 sps:$4 sm:$0xff]  }
  0xbb   : > { %2826 = vmatprep.subr.bf16.mxu0 %v5497_v36  ;;  %3390 = vmatprep.subr.bf16.mxu1 %v5499_v37  ;;  %v5580_v36 = vld [vmem:[%s6460_s11 + $0x2ac] ss:$16 sps:$4 sm:$0xff]   ;;  %v5575_v37 = vld [vmem:[%s6460_s11 + $0x2a0] ss:$16 sps:$4 sm:$0xff]  }
  0xbe   : > { %2827 = vmatpush1.bf16.msra.mxu0 %v5501_v38  ;;  %3391 = vmatpush1.bf16.msra.mxu1 %v5502_v39  ;;  %v794_v38 = vld [vmem:[%s7305_s0 + $0x100] sm:$0xff]  ;;  %v5578_v39 = vld [vmem:[%s6460_s11 + $0x2a8] ss:$16 sps:$4 sm:$0xff]  }
  0xbf   : > { %2828 = vmatprep.subr.bf16.mxu0 %v5503_v40  ;;  %3392 = vmatprep.subr.bf16.mxu1 %v5505_v41  ;;  %v798_v40 = vld [vmem:[%s7305_s0 + $0x120] sm:$0xff] }
  0xc0   : > { %v5583_v41 = vld [vmem:[%s6460_s11 + $0x2c4] ss:$16 sps:$4 sm:$0xff]  }
  0xc2   : > { %2829 = vmatpush1.bf16.msra.mxu0 %v5507_v42  ;;  %3393 = vmatpush1.bf16.msra.mxu1 %v5508_v43  ;;  %v5586_v42 = vld [vmem:[%s6460_s11 + $0x2cc] ss:$16 sps:$4 sm:$0xff]   ;;  %v4750_v43 = vcombine.low %v786_v25, %v790_v26  ;;  %v5631_v25 = vld [vmem:[%s6460_s11 + $0x3c4] ss:$16 sps:$4 sm:$0xff]  }
  0xc3   : > { %2830 = vmatprep.subr.bf16.mxu0 %v5509_v44  ;;  %3394 = vmatprep.subr.bf16.mxu1 %v5511_v45  ;;  %v4759_v44 = vcombine.high %v794_v38, %v798_v40  ;;  %v5581_v45 = vld [vmem:[%s6460_s11 + $0x2c0] ss:$16 sps:$4 sm:$0xff]   ;;  %v5634_v26 = vld [vmem:[%s6460_s11 + $0x3cc] ss:$16 sps:$4 sm:$0xff]  }
  0xc6   : > { %2831 = vmatpush1.bf16.msra.mxu0 %v5513_v46  ;;  %3395 = vmatpush1.bf16.msra.mxu1 %v5514_v47  ;;  %v5584_v46 = vld [vmem:[%s6460_s11 + $0x2c8] ss:$16 sps:$4 sm:$0xff]   ;;  %v5589_v47 = vld [vmem:[%s6460_s11 + $0x2e4] ss:$16 sps:$4 sm:$0xff]  }
  0xc7   : > { %2832 = vmatprep.subr.bf16.mxu0 %v5515_v48  ;;  %3396 = vmatprep.subr.bf16.mxu1 %v5517_v49  ;;  %v5592_v48 = vld [vmem:[%s6460_s11 + $0x2ec] ss:$16 sps:$4 sm:$0xff]   ;;  %v802_v49 = vld [vmem:[%s7305_s0 + $0x140] sm:$0xff] }
  0xca   : > { %2833 = vmatpush1.bf16.msra.mxu0 %v5519_v50  ;;  %3397 = vmatpush1.bf16.msra.mxu1 %v5520_v51  ;;  %v806_v50 = vld [vmem:[%s7305_s0 + $0x160] sm:$0xff] }
  0xcb   : > { %2834 = vmatprep.subr.bf16.mxu0 %v5521_v52  ;;  %3398 = vmatprep.subr.bf16.mxu1 %v5523_v53  ;;  %v5587_v51 = vld [vmem:[%s6460_s11 + $0x2e0] ss:$16 sps:$4 sm:$0xff]   ;;  %v5590_v52 = vld [vmem:[%s6460_s11 + $0x2e8] ss:$16 sps:$4 sm:$0xff]   ;;  %v5595_v53 = vld [vmem:[%s6460_s11 + $0x304] ss:$16 sps:$4 sm:$0xff]  }
  0xce   : > { %2835 = vmatpush1.bf16.msra.mxu0 %v5525_v54  ;;  %3399 = vmatpush1.bf16.msra.mxu1 %v5526_v55  ;;  %v5598_v54 = vld [vmem:[%s6460_s11 + $0x30c] ss:$16 sps:$4 sm:$0xff]   ;;  %v4758_v55 = vcombine.low %v794_v38, %v798_v40 }
  0xcf   : > { %2836 = vmatprep.subr.bf16.mxu0 %v5527_v56  ;;  %3400 = vmatprep.subr.bf16.mxu1 %v5529_v57  ;;  %v4767_v56 = vcombine.high %v802_v49, %v806_v50  ;;  %v5593_v57 = vld [vmem:[%s6460_s11 + $0x300] ss:$16 sps:$4 sm:$0xff]   ;;  %v5648_v38 = vld [vmem:[%s6460_s11 + $0x40c] ss:$16 sps:$4 sm:$0xff]  }
  0xd2   : > { %2837 = vmatpush1.bf16.msra.mxu0 %v5531_v58  ;;  %3401 = vmatpush1.bf16.msra.mxu1 %v5532_v59  ;;  %v5596_v58 = vld [vmem:[%s6460_s11 + $0x308] ss:$16 sps:$4 sm:$0xff]   ;;  %v5601_v59 = vld [vmem:[%s6460_s11 + $0x324] ss:$16 sps:$4 sm:$0xff]  }
  0xd3   : > { %2838 = vmatprep.subr.bf16.mxu0 %v5533_v60  ;;  %3402 = vmatprep.subr.bf16.mxu1 %v5535_v61  ;;  %v5604_v60 = vld [vmem:[%s6460_s11 + $0x32c] ss:$16 sps:$4 sm:$0xff]   ;;  %v810_v61 = vld [vmem:[%s7305_s0 + $0x180] sm:$0xff] }
  0xd6   : > { %2839 = vmatpush1.bf16.msra.mxu0 %v5537_v62  ;;  %3403 = vmatpush1.bf16.msra.mxu1 %v5538_v63  ;;  %v814_v62 = vld [vmem:[%s7305_s0 + $0x1a0] sm:$0xff] }
  0xd7   : > { %2840 = vmatprep.subr.bf16.mxu0 %v5539_v0  ;;  %3404 = vmatprep.subr.bf16.mxu1 %v5541_v1  ;;  %v5599_v63 = vld [vmem:[%s6460_s11 + $0x320] ss:$16 sps:$4 sm:$0xff]   ;;  %v5602_v0 = vld [vmem:[%s6460_s11 + $0x328] ss:$16 sps:$4 sm:$0xff]   ;;  %v5607_v1 = vld [vmem:[%s6460_s11 + $0x344] ss:$16 sps:$4 sm:$0xff]  }
  0xda   : > { %2841 = vmatpush1.bf16.msra.mxu0 %v5543_v3  ;;  %3405 = vmatpush1.bf16.msra.mxu1 %v5544_v4  ;;  %v5610_v3 = vld [vmem:[%s6460_s11 + $0x34c] ss:$16 sps:$4 sm:$0xff]   ;;  %v4766_v4 = vcombine.low %v802_v49, %v806_v50 }
  0xdb   : > { %2951 = vmatprep.subr.bf16.mxu0 %v5547_v5  ;;  %3515 = vmatprep.subr.bf16.mxu1 %v5550_v6  ;;  %v4775_v5 = vcombine.high %v810_v61, %v814_v62  ;;  %v5605_v6 = vld [vmem:[%s6460_s11 + $0x340] ss:$16 sps:$4 sm:$0xff]   ;;  %v771_v50 = vld [vmem:[%s7305_s0 + $0x48] sm:$0xff] }
  0xdd   : > { %2843 = vmatmul.mubr.bf16.vlgmr.msra.gmra.mrb[0].mxu0 %v6458_v2  ;;  %3407 = vmatmul.mubr.bf16.vlgmr.msra.gmra.mrb[0].mxu1 %v6458_v2  ;;  %v782_v2 = vld [vmem:[%s7305_s0 + $0xa0] sm:$0xff] }
  0xde   : > { %2952 = vmatpush1.bf16.msra.mxu0 %v5545_v8  ;;  %3516 = vmatpush1.bf16.msra.mxu1 %v5548_v10  ;;  %v4743_v22 = vcombine.high %v778_v18, %v782_v2  ;;  %v4742_v31 = vcombine.low %v778_v18, %v782_v2  ;;  %v5613_v8 = vld [vmem:[%s6460_s11 + $0x364] ss:$16 sps:$4 sm:$0xff]   ;;  %v5617_v18 = vld [vmem:[%s6460_s11 + $0x380] ss:$16 sps:$4 sm:$0xff]   ;;  %v5620_v2 = vld [vmem:[%s6460_s11 + $0x388] ss:$16 sps:$4 sm:$0xff]  }
  0xdf   : > { %2953 = vmatprep.subr.bf16.mxu0 %v5553_v11  ;;  %3517 = vmatprep.subr.bf16.mxu1 %v5556_v12  ;;  %v818_v10 = vld [vmem:[%s7305_s0 + $0x1c0] sm:$0xff] }
  0xe0   : > { %2852 = vmatprep.mubr.bf16.mxu0 %v4735_v13  ;;  %3416 = vmatprep.mubr.bf16.mxu1 %v4735_v13  ;;  %v822_v11 = vld [vmem:[%s7305_s0 + $0x1e0] sm:$0xff]  ;;  %v5614_v13 = vld [vmem:[%s6460_s11 + $0x368] ss:$16 sps:$4 sm:$0xff]  }
  0xe1   : > { %v5611_v12 = vld [vmem:[%s6460_s11 + $0x360] ss:$16 sps:$4 sm:$0xff]  }
  0xe2   : > { %2954 = vmatpush1.bf16.msra.mxu0 %v5551_v14  ;;  %3518 = vmatpush1.bf16.msra.mxu1 %v5554_v15  ;;  %v5619_v14 = vld [vmem:[%s6460_s11 + $0x384] ss:$16 sps:$4 sm:$0xff]   ;;  %v5622_v15 = vld [vmem:[%s6460_s11 + $0x38c] ss:$16 sps:$4 sm:$0xff]  }
  0xe3   : > { %2955 = vmatprep.subr.bf16.mxu0 %v5559_v16  ;;  %3519 = vmatprep.subr.bf16.mxu1 %v5562_v17  ;;  %v4774_v16 = vcombine.low %v810_v61, %v814_v62  ;;  %v4783_v17 = vcombine.high %v818_v10, %v822_v11  ;;  %v783_v61 = vld [vmem:[%s7305_s0 + $0xa8] sm:$0xff] }
  0xe5   : > { %2853 = vmatmul.mubr.bf16.gmra.mrb[4].mxu0 %v4734_v19  ;;  %3417 = vmatmul.mubr.bf16.gmra.mrb[4].mxu1 %v4734_v19  ;;  %v5625_v19 = vld [vmem:[%s6460_s11 + $0x3a4] ss:$16 sps:$4 sm:$0xff]  }
  0xe6   : > { %2956 = vmatpush1.bf16.msra.mxu0 %v5557_v20  ;;  %3520 = vmatpush1.bf16.msra.mxu1 %v5560_v21  ;;  %v5628_v20 = vld [vmem:[%s6460_s11 + $0x3ac] ss:$16 sps:$4 sm:$0xff]   ;;  %v826_v21 = vld [vmem:[%s7305_s0 + $0x200] sm:$0xff] }
  0xe7   : > { %2862 = vmatprep.mubr.bf16.mxu0 %v4743_v22  ;;  %3426 = vmatprep.mubr.bf16.mxu1 %v4743_v22  ;;  %v830_v22 = vld [vmem:[%s7305_s0 + $0x220] sm:$0xff] }
  0xe8   : > { %2957 = vmatprep.subr.bf16.mxu0 %v5565_v23  ;;  %3521 = vmatprep.subr.bf16.mxu1 %v5568_v24  ;;  %v5623_v23 = vld [vmem:[%s6460_s11 + $0x3a0] ss:$16 sps:$4 sm:$0xff]   ;;  %v5626_v24 = vld [vmem:[%s6460_s11 + $0x3a8] ss:$16 sps:$4 sm:$0xff]  }
  0xea   : > { %2958 = vmatpush1.bf16.msra.mxu0 %v5563_v27  ;;  %3522 = vmatpush1.bf16.msra.mxu1 %v5566_v28  ;;  %v4782_v27 = vcombine.low %v818_v10, %v822_v11  ;;  %v4791_v28 = vcombine.high %v826_v21, %v830_v22  ;;  %v791_v10 = vld [vmem:[%s7305_s0 + $0xe8] sm:$0xff] }
  0xeb   : > { %2959 = vmatprep.subr.bf16.mxu0 %v5571_v29  ;;  %3523 = vmatprep.subr.bf16.mxu1 %v5574_v30  ;;  %v5629_v29 = vld [vmem:[%s6460_s11 + $0x3c0] ss:$16 sps:$4 sm:$0xff]   ;;  %v5632_v30 = vld [vmem:[%s6460_s11 + $0x3c8] ss:$16 sps:$4 sm:$0xff]  }
  0xed   : > { %2863 = vmatmul.mubr.bf16.gmra.mrb[8].mxu0 %v4742_v31  ;;  %3427 = vmatmul.mubr.bf16.gmra.mrb[8].mxu1 %v4742_v31  ;;  %v5639_v31 = vld [vmem:[%s6460_s11 + $0x3e4] ss:$16 sps:$4 sm:$0xff]  }
  0xee   : > { %2872 = vmatprep.mubr.bf16.mxu0 %v4751_v34  ;;  %2960 = vmatpush1.bf16.msra.mxu0 %v5569_v32  ;;  %v5642_v32 = vld [vmem:[%s6460_s11 + $0x3ec] ss:$16 sps:$4 sm:$0xff]  }
  0xef   : > { %3436 = vmatprep.mubr.bf16.mxu1 %v4751_v34  ;;  %3524 = vmatpush1.bf16.msra.mxu1 %v5572_v33  ;;  %v834_v33 = vld [vmem:[%s7305_s0 + $0x240] sm:$0xff] }
  0xf0   : > { %2961 = vmatprep.subr.bf16.mxu0 %v5577_v35  ;;  %3525 = vmatprep.subr.bf16.mxu1 %v5580_v36  ;;  %v838_v34 = vld [vmem:[%s7305_s0 + $0x260] sm:$0xff]  ;;  %v5640_v36 = vld [vmem:[%s6460_s11 + $0x3e8] ss:$16 sps:$4 sm:$0xff]  }
  0xf1   : > { %v5637_v35 = vld [vmem:[%s6460_s11 + $0x3e0] ss:$16 sps:$4 sm:$0xff]   ;;  %v4799_v40 = vcombine.high %v834_v33, %v838_v34 }
  0xf2   : > { %2962 = vmatpush1.bf16.msra.mxu0 %v5575_v37  ;;  %v5645_v37 = vld [vmem:[%s6460_s11 + $0x404] ss:$16 sps:$4 sm:$0xff]  }
  0xf3   : > { %3526 = vmatpush1.bf16.msra.mxu1 %v5578_v39  ;;  %2963 = vmatprep.subr.bf16.mxu0 %v5583_v41  ;;  %v4790_v39 = vcombine.low %v826_v21, %v830_v22  ;;  %v842_v41 = vld [vmem:[%s7305_s0 + $0x280] sm:$0x11]  ;;  %v5684_v21 = vld [vmem:[%s6460_s11 + $0x4cc] ss:$16 sps:$4 sm:$0xff]  }
  0xf4   : > { %3527 = vmatprep.subr.bf16.mxu1 %v5586_v42  ;;  %v4798_v42 = vcombine.low %v834_v33, %v838_v34  ;;  %v5696_v33 = vld [vmem:[%s6460_s11 + $0x50c] ss:$16 sps:$4 sm:$0xff]  }
  0xf5   : > { %2873 = vmatmul.mubr.bf16.gmra.mrb[12].mxu0 %v4750_v43  ;;  %3437 = vmatmul.mubr.bf16.gmra.mrb[12].mxu1 %v4750_v43  ;;  %v4807_v43 = vcombine.high %v842_v41, %v842_v41 }
  0xf6   : > { %2882 = vmatprep.mubr.bf16.mxu0 %v4759_v44  ;;  %3446 = vmatprep.mubr.bf16.mxu1 %v4759_v44  ;;  %v763_v44 = vld [vmem:[%s7305_s0 + $0x8] sm:$0xff] }
  0xf7   : > { %2964 = vmatpush1.bf16.msra.mxu0 %v5581_v45  ;;  %3528 = vmatpush1.bf16.msra.mxu1 %v5584_v46  ;;  %v767_v45 = vld [vmem:[%s7305_s0 + $0x28] sm:$0xff]  ;;  %v4806_v46 = vcombine.low %v842_v41, %v842_v41 }
  0xf8   : > { %2965 = vmatprep.subr.bf16.mxu0 %v5589_v47  ;;  %3529 = vmatprep.subr.bf16.mxu1 %v5592_v48  ;;  %v4729_v47 = vcombine.high %v763_v44, %v767_v45  ;;  %v5643_v48 = vld [vmem:[%s6460_s11 + $0x400] ss:$16 sps:$4 sm:$0xff]   ;;  %v4728_v49 = vcombine.low %v763_v44, %v767_v45  ;;  %v815_v41 = vld [vmem:[%s7305_s0 + $0x1a8] sm:$0xff]  ;;  %v5705_v44 = vld [vmem:[%s6460_s11 + $0x544] ss:$16 sps:$4 sm:$0xff]  }
  0xf9   : > { %v5708_v45 = vld [vmem:[%s6460_s11 + $0x54c] ss:$16 sps:$4 sm:$0xff]  }
  0xfb   : > { %2966 = vmatpush1.bf16.msra.mxu0 %v5587_v51  ;;  %3530 = vmatpush1.bf16.msra.mxu1 %v5590_v52  ;;  %v775_v51 = vld [vmem:[%s7305_s0 + $0x68] sm:$0xff] }
  0xfc   : > { %2967 = vmatprep.subr.bf16.mxu0 %v5595_v53  ;;  %3531 = vmatprep.subr.bf16.mxu1 %v5598_v54  ;;  %v5646_v52 = vld [vmem:[%s6460_s11 + $0x408] ss:$16 sps:$4 sm:$0xff]   ;;  %v5651_v53 = vld [vmem:[%s6460_s11 + $0x424] ss:$16 sps:$4 sm:$0xff]   ;;  %v5654_v54 = vld [vmem:[%s6460_s11 + $0x42c] ss:$16 sps:$4 sm:$0xff]   ;;  %v4736_v62 = vcombine.low %v771_v50, %v775_v51 }
  0xfd   : > { %2883 = vmatmul.mubr.bf16.gmra.mrb[16].mxu0 %v4758_v55  ;;  %3447 = vmatmul.mubr.bf16.gmra.mrb[16].mxu1 %v4758_v55  ;;  %v4737_v55 = vcombine.high %v771_v50, %v775_v51  ;;  %v5711_v50 = vld [vmem:[%s6460_s11 + $0x564] ss:$16 sps:$4 sm:$0xff]   ;;  %v5714_v51 = vld [vmem:[%s6460_s11 + $0x56c] ss:$16 sps:$4 sm:$0xff]  }
  0xfe   : > { %2892 = vmatprep.mubr.bf16.mxu0 %v4767_v56  ;;  %3456 = vmatprep.mubr.bf16.mxu1 %v4767_v56  ;;  %v5649_v56 = vld [vmem:[%s6460_s11 + $0x420] ss:$16 sps:$4 sm:$0xff]  }
  0xff   : > { %2968 = vmatpush1.bf16.msra.mxu0 %v5593_v57  ;;  %3532 = vmatpush1.bf16.msra.mxu1 %v5596_v58  ;;  %v5652_v57 = vld [vmem:[%s6460_s11 + $0x428] ss:$16 sps:$4 sm:$0xff]   ;;  %v5657_v58 = vld [vmem:[%s6460_s11 + $0x444] ss:$16 sps:$4 sm:$0xff]  }
 0x100   : > { %2969 = vmatprep.subr.bf16.mxu0 %v5601_v59  ;;  %3533 = vmatprep.subr.bf16.mxu1 %v5604_v60  ;;  %v5660_v59 = vld [vmem:[%s6460_s11 + $0x44c] ss:$16 sps:$4 sm:$0xff]  }
 0x101   : > { %v779_v60 = vld [vmem:[%s7305_s0 + $0x88] sm:$0xff] }
 0x102   : > { %v4744_v11 = vcombine.low %v779_v60, %v783_v61 }
 0x103   : > { %2970 = vmatpush1.bf16.msra.mxu0 %v5599_v63  ;;  %3534 = vmatpush1.bf16.msra.mxu1 %v5602_v0  ;;  %v5655_v63 = vld [vmem:[%s6460_s11 + $0x440] ss:$16 sps:$4 sm:$0xff]   ;;  %v5658_v0 = vld [vmem:[%s6460_s11 + $0x448] ss:$16 sps:$4 sm:$0xff]  }
 0x104   : > { %2971 = vmatprep.subr.bf16.mxu0 %v5607_v1  ;;  %3535 = vmatprep.subr.bf16.mxu1 %v5610_v3  ;;  %v4745_v1 = vcombine.high %v779_v60, %v783_v61  ;;  %v5663_v3 = vld [vmem:[%s6460_s11 + $0x464] ss:$16 sps:$4 sm:$0xff]   ;;  %v5715_v60 = vld [vmem:[%s6460_s11 + $0x580] ss:$16 sps:$4 sm:$0xff]   ;;  %v5718_v61 = vld [vmem:[%s6460_s11 + $0x588] ss:$16 sps:$4 sm:$0xff]  }
 0x105   : > { %2893 = vmatmul.mubr.bf16.gmra.mrb[20].mxu0 %v4766_v4  ;;  %3457 = vmatmul.mubr.bf16.gmra.mrb[20].mxu1 %v4766_v4  ;;  %v5661_v4 = vld [vmem:[%s6460_s11 + $0x460] ss:$16 sps:$4 sm:$0xff]  }
 0x106   : > { %2902 = vmatprep.mubr.bf16.mxu0 %v4775_v5  ;;  %3466 = vmatprep.mubr.bf16.mxu1 %v4775_v5  ;;  %v5664_v5 = vld [vmem:[%s6460_s11 + $0x468] ss:$16 sps:$4 sm:$0xff]  }
 0x107   : > { %2972 = vmatpush1.bf16.msra.mxu0 %v5605_v6  ;;  %3536 = vmatpush1.bf16.msra.mxu1 %v5608_v7  ;;  %v5666_v6 = vld [vmem:[%s6460_s11 + $0x46c] ss:$16 sps:$4 sm:$0xff]   ;;  %v5669_v7 = vld [vmem:[%s6460_s11 + $0x484] ss:$16 sps:$4 sm:$0xff]  }
 0x108   : > { %2973 = vmatprep.subr.bf16.mxu0 %v5613_v8  ;;  %3537 = vmatprep.subr.bf16.mxu1 %v5616_v9  ;;  %v5672_v8 = vld [vmem:[%s6460_s11 + $0x48c] ss:$16 sps:$4 sm:$0xff]  }
 0x109   : > { %v787_v9 = vld [vmem:[%s7305_s0 + $0xc8] sm:$0xff] }
 0x10a   : > { %v4752_v22 = vcombine.low %v787_v9, %v791_v10 }
 0x10b   : > { %2974 = vmatpush1.bf16.msra.mxu0 %v5611_v12  ;;  %3538 = vmatpush1.bf16.msra.mxu1 %v5614_v13  ;;  %v5667_v12 = vld [vmem:[%s6460_s11 + $0x480] ss:$16 sps:$4 sm:$0xff]   ;;  %v4753_v13 = vcombine.high %v787_v9, %v791_v10  ;;  %v5730_v10 = vld [vmem:[%s6460_s11 + $0x5c8] ss:$16 sps:$4 sm:$0xff]  }
 0x10c   : > { %2975 = vmatprep.subr.bf16.mxu0 %v5619_v14  ;;  %3539 = vmatprep.subr.bf16.mxu1 %v5622_v15  ;;  %v5670_v14 = vld [vmem:[%s6460_s11 + $0x488] ss:$16 sps:$4 sm:$0xff]   ;;  %v5673_v15 = vld [vmem:[%s6460_s11 + $0x4a0] ss:$16 sps:$4 sm:$0xff]  }
 0x10d   : > { %2903 = vmatmul.mubr.bf16.gmra.mrb[24].mxu0 %v4774_v16  ;;  %3467 = vmatmul.mubr.bf16.gmra.mrb[24].mxu1 %v4774_v16  ;;  %v5675_v16 = vld [vmem:[%s6460_s11 + $0x4a4] ss:$16 sps:$4 sm:$0xff]   ;;  %v5727_v9 = vld [vmem:[%s6460_s11 + $0x5c0] ss:$16 sps:$4 sm:$0xff]  }
 0x10e   : > { %2912 = vmatprep.mubr.bf16.mxu0 %v4783_v17  ;;  %3476 = vmatprep.mubr.bf16.mxu1 %v4783_v17  ;;  %v5678_v17 = vld [vmem:[%s6460_s11 + $0x4ac] ss:$16 sps:$4 sm:$0xff]  }
 0x10f   : > { %2976 = vmatpush1.bf16.msra.mxu0 %v5617_v18  ;;  %3540 = vmatpush1.bf16.msra.mxu1 %v5620_v2  ;;  %v5676_v18 = vld [vmem:[%s6460_s11 + $0x4a8] ss:$16 sps:$4 sm:$0xff]  }
 0x110   : > { %2977 = vmatprep.subr.bf16.mxu0 %v5625_v19  ;;  %3541 = vmatprep.subr.bf16.mxu1 %v5628_v20  ;;  %v795_v2 = vld [vmem:[%s7305_s0 + $0x108] sm:$0xff]  ;;  %v5681_v20 = vld [vmem:[%s6460_s11 + $0x4c4] ss:$16 sps:$4 sm:$0xff]  }
 0x111   : > { %v799_v19 = vld [vmem:[%s7305_s0 + $0x128] sm:$0xff] }
 0x112   : > { %v4760_v34 = vcombine.low %v795_v2, %v799_v19 }
 0x113   : > { %2978 = vmatpush1.bf16.msra.mxu0 %v5623_v23  ;;  %3542 = vmatpush1.bf16.msra.mxu1 %v5626_v24  ;;  %v5679_v23 = vld [vmem:[%s6460_s11 + $0x4c0] ss:$16 sps:$4 sm:$0xff]   ;;  %v4761_v24 = vcombine.high %v795_v2, %v799_v19 }
 0x114   : > { %2979 = vmatprep.subr.bf16.mxu0 %v5631_v25  ;;  %3543 = vmatprep.subr.bf16.mxu1 %v5634_v26  ;;  %v5682_v25 = vld [vmem:[%s6460_s11 + $0x4c8] ss:$16 sps:$4 sm:$0xff]   ;;  %v5687_v26 = vld [vmem:[%s6460_s11 + $0x4e4] ss:$16 sps:$4 sm:$0xff]  }
 0x115   : > { %2913 = vmatmul.mubr.bf16.gmra.mrb[28].mxu0 %v4782_v27  ;;  %3477 = vmatmul.mubr.bf16.gmra.mrb[28].mxu1 %v4782_v27  ;;  %v5690_v27 = vld [vmem:[%s6460_s11 + $0x4ec] ss:$16 sps:$4 sm:$0xff]  }
 0x116   : > { %2922 = vmatprep.mubr.bf16.mxu0 %v4791_v28  ;;  %3486 = vmatprep.mubr.bf16.mxu1 %v4791_v28  ;;  %v803_v28 = vld [vmem:[%s7305_s0 + $0x148] sm:$0xff] }
 0x117   : > { %2980 = vmatpush1.bf16.msra.mxu0 %v5629_v29  ;;  %3544 = vmatpush1.bf16.msra.mxu1 %v5632_v30  ;;  %v807_v29 = vld [vmem:[%s7305_s0 + $0x168] sm:$0xff]  ;;  %v5685_v30 = vld [vmem:[%s6460_s11 + $0x4e0] ss:$16 sps:$4 sm:$0xff]  }
 0x118   : > { %2981 = vmatprep.subr.bf16.mxu0 %v5639_v31  ;;  %3545 = vmatprep.subr.bf16.mxu1 %v5642_v32  ;;  %v5688_v31 = vld [vmem:[%s6460_s11 + $0x4e8] ss:$16 sps:$4 sm:$0xff]   ;;  %v5693_v32 = vld [vmem:[%s6460_s11 + $0x504] ss:$16 sps:$4 sm:$0xff]  }
 0x11b   : > { %2982 = vmatpush1.bf16.msra.mxu0 %v5637_v35  ;;  %3546 = vmatpush1.bf16.msra.mxu1 %v5640_v36  ;;  %v4769_v35 = vcombine.high %v803_v28, %v807_v29  ;;  %v5691_v36 = vld [vmem:[%s6460_s11 + $0x500] ss:$16 sps:$4 sm:$0xff]  }
 0x11c   : > { %3092 = vmatprep.subr.bf16.mxu0 %v5645_v37  ;;  %3656 = vmatprep.subr.bf16.mxu1 %v5648_v38  ;;  %v5694_v37 = vld [vmem:[%s6460_s11 + $0x508] ss:$16 sps:$4 sm:$0xff]   ;;  %v5699_v38 = vld [vmem:[%s6460_s11 + $0x524] ss:$16 sps:$4 sm:$0xff]  }
 0x11d   : > { %2923 = vmatmul.mubr.bf16.gmra.mrb[32].mxu0 %v4790_v39  ;;  %3487 = vmatmul.mubr.bf16.gmra.mrb[32].mxu1 %v4790_v39  ;;  %v5702_v39 = vld [vmem:[%s6460_s11 + $0x52c] ss:$16 sps:$4 sm:$0xff]  }
 0x11e   : > { %2932 = vmatprep.mubr.bf16.mxu0 %v4799_v40  ;;  %3496 = vmatprep.mubr.bf16.mxu1 %v4799_v40  ;;  %v811_v40 = vld [vmem:[%s7305_s0 + $0x188] sm:$0xff] }
 0x125   : > { %2933 = vmatmul.mubr.bf16.gmra.mrb[36].mxu0 %v4798_v42  ;;  %3497 = vmatmul.mubr.bf16.gmra.mrb[36].mxu1 %v4798_v42  ;;  %v5697_v42 = vld [vmem:[%s6460_s11 + $0x520] ss:$16 sps:$4 sm:$0xff]  }
 0x126   : > { %2942 = vmatprep.mubr.bf16.mxu0 %v4807_v43  ;;  %3506 = vmatprep.mubr.bf16.mxu1 %v4807_v43  ;;  %v5700_v43 = vld [vmem:[%s6460_s11 + $0x528] ss:$16 sps:$4 sm:$0xff]  }
 0x12d   : > { %2943 = vmatmul.mubr.bf16.gmra.mrb[40].mxu0 %v4806_v46  ;;  %3507 = vmatmul.mubr.bf16.gmra.mrb[40].mxu1 %v4806_v46  ;;  %v4768_v46 = vcombine.low %v803_v28, %v807_v29  ;;  %v772_v28 = vld [vmem:[%s7305_s0 + $0x50] sm:$0xff] }
 0x12e   : > { %2983 = vmatprep.mubr.bf16.mxu0 %v4729_v47  ;;  %3547 = vmatprep.mubr.bf16.mxu1 %v4729_v47  ;;  %v4777_v47 = vcombine.high %v811_v40, %v815_v41  ;;  %v776_v29 = vld [vmem:[%s7305_s0 + $0x70] sm:$0xff] }
 0x135   : > { %2984 = vmatmul.mubr.bf16.vlgmr.msra.gmra.mrb[0].mxu0 %v4728_v49  ;;  %3548 = vmatmul.mubr.bf16.vlgmr.msra.gmra.mrb[0].mxu1 %v4728_v49  ;;  %v5706_v49 = vld [vmem:[%s6460_s11 + $0x548] ss:$16 sps:$4 sm:$0xff]  }
 0x136   : > { %3093 = vmatpush1.bf16.msra.mxu0 %v5643_v48  ;;  %3657 = vmatpush1.bf16.msra.mxu1 %v5646_v52  ;;  %v5703_v48 = vld [vmem:[%s6460_s11 + $0x540] ss:$16 sps:$4 sm:$0xff]   ;;  %v819_v52 = vld [vmem:[%s7305_s0 + $0x1c8] sm:$0xff] }
 0x137   : > { %3094 = vmatprep.subr.bf16.mxu0 %v5651_v53  ;;  %3658 = vmatprep.subr.bf16.mxu1 %v5654_v54  ;;  %v823_v53 = vld [vmem:[%s7305_s0 + $0x1e8] sm:$0xff]  ;;  %v5709_v54 = vld [vmem:[%s6460_s11 + $0x560] ss:$16 sps:$4 sm:$0xff]  }
 0x138   : > { %2993 = vmatprep.mubr.bf16.mxu0 %v4737_v55  ;;  %3557 = vmatprep.mubr.bf16.mxu1 %v4737_v55  ;;  %v5712_v55 = vld [vmem:[%s6460_s11 + $0x568] ss:$16 sps:$4 sm:$0xff]  }
 0x13a   : > { %3095 = vmatpush1.bf16.msra.mxu0 %v5649_v56  ;;  %3659 = vmatpush1.bf16.msra.mxu1 %v5652_v57  ;;  %v5717_v56 = vld [vmem:[%s6460_s11 + $0x584] ss:$16 sps:$4 sm:$0xff]   ;;  %v5720_v57 = vld [vmem:[%s6460_s11 + $0x58c] ss:$16 sps:$4 sm:$0xff]  }
 0x13b   : > { %3096 = vmatprep.subr.bf16.mxu0 %v5657_v58  ;;  %3660 = vmatprep.subr.bf16.mxu1 %v5660_v59  ;;  %v4776_v58 = vcombine.low %v811_v40, %v815_v41  ;;  %v4785_v59 = vcombine.high %v819_v52, %v823_v53  ;;  %v784_v40 = vld [vmem:[%s7305_s0 + $0xb0] sm:$0xff]  ;;  %v4738_v41 = vcombine.low %v772_v28, %v776_v29 }
 0x13d   : > { %2994 = vmatmul.mubr.bf16.gmra.mrb[4].mxu0 %v4736_v62  ;;  %3558 = vmatmul.mubr.bf16.gmra.mrb[4].mxu1 %v4736_v62  ;;  %v5723_v62 = vld [vmem:[%s6460_s11 + $0x5a4] ss:$16 sps:$4 sm:$0xff]  }
 0x13e   : > { %3097 = vmatpush1.bf16.msra.mxu0 %v5655_v63  ;;  %3661 = vmatpush1.bf16.msra.mxu1 %v5658_v0  ;;  %v5726_v63 = vld [vmem:[%s6460_s11 + $0x5ac] ss:$16 sps:$4 sm:$0xff]  }
 0x13f   : > { %3003 = vmatprep.mubr.bf16.mxu0 %v4745_v1  ;;  %3567 = vmatprep.mubr.bf16.mxu1 %v4745_v1  ;;  %v827_v0 = vld [vmem:[%s7305_s0 + $0x208] sm:$0xff] }
 0x140   : > { %3098 = vmatprep.subr.bf16.mxu0 %v5663_v3  ;;  %3662 = vmatprep.subr.bf16.mxu1 %v5666_v6  ;;  %v831_v1 = vld [vmem:[%s7305_s0 + $0x228] sm:$0xff]  ;;  %v5721_v3 = vld [vmem:[%s6460_s11 + $0x5a0] ss:$16 sps:$4 sm:$0xff]  }
 0x141   : > { %v5732_v6 = vld [vmem:[%s6460_s11 + $0x5cc] ss:$16 sps:$4 sm:$0xff]   ;;  %v4792_v2 = vcombine.low %v827_v0, %v831_v1 }
 0x142   : > { %3099 = vmatpush1.bf16.msra.mxu0 %v5661_v4  ;;  %3663 = vmatpush1.bf16.msra.mxu1 %v5664_v5  ;;  %v5724_v4 = vld [vmem:[%s6460_s11 + $0x5a8] ss:$16 sps:$4 sm:$0xff]   ;;  %v5729_v5 = vld [vmem:[%s6460_s11 + $0x5c4] ss:$16 sps:$4 sm:$0xff]  }
 0x143   : > { %3100 = vmatprep.subr.bf16.mxu0 %v5669_v7  ;;  %3664 = vmatprep.subr.bf16.mxu1 %v5672_v8  ;;  %v4784_v7 = vcombine.low %v819_v52, %v823_v53  ;;  %v4793_v8 = vcombine.high %v827_v0, %v831_v1  ;;  %v792_v52 = vld [vmem:[%s7305_s0 + $0xf0] sm:$0xff]  ;;  %v5782_v0 = vld [vmem:[%s6460_s11 + $0x6cc] ss:$16 sps:$4 sm:$0xff]  }
 0x145   : > { %3004 = vmatmul.mubr.bf16.gmra.mrb[8].mxu0 %v4744_v11  ;;  %3568 = vmatmul.mubr.bf16.gmra.mrb[8].mxu1 %v4744_v11  ;;  %v5737_v11 = vld [vmem:[%s6460_s11 + $0x5e4] ss:$16 sps:$4 sm:$0xff]  }
 0x146   : > { %3013 = vmatprep.mubr.bf16.mxu0 %v4753_v13  ;;  %3101 = vmatpush1.bf16.msra.mxu0 %v5667_v12  ;;  %v5740_v12 = vld [vmem:[%s6460_s11 + $0x5ec] ss:$16 sps:$4 sm:$0xff]  }
 0x147   : > { %3577 = vmatprep.mubr.bf16.mxu1 %v4753_v13  ;;  %3665 = vmatpush1.bf16.msra.mxu1 %v5670_v14  ;;  %v835_v13 = vld [vmem:[%s7305_s0 + $0x248] sm:$0xff] }
 0x148   : > { %3102 = vmatprep.subr.bf16.mxu0 %v5675_v16  ;;  %3666 = vmatprep.subr.bf16.mxu1 %v5678_v17  ;;  %v839_v14 = vld [vmem:[%s7305_s0 + $0x268] sm:$0xff]  ;;  %v5743_v17 = vld [vmem:[%s6460_s11 + $0x604] ss:$16 sps:$4 sm:$0xff]  }
 0x149   : > { %v5738_v16 = vld [vmem:[%s6460_s11 + $0x5e8] ss:$16 sps:$4 sm:$0xff]   ;;  %v4801_v19 = vcombine.high %v835_v13, %v839_v14 }
 0x14a   : > { %3103 = vmatpush1.bf16.msra.mxu0 %v5673_v15  ;;  %v5735_v15 = vld [vmem:[%s6460_s11 + $0x5e0] ss:$16 sps:$4 sm:$0xff]  }
 0x14b   : > { %3667 = vmatpush1.bf16.msra.mxu1 %v5676_v18  ;;  %3104 = vmatprep.subr.bf16.mxu0 %v5681_v20  ;;  %v5746_v18 = vld [vmem:[%s6460_s11 + $0x60c] ss:$16 sps:$4 sm:$0xff]  }
 0x14c   : > { %3668 = vmatprep.subr.bf16.mxu1 %v5684_v21  ;;  %v843_v20 = vld [vmem:[%s7305_s0 + $0x288] sm:$0x11]  ;;  %v4800_v21 = vcombine.low %v835_v13, %v839_v14 }
 0x14d   : > { %3014 = vmatmul.mubr.bf16.gmra.mrb[12].mxu0 %v4752_v22  ;;  %3578 = vmatmul.mubr.bf16.gmra.mrb[12].mxu1 %v4752_v22  ;;  %v4809_v22 = vcombine.high %v843_v20, %v843_v20  ;;  %v5794_v13 = vld [vmem:[%s6460_s11 + $0x70c] ss:$16 sps:$4 sm:$0xff]  }
 0x14e   : > { %3023 = vmatprep.mubr.bf16.mxu0 %v4761_v24  ;;  %3587 = vmatprep.mubr.bf16.mxu1 %v4761_v24  ;;  %v768_v24 = vld [vmem:[%s7305_s0 + $0x30] sm:$0xff] }
 0x14f   : > { %3105 = vmatpush1.bf16.msra.mxu0 %v5679_v23  ;;  %3669 = vmatpush1.bf16.msra.mxu1 %v5682_v25  ;;  %v764_v23 = vld [vmem:[%s7305_s0 + $0x10] sm:$0xff]  ;;  %v4808_v25 = vcombine.low %v843_v20, %v843_v20 }
 0x150   : > { %3106 = vmatprep.subr.bf16.mxu0 %v5687_v26  ;;  %3670 = vmatprep.subr.bf16.mxu1 %v5690_v27  ;;  %v4731_v26 = vcombine.high %v764_v23, %v768_v24  ;;  %v4730_v27 = vcombine.low %v764_v23, %v768_v24  ;;  %v816_v20 = vld [vmem:[%s7305_s0 + $0x1b0] sm:$0xff]  ;;  %v5806_v24 = vld [vmem:[%s6460_s11 + $0x74c] ss:$16 sps:$4 sm:$0xff]  }
 0x151   : > { %v5803_v23 = vld [vmem:[%s6460_s11 + $0x744] ss:$16 sps:$4 sm:$0xff]  }
 0x153   : > { %3107 = vmatpush1.bf16.msra.mxu0 %v5685_v30  ;;  %3671 = vmatpush1.bf16.msra.mxu1 %v5688_v31  ;;  %v5741_v30 = vld [vmem:[%s6460_s11 + $0x600] ss:$16 sps:$4 sm:$0xff]   ;;  %v5744_v31 = vld [vmem:[%s6460_s11 + $0x608] ss:$16 sps:$4 sm:$0xff]  }
 0x154   : > { %3108 = vmatprep.subr.bf16.mxu0 %v5693_v32  ;;  %3672 = vmatprep.subr.bf16.mxu1 %v5696_v33  ;;  %v5749_v32 = vld [vmem:[%s6460_s11 + $0x624] ss:$16 sps:$4 sm:$0xff]   ;;  %v5752_v33 = vld [vmem:[%s6460_s11 + $0x62c] ss:$16 sps:$4 sm:$0xff]  }
 0x155   : > { %3024 = vmatmul.mubr.bf16.gmra.mrb[16].mxu0 %v4760_v34  ;;  %3588 = vmatmul.mubr.bf16.gmra.mrb[16].mxu1 %v4760_v34  ;;  %v4739_v34 = vcombine.high %v772_v28, %v776_v29  ;;  %v5804_v28 = vld [vmem:[%s6460_s11 + $0x748] ss:$16 sps:$4 sm:$0xff]   ;;  %v5809_v29 = vld [vmem:[%s6460_s11 + $0x764] ss:$16 sps:$4 sm:$0xff]  }
 0x156   : > { %3033 = vmatprep.mubr.bf16.mxu0 %v4769_v35  ;;  %3597 = vmatprep.mubr.bf16.mxu1 %v4769_v35  ;;  %v5747_v35 = vld [vmem:[%s6460_s11 + $0x620] ss:$16 sps:$4 sm:$0xff]  }
 0x157   : > { %3109 = vmatpush1.bf16.msra.mxu0 %v5691_v36  ;;  %3673 = vmatpush1.bf16.msra.mxu1 %v5694_v37  ;;  %v5750_v36 = vld [vmem:[%s6460_s11 + $0x628] ss:$16 sps:$4 sm:$0xff]   ;;  %v5755_v37 = vld [vmem:[%s6460_s11 + $0x644] ss:$16 sps:$4 sm:$0xff]  }
 0x158   : > { %3110 = vmatprep.subr.bf16.mxu0 %v5699_v38  ;;  %3674 = vmatprep.subr.bf16.mxu1 %v5702_v39  ;;  %v5758_v38 = vld [vmem:[%s6460_s11 + $0x64c] ss:$16 sps:$4 sm:$0xff]   ;;  %v780_v39 = vld [vmem:[%s7305_s0 + $0x90] sm:$0xff] }
 0x159   : > { %v4746_v53 = vcombine.low %v780_v39, %v784_v40 }
 0x15b   : > { %3111 = vmatpush1.bf16.msra.mxu0 %v5697_v42  ;;  %3675 = vmatpush1.bf16.msra.mxu1 %v5700_v43  ;;  %v5753_v42 = vld [vmem:[%s6460_s11 + $0x640] ss:$16 sps:$4 sm:$0xff]   ;;  %v5756_v43 = vld [vmem:[%s6460_s11 + $0x648] ss:$16 sps:$4 sm:$0xff]  }
 0x15c   : > { %3112 = vmatprep.subr.bf16.mxu0 %v5705_v44  ;;  %3676 = vmatprep.subr.bf16.mxu1 %v5708_v45  ;;  %v4747_v44 = vcombine.high %v780_v39, %v784_v40  ;;  %v5761_v45 = vld [vmem:[%s6460_s11 + $0x664] ss:$16 sps:$4 sm:$0xff]   ;;  %v5813_v39 = vld [vmem:[%s6460_s11 + $0x780] ss:$16 sps:$4 sm:$0xff]   ;;  %v5816_v40 = vld [vmem:[%s6460_s11 + $0x788] ss:$16 sps:$4 sm:$0xff]  }
 0x15d   : > { %3034 = vmatmul.mubr.bf16.gmra.mrb[20].mxu0 %v4768_v46  ;;  %3598 = vmatmul.mubr.bf16.gmra.mrb[20].mxu1 %v4768_v46  ;;  %v5764_v46 = vld [vmem:[%s6460_s11 + $0x66c] ss:$16 sps:$4 sm:$0xff]  }
 0x15e   : > { %3043 = vmatprep.mubr.bf16.mxu0 %v4777_v47  ;;  %3607 = vmatprep.mubr.bf16.mxu1 %v4777_v47  ;;  %v5759_v47 = vld [vmem:[%s6460_s11 + $0x660] ss:$16 sps:$4 sm:$0xff]  }
 0x15f   : > { %3113 = vmatpush1.bf16.msra.mxu0 %v5703_v48  ;;  %3677 = vmatpush1.bf16.msra.mxu1 %v5706_v49  ;;  %v5762_v48 = vld [vmem:[%s6460_s11 + $0x668] ss:$16 sps:$4 sm:$0xff]   ;;  %v5767_v49 = vld [vmem:[%s6460_s11 + $0x684] ss:$16 sps:$4 sm:$0xff]  }
 0x160   : > { %3114 = vmatprep.subr.bf16.mxu0 %v5711_v50  ;;  %3678 = vmatprep.subr.bf16.mxu1 %v5714_v51  ;;  %v5770_v50 = vld [vmem:[%s6460_s11 + $0x68c] ss:$16 sps:$4 sm:$0xff]   ;;  %v788_v51 = vld [vmem:[%s7305_s0 + $0xd0] sm:$0xff] }
 0x161   : > { %v4754_v1 = vcombine.low %v788_v51, %v792_v52 }
 0x163   : > { %3115 = vmatpush1.bf16.msra.mxu0 %v5709_v54  ;;  %3679 = vmatpush1.bf16.msra.mxu1 %v5712_v55  ;;  %v5765_v54 = vld [vmem:[%s6460_s11 + $0x680] ss:$16 sps:$4 sm:$0xff]   ;;  %v4755_v55 = vcombine.high %v788_v51, %v792_v52  ;;  %v5828_v52 = vld [vmem:[%s6460_s11 + $0x7c8] ss:$16 sps:$4 sm:$0xff]  }
 0x164   : > { %3116 = vmatprep.subr.bf16.mxu0 %v5717_v56  ;;  %3680 = vmatprep.subr.bf16.mxu1 %v5720_v57  ;;  %v5768_v56 = vld [vmem:[%s6460_s11 + $0x688] ss:$16 sps:$4 sm:$0xff]   ;;  %v5773_v57 = vld [vmem:[%s6460_s11 + $0x6a4] ss:$16 sps:$4 sm:$0xff]   ;;  %v5825_v51 = vld [vmem:[%s6460_s11 + $0x7c0] ss:$16 sps:$4 sm:$0xff]  }
 0x165   : > { %3044 = vmatmul.mubr.bf16.gmra.mrb[24].mxu0 %v4776_v58  ;;  %3608 = vmatmul.mubr.bf16.gmra.mrb[24].mxu1 %v4776_v58  ;;  %v5776_v58 = vld [vmem:[%s6460_s11 + $0x6ac] ss:$16 sps:$4 sm:$0xff]  }
 0x166   : > { %3053 = vmatprep.mubr.bf16.mxu0 %v4785_v59  ;;  %3617 = vmatprep.mubr.bf16.mxu1 %v4785_v59  ;;  %v5771_v59 = vld [vmem:[%s6460_s11 + $0x6a0] ss:$16 sps:$4 sm:$0xff]  }
 0x167   : > { %3117 = vmatpush1.bf16.msra.mxu0 %v5715_v60  ;;  %3681 = vmatpush1.bf16.msra.mxu1 %v5718_v61  ;;  %v5774_v60 = vld [vmem:[%s6460_s11 + $0x6a8] ss:$16 sps:$4 sm:$0xff]   ;;  %v796_v61 = vld [vmem:[%s7305_s0 + $0x110] sm:$0xff] }
 0x168   : > { %3118 = vmatprep.subr.bf16.mxu0 %v5723_v62  ;;  %3682 = vmatprep.subr.bf16.mxu1 %v5726_v63  ;;  %v800_v62 = vld [vmem:[%s7305_s0 + $0x130] sm:$0xff] }
 0x169   : > { %v5779_v63 = vld [vmem:[%s6460_s11 + $0x6c4] ss:$16 sps:$4 sm:$0xff]   ;;  %v4762_v14 = vcombine.low %v796_v61, %v800_v62 }
 0x16b   : > { %3119 = vmatpush1.bf16.msra.mxu0 %v5721_v3  ;;  %3683 = vmatpush1.bf16.msra.mxu1 %v5724_v4  ;;  %v4763_v3 = vcombine.high %v796_v61, %v800_v62  ;;  %v5777_v4 = vld [vmem:[%s6460_s11 + $0x6c0] ss:$16 sps:$4 sm:$0xff]  }
 0x16c   : > { %3120 = vmatprep.subr.bf16.mxu0 %v5729_v5  ;;  %3684 = vmatprep.subr.bf16.mxu1 %v5732_v6  ;;  %v5780_v5 = vld [vmem:[%s6460_s11 + $0x6c8] ss:$16 sps:$4 sm:$0xff]   ;;  %v5785_v6 = vld [vmem:[%s6460_s11 + $0x6e4] ss:$16 sps:$4 sm:$0xff]  }
 0x16d   : > { %3054 = vmatmul.mubr.bf16.gmra.mrb[28].mxu0 %v4784_v7  ;;  %3618 = vmatmul.mubr.bf16.gmra.mrb[28].mxu1 %v4784_v7  ;;  %v5788_v7 = vld [vmem:[%s6460_s11 + $0x6ec] ss:$16 sps:$4 sm:$0xff]   ;;  %v844_v61 = vld [vmem:[%s7305_s0 + $0x290] sm:$0x11] }
 0x16e   : > { %3063 = vmatprep.mubr.bf16.mxu0 %v4793_v8  ;;  %3627 = vmatprep.mubr.bf16.mxu1 %v4793_v8  ;;  %v804_v8 = vld [vmem:[%s7305_s0 + $0x150] sm:$0xff] }
 0x16f   : > { %3121 = vmatpush1.bf16.msra.mxu0 %v5727_v9  ;;  %3685 = vmatpush1.bf16.msra.mxu1 %v5730_v10  ;;  %v808_v9 = vld [vmem:[%s7305_s0 + $0x170] sm:$0xff] }
 0x170   : > { %3122 = vmatprep.subr.bf16.mxu0 %v5737_v11  ;;  %3686 = vmatprep.subr.bf16.mxu1 %v5740_v12  ;;  %v5783_v10 = vld [vmem:[%s6460_s11 + $0x6e0] ss:$16 sps:$4 sm:$0xff]   ;;  %v5786_v11 = vld [vmem:[%s6460_s11 + $0x6e8] ss:$16 sps:$4 sm:$0xff]   ;;  %v5791_v12 = vld [vmem:[%s6460_s11 + $0x704] ss:$16 sps:$4 sm:$0xff]  }
 0x173   : > { %3123 = vmatpush1.bf16.msra.mxu0 %v5735_v15  ;;  %3687 = vmatpush1.bf16.msra.mxu1 %v5738_v16  ;;  %v4771_v15 = vcombine.high %v804_v8, %v808_v9  ;;  %v5789_v16 = vld [vmem:[%s6460_s11 + $0x700] ss:$16 sps:$4 sm:$0xff]  }
 0x174   : > { %3233 = vmatprep.subr.bf16.mxu0 %v5743_v17  ;;  %3797 = vmatprep.subr.bf16.mxu1 %v5746_v18  ;;  %v5792_v17 = vld [vmem:[%s6460_s11 + $0x708] ss:$16 sps:$4 sm:$0xff]   ;;  %v5797_v18 = vld [vmem:[%s6460_s11 + $0x724] ss:$16 sps:$4 sm:$0xff]  }
 0x175   : > { %3064 = vmatmul.mubr.bf16.gmra.mrb[32].mxu0 %v4792_v2  ;;  %3628 = vmatmul.mubr.bf16.gmra.mrb[32].mxu1 %v4792_v2  ;;  %v5800_v2 = vld [vmem:[%s6460_s11 + $0x72c] ss:$16 sps:$4 sm:$0xff]  }
 0x176   : > { %3073 = vmatprep.mubr.bf16.mxu0 %v4801_v19  ;;  %3637 = vmatprep.mubr.bf16.mxu1 %v4801_v19  ;;  %v812_v19 = vld [vmem:[%s7305_s0 + $0x190] sm:$0xff] }
 0x17d   : > { %3074 = vmatmul.mubr.bf16.gmra.mrb[36].mxu0 %v4800_v21  ;;  %3638 = vmatmul.mubr.bf16.gmra.mrb[36].mxu1 %v4800_v21  ;;  %v5795_v21 = vld [vmem:[%s6460_s11 + $0x720] ss:$16 sps:$4 sm:$0xff]  }
 0x17e   : > { %3083 = vmatprep.mubr.bf16.mxu0 %v4809_v22  ;;  %3647 = vmatprep.mubr.bf16.mxu1 %v4809_v22  ;;  %v5798_v22 = vld [vmem:[%s6460_s11 + $0x728] ss:$16 sps:$4 sm:$0xff]  }
 0x185   : > { %3084 = vmatmul.mubr.bf16.gmra.mrb[40].mxu0 %v4808_v25  ;;  %3648 = vmatmul.mubr.bf16.gmra.mrb[40].mxu1 %v4808_v25  ;;  %v4770_v25 = vcombine.low %v804_v8, %v808_v9  ;;  %v781_v9 = vld [vmem:[%s7305_s0 + $0x98] sm:$0xff] }
 0x186   : > { %3124 = vmatprep.mubr.bf16.mxu0 %v4731_v26  ;;  %3688 = vmatprep.mubr.bf16.mxu1 %v4731_v26  ;;  %v4779_v26 = vcombine.high %v812_v19, %v816_v20 }
 0x18d   : > { %3125 = vmatmul.mubr.bf16.vlgmr.msra.gmra.mrb[0].mxu0 %v4730_v27  ;;  %3689 = vmatmul.mubr.bf16.vlgmr.msra.gmra.mrb[0].mxu1 %v4730_v27  ;;  %v5801_v27 = vld [vmem:[%s6460_s11 + $0x740] ss:$16 sps:$4 sm:$0xff]  }
 0x18e   : > { %3234 = vmatpush1.bf16.msra.mxu0 %v5741_v30  ;;  %3798 = vmatpush1.bf16.msra.mxu1 %v5744_v31  ;;  %v5812_v30 = vld [vmem:[%s6460_s11 + $0x76c] ss:$16 sps:$4 sm:$0xff]   ;;  %v820_v31 = vld [vmem:[%s7305_s0 + $0x1d0] sm:$0xff] }
 0x18f   : > { %3235 = vmatprep.subr.bf16.mxu0 %v5749_v32  ;;  %3799 = vmatprep.subr.bf16.mxu1 %v5752_v33  ;;  %v824_v32 = vld [vmem:[%s7305_s0 + $0x1f0] sm:$0xff] }
 0x190   : > { %3134 = vmatprep.mubr.bf16.mxu0 %v4739_v34  ;;  %3698 = vmatprep.mubr.bf16.mxu1 %v4739_v34  ;;  %v5807_v33 = vld [vmem:[%s6460_s11 + $0x760] ss:$16 sps:$4 sm:$0xff]   ;;  %v5810_v34 = vld [vmem:[%s6460_s11 + $0x768] ss:$16 sps:$4 sm:$0xff]  }
 0x192   : > { %3236 = vmatpush1.bf16.msra.mxu0 %v5747_v35  ;;  %3800 = vmatpush1.bf16.msra.mxu1 %v5750_v36  ;;  %v5815_v35 = vld [vmem:[%s6460_s11 + $0x784] ss:$16 sps:$4 sm:$0xff]   ;;  %v5818_v36 = vld [vmem:[%s6460_s11 + $0x78c] ss:$16 sps:$4 sm:$0xff]  }
 0x193   : > { %3237 = vmatprep.subr.bf16.mxu0 %v5755_v37  ;;  %3801 = vmatprep.subr.bf16.mxu1 %v5758_v38  ;;  %v4778_v37 = vcombine.low %v812_v19, %v816_v20  ;;  %v4787_v38 = vcombine.high %v820_v31, %v824_v32  ;;  %v805_v20 = vld [vmem:[%s7305_s0 + $0x158] sm:$0xff] }
 0x195   : > { %3135 = vmatmul.mubr.bf16.gmra.mrb[4].mxu0 %v4738_v41  ;;  %3699 = vmatmul.mubr.bf16.gmra.mrb[4].mxu1 %v4738_v41  ;;  %v5821_v41 = vld [vmem:[%s6460_s11 + $0x7a4] ss:$16 sps:$4 sm:$0xff]  }
 0x196   : > { %3238 = vmatpush1.bf16.msra.mxu0 %v5753_v42  ;;  %3802 = vmatpush1.bf16.msra.mxu1 %v5756_v43  ;;  %v5824_v42 = vld [vmem:[%s6460_s11 + $0x7ac] ss:$16 sps:$4 sm:$0xff]   ;;  %v828_v43 = vld [vmem:[%s7305_s0 + $0x210] sm:$0xff] }
 0x197   : > { %3144 = vmatprep.mubr.bf16.mxu0 %v4747_v44  ;;  %3708 = vmatprep.mubr.bf16.mxu1 %v4747_v44  ;;  %v832_v44 = vld [vmem:[%s7305_s0 + $0x230] sm:$0xff] }
 0x198   : > { %3239 = vmatprep.subr.bf16.mxu0 %v5761_v45  ;;  %3803 = vmatprep.subr.bf16.mxu1 %v5764_v46  ;;  %v5819_v45 = vld [vmem:[%s6460_s11 + $0x7a0] ss:$16 sps:$4 sm:$0xff]   ;;  %v5822_v46 = vld [vmem:[%s6460_s11 + $0x7a8] ss:$16 sps:$4 sm:$0xff]  }
 0x19a   : > { %3240 = vmatpush1.bf16.msra.mxu0 %v5759_v47  ;;  %3804 = vmatpush1.bf16.msra.mxu1 %v5762_v48  ;;  %v5827_v47 = vld [vmem:[%s6460_s11 + $0x7c4] ss:$16 sps:$4 sm:$0xff]   ;;  %v5830_v48 = vld [vmem:[%s6460_s11 + $0x7cc] ss:$16 sps:$4 sm:$0xff]  }
 0x19b   : > { %3241 = vmatprep.subr.bf16.mxu0 %v5767_v49  ;;  %3805 = vmatprep.subr.bf16.mxu1 %v5770_v50  ;;  %v4786_v49 = vcombine.low %v820_v31, %v824_v32  ;;  %v4795_v50 = vcombine.high %v828_v43, %v832_v44  ;;  %v829_v32 = vld [vmem:[%s7305_s0 + $0x218] sm:$0xff] }
 0x19d   : > { %3145 = vmatmul.mubr.bf16.gmra.mrb[8].mxu0 %v4746_v53  ;;  %3709 = vmatmul.mubr.bf16.gmra.mrb[8].mxu1 %v4746_v53  ;;  %v5835_v53 = vld [vmem:[%s6460_s11 + $0x7e4] ss:$16 sps:$4 sm:$0xff]  }
 0x19e   : > { %3154 = vmatprep.mubr.bf16.mxu0 %v4755_v55  ;;  %3242 = vmatpush1.bf16.msra.mxu0 %v5765_v54  ;;  %v5838_v54 = vld [vmem:[%s6460_s11 + $0x7ec] ss:$16 sps:$4 sm:$0xff]  }
 0x19f   : > { %3718 = vmatprep.mubr.bf16.mxu1 %v4755_v55  ;;  %3806 = vmatpush1.bf16.msra.mxu1 %v5768_v56  ;;  %v836_v55 = vld [vmem:[%s7305_s0 + $0x250] sm:$0xff] }
 0x1a0   : > { %3243 = vmatprep.subr.bf16.mxu0 %v5773_v57  ;;  %3807 = vmatprep.subr.bf16.mxu1 %v5776_v58  ;;  %v840_v56 = vld [vmem:[%s7305_s0 + $0x270] sm:$0xff]  ;;  %v5836_v58 = vld [vmem:[%s6460_s11 + $0x7e8] ss:$16 sps:$4 sm:$0xff]  }
 0x1a1   : > { %v5833_v57 = vld [vmem:[%s6460_s11 + $0x7e0] ss:$16 sps:$4 sm:$0xff]   ;;  %v4802_v62 = vcombine.low %v836_v55, %v840_v56 }
 0x1a2   : > { %3244 = vmatpush1.bf16.msra.mxu0 %v5771_v59  ;;  %v4794_v59 = vcombine.low %v828_v43, %v832_v44  ;;  %v3940_v44 = vlaneseq }
 0x1a3   : > { %3808 = vmatpush1.bf16.msra.mxu1 %v5774_v60  ;;  %3245 = vmatprep.subr.bf16.mxu0 %v5779_v63  ;;  %v4803_v60 = vcombine.high %v836_v55, %v840_v56  ;;  %v4811_v63 = vcombine.high %v844_v61, %v844_v61 }
 0x1a4   : > { %3809 = vmatprep.subr.bf16.mxu1 %v5782_v0  ;;  %v765_v0 = vld [vmem:[%s7305_s0 + $0x18] sm:$0xff] }
 0x1a5   : > { %3155 = vmatmul.mubr.bf16.gmra.mrb[12].mxu0 %v4754_v1  ;;  %3719 = vmatmul.mubr.bf16.gmra.mrb[12].mxu1 %v4754_v1  ;;  %v769_v1 = vld [vmem:[%s7305_s0 + $0x38] sm:$0xff] }
 0x1a6   : > { %3164 = vmatprep.mubr.bf16.mxu0 %v4763_v3  ;;  %3728 = vmatprep.mubr.bf16.mxu1 %v4763_v3  ;;  %v4810_v3 = vcombine.low %v844_v61, %v844_v61 }
 0x1a7   : > { %3246 = vmatpush1.bf16.msra.mxu0 %v5777_v4  ;;  %3810 = vmatpush1.bf16.msra.mxu1 %v5780_v5  ;;  %v4733_v4 = vcombine.high %v765_v0, %v769_v1  ;;  %v773_v5 = vld [vmem:[%s7305_s0 + $0x58] sm:$0xff] }
 0x1a8   : > { %3247 = vmatprep.subr.bf16.mxu0 %v5785_v6  ;;  %3811 = vmatprep.subr.bf16.mxu1 %v5788_v7  ;;  %v777_v6 = vld [vmem:[%s7305_s0 + $0x78] sm:$0xff]  ;;  %v4732_v7 = vcombine.low %v765_v0, %v769_v1 }
 0x1a9   : > { %v4741_v8 = vcombine.high %v773_v5, %v777_v6 }
 0x1ab   : > { %3248 = vmatpush1.bf16.msra.mxu0 %v5783_v10  ;;  %3812 = vmatpush1.bf16.msra.mxu1 %v5786_v11  ;;  %v785_v10 = vld [vmem:[%s7305_s0 + $0xb8] sm:$0xff]  ;;  %v4740_v11 = vcombine.low %v773_v5, %v777_v6 }
 0x1ac   : > { %3249 = vmatprep.subr.bf16.mxu0 %v5791_v12  ;;  %3813 = vmatprep.subr.bf16.mxu1 %v5794_v13  ;;  %v4749_v12 = vcombine.high %v781_v9, %v785_v10  ;;  %v789_v13 = vld [vmem:[%s7305_s0 + $0xd8] sm:$0xff] }
 0x1ad   : > { %3165 = vmatmul.mubr.bf16.gmra.mrb[16].mxu0 %v4762_v14  ;;  %3729 = vmatmul.mubr.bf16.gmra.mrb[16].mxu1 %v4762_v14  ;;  %v793_v14 = vld [vmem:[%s7305_s0 + $0xf8] sm:$0xff] }
 0x1ae   : > { %3174 = vmatprep.mubr.bf16.mxu0 %v4771_v15  ;;  %3738 = vmatprep.mubr.bf16.mxu1 %v4771_v15  ;;  %v4748_v15 = vcombine.low %v781_v9, %v785_v10 }
 0x1af   : > { %3250 = vmatpush1.bf16.msra.mxu0 %v5789_v16  ;;  %3814 = vmatpush1.bf16.msra.mxu1 %v5792_v17  ;;  %v4757_v16 = vcombine.high %v789_v13, %v793_v14  ;;  %v797_v17 = vld [vmem:[%s7305_s0 + $0x118] sm:$0xff] }
 0x1b0   : > { %3251 = vmatprep.subr.bf16.mxu0 %v5797_v18  ;;  %3815 = vmatprep.subr.bf16.mxu1 %v5800_v2  ;;  %v801_v18 = vld [vmem:[%s7305_s0 + $0x138] sm:$0xff]  ;;  %v4756_v2 = vcombine.low %v789_v13, %v793_v14 }
 0x1b1   : > { %v4765_v19 = vcombine.high %v797_v17, %v801_v18 }
 0x1b3   : > { %3252 = vmatpush1.bf16.msra.mxu0 %v5795_v21  ;;  %3816 = vmatpush1.bf16.msra.mxu1 %v5798_v22  ;;  %v809_v21 = vld [vmem:[%s7305_s0 + $0x178] sm:$0xff]  ;;  %v4764_v22 = vcombine.low %v797_v17, %v801_v18 }
 0x1b4   : > { %3253 = vmatprep.subr.bf16.mxu0 %v5803_v23  ;;  %3817 = vmatprep.subr.bf16.mxu1 %v5806_v24  ;;  %v4773_v23 = vcombine.high %v805_v20, %v809_v21  ;;  %v813_v24 = vld [vmem:[%s7305_s0 + $0x198] sm:$0xff] }
 0x1b5   : > { %3175 = vmatmul.mubr.bf16.gmra.mrb[20].mxu0 %v4770_v25  ;;  %3739 = vmatmul.mubr.bf16.gmra.mrb[20].mxu1 %v4770_v25  ;;  %v817_v25 = vld [vmem:[%s7305_s0 + $0x1b8] sm:$0xff] }
 0x1b6   : > { %3184 = vmatprep.mubr.bf16.mxu0 %v4779_v26  ;;  %3748 = vmatprep.mubr.bf16.mxu1 %v4779_v26  ;;  %v4772_v26 = vcombine.low %v805_v20, %v809_v21 }
 0x1b7   : > { %3254 = vmatpush1.bf16.msra.mxu0 %v5801_v27  ;;  %3818 = vmatpush1.bf16.msra.mxu1 %v5804_v28  ;;  %v4781_v27 = vcombine.high %v813_v24, %v817_v25  ;;  %v821_v28 = vld [vmem:[%s7305_s0 + $0x1d8] sm:$0xff] }
 0x1b8   : > { %3255 = vmatprep.subr.bf16.mxu0 %v5809_v29  ;;  %3819 = vmatprep.subr.bf16.mxu1 %v5812_v30  ;;  %v825_v29 = vld [vmem:[%s7305_s0 + $0x1f8] sm:$0xff]  ;;  %v4780_v30 = vcombine.low %v813_v24, %v817_v25 }
 0x1b9   : > { %v4789_v31 = vcombine.high %v821_v28, %v825_v29 }
 0x1bb   : > { %3256 = vmatpush1.bf16.msra.mxu0 %v5807_v33  ;;  %3820 = vmatpush1.bf16.msra.mxu1 %v5810_v34  ;;  %v833_v33 = vld [vmem:[%s7305_s0 + $0x238] sm:$0xff]  ;;  %v4788_v34 = vcombine.low %v821_v28, %v825_v29 }
 0x1bc   : > { %3257 = vmatprep.subr.bf16.mxu0 %v5815_v35  ;;  %3821 = vmatprep.subr.bf16.mxu1 %v5818_v36  ;;  %v4797_v35 = vcombine.high %v829_v32, %v833_v33  ;;  %v837_v36 = vld [vmem:[%s7305_s0 + $0x258] sm:$0xff] }
 0x1bd   : > { %3185 = vmatmul.mubr.bf16.gmra.mrb[24].mxu0 %v4778_v37  ;;  %3749 = vmatmul.mubr.bf16.gmra.mrb[24].mxu1 %v4778_v37  ;;  %v841_v37 = vld [vmem:[%s7305_s0 + $0x278] sm:$0xff] }
 0x1be   : > { %3194 = vmatprep.mubr.bf16.mxu0 %v4787_v38  ;;  %3758 = vmatprep.mubr.bf16.mxu1 %v4787_v38  ;;  %v4796_v38 = vcombine.low %v829_v32, %v833_v33 }
 0x1bf   : > { %3258 = vmatpush1.bf16.msra.mxu0 %v5813_v39  ;;  %3822 = vmatpush1.bf16.msra.mxu1 %v5816_v40  ;;  %v4805_v39 = vcombine.high %v837_v36, %v841_v37  ;;  %v845_v40 = vld [vmem:[%s7305_s0 + $0x298] sm:$0x11] }
 0x1c0   : > { %3259 = vmatprep.subr.bf16.mxu0 %v5821_v41  ;;  %3823 = vmatprep.subr.bf16.mxu1 %v5824_v42  ;;  %v4804_v41 = vcombine.low %v837_v36, %v841_v37  ;;  %v4813_v42 = vcombine.high %v845_v40, %v845_v40  ;;  %v4812_v43 = vcombine.low %v845_v40, %v845_v40 }
 0x1c3   : > { %3260 = vmatpush1.bf16.msra.mxu0 %v5819_v45  ;;  %3824 = vmatpush1.bf16.msra.mxu1 %v5822_v46  ;;  %v3941_v45 = vshrl.u32 %v3940_v44, 7 }
 0x1c4   : > { %3261 = vmatprep.subr.bf16.mxu0 %v5827_v47  ;;  %3825 = vmatprep.subr.bf16.mxu1 %v5830_v48  ;;  %v3938_v48 = vld [vmem:[%s754_s14] sm:$0xf] }
 0x1c5   : > { %3195 = vmatmul.mubr.bf16.gmra.mrb[28].mxu0 %v4786_v49  ;;  %3759 = vmatmul.mubr.bf16.gmra.mrb[28].mxu1 %v4786_v49  ;;  %v3942_v46 = vsub.s32 0, %v3941_v45  ;;  %v3950_v47 = vsub.s32 2, %v3941_v45  ;;  %v3946_v49 = vsub.s32 1, %v3941_v45 }
 0x1c6   : > { %3204 = vmatprep.mubr.bf16.mxu0 %v4795_v50  ;;  %3768 = vmatprep.mubr.bf16.mxu1 %v4795_v50  ;;  %v3954_v50 = vsub.s32 3, %v3941_v45 }
 0x1c7   : > { %3262 = vmatpush1.bf16.msra.mxu0 %v5825_v51  ;;  %3826 = vmatpush1.bf16.msra.mxu1 %v5828_v52  ;;  %v4044_v51 = vld [vmem:[%s759_s21] sm:$0xf]  ;;  %v6973_v52 = vrot.slane %v3938_v48, %v3942_v46 }
 0x1c8   : > { %3263 = vmatprep.subr.bf16.mxu0 %v5835_v53  ;;  %3827 = vmatprep.subr.bf16.mxu1 %v5838_v54  ;;  %v6975_v53 = vrot.slane %v3938_v48, %v3950_v47  ;;  %v6977_v54 = vrot.slane %v3938_v48, %v3946_v49  ;;  %v6979_v55 = vrot.slane %v3938_v48, %v3954_v50 }
 0x1c9   : > { %v6981_v56 = vrot.slane %v4044_v51, %v3942_v46  ;;  %v6987_v61 = vrot.slane %v4044_v51, %v3954_v50 }
 0x1cb   : > { %3264 = vmatpush1.bf16.msra.mxu0 %v5833_v57  ;;  %3828 = vmatpush1.bf16.msra.mxu1 %v5836_v58  ;;  %v6983_v57 = vrot.slane %v4044_v51, %v3950_v47 }
 0x1cd   : > { %3205 = vmatmul.mubr.bf16.gmra.mrb[32].mxu0 %v4794_v59  ;;  %3769 = vmatmul.mubr.bf16.gmra.mrb[32].mxu1 %v4794_v59 }
 0x1ce   : > { %3214 = vmatprep.mubr.bf16.mxu0 %v4803_v60  ;;  %3778 = vmatprep.mubr.bf16.mxu1 %v4803_v60  ;;  %v6985_v60 = vrot.slane %v4044_v51, %v3946_v49 }
 0x1d5   : > { %3215 = vmatmul.mubr.bf16.gmra.mrb[36].mxu0 %v4802_v62  ;;  %3779 = vmatmul.mubr.bf16.gmra.mrb[36].mxu1 %v4802_v62 }
 0x1d6   : > { %3224 = vmatprep.mubr.bf16.mxu0 %v4811_v63  ;;  %3788 = vmatprep.mubr.bf16.mxu1 %v4811_v63 }
 0x1dd   : > { %3225 = vmatmul.mubr.bf16.gmra.mrb[40].mxu0 %v4810_v3  ;;  %3789 = vmatmul.mubr.bf16.gmra.mrb[40].mxu1 %v4810_v3 }
 0x1de   : > { %3265 = vmatprep.mubr.bf16.mxu0 %v4733_v4  ;;  %3829 = vmatprep.mubr.bf16.mxu1 %v4733_v4 }
 0x1e5   : > { %3266 = vmatmul.mubr.bf16.vlgmr.msra.gmra.mrb[0].mxu0 %v4732_v7  ;;  %3830 = vmatmul.mubr.bf16.vlgmr.msra.gmra.mrb[0].mxu1 %v4732_v7 }
 0x1e6   : > { %3275 = vmatprep.mubr.bf16.mxu0 %v4741_v8  ;;  %3839 = vmatprep.mubr.bf16.mxu1 %v4741_v8 }
 0x1ed   : > { %3276 = vmatmul.mubr.bf16.gmra.mrb[4].mxu0 %v4740_v11  ;;  %3840 = vmatmul.mubr.bf16.gmra.mrb[4].mxu1 %v4740_v11 }
 0x1ee   : > { %3285 = vmatprep.mubr.bf16.mxu0 %v4749_v12  ;;  %3849 = vmatprep.mubr.bf16.mxu1 %v4749_v12 }
 0x1f5   : > { %3286 = vmatmul.mubr.bf16.gmra.mrb[8].mxu0 %v4748_v15  ;;  %3850 = vmatmul.mubr.bf16.gmra.mrb[8].mxu1 %v4748_v15 }
 0x1f6   : > { %3295 = vmatprep.mubr.bf16.mxu0 %v4757_v16  ;;  %3859 = vmatprep.mubr.bf16.mxu1 %v4757_v16 }
 0x1fd   : > { %3296 = vmatmul.mubr.bf16.gmra.mrb[12].mxu0 %v4756_v2  ;;  %3860 = vmatmul.mubr.bf16.gmra.mrb[12].mxu1 %v4756_v2 }
 0x1fe   : > { %3305 = vmatprep.mubr.bf16.mxu0 %v4765_v19  ;;  %3869 = vmatprep.mubr.bf16.mxu1 %v4765_v19 }
 0x205   : > { %3306 = vmatmul.mubr.bf16.gmra.mrb[16].mxu0 %v4764_v22  ;;  %3870 = vmatmul.mubr.bf16.gmra.mrb[16].mxu1 %v4764_v22 }
 0x206   : > { %3315 = vmatprep.mubr.bf16.mxu0 %v4773_v23  ;;  %3879 = vmatprep.mubr.bf16.mxu1 %v4773_v23 }
 0x20d   : > { %3316 = vmatmul.mubr.bf16.gmra.mrb[20].mxu0 %v4772_v26  ;;  %3880 = vmatmul.mubr.bf16.gmra.mrb[20].mxu1 %v4772_v26 }
 0x20e   : > { %3325 = vmatprep.mubr.bf16.mxu0 %v4781_v27  ;;  %3889 = vmatprep.mubr.bf16.mxu1 %v4781_v27 }
 0x215   : > { %3326 = vmatmul.mubr.bf16.gmra.mrb[24].mxu0 %v4780_v30  ;;  %3890 = vmatmul.mubr.bf16.gmra.mrb[24].mxu1 %v4780_v30 }
 0x216   : > { %3335 = vmatprep.mubr.bf16.mxu0 %v4789_v31  ;;  %3899 = vmatprep.mubr.bf16.mxu1 %v4789_v31 }
 0x21d   : > { %3336 = vmatmul.mubr.bf16.gmra.mrb[28].mxu0 %v4788_v34  ;;  %3900 = vmatmul.mubr.bf16.gmra.mrb[28].mxu1 %v4788_v34 }
 0x21e   : > { %3345 = vmatprep.mubr.bf16.mxu0 %v4797_v35  ;;  %3909 = vmatprep.mubr.bf16.mxu1 %v4797_v35 }
 0x225   : > { %3346 = vmatmul.mubr.bf16.gmra.mrb[32].mxu0 %v4796_v38  ;;  %3910 = vmatmul.mubr.bf16.gmra.mrb[32].mxu1 %v4796_v38 }
 0x226   : > { %3355 = vmatprep.mubr.bf16.mxu0 %v4805_v39  ;;  %3919 = vmatprep.mubr.bf16.mxu1 %v4805_v39 }
 0x22d   : > { %3356 = vmatmul.mubr.bf16.gmra.mrb[36].mxu0 %v4804_v41  ;;  %3920 = vmatmul.mubr.bf16.gmra.mrb[36].mxu1 %v4804_v41 }
 0x22e   : > { %3365 = vmatprep.mubr.bf16.mxu0 %v4813_v42  ;;  %3929 = vmatprep.mubr.bf16.mxu1 %v4813_v42 }
 0x235   : > { %3366 = vmatmul.mubr.bf16.gmra.mrb[40].mxu0 %v4812_v43  ;;  %3930 = vmatmul.mubr.bf16.gmra.mrb[40].mxu1 %v4812_v43 }
 0x2b8   : > { %v3267_v58 = vpop.f32.mrb[0].mxu0  ;;  %v3831_v59 = vpop.f32.mrb[0].mxu1 }
 0x2b9   : > { %v3960_v62 = vmul.f32 %v6973_v52, %v3267_v58  ;;  %v3962_v63 = vmul.f32 %v6975_v53, %v3831_v59  ;;  %v3269_v0 = vpop.f32.mrb[1].mxu0  ;;  %v3833_v1 = vpop.f32.mrb[1].mxu1 }
 0x2ba   : > { %v3961_v3 = vmul.f32 %v6977_v54, %v3269_v0  ;;  %v3963_v4 = vmul.f32 %v6979_v55, %v3833_v1  ;;  %v3271_v5 = vpop.f32.mrb[2].mxu0  ;;  %v3835_v6 = vpop.f32.mrb[2].mxu1 }
 0x2bb   : > { %v4066_v7 = vadd.f32 %v6981_v56, %v3960_v62  ;;  %v4068_v8 = vadd.f32 %v6983_v57, %v3962_v63  ;;  %v3964_v9 = vmul.f32 %v6973_v52, %v3271_v5  ;;  %v3966_v10 = vmul.f32 %v6975_v53, %v3835_v6  ;;  %v3273_v11 = vpop.f32.mrb[3].mxu0  ;;  %v3837_v12 = vpop.f32.mrb[3].mxu1 }
 0x2bc   : > { %v4067_v13 = vadd.f32 %v6985_v60, %v3961_v3  ;;  %v4069_v14 = vadd.f32 %v6987_v61, %v3963_v4  ;;  %v3965_v15 = vmul.f32 %v6977_v54, %v3273_v11  ;;  %v3967_v16 = vmul.f32 %v6979_v55, %v3837_v12 }
 0x2bd   : > { %v4150_v17 = vmax.f32 %v4066_v7, 0.0  ;;  %v4152_v18 = vmax.f32 %v4068_v8, 0.0  ;;  %v4070_v2 = vadd.f32 %v6981_v56, %v3964_v9  ;;  %v4072_v19 = vadd.f32 %v6983_v57, %v3966_v10 }
 0x2be   : > { %v4151_v20 = vmax.f32 %v4067_v13, 0.0  ;;  %v4153_v21 = vmax.f32 %v4069_v14, 0.0  ;;  %v4071_v22 = vadd.f32 %v6985_v60, %v3965_v15  ;;  %v4073_v23 = vadd.f32 %v6987_v61, %v3967_v16 }
 0x2bf   : > { %v4154_v24 = vmax.f32 %v4070_v2, 0.0  ;;  %v4156_v25 = vmax.f32 %v4072_v19, 0.0 }
 0x2c0   : > { %v5117_v26 = vpack.c.bf16 %v4151_v20, %v4150_v17  ;;  %v5118_v27 = vpack.c.bf16 %v4153_v21, %v4152_v18  ;;  %v4155_v28 = vmax.f32 %v4071_v22, 0.0  ;;  %v4157_v29 = vmax.f32 %v4073_v23, 0.0  ;;  %v3277_v30 = vpop.f32.mrb[4].mxu0  ;;  %v3841_v31 = vpop.f32.mrb[4].mxu1 }
 0x2c1   : > { %v3968_v32 = vmul.f32 %v6973_v52, %v3277_v30  ;;  %v3970_v33 = vmul.f32 %v6975_v53, %v3841_v31  ;;  %v3279_v34 = vpop.f32.mrb[5].mxu0  ;;  %v3843_v35 = vpop.f32.mrb[5].mxu1 }
 0x2c2   : > { %4490 = vst [vmem:[%s7009_s15] sm:$0xff] %v5117_v26  ;;  %4491 = vst [vmem:[%s7009_s15 + $0x8] sm:$0xff] %v5118_v27  ;;  %v5119_v36 = vpack.c.bf16 %v4155_v28, %v4154_v24  ;;  %v5120_v37 = vpack.c.bf16 %v4157_v29, %v4156_v25  ;;  %v3969_v38 = vmul.f32 %v6977_v54, %v3279_v34  ;;  %v3281_v40 = vpop.f32.mrb[6].mxu0  ;;  %v3845_v41 = vpop.f32.mrb[6].mxu1 }
 0x2c3   : > { %v3971_v39 = vmul.f32 %v6979_v55, %v3843_v35  ;;  %v4074_v42 = vadd.f32 %v6981_v56, %v3968_v32  ;;  %v4076_v43 = vadd.f32 %v6983_v57, %v3970_v33  ;;  %v3972_v44 = vmul.f32 %v6973_v52, %v3281_v40  ;;  %v3283_v46 = vpop.f32.mrb[7].mxu0  ;;  %v3847_v47 = vpop.f32.mrb[7].mxu1 }
 0x2c4   : > { %v3974_v45 = vmul.f32 %v6975_v53, %v3845_v41  ;;  %4492 = vst [vmem:[%s7009_s15 + $0x10] sm:$0xff] %v5119_v36  ;;  %4493 = vst [vmem:[%s7009_s15 + $0x18] sm:$0xff] %v5120_v37  ;;  %v4075_v48 = vadd.f32 %v6985_v60, %v3969_v38  ;;  %v3973_v50 = vmul.f32 %v6977_v54, %v3283_v46 }
 0x2c5   : > { %v4077_v49 = vadd.f32 %v6987_v61, %v3971_v39  ;;  %v3975_v51 = vmul.f32 %v6979_v55, %v3847_v47  ;;  %v4158_v58 = vmax.f32 %v4074_v42, 0.0  ;;  %v4160_v59 = vmax.f32 %v4076_v43, 0.0 }
 0x2c6   : > { %v4078_v62 = vadd.f32 %v6981_v56, %v3972_v44  ;;  %v4080_v63 = vadd.f32 %v6983_v57, %v3974_v45  ;;  %v4159_v0 = vmax.f32 %v4075_v48, 0.0  ;;  %v4079_v3 = vadd.f32 %v6985_v60, %v3973_v50 }
 0x2c7   : > { %v4161_v1 = vmax.f32 %v4077_v49, 0.0  ;;  %v4081_v4 = vadd.f32 %v6987_v61, %v3975_v51 }
 0x2c8   : > { %v4162_v5 = vmax.f32 %v4078_v62, 0.0  ;;  %v4164_v6 = vmax.f32 %v4080_v63, 0.0  ;;  %v5121_v7 = vpack.c.bf16 %v4159_v0, %v4158_v58  ;;  %v4163_v9 = vmax.f32 %v4079_v3, 0.0  ;;  %v3287_v11 = vpop.f32.mrb[8].mxu0  ;;  %v3851_v12 = vpop.f32.mrb[8].mxu1 }
 0x2c9   : > { %v5122_v8 = vpack.c.bf16 %v4161_v1, %v4160_v59  ;;  %v4165_v10 = vmax.f32 %v4081_v4, 0.0  ;;  %v3976_v13 = vmul.f32 %v6973_v52, %v3287_v11  ;;  %v3978_v14 = vmul.f32 %v6975_v53, %v3851_v12  ;;  %v3289_v15 = vpop.f32.mrb[9].mxu0  ;;  %v3853_v16 = vpop.f32.mrb[9].mxu1 }
 0x2ca   : > { %4494 = vst [vmem:[%s7009_s15 + $0x20] sm:$0xff] %v5121_v7  ;;  %v5123_v17 = vpack.c.bf16 %v4163_v9, %v4162_v5  ;;  %v3977_v2 = vmul.f32 %v6977_v54, %v3289_v15  ;;  %v3979_v19 = vmul.f32 %v6979_v55, %v3853_v16  ;;  %v3291_v20 = vpop.f32.mrb[10].mxu0  ;;  %v3855_v21 = vpop.f32.mrb[10].mxu1 }
 0x2cb   : > { %4495 = vst [vmem:[%s7009_s15 + $0x28] sm:$0xff] %v5122_v8  ;;  %v5124_v18 = vpack.c.bf16 %v4165_v10, %v4164_v6  ;;  %v4082_v22 = vadd.f32 %v6981_v56, %v3976_v13  ;;  %v4084_v23 = vadd.f32 %v6983_v57, %v3978_v14  ;;  %v3980_v24 = vmul.f32 %v6973_v52, %v3291_v20  ;;  %v3293_v26 = vpop.f32.mrb[11].mxu0  ;;  %v3857_v27 = vpop.f32.mrb[11].mxu1 }
 0x2cc   : > { %v3982_v25 = vmul.f32 %v6975_v53, %v3855_v21  ;;  %4496 = vst [vmem:[%s7009_s15 + $0x30] sm:$0xff] %v5123_v17  ;;  %v4083_v28 = vadd.f32 %v6985_v60, %v3977_v2  ;;  %v4085_v29 = vadd.f32 %v6987_v61, %v3979_v19  ;;  %v3981_v30 = vmul.f32 %v6977_v54, %v3293_v26 }
 0x2cd   : > { %4497 = vst [vmem:[%s7009_s15 + $0x38] sm:$0xff] %v5124_v18  ;;  %v3983_v31 = vmul.f32 %v6979_v55, %v3857_v27  ;;  %v4166_v32 = vmax.f32 %v4082_v22, 0.0  ;;  %v4168_v33 = vmax.f32 %v4084_v23, 0.0  ;;  %v4086_v34 = vadd.f32 %v6981_v56, %v3980_v24 }
 0x2ce   : > { %v4088_v35 = vadd.f32 %v6983_v57, %v3982_v25  ;;  %v4167_v36 = vmax.f32 %v4083_v28, 0.0  ;;  %v4169_v37 = vmax.f32 %v4085_v29, 0.0  ;;  %v4087_v38 = vadd.f32 %v6985_v60, %v3981_v30 }
 0x2cf   : > { %v4089_v39 = vadd.f32 %v6987_v61, %v3983_v31  ;;  %v4170_v40 = vmax.f32 %v4086_v34, 0.0 }
 0x2d0   : > { %v4172_v41 = vmax.f32 %v4088_v35, 0.0  ;;  %v5125_v42 = vpack.c.bf16 %v4167_v36, %v4166_v32  ;;  %v5126_v43 = vpack.c.bf16 %v4169_v37, %v4168_v33  ;;  %v4171_v44 = vmax.f32 %v4087_v38, 0.0  ;;  %v3297_v46 = vpop.f32.mrb[12].mxu0  ;;  %v3861_v47 = vpop.f32.mrb[12].mxu1 }
 0x2d1   : > { %v4173_v45 = vmax.f32 %v4089_v39, 0.0  ;;  %v3984_v48 = vmul.f32 %v6973_v52, %v3297_v46  ;;  %v3986_v49 = vmul.f32 %v6975_v53, %v3861_v47  ;;  %v3299_v50 = vpop.f32.mrb[13].mxu0  ;;  %v3863_v51 = vpop.f32.mrb[13].mxu1 }
 0x2d2   : > { %4498 = vst [vmem:[%s7009_s15 + $0x40] sm:$0xff] %v5125_v42  ;;  %4499 = vst [vmem:[%s7009_s15 + $0x48] sm:$0xff] %v5126_v43  ;;  %v5127_v58 = vpack.c.bf16 %v4171_v44, %v4170_v40  ;;  %v3985_v62 = vmul.f32 %v6977_v54, %v3299_v50  ;;  %v3987_v63 = vmul.f32 %v6979_v55, %v3863_v51  ;;  %v3301_v0 = vpop.f32.mrb[14].mxu0  ;;  %v3865_v1 = vpop.f32.mrb[14].mxu1 }
 0x2d3   : > { %v5128_v59 = vpack.c.bf16 %v4173_v45, %v4172_v41  ;;  %v4090_v3 = vadd.f32 %v6981_v56, %v3984_v48  ;;  %v4092_v4 = vadd.f32 %v6983_v57, %v3986_v49  ;;  %v3988_v5 = vmul.f32 %v6973_v52, %v3301_v0  ;;  %v3303_v7 = vpop.f32.mrb[15].mxu0  ;;  %v3867_v8 = vpop.f32.mrb[15].mxu1 }
 0x2d4   : > { %v3990_v6 = vmul.f32 %v6975_v53, %v3865_v1  ;;  %4500 = vst [vmem:[%s7009_s15 + $0x50] sm:$0xff] %v5127_v58  ;;  %v4091_v9 = vadd.f32 %v6985_v60, %v3985_v62  ;;  %v4093_v10 = vadd.f32 %v6987_v61, %v3987_v63  ;;  %v3989_v11 = vmul.f32 %v6977_v54, %v3303_v7 }
 0x2d5   : > { %4501 = vst [vmem:[%s7009_s15 + $0x58] sm:$0xff] %v5128_v59  ;;  %v3991_v12 = vmul.f32 %v6979_v55, %v3867_v8  ;;  %v4174_v13 = vmax.f32 %v4090_v3, 0.0  ;;  %v4176_v14 = vmax.f32 %v4092_v4, 0.0  ;;  %v4094_v15 = vadd.f32 %v6981_v56, %v3988_v5 }
 0x2d6   : > { %v4096_v16 = vadd.f32 %v6983_v57, %v3990_v6  ;;  %v4175_v17 = vmax.f32 %v4091_v9, 0.0  ;;  %v4177_v18 = vmax.f32 %v4093_v10, 0.0  ;;  %v4095_v2 = vadd.f32 %v6985_v60, %v3989_v11 }
 0x2d7   : > { %v4097_v19 = vadd.f32 %v6987_v61, %v3991_v12  ;;  %v4178_v20 = vmax.f32 %v4094_v15, 0.0 }
 0x2d8   : > { %v4180_v21 = vmax.f32 %v4096_v16, 0.0  ;;  %v5129_v22 = vpack.c.bf16 %v4175_v17, %v4174_v13  ;;  %v5130_v23 = vpack.c.bf16 %v4177_v18, %v4176_v14  ;;  %v4179_v24 = vmax.f32 %v4095_v2, 0.0  ;;  %v3307_v26 = vpop.f32.mrb[16].mxu0  ;;  %v3871_v27 = vpop.f32.mrb[16].mxu1 }
 0x2d9   : > { %v4181_v25 = vmax.f32 %v4097_v19, 0.0  ;;  %v3992_v28 = vmul.f32 %v6973_v52, %v3307_v26  ;;  %v3994_v29 = vmul.f32 %v6975_v53, %v3871_v27  ;;  %v3309_v30 = vpop.f32.mrb[17].mxu0  ;;  %v3873_v31 = vpop.f32.mrb[17].mxu1 }
 0x2da   : > { %4502 = vst [vmem:[%s7009_s15 + $0x60] sm:$0xff] %v5129_v22  ;;  %4503 = vst [vmem:[%s7009_s15 + $0x68] sm:$0xff] %v5130_v23  ;;  %v5131_v32 = vpack.c.bf16 %v4179_v24, %v4178_v20  ;;  %v3993_v34 = vmul.f32 %v6977_v54, %v3309_v30  ;;  %v3995_v35 = vmul.f32 %v6979_v55, %v3873_v31  ;;  %v3311_v36 = vpop.f32.mrb[18].mxu0  ;;  %v3875_v37 = vpop.f32.mrb[18].mxu1 }
 0x2db   : > { %v5132_v33 = vpack.c.bf16 %v4181_v25, %v4180_v21  ;;  %v4098_v38 = vadd.f32 %v6981_v56, %v3992_v28  ;;  %v4100_v39 = vadd.f32 %v6983_v57, %v3994_v29  ;;  %v3996_v40 = vmul.f32 %v6973_v52, %v3311_v36  ;;  %v3313_v42 = vpop.f32.mrb[19].mxu0  ;;  %v3877_v43 = vpop.f32.mrb[19].mxu1 }
 0x2dc   : > { %v3998_v41 = vmul.f32 %v6975_v53, %v3875_v37  ;;  %4504 = vst [vmem:[%s7009_s15 + $0x70] sm:$0xff] %v5131_v32  ;;  %v4099_v44 = vadd.f32 %v6985_v60, %v3993_v34  ;;  %v4101_v45 = vadd.f32 %v6987_v61, %v3995_v35  ;;  %v3997_v46 = vmul.f32 %v6977_v54, %v3313_v42 }
 0x2dd   : > { %4505 = vst [vmem:[%s7009_s15 + $0x78] sm:$0xff] %v5132_v33  ;;  %v3999_v47 = vmul.f32 %v6979_v55, %v3877_v43  ;;  %v4182_v48 = vmax.f32 %v4098_v38, 0.0  ;;  %v4184_v49 = vmax.f32 %v4100_v39, 0.0  ;;  %v4102_v50 = vadd.f32 %v6981_v56, %v3996_v40 }
 0x2de   : > { %v4104_v51 = vadd.f32 %v6983_v57, %v3998_v41  ;;  %v4183_v58 = vmax.f32 %v4099_v44, 0.0  ;;  %v4185_v59 = vmax.f32 %v4101_v45, 0.0  ;;  %v4103_v62 = vadd.f32 %v6985_v60, %v3997_v46 }
 0x2df   : > { %v4105_v63 = vadd.f32 %v6987_v61, %v3999_v47  ;;  %v4186_v0 = vmax.f32 %v4102_v50, 0.0 }
 0x2e0   : > { %v4188_v1 = vmax.f32 %v4104_v51, 0.0  ;;  %v5133_v3 = vpack.c.bf16 %v4183_v58, %v4182_v48  ;;  %v5134_v4 = vpack.c.bf16 %v4185_v59, %v4184_v49  ;;  %v4187_v5 = vmax.f32 %v4103_v62, 0.0  ;;  %v3317_v7 = vpop.f32.mrb[20].mxu0  ;;  %v3881_v8 = vpop.f32.mrb[20].mxu1 }
 0x2e1   : > { %v4189_v6 = vmax.f32 %v4105_v63, 0.0  ;;  %v4000_v9 = vmul.f32 %v6973_v52, %v3317_v7  ;;  %v4002_v10 = vmul.f32 %v6975_v53, %v3881_v8  ;;  %v3319_v11 = vpop.f32.mrb[21].mxu0  ;;  %v3883_v12 = vpop.f32.mrb[21].mxu1 }
 0x2e2   : > { %4506 = vst [vmem:[%s7009_s15 + $0x80] sm:$0xff] %v5133_v3  ;;  %4507 = vst [vmem:[%s7009_s15 + $0x88] sm:$0xff] %v5134_v4  ;;  %v5135_v13 = vpack.c.bf16 %v4187_v5, %v4186_v0  ;;  %v4001_v15 = vmul.f32 %v6977_v54, %v3319_v11  ;;  %v4003_v16 = vmul.f32 %v6979_v55, %v3883_v12  ;;  %v3321_v17 = vpop.f32.mrb[22].mxu0  ;;  %v3885_v18 = vpop.f32.mrb[22].mxu1 }
 0x2e3   : > { %v5136_v14 = vpack.c.bf16 %v4189_v6, %v4188_v1  ;;  %v4106_v2 = vadd.f32 %v6981_v56, %v4000_v9  ;;  %v4108_v19 = vadd.f32 %v6983_v57, %v4002_v10  ;;  %v4004_v20 = vmul.f32 %v6973_v52, %v3321_v17  ;;  %v3323_v22 = vpop.f32.mrb[23].mxu0  ;;  %v3887_v23 = vpop.f32.mrb[23].mxu1 }
 0x2e4   : > { %v4006_v21 = vmul.f32 %v6975_v53, %v3885_v18  ;;  %4508 = vst [vmem:[%s7009_s15 + $0x90] sm:$0xff] %v5135_v13  ;;  %v4107_v24 = vadd.f32 %v6985_v60, %v4001_v15  ;;  %v4109_v25 = vadd.f32 %v6987_v61, %v4003_v16  ;;  %v4005_v26 = vmul.f32 %v6977_v54, %v3323_v22 }
 0x2e5   : > { %4509 = vst [vmem:[%s7009_s15 + $0x98] sm:$0xff] %v5136_v14  ;;  %v4007_v27 = vmul.f32 %v6979_v55, %v3887_v23  ;;  %v4190_v28 = vmax.f32 %v4106_v2, 0.0  ;;  %v4192_v29 = vmax.f32 %v4108_v19, 0.0  ;;  %v4110_v30 = vadd.f32 %v6981_v56, %v4004_v20 }
 0x2e6   : > { %v4112_v31 = vadd.f32 %v6983_v57, %v4006_v21  ;;  %v4191_v32 = vmax.f32 %v4107_v24, 0.0  ;;  %v4193_v33 = vmax.f32 %v4109_v25, 0.0  ;;  %v4111_v34 = vadd.f32 %v6985_v60, %v4005_v26 }
 0x2e7   : > { %v4113_v35 = vadd.f32 %v6987_v61, %v4007_v27  ;;  %v4194_v36 = vmax.f32 %v4110_v30, 0.0 }
 0x2e8   : > { %v4196_v37 = vmax.f32 %v4112_v31, 0.0  ;;  %v5137_v38 = vpack.c.bf16 %v4191_v32, %v4190_v28  ;;  %v5138_v39 = vpack.c.bf16 %v4193_v33, %v4192_v29  ;;  %v4195_v40 = vmax.f32 %v4111_v34, 0.0  ;;  %v3327_v42 = vpop.f32.mrb[24].mxu0  ;;  %v3891_v43 = vpop.f32.mrb[24].mxu1 }
 0x2e9   : > { %v4197_v41 = vmax.f32 %v4113_v35, 0.0  ;;  %v4008_v44 = vmul.f32 %v6973_v52, %v3327_v42  ;;  %v4010_v45 = vmul.f32 %v6975_v53, %v3891_v43  ;;  %v3329_v46 = vpop.f32.mrb[25].mxu0  ;;  %v3893_v47 = vpop.f32.mrb[25].mxu1 }
 0x2ea   : > { %4510 = vst [vmem:[%s7009_s15 + $0xa0] sm:$0xff] %v5137_v38  ;;  %4511 = vst [vmem:[%s7009_s15 + $0xa8] sm:$0xff] %v5138_v39  ;;  %v5139_v48 = vpack.c.bf16 %v4195_v40, %v4194_v36  ;;  %v4009_v50 = vmul.f32 %v6977_v54, %v3329_v46  ;;  %v4011_v51 = vmul.f32 %v6979_v55, %v3893_v47  ;;  %v3331_v58 = vpop.f32.mrb[26].mxu0  ;;  %v3895_v59 = vpop.f32.mrb[26].mxu1 }
 0x2eb   : > { %v5140_v49 = vpack.c.bf16 %v4197_v41, %v4196_v37  ;;  %v4114_v62 = vadd.f32 %v6981_v56, %v4008_v44  ;;  %v4116_v63 = vadd.f32 %v6983_v57, %v4010_v45  ;;  %v4012_v0 = vmul.f32 %v6973_v52, %v3331_v58  ;;  %v3333_v3 = vpop.f32.mrb[27].mxu0  ;;  %v3897_v4 = vpop.f32.mrb[27].mxu1 }
 0x2ec   : > { %v4014_v1 = vmul.f32 %v6975_v53, %v3895_v59  ;;  %4512 = vst [vmem:[%s7009_s15 + $0xb0] sm:$0xff] %v5139_v48  ;;  %v4115_v5 = vadd.f32 %v6985_v60, %v4009_v50  ;;  %v4117_v6 = vadd.f32 %v6987_v61, %v4011_v51  ;;  %v4013_v7 = vmul.f32 %v6977_v54, %v3333_v3 }
 0x2ed   : > { %4513 = vst [vmem:[%s7009_s15 + $0xb8] sm:$0xff] %v5140_v49  ;;  %v4015_v8 = vmul.f32 %v6979_v55, %v3897_v4  ;;  %v4198_v9 = vmax.f32 %v4114_v62, 0.0  ;;  %v4200_v10 = vmax.f32 %v4116_v63, 0.0  ;;  %v4118_v11 = vadd.f32 %v6981_v56, %v4012_v0 }
 0x2ee   : > { %v4120_v12 = vadd.f32 %v6983_v57, %v4014_v1  ;;  %v4199_v13 = vmax.f32 %v4115_v5, 0.0  ;;  %v4201_v14 = vmax.f32 %v4117_v6, 0.0  ;;  %v4119_v15 = vadd.f32 %v6985_v60, %v4013_v7 }
 0x2ef   : > { %v4121_v16 = vadd.f32 %v6987_v61, %v4015_v8  ;;  %v4202_v17 = vmax.f32 %v4118_v11, 0.0 }
 0x2f0   : > { %v4204_v18 = vmax.f32 %v4120_v12, 0.0  ;;  %v5141_v2 = vpack.c.bf16 %v4199_v13, %v4198_v9  ;;  %v5142_v19 = vpack.c.bf16 %v4201_v14, %v4200_v10  ;;  %v4203_v20 = vmax.f32 %v4119_v15, 0.0  ;;  %v3337_v22 = vpop.f32.mrb[28].mxu0  ;;  %v3901_v23 = vpop.f32.mrb[28].mxu1 }
 0x2f1   : > { %v4205_v21 = vmax.f32 %v4121_v16, 0.0  ;;  %v4016_v24 = vmul.f32 %v6973_v52, %v3337_v22  ;;  %v4018_v25 = vmul.f32 %v6975_v53, %v3901_v23  ;;  %v3339_v26 = vpop.f32.mrb[29].mxu0  ;;  %v3903_v27 = vpop.f32.mrb[29].mxu1 }
 0x2f2   : > { %4514 = vst [vmem:[%s7009_s15 + $0xc0] sm:$0xff] %v5141_v2  ;;  %4515 = vst [vmem:[%s7009_s15 + $0xc8] sm:$0xff] %v5142_v19  ;;  %v5143_v28 = vpack.c.bf16 %v4203_v20, %v4202_v17  ;;  %v4017_v30 = vmul.f32 %v6977_v54, %v3339_v26  ;;  %v4019_v31 = vmul.f32 %v6979_v55, %v3903_v27  ;;  %v3341_v32 = vpop.f32.mrb[30].mxu0  ;;  %v3905_v33 = vpop.f32.mrb[30].mxu1 }
 0x2f3   : > { %v5144_v29 = vpack.c.bf16 %v4205_v21, %v4204_v18  ;;  %v4122_v34 = vadd.f32 %v6981_v56, %v4016_v24  ;;  %v4124_v35 = vadd.f32 %v6983_v57, %v4018_v25  ;;  %v4020_v36 = vmul.f32 %v6973_v52, %v3341_v32  ;;  %v3343_v38 = vpop.f32.mrb[31].mxu0  ;;  %v3907_v39 = vpop.f32.mrb[31].mxu1 }
 0x2f4   : > { %v4022_v37 = vmul.f32 %v6975_v53, %v3905_v33  ;;  %4516 = vst [vmem:[%s7009_s15 + $0xd0] sm:$0xff] %v5143_v28  ;;  %v4123_v40 = vadd.f32 %v6985_v60, %v4017_v30  ;;  %v4125_v41 = vadd.f32 %v6987_v61, %v4019_v31  ;;  %v4021_v42 = vmul.f32 %v6977_v54, %v3343_v38 }
 0x2f5   : > { %4517 = vst [vmem:[%s7009_s15 + $0xd8] sm:$0xff] %v5144_v29  ;;  %v4023_v43 = vmul.f32 %v6979_v55, %v3907_v39  ;;  %v4206_v44 = vmax.f32 %v4122_v34, 0.0  ;;  %v4208_v45 = vmax.f32 %v4124_v35, 0.0  ;;  %v4126_v46 = vadd.f32 %v6981_v56, %v4020_v36 }
 0x2f6   : > { %v4128_v47 = vadd.f32 %v6983_v57, %v4022_v37  ;;  %v4207_v48 = vmax.f32 %v4123_v40, 0.0  ;;  %v4209_v49 = vmax.f32 %v4125_v41, 0.0  ;;  %v4127_v50 = vadd.f32 %v6985_v60, %v4021_v42 }
 0x2f7   : > { %v4129_v51 = vadd.f32 %v6987_v61, %v4023_v43  ;;  %v4210_v58 = vmax.f32 %v4126_v46, 0.0 }
 0x2f8   : > { %v4212_v59 = vmax.f32 %v4128_v47, 0.0  ;;  %v5145_v62 = vpack.c.bf16 %v4207_v48, %v4206_v44  ;;  %v5146_v63 = vpack.c.bf16 %v4209_v49, %v4208_v45  ;;  %v4211_v0 = vmax.f32 %v4127_v50, 0.0  ;;  %v3347_v3 = vpop.f32.mrb[32].mxu0  ;;  %v3911_v4 = vpop.f32.mrb[32].mxu1 }
 0x2f9   : > { %v4213_v1 = vmax.f32 %v4129_v51, 0.0  ;;  %v4024_v5 = vmul.f32 %v6973_v52, %v3347_v3  ;;  %v4026_v6 = vmul.f32 %v6975_v53, %v3911_v4  ;;  %v3349_v7 = vpop.f32.mrb[33].mxu0  ;;  %v3913_v8 = vpop.f32.mrb[33].mxu1 }
 0x2fa   : > { %4518 = vst [vmem:[%s7009_s15 + $0xe0] sm:$0xff] %v5145_v62  ;;  %4519 = vst [vmem:[%s7009_s15 + $0xe8] sm:$0xff] %v5146_v63  ;;  %v5147_v9 = vpack.c.bf16 %v4211_v0, %v4210_v58  ;;  %v4025_v11 = vmul.f32 %v6977_v54, %v3349_v7  ;;  %v4027_v12 = vmul.f32 %v6979_v55, %v3913_v8  ;;  %v3351_v13 = vpop.f32.mrb[34].mxu0  ;;  %v3915_v14 = vpop.f32.mrb[34].mxu1 }
 0x2fb   : > { %v5148_v10 = vpack.c.bf16 %v4213_v1, %v4212_v59  ;;  %v4130_v15 = vadd.f32 %v6981_v56, %v4024_v5  ;;  %v4132_v16 = vadd.f32 %v6983_v57, %v4026_v6  ;;  %v4028_v17 = vmul.f32 %v6973_v52, %v3351_v13  ;;  %v3353_v2 = vpop.f32.mrb[35].mxu0  ;;  %v3917_v19 = vpop.f32.mrb[35].mxu1 }
 0x2fc   : > { %v4030_v18 = vmul.f32 %v6975_v53, %v3915_v14  ;;  %4520 = vst [vmem:[%s7009_s15 + $0xf0] sm:$0xff] %v5147_v9  ;;  %v4131_v20 = vadd.f32 %v6985_v60, %v4025_v11  ;;  %v4133_v21 = vadd.f32 %v6987_v61, %v4027_v12  ;;  %v4029_v22 = vmul.f32 %v6977_v54, %v3353_v2 }
 0x2fd   : > { %4521 = vst [vmem:[%s7009_s15 + $0xf8] sm:$0xff] %v5148_v10  ;;  %v4031_v23 = vmul.f32 %v6979_v55, %v3917_v19  ;;  %v4214_v24 = vmax.f32 %v4130_v15, 0.0  ;;  %v4216_v25 = vmax.f32 %v4132_v16, 0.0  ;;  %v4134_v26 = vadd.f32 %v6981_v56, %v4028_v17 }
 0x2fe   : > { %v4136_v27 = vadd.f32 %v6983_v57, %v4030_v18  ;;  %v4215_v28 = vmax.f32 %v4131_v20, 0.0  ;;  %v4217_v29 = vmax.f32 %v4133_v21, 0.0  ;;  %v4135_v30 = vadd.f32 %v6985_v60, %v4029_v22 }
 0x2ff   : > { %v4137_v31 = vadd.f32 %v6987_v61, %v4031_v23  ;;  %v4218_v32 = vmax.f32 %v4134_v26, 0.0 }
 0x300   : > { %v4220_v33 = vmax.f32 %v4136_v27, 0.0  ;;  %v5149_v34 = vpack.c.bf16 %v4215_v28, %v4214_v24  ;;  %v5150_v35 = vpack.c.bf16 %v4217_v29, %v4216_v25  ;;  %v4219_v36 = vmax.f32 %v4135_v30, 0.0  ;;  %v3357_v38 = vpop.f32.mrb[36].mxu0  ;;  %v3921_v39 = vpop.f32.mrb[36].mxu1 }
 0x301   : > { %v4221_v37 = vmax.f32 %v4137_v31, 0.0  ;;  %v4032_v40 = vmul.f32 %v6973_v52, %v3357_v38  ;;  %v4034_v41 = vmul.f32 %v6975_v53, %v3921_v39  ;;  %v3359_v42 = vpop.f32.mrb[37].mxu0  ;;  %v3923_v43 = vpop.f32.mrb[37].mxu1  ;;  %v4562_v38 = vld [vmem:[%s7009_s15 + $0x20] sm:$0xff] (%p5921_p5)  ;;  %v4564_v39 = vld [vmem:[%s7009_s15 + $0x28] sm:$0xff] (%p5921_p5) }
 0x302   : > { %4522 = vst [vmem:[%s7009_s15 + $0x100] sm:$0xff] %v5149_v34  ;;  %4523 = vst [vmem:[%s7009_s15 + $0x108] sm:$0xff] %v5150_v35  ;;  %v5151_v44 = vpack.c.bf16 %v4219_v36, %v4218_v32  ;;  %v4033_v46 = vmul.f32 %v6977_v54, %v3359_v42  ;;  %v4035_v47 = vmul.f32 %v6979_v55, %v3923_v43  ;;  %v3361_v48 = vpop.f32.mrb[38].mxu0  ;;  %v3925_v49 = vpop.f32.mrb[38].mxu1  ;;  %v4570_v42 = vld [vmem:[%s7009_s15 + $0x40] sm:$0xff] (%p5921_p5)  ;;  %v4572_v43 = vld [vmem:[%s7009_s15 + $0x48] sm:$0xff] (%p5921_p5) }
 0x303   : > { %v5152_v45 = vpack.c.bf16 %v4221_v37, %v4220_v33  ;;  %v4138_v50 = vadd.f32 %v6981_v56, %v4032_v40  ;;  %v4140_v51 = vadd.f32 %v6983_v57, %v4034_v41  ;;  %v4036_v58 = vmul.f32 %v6973_v52, %v3361_v48  ;;  %v3363_v62 = vpop.f32.mrb[39].mxu0  ;;  %v3927_v63 = vpop.f32.mrb[39].mxu1  ;;  %4563 = vst [vmem:[%s7212_s27 + $0x40] sm:$0xff] (%p5921_p5), %v4562_v38  ;;  %v4566_v40 = vld [vmem:[%s7009_s15 + $0x30] sm:$0xff] (%p5921_p5)  ;;  %v4568_v41 = vld [vmem:[%s7009_s15 + $0x38] sm:$0xff] (%p5921_p5) }
 0x304   : > { %v4038_v59 = vmul.f32 %v6975_v53, %v3925_v49  ;;  %4524 = vst [vmem:[%s7009_s15 + $0x110] sm:$0xff] %v5151_v44  ;;  %v4139_v0 = vadd.f32 %v6985_v60, %v4033_v46  ;;  %v4141_v1 = vadd.f32 %v6987_v61, %v4035_v47  ;;  %v4037_v3 = vmul.f32 %v6977_v54, %v3363_v62  ;;  %v4574_v44 = vld [vmem:[%s7009_s15 + $0x50] sm:$0xff] (%p5921_p5)  ;;  %v4578_v46 = vld [vmem:[%s7009_s15 + $0x60] sm:$0xff] (%p5921_p5)  ;;  %v4580_v47 = vld [vmem:[%s7009_s15 + $0x68] sm:$0xff] (%p5921_p5) }
 0x305   : > { %4525 = vst [vmem:[%s7009_s15 + $0x118] sm:$0xff] %v5152_v45  ;;  %v4039_v4 = vmul.f32 %v6979_v55, %v3927_v63  ;;  %v4222_v5 = vmax.f32 %v4138_v50, 0.0  ;;  %v4224_v6 = vmax.f32 %v4140_v51, 0.0  ;;  %v4142_v7 = vadd.f32 %v6981_v56, %v4036_v58  ;;  %4565 = vst [vmem:[%s7212_s27 + $0x48] sm:$0xff] (%p5921_p5), %v4564_v39  ;;  %v4576_v45 = vld [vmem:[%s7009_s15 + $0x58] sm:$0xff] (%p5921_p5)  ;;  %v4582_v48 = vld [vmem:[%s7009_s15 + $0x70] sm:$0xff] (%p5921_p5) }
 0x306   : > { %v4144_v8 = vadd.f32 %v6983_v57, %v4038_v59  ;;  %v4223_v9 = vmax.f32 %v4139_v0, 0.0  ;;  %v4225_v10 = vmax.f32 %v4141_v1, 0.0  ;;  %v4143_v11 = vadd.f32 %v6985_v60, %v4037_v3  ;;  %4567 = vst [vmem:[%s7212_s27 + $0x60] sm:$0xff] (%p5921_p5), %v4566_v40  ;;  %4569 = vst [vmem:[%s7212_s27 + $0x68] sm:$0xff] (%p5921_p5), %v4568_v41  ;;  %v4584_v49 = vld [vmem:[%s7009_s15 + $0x78] sm:$0xff] (%p5921_p5)  ;;  %v4586_v50 = vld [vmem:[%s7009_s15 + $0x80] sm:$0xff] (%p5921_p5) }
 0x307   : > { %v4145_v12 = vadd.f32 %v6987_v61, %v4039_v4  ;;  %v4226_v13 = vmax.f32 %v4142_v7, 0.0  ;;  %4571 = vst [vmem:[%s7212_s27 + $0x80] sm:$0xff] (%p5921_p5), %v4570_v42  ;;  %4573 = vst [vmem:[%s7212_s27 + $0x88] sm:$0xff] (%p5921_p5), %v4572_v43  ;;  %v4588_v51 = vld [vmem:[%s7009_s15 + $0x88] sm:$0xff] (%p5921_p5)  ;;  %v4590_v58 = vld [vmem:[%s7009_s15 + $0x90] sm:$0xff] (%p5921_p5) }
 0x308   : > { %v4228_v14 = vmax.f32 %v4144_v8, 0.0  ;;  %v5153_v15 = vpack.c.bf16 %v4223_v9, %v4222_v5  ;;  %v5154_v16 = vpack.c.bf16 %v4225_v10, %v4224_v6  ;;  %v4227_v17 = vmax.f32 %v4143_v11, 0.0  ;;  %v3367_v2 = vpop.f32.mrb[40].mxu0  ;;  %v3931_v19 = vpop.f32.mrb[40].mxu1  ;;  %4575 = vst [vmem:[%s7212_s27 + $0xa0] sm:$0xff] (%p5921_p5), %v4574_v44  ;;  %4577 = vst [vmem:[%s7212_s27 + $0xa8] sm:$0xff] (%p5921_p5), %v4576_v45 }
 0x309   : > { %v4229_v18 = vmax.f32 %v4145_v12, 0.0  ;;  %v4040_v20 = vmul.f32 %v6973_v52, %v3367_v2  ;;  %v4042_v21 = vmul.f32 %v6975_v53, %v3931_v19  ;;  %v3369_v22 = vpop.f32.mrb[41].mxu0  ;;  %v3933_v23 = vpop.f32.mrb[41].mxu1  ;;  %4579 = vst [vmem:[%s7212_s27 + $0xc0] sm:$0xff] (%p5921_p5), %v4578_v46  ;;  %4581 = vst [vmem:[%s7212_s27 + $0xc8] sm:$0xff] (%p5921_p5), %v4580_v47  ;;  %v4592_v59 = vld [vmem:[%s7009_s15 + $0x98] sm:$0xff] (%p5921_p5) }
 0x30a   : > { %4526 = vst [vmem:[%s7009_s15 + $0x120] sm:$0xff] %v5153_v15  ;;  %4527 = vst [vmem:[%s7009_s15 + $0x128] sm:$0xff] %v5154_v16  ;;  %v5155_v24 = vpack.c.bf16 %v4227_v17, %v4226_v13  ;;  %v4041_v26 = vmul.f32 %v6977_v54, %v3369_v22  ;;  %v4043_v27 = vmul.f32 %v6979_v55, %v3933_v23  ;;  %v3371_v28 = vpop.f32.mrb[42].mxu0  ;;  %v3935_v29 = vpop.f32.mrb[42].mxu1  ;;  %v4594_v62 = vld [vmem:[%s7009_s15 + $0xa0] sm:$0xff] (%p5921_p5)  ;;  %v4596_v63 = vld [vmem:[%s7009_s15 + $0xa8] sm:$0xff] (%p5921_p5) }
 0x30b   : > { %v5156_v25 = vpack.c.bf16 %v4229_v18, %v4228_v14  ;;  %v4146_v52 = vadd.f32 %v6981_v56, %v4040_v20  ;;  %v4148_v30 = vadd.f32 %v6983_v57, %v4042_v21  ;;  %v3372_v53 = vpop.f32.mrb[43].mxu0  ;;  %v3936_v31 = vpop.f32.mrb[43].mxu1  ;;  %v4554_v56 = vld [vmem:[%s7009_s15] sm:$0xff] (%p5921_p5)  ;;  %v4556_v57 = vld [vmem:[%s7009_s15 + $0x8] sm:$0xff] (%p5921_p5)  ;;  %4583 = vst [vmem:[%s7212_s27 + $0xe0] sm:$0xff] (%p5921_p5), %v4582_v48  ;;  %4585 = vst [vmem:[%s7212_s27 + $0xe8] sm:$0xff] (%p5921_p5), %v4584_v49 }
 0x30c   : > { %4528 = vst [vmem:[%s7009_s15 + $0x130] sm:$0xff] %v5155_v24  ;;  %v4147_v32 = vadd.f32 %v6985_v60, %v4041_v26  ;;  %v4149_v33 = vadd.f32 %v6987_v61, %v4043_v27  ;;  %4538 = sbr.rel (!%p5921_p5) target bundleno = 797 (0x31d), region = 63  ;;  %v4558_v60 = vld [vmem:[%s7009_s15 + $0x10] sm:$0xff] (%p5921_p5)  ;;  %v4560_v61 = vld [vmem:[%s7009_s15 + $0x18] sm:$0xff] (%p5921_p5)  ;;  %4555 = vst [vmem:[%s7212_s27] sm:$0xff] (%p5921_p5), %v4554_v56 }
 0x30d   : > { %4529 = vst [vmem:[%s7009_s15 + $0x138] sm:$0xff] %v5156_v25  ;;  %v4230_v34 = vmax.f32 %v4146_v52, 0.0  ;;  %v4232_v54 = vmax.f32 %v4148_v30, 0.0  ;;  %4557 = vst [vmem:[%s7212_s27 + $0x8] sm:$0xff] (%p5921_p5), %v4556_v57  ;;  %v4598_v0 = vld [vmem:[%s7009_s15 + $0xb0] sm:$0xff] (%p5921_p5)  ;;  %v4600_v1 = vld [vmem:[%s7009_s15 + $0xb8] sm:$0xff] (%p5921_p5) }
 0x30e   : > { %v4231_v35 = vmax.f32 %v4147_v32, 0.0  ;;  %v4233_v55 = vmax.f32 %v4149_v33, 0.0  ;;  %4559 = vst [vmem:[%s7212_s27 + $0x20] sm:$0xff] (%p5921_p5), %v4558_v60  ;;  %4561 = vst [vmem:[%s7212_s27 + $0x28] sm:$0xff] (%p5921_p5), %v4560_v61  ;;  %v4602_v3 = vld [vmem:[%s7009_s15 + $0xc0] sm:$0xff] (%p5921_p5)  ;;  %v4604_v4 = vld [vmem:[%s7009_s15 + $0xc8] sm:$0xff] (%p5921_p5) }
 0x30f   : > { %4587 = vst [vmem:[%s7212_s27 + $0x100] sm:$0xff] (%p5921_p5), %v4586_v50  ;;  %4589 = vst [vmem:[%s7212_s27 + $0x108] sm:$0xff] (%p5921_p5), %v4588_v51  ;;  %v4606_v5 = vld [vmem:[%s7009_s15 + $0xd0] sm:$0xff] (%p5921_p5)  ;;  %v4608_v6 = vld [vmem:[%s7009_s15 + $0xd8] sm:$0xff] (%p5921_p5) }
 0x310   : > { %v5157_v36 = vpack.c.bf16 %v4231_v35, %v4230_v34  ;;  %v5158_v37 = vpack.c.bf16 %v4233_v55, %v4232_v54  ;;  %4591 = vst [vmem:[%s7212_s27 + $0x120] sm:$0xff] (%p5921_p5), %v4590_v58  ;;  %4593 = vst [vmem:[%s7212_s27 + $0x128] sm:$0xff] (%p5921_p5), %v4592_v59  ;;  %v4610_v7 = vld [vmem:[%s7009_s15 + $0xe0] sm:$0xff] (%p5921_p5)  ;;  %v4612_v8 = vld [vmem:[%s7009_s15 + $0xe8] sm:$0xff] (%p5921_p5) }
 0x311   : > { %4595 = vst [vmem:[%s7212_s27 + $0x140] sm:$0xff] (%p5921_p5), %v4594_v62  ;;  %4597 = vst [vmem:[%s7212_s27 + $0x148] sm:$0xff] (%p5921_p5), %v4596_v63  ;;  %v4614_v9 = vld [vmem:[%s7009_s15 + $0xf0] sm:$0xff] (%p5921_p5)  ;;  %v4616_v10 = vld [vmem:[%s7009_s15 + $0xf8] sm:$0xff] (%p5921_p5) }
 0x312   : > { %4530 = vst [vmem:[%s7009_s15 + $0x140] sm:$0x11] %v5157_v36  ;;  %4531 = vst [vmem:[%s7009_s15 + $0x148] sm:$0x11] %v5158_v37  ;;  %v4618_v11 = vld [vmem:[%s7009_s15 + $0x100] sm:$0xff] (%p5921_p5)  ;;  %v4620_v12 = vld [vmem:[%s7009_s15 + $0x108] sm:$0xff] (%p5921_p5) }
 0x313   : > { %4599 = vst [vmem:[%s7212_s27 + $0x160] sm:$0xff] %v4598_v0  ;;  %4601 = vst [vmem:[%s7212_s27 + $0x168] sm:$0xff] %v4600_v1  ;;  %v4622_v13 = vld [vmem:[%s7009_s15 + $0x110] sm:$0xff]  ;;  %v4624_v14 = vld [vmem:[%s7009_s15 + $0x118] sm:$0xff] }
 0x314   : > { %4603 = vst [vmem:[%s7212_s27 + $0x180] sm:$0xff] %v4602_v3  ;;  %4605 = vst [vmem:[%s7212_s27 + $0x188] sm:$0xff] %v4604_v4  ;;  %v4626_v15 = vld [vmem:[%s7009_s15 + $0x120] sm:$0xff]  ;;  %v4628_v16 = vld [vmem:[%s7009_s15 + $0x128] sm:$0xff] }
 0x315   : > { %4607 = vst [vmem:[%s7212_s27 + $0x1a0] sm:$0xff] %v4606_v5  ;;  %4609 = vst [vmem:[%s7212_s27 + $0x1a8] sm:$0xff] %v4608_v6  ;;  %v4630_v17 = vld [vmem:[%s7009_s15 + $0x130] sm:$0xff]  ;;  %v4632_v18 = vld [vmem:[%s7009_s15 + $0x138] sm:$0xff] }
 0x316   : > { %4611 = vst [vmem:[%s7212_s27 + $0x1c0] sm:$0xff] %v4610_v7  ;;  %4613 = vst [vmem:[%s7212_s27 + $0x1c8] sm:$0xff] %v4612_v8 }
 0x317   : > { %4615 = vst [vmem:[%s7212_s27 + $0x1e0] sm:$0xff] %v4614_v9  ;;  %4617 = vst [vmem:[%s7212_s27 + $0x1e8] sm:$0xff] %v4616_v10 }
 0x318   : > { %4619 = vst [vmem:[%s7212_s27 + $0x200] sm:$0xff] %v4618_v11  ;;  %4621 = vst [vmem:[%s7212_s27 + $0x208] sm:$0xff] %v4620_v12 }
 0x319   : > { %4623 = vst [vmem:[%s7212_s27 + $0x220] sm:$0xff] %v4622_v13  ;;  %4625 = vst [vmem:[%s7212_s27 + $0x228] sm:$0xff] %v4624_v14  ;;  %v4634_v2 = vld [vmem:[%s7009_s15 + $0x140] sm:$0xff]  ;;  %v4636_v19 = vld [vmem:[%s7009_s15 + $0x148] sm:$0xff] }
 0x31a   : > { %4627 = vst [vmem:[%s7212_s27 + $0x240] sm:$0xff] %v4626_v15  ;;  %4629 = vst [vmem:[%s7212_s27 + $0x248] sm:$0xff] %v4628_v16 }
 0x31b   : > { %4631 = vst [vmem:[%s7212_s27 + $0x260] sm:$0xff] %v4630_v17  ;;  %4633 = vst [vmem:[%s7212_s27 + $0x268] sm:$0xff] %v4632_v18 }
 0x31c   : > { %4635 = vst [vmem:[%s7212_s27 + $0x280] sm:$0xff] %v4634_v2  ;;  %4637 = vst [vmem:[%s7212_s27 + $0x288] sm:$0xff] %v4636_v19 }
 0x31d PF: > { %p11_p11 = scmp.ge.s32.totalorder %s5909_s19, 4   ;;  %s7311_s15 = smov %s5859_s16 }
 0x31e   : > { %s7312_s16 = smov %s5919_s22  ;;  %s7313_s17 = smov %s5909_s19 }
 0x31f   :  { %13 = sbr.rel (!%p11_p11) target bundleno = 2 (0x2), region = 123 }

// kernel: deconv_forward.5
= control target key start
LH: loop header
LB: loop body
LE: loop exit
PB: predicated region body
PF: predicated region fallthrough
CT: control target
= control target key end

     0   :  { %s7668_s21 = smov 0   ;;  %s7670_s22 = smov 0   ;;  %s10255_s0 = inlined_call_operand.vmem [shape: bf16[578,1024], index: 0, kind: input, shape index: {}]   ;;  %s10256_s1 = inlined_call_operand.vmem [shape: bf16[1024,1024], index: 1, kind: input, shape index: {}]   ;;  %s10257_s2 = inlined_call_operand.vmem [shape: f32[1,1024], index: 2, kind: input, shape index: {}]   ;;  %s10258_s3 = inlined_call_operand.vmem [shape: f32[1,1024], index: 3, kind: input, shape index: {}]   ;;  %s10259_s4 = inlined_call_operand.vmem [shape: bf16[256,128], index: 4, kind: input, shape index: {}]   ;;  %s10260_s5 = inlined_call_operand.vmem [shape: f32[1,128], index: 5, kind: input, shape index: {}]   ;;  %s10261_s6 = inlined_call_operand.vmem [shape: f32[578,512], index: 6, kind: output, shape index: {}]  }
   0x1   :  { %s7672_s23 = smov 0  }
   0x2 LB: > { %s7684_s24 = sadd.s32 4294967295, %s7630_s23   ;;  %s7687_s25 = sadd.s32 1, %s7630_s23   ;;  %s7630_s23 = sphi %s7672_s23, %s10476_s23   ;;  %s7626_s22 = sphi %s7670_s22, %s10475_s22   ;;  %s7622_s21 = sphi %s7668_s21, %s10474_s21  }
   0x3   : > { %s41_s26 = ssub.s32 %s7630_s23, %s7687_s25  ;;  %s44_s27 = sadd.s32 1, %s7626_s22 }
   0x4   : > { %p42_p0 = scmp.eq.s32.totalorder %s41_s26, 0  ;;  %p51_p1 = scmp.ne.s32.totalorder %s7626_s22, %s7622_s21 }
   0x5   : > { %p52_p2 = scmp.eq.s32.totalorder %s7630_s23, 0  ;;  %p175_p3 = scmp.eq.s32.totalorder %s7684_s24, 3 }
   0x6   : > { %s7697_s28 = scalar_select %p42_p0, %s7626_s22, %s44_s27  }
   0x7   : > { %p53_p4 = por %p52_p2, %p51_p1  ;;  %p7699_p5 = por %p175_p3, %p51_p1 }
   0x8   : > { %p6439_p6 = scmp.ge.s32.totalorder %s7630_s23, 4 }
   0xa   : > { %206 = sbr.rel (%p6439_p6) target bundleno = 149 (0x95), region = 28 }
  0x11   : > { %209 = sbr.rel (!%p53_p4) target bundleno = 149 (0x95), region = 32  ;;  %s211_s30 = sand.u32 (%p53_p4), 1, %s7626_s22  }
  0x12   : > { %s6891_s7 = sshll.u32 (%p53_p4), %s7630_s23, 3  ;;  %s6440_s8 = sshll.u32 (%p53_p4), %s211_s30, 10 }
  0x13   : > { %s7709_s11 = scalar_lea.vmem (%p53_p4), %s10256_s1, %s6891_s7  ;;  %s7714_s12 = scalar_lea.vmem (%p53_p4), [#allocation2], %s6440_s8 }
  0x14   : > { %v498_v0 = vld [vmem:[%s7709_s11] sm:$0xff] (%p53_p4) }
  0x15   : > { %v500_v1 = vld [vmem:[%s7709_s11 + $0x20] sm:$0xff] (%p53_p4)  ;;  %499 = vst [vmem:[%s7714_s12] sm:$0xff] (%p53_p4), %v498_v0 }
  0x16   : > { %v502_v2 = vld [vmem:[%s7709_s11 + $0x40] sm:$0xff] (%p53_p4)  ;;  %501 = vst [vmem:[%s7714_s12 + $0x8] sm:$0xff] (%p53_p4), %v500_v1 }
  0x17   : > { %503 = vst [vmem:[%s7714_s12 + $0x10] sm:$0xff] (%p53_p4), %v502_v2  ;;  %v504_v3 = vld [vmem:[%s7709_s11 + $0x60] sm:$0xff] (%p53_p4) }
  0x18   : > { %v506_v4 = vld [vmem:[%s7709_s11 + $0x80] sm:$0xff]  ;;  %505 = vst [vmem:[%s7714_s12 + $0x18] sm:$0xff] %v504_v3 }
  0x19   : > { %v508_v5 = vld [vmem:[%s7709_s11 + $0xa0] sm:$0xff]  ;;  %507 = vst [vmem:[%s7714_s12 + $0x20] sm:$0xff] %v506_v4 }
  0x1a   : > { %509 = vst [vmem:[%s7714_s12 + $0x28] sm:$0xff] %v508_v5  ;;  %v510_v6 = vld [vmem:[%s7709_s11 + $0xc0] sm:$0xff] }
  0x1b   : > { %v512_v7 = vld [vmem:[%s7709_s11 + $0xe0] sm:$0xff]  ;;  %511 = vst [vmem:[%s7714_s12 + $0x30] sm:$0xff] %v510_v6 }
  0x1c   : > { %v514_v8 = vld [vmem:[%s7709_s11 + $0x100] sm:$0xff]  ;;  %513 = vst [vmem:[%s7714_s12 + $0x38] sm:$0xff] %v512_v7 }
  0x1d   : > { %515 = vst [vmem:[%s7714_s12 + $0x40] sm:$0xff] %v514_v8  ;;  %v516_v9 = vld [vmem:[%s7709_s11 + $0x120] sm:$0xff] }
  0x1e   : > { %v518_v10 = vld [vmem:[%s7709_s11 + $0x140] sm:$0xff]  ;;  %517 = vst [vmem:[%s7714_s12 + $0x48] sm:$0xff] %v516_v9 }
  0x1f   : > { %v520_v11 = vld [vmem:[%s7709_s11 + $0x160] sm:$0xff]  ;;  %519 = vst [vmem:[%s7714_s12 + $0x50] sm:$0xff] %v518_v10 }
  0x20   : > { %521 = vst [vmem:[%s7714_s12 + $0x58] sm:$0xff] %v520_v11  ;;  %v522_v12 = vld [vmem:[%s7709_s11 + $0x180] sm:$0xff] }
  0x21   : > { %v524_v13 = vld [vmem:[%s7709_s11 + $0x1a0] sm:$0xff]  ;;  %523 = vst [vmem:[%s7714_s12 + $0x60] sm:$0xff] %v522_v12 }
  0x22   : > { %v526_v14 = vld [vmem:[%s7709_s11 + $0x1c0] sm:$0xff]  ;;  %525 = vst [vmem:[%s7714_s12 + $0x68] sm:$0xff] %v524_v13 }
  0x23   : > { %527 = vst [vmem:[%s7714_s12 + $0x70] sm:$0xff] %v526_v14  ;;  %v528_v15 = vld [vmem:[%s7709_s11 + $0x1e0] sm:$0xff] }
  0x24   : > { %v530_v16 = vld [vmem:[%s7709_s11 + $0x200] sm:$0xff]  ;;  %529 = vst [vmem:[%s7714_s12 + $0x78] sm:$0xff] %v528_v15 }
  0x25   : > { %v532_v17 = vld [vmem:[%s7709_s11 + $0x220] sm:$0xff]  ;;  %531 = vst [vmem:[%s7714_s12 + $0x80] sm:$0xff] %v530_v16 }
  0x26   : > { %533 = vst [vmem:[%s7714_s12 + $0x88] sm:$0xff] %v532_v17  ;;  %v534_v18 = vld [vmem:[%s7709_s11 + $0x240] sm:$0xff] }
  0x27   : > { %v536_v19 = vld [vmem:[%s7709_s11 + $0x260] sm:$0xff]  ;;  %535 = vst [vmem:[%s7714_s12 + $0x90] sm:$0xff] %v534_v18 }
  0x28   : > { %v538_v20 = vld [vmem:[%s7709_s11 + $0x280] sm:$0xff]  ;;  %537 = vst [vmem:[%s7714_s12 + $0x98] sm:$0xff] %v536_v19 }
  0x29   : > { %539 = vst [vmem:[%s7714_s12 + $0xa0] sm:$0xff] %v538_v20  ;;  %v540_v21 = vld [vmem:[%s7709_s11 + $0x2a0] sm:$0xff] }
  0x2a   : > { %v542_v22 = vld [vmem:[%s7709_s11 + $0x2c0] sm:$0xff]  ;;  %541 = vst [vmem:[%s7714_s12 + $0xa8] sm:$0xff] %v540_v21 }
  0x2b   : > { %v544_v23 = vld [vmem:[%s7709_s11 + $0x2e0] sm:$0xff]  ;;  %543 = vst [vmem:[%s7714_s12 + $0xb0] sm:$0xff] %v542_v22 }
  0x2c   : > { %545 = vst [vmem:[%s7714_s12 + $0xb8] sm:$0xff] %v544_v23  ;;  %v546_v24 = vld [vmem:[%s7709_s11 + $0x300] sm:$0xff] }
  0x2d   : > { %v548_v25 = vld [vmem:[%s7709_s11 + $0x320] sm:$0xff]  ;;  %547 = vst [vmem:[%s7714_s12 + $0xc0] sm:$0xff] %v546_v24 }
  0x2e   : > { %v550_v26 = vld [vmem:[%s7709_s11 + $0x340] sm:$0xff]  ;;  %549 = vst [vmem:[%s7714_s12 + $0xc8] sm:$0xff] %v548_v25 }
  0x2f   : > { %551 = vst [vmem:[%s7714_s12 + $0xd0] sm:$0xff] %v550_v26  ;;  %v552_v27 = vld [vmem:[%s7709_s11 + $0x360] sm:$0xff] }
  0x30   : > { %v554_v28 = vld [vmem:[%s7709_s11 + $0x380] sm:$0xff]  ;;  %553 = vst [vmem:[%s7714_s12 + $0xd8] sm:$0xff] %v552_v27 }
  0x31   : > { %v556_v29 = vld [vmem:[%s7709_s11 + $0x3a0] sm:$0xff]  ;;  %555 = vst [vmem:[%s7714_s12 + $0xe0] sm:$0xff] %v554_v28 }
  0x32   : > { %557 = vst [vmem:[%s7714_s12 + $0xe8] sm:$0xff] %v556_v29  ;;  %v558_v30 = vld [vmem:[%s7709_s11 + $0x3c0] sm:$0xff] }
  0x33   : > { %v560_v31 = vld [vmem:[%s7709_s11 + $0x3e0] sm:$0xff]  ;;  %559 = vst [vmem:[%s7714_s12 + $0xf0] sm:$0xff] %v558_v30 }
  0x34   : > { %v562_v32 = vld [vmem:[%s7709_s11 + $0x400] sm:$0xff]  ;;  %561 = vst [vmem:[%s7714_s12 + $0xf8] sm:$0xff] %v560_v31 }
  0x35   : > { %563 = vst [vmem:[%s7714_s12 + $0x100] sm:$0xff] %v562_v32  ;;  %v564_v33 = vld [vmem:[%s7709_s11 + $0x420] sm:$0xff] }
  0x36   : > { %v566_v34 = vld [vmem:[%s7709_s11 + $0x440] sm:$0xff]  ;;  %565 = vst [vmem:[%s7714_s12 + $0x108] sm:$0xff] %v564_v33 }
  0x37   : > { %v568_v35 = vld [vmem:[%s7709_s11 + $0x460] sm:$0xff]  ;;  %567 = vst [vmem:[%s7714_s12 + $0x110] sm:$0xff] %v566_v34 }
  0x38   : > { %569 = vst [vmem:[%s7714_s12 + $0x118] sm:$0xff] %v568_v35  ;;  %v570_v36 = vld [vmem:[%s7709_s11 + $0x480] sm:$0xff] }
  0x39   : > { %v572_v37 = vld [vmem:[%s7709_s11 + $0x4a0] sm:$0xff]  ;;  %571 = vst [vmem:[%s7714_s12 + $0x120] sm:$0xff] %v570_v36 }
  0x3a   : > { %v574_v38 = vld [vmem:[%s7709_s11 + $0x4c0] sm:$0xff]  ;;  %573 = vst [vmem:[%s7714_s12 + $0x128] sm:$0xff] %v572_v37 }
  0x3b   : > { %575 = vst [vmem:[%s7714_s12 + $0x130] sm:$0xff] %v574_v38  ;;  %v576_v39 = vld [vmem:[%s7709_s11 + $0x4e0] sm:$0xff] }
  0x3c   : > { %v578_v40 = vld [vmem:[%s7709_s11 + $0x500] sm:$0xff]  ;;  %577 = vst [vmem:[%s7714_s12 + $0x138] sm:$0xff] %v576_v39 }
  0x3d   : > { %v580_v41 = vld [vmem:[%s7709_s11 + $0x520] sm:$0xff]  ;;  %579 = vst [vmem:[%s7714_s12 + $0x140] sm:$0xff] %v578_v40 }
  0x3e   : > { %581 = vst [vmem:[%s7714_s12 + $0x148] sm:$0xff] %v580_v41  ;;  %v582_v42 = vld [vmem:[%s7709_s11 + $0x540] sm:$0xff] }
  0x3f   : > { %v584_v43 = vld [vmem:[%s7709_s11 + $0x560] sm:$0xff]  ;;  %583 = vst [vmem:[%s7714_s12 + $0x150] sm:$0xff] %v582_v42 }
  0x40   : > { %v586_v44 = vld [vmem:[%s7709_s11 + $0x580] sm:$0xff]  ;;  %585 = vst [vmem:[%s7714_s12 + $0x158] sm:$0xff] %v584_v43 }
  0x41   : > { %587 = vst [vmem:[%s7714_s12 + $0x160] sm:$0xff] %v586_v44  ;;  %v588_v45 = vld [vmem:[%s7709_s11 + $0x5a0] sm:$0xff] }
  0x42   : > { %v590_v46 = vld [vmem:[%s7709_s11 + $0x5c0] sm:$0xff]  ;;  %589 = vst [vmem:[%s7714_s12 + $0x168] sm:$0xff] %v588_v45 }
  0x43   : > { %v592_v47 = vld [vmem:[%s7709_s11 + $0x5e0] sm:$0xff]  ;;  %591 = vst [vmem:[%s7714_s12 + $0x170] sm:$0xff] %v590_v46 }
  0x44   : > { %593 = vst [vmem:[%s7714_s12 + $0x178] sm:$0xff] %v592_v47  ;;  %v594_v48 = vld [vmem:[%s7709_s11 + $0x600] sm:$0xff] }
  0x45   : > { %v596_v49 = vld [vmem:[%s7709_s11 + $0x620] sm:$0xff]  ;;  %595 = vst [vmem:[%s7714_s12 + $0x180] sm:$0xff] %v594_v48 }
  0x46   : > { %v598_v50 = vld [vmem:[%s7709_s11 + $0x640] sm:$0xff]  ;;  %597 = vst [vmem:[%s7714_s12 + $0x188] sm:$0xff] %v596_v49 }
  0x47   : > { %599 = vst [vmem:[%s7714_s12 + $0x190] sm:$0xff] %v598_v50  ;;  %v600_v51 = vld [vmem:[%s7709_s11 + $0x660] sm:$0xff] }
  0x48   : > { %v602_v52 = vld [vmem:[%s7709_s11 + $0x680] sm:$0xff]  ;;  %601 = vst [vmem:[%s7714_s12 + $0x198] sm:$0xff] %v600_v51 }
  0x49   : > { %v604_v53 = vld [vmem:[%s7709_s11 + $0x6a0] sm:$0xff]  ;;  %603 = vst [vmem:[%s7714_s12 + $0x1a0] sm:$0xff] %v602_v52 }
  0x4a   : > { %605 = vst [vmem:[%s7714_s12 + $0x1a8] sm:$0xff] %v604_v53  ;;  %v606_v54 = vld [vmem:[%s7709_s11 + $0x6c0] sm:$0xff] }
  0x4b   : > { %v608_v55 = vld [vmem:[%s7709_s11 + $0x6e0] sm:$0xff]  ;;  %607 = vst [vmem:[%s7714_s12 + $0x1b0] sm:$0xff] %v606_v54 }
  0x4c   : > { %v610_v56 = vld [vmem:[%s7709_s11 + $0x700] sm:$0xff]  ;;  %609 = vst [vmem:[%s7714_s12 + $0x1b8] sm:$0xff] %v608_v55 }
  0x4d   : > { %611 = vst [vmem:[%s7714_s12 + $0x1c0] sm:$0xff] %v610_v56  ;;  %v612_v57 = vld [vmem:[%s7709_s11 + $0x720] sm:$0xff] }
  0x4e   : > { %v614_v58 = vld [vmem:[%s7709_s11 + $0x740] sm:$0xff]  ;;  %613 = vst [vmem:[%s7714_s12 + $0x1c8] sm:$0xff] %v612_v57 }
  0x4f   : > { %v616_v59 = vld [vmem:[%s7709_s11 + $0x760] sm:$0xff]  ;;  %615 = vst [vmem:[%s7714_s12 + $0x1d0] sm:$0xff] %v614_v58 }
  0x50   : > { %617 = vst [vmem:[%s7714_s12 + $0x1d8] sm:$0xff] %v616_v59  ;;  %v618_v60 = vld [vmem:[%s7709_s11 + $0x780] sm:$0xff] }
  0x51   : > { %v620_v61 = vld [vmem:[%s7709_s11 + $0x7a0] sm:$0xff]  ;;  %619 = vst [vmem:[%s7714_s12 + $0x1e0] sm:$0xff] %v618_v60 }
  0x52   : > { %v622_v62 = vld [vmem:[%s7709_s11 + $0x7c0] sm:$0xff]  ;;  %621 = vst [vmem:[%s7714_s12 + $0x1e8] sm:$0xff] %v620_v61 }
  0x53   : > { %623 = vst [vmem:[%s7714_s12 + $0x1f0] sm:$0xff] %v622_v62  ;;  %v624_v63 = vld [vmem:[%s7709_s11 + $0x7e0] sm:$0xff] }
  0x54   : > { %v626_v0 = vld [vmem:[%s7709_s11 + $0x800] sm:$0xff]  ;;  %625 = vst [vmem:[%s7714_s12 + $0x1f8] sm:$0xff] %v624_v63 }
  0x55   : > { %v628_v1 = vld [vmem:[%s7709_s11 + $0x820] sm:$0xff]  ;;  %627 = vst [vmem:[%s7714_s12 + $0x200] sm:$0xff] %v626_v0 }
  0x56   : > { %629 = vst [vmem:[%s7714_s12 + $0x208] sm:$0xff] %v628_v1  ;;  %v630_v2 = vld [vmem:[%s7709_s11 + $0x840] sm:$0xff] }
  0x57   : > { %v632_v3 = vld [vmem:[%s7709_s11 + $0x860] sm:$0xff]  ;;  %631 = vst [vmem:[%s7714_s12 + $0x210] sm:$0xff] %v630_v2 }
  0x58   : > { %v634_v4 = vld [vmem:[%s7709_s11 + $0x880] sm:$0xff]  ;;  %633 = vst [vmem:[%s7714_s12 + $0x218] sm:$0xff] %v632_v3 }
  0x59   : > { %635 = vst [vmem:[%s7714_s12 + $0x220] sm:$0xff] %v634_v4  ;;  %v636_v5 = vld [vmem:[%s7709_s11 + $0x8a0] sm:$0xff] }
  0x5a   : > { %v638_v6 = vld [vmem:[%s7709_s11 + $0x8c0] sm:$0xff]  ;;  %637 = vst [vmem:[%s7714_s12 + $0x228] sm:$0xff] %v636_v5 }
  0x5b   : > { %v640_v7 = vld [vmem:[%s7709_s11 + $0x8e0] sm:$0xff]  ;;  %639 = vst [vmem:[%s7714_s12 + $0x230] sm:$0xff] %v638_v6 }
  0x5c   : > { %641 = vst [vmem:[%s7714_s12 + $0x238] sm:$0xff] %v640_v7  ;;  %v642_v8 = vld [vmem:[%s7709_s11 + $0x900] sm:$0xff] }
  0x5d   : > { %v644_v9 = vld [vmem:[%s7709_s11 + $0x920] sm:$0xff]  ;;  %643 = vst [vmem:[%s7714_s12 + $0x240] sm:$0xff] %v642_v8 }
  0x5e   : > { %v646_v10 = vld [vmem:[%s7709_s11 + $0x940] sm:$0xff]  ;;  %645 = vst [vmem:[%s7714_s12 + $0x248] sm:$0xff] %v644_v9 }
  0x5f   : > { %647 = vst [vmem:[%s7714_s12 + $0x250] sm:$0xff] %v646_v10  ;;  %v648_v11 = vld [vmem:[%s7709_s11 + $0x960] sm:$0xff] }
  0x60   : > { %v650_v12 = vld [vmem:[%s7709_s11 + $0x980] sm:$0xff]  ;;  %649 = vst [vmem:[%s7714_s12 + $0x258] sm:$0xff] %v648_v11 }
  0x61   : > { %v652_v13 = vld [vmem:[%s7709_s11 + $0x9a0] sm:$0xff]  ;;  %651 = vst [vmem:[%s7714_s12 + $0x260] sm:$0xff] %v650_v12 }
  0x62   : > { %653 = vst [vmem:[%s7714_s12 + $0x268] sm:$0xff] %v652_v13  ;;  %v654_v14 = vld [vmem:[%s7709_s11 + $0x9c0] sm:$0xff] }
  0x63   : > { %v656_v15 = vld [vmem:[%s7709_s11 + $0x9e0] sm:$0xff]  ;;  %655 = vst [vmem:[%s7714_s12 + $0x270] sm:$0xff] %v654_v14 }
  0x64   : > { %v658_v16 = vld [vmem:[%s7709_s11 + $0xa00] sm:$0xff]  ;;  %657 = vst [vmem:[%s7714_s12 + $0x278] sm:$0xff] %v656_v15 }
  0x65   : > { %659 = vst [vmem:[%s7714_s12 + $0x280] sm:$0xff] %v658_v16  ;;  %v660_v17 = vld [vmem:[%s7709_s11 + $0xa20] sm:$0xff] }
  0x66   : > { %v662_v18 = vld [vmem:[%s7709_s11 + $0xa40] sm:$0xff]  ;;  %661 = vst [vmem:[%s7714_s12 + $0x288] sm:$0xff] %v660_v17 }
  0x67   : > { %v664_v19 = vld [vmem:[%s7709_s11 + $0xa60] sm:$0xff]  ;;  %663 = vst [vmem:[%s7714_s12 + $0x290] sm:$0xff] %v662_v18 }
  0x68   : > { %665 = vst [vmem:[%s7714_s12 + $0x298] sm:$0xff] %v664_v19  ;;  %v666_v20 = vld [vmem:[%s7709_s11 + $0xa80] sm:$0xff] }
  0x69   : > { %v668_v21 = vld [vmem:[%s7709_s11 + $0xaa0] sm:$0xff]  ;;  %667 = vst [vmem:[%s7714_s12 + $0x2a0] sm:$0xff] %v666_v20 }
  0x6a   : > { %v670_v22 = vld [vmem:[%s7709_s11 + $0xac0] sm:$0xff]  ;;  %669 = vst [vmem:[%s7714_s12 + $0x2a8] sm:$0xff] %v668_v21 }
  0x6b   : > { %671 = vst [vmem:[%s7714_s12 + $0x2b0] sm:$0xff] %v670_v22  ;;  %v672_v23 = vld [vmem:[%s7709_s11 + $0xae0] sm:$0xff] }
  0x6c   : > { %v674_v24 = vld [vmem:[%s7709_s11 + $0xb00] sm:$0xff]  ;;  %673 = vst [vmem:[%s7714_s12 + $0x2b8] sm:$0xff] %v672_v23 }
  0x6d   : > { %v676_v25 = vld [vmem:[%s7709_s11 + $0xb20] sm:$0xff]  ;;  %675 = vst [vmem:[%s7714_s12 + $0x2c0] sm:$0xff] %v674_v24 }
  0x6e   : > { %677 = vst [vmem:[%s7714_s12 + $0x2c8] sm:$0xff] %v676_v25  ;;  %v678_v26 = vld [vmem:[%s7709_s11 + $0xb40] sm:$0xff] }
  0x6f   : > { %v680_v27 = vld [vmem:[%s7709_s11 + $0xb60] sm:$0xff]  ;;  %679 = vst [vmem:[%s7714_s12 + $0x2d0] sm:$0xff] %v678_v26 }
  0x70   : > { %v682_v28 = vld [vmem:[%s7709_s11 + $0xb80] sm:$0xff]  ;;  %681 = vst [vmem:[%s7714_s12 + $0x2d8] sm:$0xff] %v680_v27 }
  0x71   : > { %683 = vst [vmem:[%s7714_s12 + $0x2e0] sm:$0xff] %v682_v28  ;;  %v684_v29 = vld [vmem:[%s7709_s11 + $0xba0] sm:$0xff] }
  0x72   : > { %v686_v30 = vld [vmem:[%s7709_s11 + $0xbc0] sm:$0xff]  ;;  %685 = vst [vmem:[%s7714_s12 + $0x2e8] sm:$0xff] %v684_v29 }
  0x73   : > { %v688_v31 = vld [vmem:[%s7709_s11 + $0xbe0] sm:$0xff]  ;;  %687 = vst [vmem:[%s7714_s12 + $0x2f0] sm:$0xff] %v686_v30 }
  0x74   : > { %689 = vst [vmem:[%s7714_s12 + $0x2f8] sm:$0xff] %v688_v31  ;;  %v690_v32 = vld [vmem:[%s7709_s11 + $0xc00] sm:$0xff] }
  0x75   : > { %v692_v33 = vld [vmem:[%s7709_s11 + $0xc20] sm:$0xff]  ;;  %691 = vst [vmem:[%s7714_s12 + $0x300] sm:$0xff] %v690_v32 }
  0x76   : > { %v694_v34 = vld [vmem:[%s7709_s11 + $0xc40] sm:$0xff]  ;;  %693 = vst [vmem:[%s7714_s12 + $0x308] sm:$0xff] %v692_v33 }
  0x77   : > { %695 = vst [vmem:[%s7714_s12 + $0x310] sm:$0xff] %v694_v34  ;;  %v696_v35 = vld [vmem:[%s7709_s11 + $0xc60] sm:$0xff] }
  0x78   : > { %v698_v36 = vld [vmem:[%s7709_s11 + $0xc80] sm:$0xff]  ;;  %697 = vst [vmem:[%s7714_s12 + $0x318] sm:$0xff] %v696_v35 }
  0x79   : > { %v700_v37 = vld [vmem:[%s7709_s11 + $0xca0] sm:$0xff]  ;;  %699 = vst [vmem:[%s7714_s12 + $0x320] sm:$0xff] %v698_v36 }
  0x7a   : > { %701 = vst [vmem:[%s7714_s12 + $0x328] sm:$0xff] %v700_v37  ;;  %v702_v38 = vld [vmem:[%s7709_s11 + $0xcc0] sm:$0xff] }
  0x7b   : > { %v704_v39 = vld [vmem:[%s7709_s11 + $0xce0] sm:$0xff]  ;;  %703 = vst [vmem:[%s7714_s12 + $0x330] sm:$0xff] %v702_v38 }
  0x7c   : > { %v706_v40 = vld [vmem:[%s7709_s11 + $0xd00] sm:$0xff]  ;;  %705 = vst [vmem:[%s7714_s12 + $0x338] sm:$0xff] %v704_v39 }
  0x7d   : > { %707 = vst [vmem:[%s7714_s12 + $0x340] sm:$0xff] %v706_v40  ;;  %v708_v41 = vld [vmem:[%s7709_s11 + $0xd20] sm:$0xff] }
  0x7e   : > { %v710_v42 = vld [vmem:[%s7709_s11 + $0xd40] sm:$0xff]  ;;  %709 = vst [vmem:[%s7714_s12 + $0x348] sm:$0xff] %v708_v41 }
  0x7f   : > { %v712_v43 = vld [vmem:[%s7709_s11 + $0xd60] sm:$0xff]  ;;  %711 = vst [vmem:[%s7714_s12 + $0x350] sm:$0xff] %v710_v42 }
  0x80   : > { %713 = vst [vmem:[%s7714_s12 + $0x358] sm:$0xff] %v712_v43  ;;  %v714_v44 = vld [vmem:[%s7709_s11 + $0xd80] sm:$0xff] }
  0x81   : > { %v716_v45 = vld [vmem:[%s7709_s11 + $0xda0] sm:$0xff]  ;;  %715 = vst [vmem:[%s7714_s12 + $0x360] sm:$0xff] %v714_v44 }
  0x82   : > { %v718_v46 = vld [vmem:[%s7709_s11 + $0xdc0] sm:$0xff]  ;;  %717 = vst [vmem:[%s7714_s12 + $0x368] sm:$0xff] %v716_v45 }
  0x83   : > { %719 = vst [vmem:[%s7714_s12 + $0x370] sm:$0xff] %v718_v46  ;;  %v720_v47 = vld [vmem:[%s7709_s11 + $0xde0] sm:$0xff] }
  0x84   : > { %v722_v48 = vld [vmem:[%s7709_s11 + $0xe00] sm:$0xff]  ;;  %721 = vst [vmem:[%s7714_s12 + $0x378] sm:$0xff] %v720_v47 }
  0x85   : > { %v724_v49 = vld [vmem:[%s7709_s11 + $0xe20] sm:$0xff]  ;;  %723 = vst [vmem:[%s7714_s12 + $0x380] sm:$0xff] %v722_v48 }
  0x86   : > { %725 = vst [vmem:[%s7714_s12 + $0x388] sm:$0xff] %v724_v49  ;;  %v726_v50 = vld [vmem:[%s7709_s11 + $0xe40] sm:$0xff] }
  0x87   : > { %v728_v51 = vld [vmem:[%s7709_s11 + $0xe60] sm:$0xff]  ;;  %727 = vst [vmem:[%s7714_s12 + $0x390] sm:$0xff] %v726_v50 }
  0x88   : > { %v730_v52 = vld [vmem:[%s7709_s11 + $0xe80] sm:$0xff]  ;;  %729 = vst [vmem:[%s7714_s12 + $0x398] sm:$0xff] %v728_v51 }
  0x89   : > { %731 = vst [vmem:[%s7714_s12 + $0x3a0] sm:$0xff] %v730_v52  ;;  %v732_v53 = vld [vmem:[%s7709_s11 + $0xea0] sm:$0xff] }
  0x8a   : > { %v734_v54 = vld [vmem:[%s7709_s11 + $0xec0] sm:$0xff]  ;;  %733 = vst [vmem:[%s7714_s12 + $0x3a8] sm:$0xff] %v732_v53 }
  0x8b   : > { %v736_v55 = vld [vmem:[%s7709_s11 + $0xee0] sm:$0xff]  ;;  %735 = vst [vmem:[%s7714_s12 + $0x3b0] sm:$0xff] %v734_v54 }
  0x8c   : > { %737 = vst [vmem:[%s7714_s12 + $0x3b8] sm:$0xff] %v736_v55  ;;  %v738_v56 = vld [vmem:[%s7709_s11 + $0xf00] sm:$0xff] }
  0x8d   : > { %v740_v57 = vld [vmem:[%s7709_s11 + $0xf20] sm:$0xff]  ;;  %739 = vst [vmem:[%s7714_s12 + $0x3c0] sm:$0xff] %v738_v56 }
  0x8e   : > { %v742_v58 = vld [vmem:[%s7709_s11 + $0xf40] sm:$0xff]  ;;  %741 = vst [vmem:[%s7714_s12 + $0x3c8] sm:$0xff] %v740_v57 }
  0x8f   : > { %743 = vst [vmem:[%s7714_s12 + $0x3d0] sm:$0xff] %v742_v58  ;;  %v744_v59 = vld [vmem:[%s7709_s11 + $0xf60] sm:$0xff] }
  0x90   : > { %v746_v60 = vld [vmem:[%s7709_s11 + $0xf80] sm:$0xff]  ;;  %745 = vst [vmem:[%s7714_s12 + $0x3d8] sm:$0xff] %v744_v59 }
  0x91   : > { %v748_v61 = vld [vmem:[%s7709_s11 + $0xfa0] sm:$0xff]  ;;  %747 = vst [vmem:[%s7714_s12 + $0x3e0] sm:$0xff] %v746_v60 }
  0x92   : > { %749 = vst [vmem:[%s7714_s12 + $0x3e8] sm:$0xff] %v748_v61  ;;  %v750_v62 = vld [vmem:[%s7709_s11 + $0xfc0] sm:$0xff] }
  0x93   : > { %v752_v63 = vld [vmem:[%s7709_s11 + $0xfe0] sm:$0xff]  ;;  %751 = vst [vmem:[%s7714_s12 + $0x3f0] sm:$0xff] %v750_v62 }
  0x94   : > { %753 = vst [vmem:[%s7714_s12 + $0x3f8] sm:$0xff] %v752_v63 }
  0x95 PF: > { %p6443_p7 = scmp.ge.s32.totalorder %s7630_s23, 1  ;;  %p774_p8 = scmp.lt.s32.totalorder %s7630_s23, 5 }
  0x97   : > { %p775_p9 = pnand %p6443_p7, %p774_p8 }
  0x99   : > { %778 = sbr.rel (%p775_p9) target bundleno = 1413 (0x585), region = 78 }
  0xa0   : > { %s781_s13 = sand.u32 1, %s7622_s21   ;;  %v7975_v0 = vld [vmem:[%s10255_s0 + $0x8] sm:$0xff]  ;;  %v8146_v58 = vld [vmem:[%s10255_s0] sm:$0xff]  ;;  %s6445_s12 = sshll.u32 %s7684_s24, 1 }
  0xa1   : > { %v7980_v1 = vld [vmem:[%s10255_s0 + $0x28] sm:$0xff]  ;;  %s6444_s18 = sshll.u32 %s781_s13, 10  ;;  %v8151_v59 = vld [vmem:[%s10255_s0 + $0x20] sm:$0xff]  ;;  %p819_p10 = scmp.lt.s32.totalorder %s6445_s12, 7 }
  0xa2   : > { %v6449_v2 = vcombine.low %v7975_v0, %v7980_v1  ;;  %v6450_v3 = vcombine.high %v7975_v0, %v7980_v1  ;;  %s7988_s19 = scalar_lea.vmem [#allocation2], %s6444_s18  ;;  %v838_v53 = vld [vmem:[%s10255_s0 + $0x48] sm:$0xff]  ;;  %v6448_v61 = vcombine.high %v8146_v58, %v8151_v59  ;;  %s7366_s10 = smul.u32 584, %s781_s13 }
  0xa3   : > { %v7991_v4 = vld [vmem:[%s7988_s19 + $0x104] ss:$8 sps:$4 sm:$0xff]   ;;  %v7994_v5 = vld [vmem:[%s7988_s19 + $0x100] ss:$8 sps:$4 sm:$0xff]   ;;  %v7998_v6 = vld [vmem:[%s7988_s19 + $0x114] ss:$8 sps:$4 sm:$0xff]  }
  0xa4   : > { %3790 = vmatprep.mubr.bf16.mxu0 %v6450_v3  ;;  %3758 = vmatprep.subr.bf16.mxu0 %v7991_v4  ;;  %v8002_v7 = vld [vmem:[%s7988_s19 + $0x110] ss:$8 sps:$4 sm:$0xff]   ;;  %v8006_v8 = vld [vmem:[%s7988_s19 + $0x124] ss:$8 sps:$4 sm:$0xff]   ;;  %v8010_v9 = vld [vmem:[%s7988_s19 + $0x120] ss:$8 sps:$4 sm:$0xff]  }
  0xa5   : > { %3759 = vmatpush1.bf16.msra.mxu0 %v7994_v5  ;;  %v8014_v10 = vld [vmem:[%s7988_s19 + $0x134] ss:$8 sps:$4 sm:$0xff]   ;;  %v8018_v11 = vld [vmem:[%s7988_s19 + $0x130] ss:$8 sps:$4 sm:$0xff]   ;;  %v8022_v12 = vld [vmem:[%s7988_s19 + $0x144] ss:$8 sps:$4 sm:$0xff]   ;;  %3389 = vmatprep.mubr.bf16.mxu1 %v6448_v61 }
  0xa6   : > { %3760 = vmatprep.subr.bf16.mxu0 %v7998_v6  ;;  %v8026_v13 = vld [vmem:[%s7988_s19 + $0x140] ss:$8 sps:$4 sm:$0xff]   ;;  %v8030_v14 = vld [vmem:[%s7988_s19 + $0x154] ss:$8 sps:$4 sm:$0xff]   ;;  %v8034_v15 = vld [vmem:[%s7988_s19 + $0x150] ss:$8 sps:$4 sm:$0xff]  }
  0xa7   : > { %v8038_v16 = vld [vmem:[%s7988_s19 + $0x164] ss:$8 sps:$4 sm:$0xff]   ;;  %v8042_v17 = vld [vmem:[%s7988_s19 + $0x160] ss:$8 sps:$4 sm:$0xff]   ;;  %v8046_v18 = vld [vmem:[%s7988_s19 + $0x174] ss:$8 sps:$4 sm:$0xff]  }
  0xa8   : > { %v7449_v19 = vld [vmem:[%s7988_s19 + $0x4] ss:$8 sps:$4 sm:$0xff]   ;;  %v7451_v20 = vld [vmem:[%s7988_s19] ss:$8 sps:$4 sm:$0xff]   ;;  %v8052_v21 = vld [vmem:[%s7988_s19 + $0x170] ss:$8 sps:$4 sm:$0xff]  }
  0xa9   : > { %3761 = vmatpush1.bf16.msra.mxu0 %v8002_v7  ;;  %v7452_v22 = vld [vmem:[%s7988_s19 + $0x14] ss:$8 sps:$4 sm:$0xff]   ;;  %v8057_v23 = vld [vmem:[%s7988_s19 + $0x184] ss:$8 sps:$4 sm:$0xff]   ;;  %3357 = vmatprep.subr.bf16.mxu1 %v7449_v19  ;;  %v7454_v24 = vld [vmem:[%s7988_s19 + $0x10] ss:$8 sps:$4 sm:$0xff]  }
  0xaa   : > { %3762 = vmatprep.subr.bf16.mxu0 %v8006_v8  ;;  %3358 = vmatpush1.bf16.msra.mxu1 %v7451_v20  ;;  %v7458_v25 = vld [vmem:[%s7988_s19 + $0x24] ss:$8 sps:$4 sm:$0xff]   ;;  %v8063_v26 = vld [vmem:[%s7988_s19 + $0x180] ss:$8 sps:$4 sm:$0xff]   ;;  %v8067_v27 = vld [vmem:[%s7988_s19 + $0x194] ss:$8 sps:$4 sm:$0xff]  }
  0xab   : > { %3359 = vmatprep.subr.bf16.mxu1 %v7452_v22  ;;  %v7460_v28 = vld [vmem:[%s7988_s19 + $0x20] ss:$8 sps:$4 sm:$0xff]   ;;  %v7461_v29 = vld [vmem:[%s7988_s19 + $0x34] ss:$8 sps:$4 sm:$0xff]   ;;  %v8073_v30 = vld [vmem:[%s7988_s19 + $0x190] ss:$8 sps:$4 sm:$0xff]  }
  0xac   : > { %v8077_v31 = vld [vmem:[%s7988_s19 + $0x1a4] ss:$8 sps:$4 sm:$0xff]   ;;  %v7463_v32 = vld [vmem:[%s7988_s19 + $0x30] ss:$8 sps:$4 sm:$0xff]   ;;  %v8083_v34 = vld [vmem:[%s7988_s19 + $0x1a0] ss:$8 sps:$4 sm:$0xff]  }
  0xad   : > { %3763 = vmatpush1.bf16.msra.mxu0 %v8010_v9  ;;  %v7467_v33 = vld [vmem:[%s7988_s19 + $0x44] ss:$8 sps:$4 sm:$0xff]   ;;  %v8087_v35 = vld [vmem:[%s7988_s19 + $0x1b4] ss:$8 sps:$4 sm:$0xff]   ;;  %v7469_v36 = vld [vmem:[%s7988_s19 + $0x40] ss:$8 sps:$4 sm:$0xff]  }
  0xae   : > { %3764 = vmatprep.subr.bf16.mxu0 %v8014_v10  ;;  %3360 = vmatpush1.bf16.msra.mxu1 %v7454_v24  ;;  %v7470_v37 = vld [vmem:[%s7988_s19 + $0x54] ss:$8 sps:$4 sm:$0xff]   ;;  %v8093_v38 = vld [vmem:[%s7988_s19 + $0x1b0] ss:$8 sps:$4 sm:$0xff]   ;;  %v8097_v39 = vld [vmem:[%s7988_s19 + $0x1c4] ss:$8 sps:$4 sm:$0xff]  }
  0xaf   : > { %3361 = vmatprep.subr.bf16.mxu1 %v7458_v25  ;;  %v7472_v40 = vld [vmem:[%s7988_s19 + $0x50] ss:$8 sps:$4 sm:$0xff]   ;;  %v7473_v41 = vld [vmem:[%s7988_s19 + $0x64] ss:$8 sps:$4 sm:$0xff]   ;;  %v8103_v42 = vld [vmem:[%s7988_s19 + $0x1c0] ss:$8 sps:$4 sm:$0xff]  }
  0xb0   : > { %v8107_v43 = vld [vmem:[%s7988_s19 + $0x1d4] ss:$8 sps:$4 sm:$0xff]   ;;  %v7478_v44 = vld [vmem:[%s7988_s19 + $0x60] ss:$8 sps:$4 sm:$0xff]   ;;  %v8113_v46 = vld [vmem:[%s7988_s19 + $0x1d0] ss:$8 sps:$4 sm:$0xff]  }
  0xb1   : > { %3765 = vmatpush1.bf16.msra.mxu0 %v8018_v11  ;;  %v7479_v45 = vld [vmem:[%s7988_s19 + $0x74] ss:$8 sps:$4 sm:$0xff]   ;;  %v8117_v47 = vld [vmem:[%s7988_s19 + $0x1e4] ss:$8 sps:$4 sm:$0xff]   ;;  %v7481_v48 = vld [vmem:[%s7988_s19 + $0x70] ss:$8 sps:$4 sm:$0xff]  }
  0xb2   : > { %3766 = vmatprep.subr.bf16.mxu0 %v8022_v12  ;;  %3362 = vmatpush1.bf16.msra.mxu1 %v7460_v28  ;;  %v7482_v49 = vld [vmem:[%s7988_s19 + $0x84] ss:$8 sps:$4 sm:$0xff]   ;;  %v8123_v50 = vld [vmem:[%s7988_s19 + $0x1e0] ss:$8 sps:$4 sm:$0xff]   ;;  %v8127_v51 = vld [vmem:[%s7988_s19 + $0x1f4] ss:$8 sps:$4 sm:$0xff]  }
  0xb3   : > { %3363 = vmatprep.subr.bf16.mxu1 %v7461_v29  ;;  %v7484_v52 = vld [vmem:[%s7988_s19 + $0x80] ss:$8 sps:$4 sm:$0xff]   ;;  %v7488_v55 = vld [vmem:[%s7988_s19 + $0x94] ss:$8 sps:$4 sm:$0xff]   ;;  %v8139_v56 = vld [vmem:[%s7988_s19 + $0x1f0] ss:$8 sps:$4 sm:$0xff]  }
  0xb4   : > { %v842_v54 = vld [vmem:[%s10255_s0 + $0x68] sm:$0xff]  ;;  %v7490_v60 = vld [vmem:[%s7988_s19 + $0x90] ss:$8 sps:$4 sm:$0xff]   ;;  %v7445_v19 = vld [vmem:[%s7988_s19 + $0x214] ss:$8 sps:$4 sm:$0xff]   ;;  %s10478_s12 = smov (!%p819_p10, %s6445_s12), 7 }
  0xb5   : > { %3767 = vmatpush1.bf16.msra.mxu0 %v8026_v13  ;;  %v7442_v57 = vld [vmem:[%s7988_s19 + $0x204] ss:$8 sps:$4 sm:$0xff]   ;;  %v7440_v63 = vld [vmem:[%s7988_s19 + $0x200] ss:$8 sps:$4 sm:$0xff]   ;;  %v6458_v3 = vcombine.high %v838_v53, %v842_v54  ;;  %v7497_v22 = vld [vmem:[%s7988_s19 + $0xb4] ss:$8 sps:$4 sm:$0xff]   ;;  %s821_s30 = scalar_lea.vmem %s10257_s2, %s10478_s12  ;;  %s826_s9 = scalar_lea.vmem %s10258_s3, %s10478_s12 }
  0xb6   : > { %3768 = vmatprep.subr.bf16.mxu0 %v8030_v14  ;;  %3364 = vmatpush1.bf16.msra.mxu1 %v7463_v32  ;;  %v7491_v62 = vld [vmem:[%s7988_s19 + $0xa4] ss:$8 sps:$4 sm:$0xff]   ;;  %v7493_v20 = vld [vmem:[%s7988_s19 + $0xa0] ss:$8 sps:$4 sm:$0xff]   ;;  %v7443_v24 = vld [vmem:[%s7988_s19 + $0x210] ss:$8 sps:$4 sm:$0xff]  }
  0xb7   : > { %3365 = vmatprep.subr.bf16.mxu1 %v7467_v33  ;;  %v846_v25 = vld [vmem:[%s10255_s0 + $0x88] sm:$0xff]  ;;  %v7499_v1 = vld [vmem:[%s7988_s19 + $0xb0] ss:$8 sps:$4 sm:$0xff]   ;;  %s9850_s21 = scalar_lea.vmem [#allocation3], %s7366_s10  ;;  %s6888_s13 = sshll.u32 (%p7699_p5), %s7684_s24, 3 }
  0xb8   : > { %v850_v28 = vld [vmem:[%s10255_s0 + $0xa8] sm:$0xff]  ;;  %s10100_s16 = scalar_lea.vmem (%p7699_p5), %s10261_s6, %s6888_s13 }
  0xb9   : > { %3769 = vmatpush1.bf16.msra.mxu0 %v8034_v15  ;;  %v7448_v0 = vld [vmem:[%s7988_s19 + $0x224] ss:$8 sps:$4 sm:$0xff]   ;;  %v6466_v32 = vcombine.high %v846_v25, %v850_v28  ;;  %v7446_v33 = vld [vmem:[%s7988_s19 + $0x220] ss:$8 sps:$4 sm:$0xff]  }
  0xba   : > { %3770 = vmatprep.subr.bf16.mxu0 %v8038_v16  ;;  %3366 = vmatpush1.bf16.msra.mxu1 %v7469_v36  ;;  %v7500_v29 = vld [vmem:[%s7988_s19 + $0xc4] ss:$8 sps:$4 sm:$0xff]   ;;  %v7457_v36 = vld [vmem:[%s7988_s19 + $0x234] ss:$8 sps:$4 sm:$0xff]  }
  0xbb   : > { %3367 = vmatprep.subr.bf16.mxu1 %v7470_v37  ;;  %v7502_v37 = vld [vmem:[%s7988_s19 + $0xc0] ss:$8 sps:$4 sm:$0xff]  }
  0xbc   : > { %v862_v61 = vld [vmem:[%s10255_s0 + $0x108] sm:$0xff] }
  0xbd   : > { %3771 = vmatpush1.bf16.msra.mxu0 %v8042_v17 }
  0xbe   : > { %3772 = vmatprep.subr.bf16.mxu0 %v8046_v18  ;;  %3368 = vmatpush1.bf16.msra.mxu1 %v7472_v40  ;;  %v7503_v40 = vld [vmem:[%s7988_s19 + $0xd4] ss:$8 sps:$4 sm:$0xff]  }
  0xbf   : > { %3369 = vmatprep.subr.bf16.mxu1 %v7473_v41  ;;  %v7455_v41 = vld [vmem:[%s7988_s19 + $0x230] ss:$8 sps:$4 sm:$0xff]  }
  0xc1   : > { %3773 = vmatpush1.bf16.msra.mxu0 %v8052_v21 }
  0xc2   : > { %3774 = vmatprep.subr.bf16.mxu0 %v8057_v23  ;;  %3370 = vmatpush1.bf16.msra.mxu1 %v7478_v44  ;;  %v854_v44 = vld [vmem:[%s10255_s0 + $0xc8] sm:$0xff] }
  0xc3   : > { %3371 = vmatprep.subr.bf16.mxu1 %v7479_v45  ;;  %v858_v45 = vld [vmem:[%s10255_s0 + $0xe8] sm:$0xff] }
  0xc5   : > { %3775 = vmatpush1.bf16.msra.mxu0 %v8063_v26 }
  0xc6   : > { %3776 = vmatprep.subr.bf16.mxu0 %v8067_v27  ;;  %3372 = vmatpush1.bf16.msra.mxu1 %v7481_v48  ;;  %v7466_v48 = vld [vmem:[%s7988_s19 + $0x244] ss:$8 sps:$4 sm:$0xff]  }
  0xc7   : > { %3373 = vmatprep.subr.bf16.mxu1 %v7482_v49  ;;  %v7464_v49 = vld [vmem:[%s7988_s19 + $0x240] ss:$8 sps:$4 sm:$0xff]  }
  0xc9   : > { %3777 = vmatpush1.bf16.msra.mxu0 %v8073_v30 }
  0xca   : > { %3778 = vmatprep.subr.bf16.mxu0 %v8077_v31  ;;  %3374 = vmatpush1.bf16.msra.mxu1 %v7484_v52  ;;  %v7508_v52 = vld [vmem:[%s7988_s19 + $0xd0] ss:$8 sps:$4 sm:$0xff]  }
  0xcb   : > { %3375 = vmatprep.subr.bf16.mxu1 %v7488_v55  ;;  %v7509_v55 = vld [vmem:[%s7988_s19 + $0xe4] ss:$8 sps:$4 sm:$0xff]  }
  0xcd   : > { %3779 = vmatpush1.bf16.msra.mxu0 %v8083_v34 }
  0xce   : > { %3780 = vmatprep.subr.bf16.mxu0 %v8087_v35  ;;  %3376 = vmatpush1.bf16.msra.mxu1 %v7490_v60  ;;  %v7511_v60 = vld [vmem:[%s7988_s19 + $0xe0] ss:$8 sps:$4 sm:$0xff]  }
  0xcf   : > { %3377 = vmatprep.subr.bf16.mxu1 %v7491_v62  ;;  %v866_v62 = vld [vmem:[%s10255_s0 + $0x128] sm:$0xff] }
  0xd1   : > { %3781 = vmatpush1.bf16.msra.mxu0 %v8093_v38 }
  0xd2   : > { %3782 = vmatprep.subr.bf16.mxu0 %v8097_v39  ;;  %3378 = vmatpush1.bf16.msra.mxu1 %v7493_v20  ;;  %v7514_v20 = vld [vmem:[%s7988_s19 + $0xf0] ss:$8 sps:$4 sm:$0xff]  }
  0xd3   : > { %3379 = vmatprep.subr.bf16.mxu1 %v7497_v22  ;;  %v837_v22 = vld [vmem:[%s10255_s0 + $0x40] sm:$0xff] }
  0xd5   : > { %3783 = vmatpush1.bf16.msra.mxu0 %v8103_v42 }
  0xd6   : > { %3784 = vmatprep.subr.bf16.mxu0 %v8107_v43  ;;  %3380 = vmatpush1.bf16.msra.mxu1 %v7499_v1  ;;  %v6482_v1 = vcombine.high %v862_v61, %v866_v62 }
  0xd7   : > { %3381 = vmatprep.subr.bf16.mxu1 %v7500_v29 }
  0xd9   : > { %3785 = vmatpush1.bf16.msra.mxu0 %v8113_v46 }
  0xda   : > { %3786 = vmatprep.subr.bf16.mxu0 %v8117_v47  ;;  %3382 = vmatpush1.bf16.msra.mxu1 %v7502_v37  ;;  %v7507_v37 = vld [vmem:[%s7988_s19 + $0x284] ss:$8 sps:$4 sm:$0xff]  }
  0xdb   : > { %3383 = vmatprep.subr.bf16.mxu1 %v7503_v40  ;;  %v6481_v40 = vcombine.low %v862_v61, %v866_v62  ;;  %v7521_v62 = vld [vmem:[%s7988_s19 + $0x2b0] ss:$8 sps:$4 sm:$0xff]  }
  0xdd   : > { %3787 = vmatpush1.bf16.msra.mxu0 %v8123_v50 }
  0xde   : > { %3788 = vmatprep.subr.bf16.mxu0 %v8127_v51  ;;  %3384 = vmatpush1.bf16.msra.mxu1 %v7508_v52  ;;  %v7515_v52 = vld [vmem:[%s7988_s19 + $0x290] ss:$8 sps:$4 sm:$0xff]  }
  0xdf   : > { %3385 = vmatprep.subr.bf16.mxu1 %v7509_v55 }
  0xe1   : > { %3789 = vmatpush1.bf16.msra.mxu0 %v8139_v56 }
  0xe2   : > { %4159 = vmatprep.subr.bf16.mxu0 %v7442_v57  ;;  %v6474_v57 = vcombine.high %v854_v44, %v858_v45  ;;  %3386 = vmatpush1.bf16.msra.mxu1 %v7511_v60 }
  0xe4   : > { %3791 = vmatmul.mubr.bf16.vlgmr.msra.gmra.mrb[0].mxu0 %v6449_v2  ;;  %v6457_v2 = vcombine.low %v838_v53, %v842_v54  ;;  %v6465_v53 = vcombine.low %v846_v25, %v850_v28  ;;  %v7477_v54 = vld [vmem:[%s7988_s19 + $0x254] ss:$8 sps:$4 sm:$0xff]   ;;  %v7485_v25 = vld [vmem:[%s7988_s19 + $0x260] ss:$8 sps:$4 sm:$0xff]   ;;  %v6473_v28 = vcombine.low %v854_v44, %v858_v45 }
  0xe5   : > { %4160 = vmatpush1.bf16.msra.mxu0 %v7440_v63  ;;  %3800 = vmatprep.mubr.bf16.mxu0 %v6458_v3  ;;  %v7475_v63 = vld [vmem:[%s7988_s19 + $0x250] ss:$8 sps:$4 sm:$0xff]   ;;  %v7487_v3 = vld [vmem:[%s7988_s19 + $0x264] ss:$8 sps:$4 sm:$0xff]  }
  0xe6   : > { %4161 = vmatprep.subr.bf16.mxu0 %v7445_v19  ;;  %v7512_v19 = vld [vmem:[%s7988_s19 + $0xf4] ss:$8 sps:$4 sm:$0xff]  }
  0xe7   : > { %3387 = vmatprep.subr.bf16.mxu1 %v7512_v19 }
  0xe8   : > { %3388 = vmatpush1.bf16.msra.mxu1 %v7514_v20  ;;  %v7524_v20 = vld [vmem:[%s7988_s19 + $0x2c0] ss:$8 sps:$4 sm:$0xff]  }
  0xe9   : > { %4162 = vmatpush1.bf16.msra.mxu0 %v7443_v24  ;;  %v841_v24 = vld [vmem:[%s10255_s0 + $0x60] sm:$0xff]  ;;  %6892 = vmatprep.subr.bf16.mxu1 %v7991_v4 }
  0xea   : > { %4163 = vmatprep.subr.bf16.mxu0 %v7448_v0  ;;  %v7496_v0 = vld [vmem:[%s7988_s19 + $0x274] ss:$8 sps:$4 sm:$0xff]   ;;  %v6456_v29 = vcombine.high %v837_v22, %v841_v24  ;;  %v7505_v4 = vld [vmem:[%s7988_s19 + $0x280] ss:$8 sps:$4 sm:$0xff]   ;;  %v6455_v45 = vcombine.low %v837_v22, %v841_v24 }
  0xeb   : > { %v7529_v24 = vld [vmem:[%s7988_s19 + $0x2d4] ss:$8 sps:$4 sm:$0xff]  }
  0xec   : > { %3801 = vmatmul.mubr.bf16.gmra.mrb[4].mxu0 %v6457_v2  ;;  %v6447_v2 = vcombine.low %v8146_v58, %v8151_v59  ;;  %v845_v58 = vld [vmem:[%s10255_s0 + $0x80] sm:$0xff] }
  0xed   : > { %3810 = vmatprep.mubr.bf16.mxu0 %v6466_v32  ;;  %4164 = vmatpush1.bf16.msra.mxu0 %v7446_v33  ;;  %v870_v32 = vld [vmem:[%s10255_s0 + $0x148] sm:$0xff]  ;;  %v849_v59 = vld [vmem:[%s10255_s0 + $0xa0] sm:$0xff] }
  0xee   : > { %4165 = vmatprep.subr.bf16.mxu0 %v7457_v36  ;;  %v874_v33 = vld [vmem:[%s10255_s0 + $0x168] sm:$0xff]  ;;  %v7494_v36 = vld [vmem:[%s7988_s19 + $0x270] ss:$8 sps:$4 sm:$0xff]   ;;  %3390 = vmatmul.mubr.bf16.vlgmr.msra.gmra.mrb[0].mxu1 %v6447_v2  ;;  %v6463_v60 = vcombine.low %v845_v58, %v849_v59 }
  0xef   : > { %3399 = vmatprep.mubr.bf16.mxu1 %v6456_v29  ;;  %6908 = vmatpush1.bf16.msra.mxu1 %v7994_v5  ;;  %v6490_v44 = vcombine.high %v870_v32, %v874_v33  ;;  %v882_v5 = vld [vmem:[%s10255_s0 + $0x1a8] sm:$0xff]  ;;  %v6489_v55 = vcombine.low %v870_v32, %v874_v33  ;;  %v7535_v33 = vld [vmem:[%s7988_s19 + $0x2f4] ss:$8 sps:$4 sm:$0xff]  }
  0xf0   : > { %6893 = vmatprep.subr.bf16.mxu1 %v7998_v6  ;;  %v7520_v6 = vld [vmem:[%s7988_s19 + $0x2a4] ss:$8 sps:$4 sm:$0xff]   ;;  %v7530_v29 = vld [vmem:[%s7988_s19 + $0x2e0] ss:$8 sps:$4 sm:$0xff]  }
  0xf1   : > { %4166 = vmatpush1.bf16.msra.mxu0 %v7455_v41  ;;  %v7517_v41 = vld [vmem:[%s7988_s19 + $0x294] ss:$8 sps:$4 sm:$0xff]  }
  0xf2   : > { %4167 = vmatprep.subr.bf16.mxu0 %v7466_v48  ;;  %v6464_v48 = vcombine.high %v845_v58, %v849_v59  ;;  %v7538_v58 = vld [vmem:[%s7988_s19 + $0x304] ss:$8 sps:$4 sm:$0xff]  }
  0xf3   : > { %6909 = vmatpush1.bf16.msra.mxu1 %v8002_v7  ;;  %v853_v7 = vld [vmem:[%s10255_s0 + $0xc0] sm:$0xff] }
  0xf4   : > { %3811 = vmatmul.mubr.bf16.gmra.mrb[8].mxu0 %v6465_v53  ;;  %6894 = vmatprep.subr.bf16.mxu1 %v8006_v8  ;;  %v857_v53 = vld [vmem:[%s10255_s0 + $0xe0] sm:$0xff]  ;;  %v7523_v8 = vld [vmem:[%s7988_s19 + $0x2b4] ss:$8 sps:$4 sm:$0xff]  }
  0xf5   : > { %3820 = vmatprep.mubr.bf16.mxu0 %v6474_v57  ;;  %4168 = vmatpush1.bf16.msra.mxu0 %v7464_v49  ;;  %v878_v49 = vld [vmem:[%s10255_s0 + $0x188] sm:$0xff]  ;;  %v6472_v61 = vcombine.high %v853_v7, %v857_v53  ;;  %v6471_v22 = vcombine.low %v853_v7, %v857_v53  ;;  %v881_v59 = vld [vmem:[%s10255_s0 + $0x1a0] sm:$0xff] }
  0xf6   : > { %4169 = vmatprep.subr.bf16.mxu0 %v7477_v54  ;;  %3400 = vmatmul.mubr.bf16.gmra.mrb[4].mxu1 %v6455_v45  ;;  %v7518_v54 = vld [vmem:[%s7988_s19 + $0x2a0] ss:$8 sps:$4 sm:$0xff]   ;;  %v6498_v57 = vcombine.high %v878_v49, %v882_v5 }
  0xf7   : > { %3409 = vmatprep.mubr.bf16.mxu1 %v6464_v48  ;;  %6910 = vmatpush1.bf16.msra.mxu1 %v8010_v9  ;;  %v886_v9 = vld [vmem:[%s10255_s0 + $0x1c8] sm:$0xff] }
  0xf8   : > { %6895 = vmatprep.subr.bf16.mxu1 %v8014_v10  ;;  %v890_v10 = vld [vmem:[%s10255_s0 + $0x1e8] sm:$0xff] }
  0xf9   : > { %4170 = vmatpush1.bf16.msra.mxu0 %v7475_v63  ;;  %v7526_v63 = vld [vmem:[%s7988_s19 + $0x2c4] ss:$8 sps:$4 sm:$0xff]   ;;  %v6506_v19 = vcombine.high %v886_v9, %v890_v10 }
  0xfa   : > { %4171 = vmatprep.subr.bf16.mxu0 %v7487_v3  ;;  %v865_v3 = vld [vmem:[%s10255_s0 + $0x120] sm:$0xff]  ;;  %v930_v53 = vld [vmem:[%s10255_s0 + $0x328] sm:$0xff] }
  0xfb   : > { %6911 = vmatpush1.bf16.msra.mxu1 %v8018_v11  ;;  %v6497_v11 = vcombine.low %v878_v49, %v882_v5  ;;  %v922_v5 = vld [vmem:[%s10255_s0 + $0x2e8] sm:$0xff] }
  0xfc   : > { %3821 = vmatmul.mubr.bf16.gmra.mrb[12].mxu0 %v6473_v28  ;;  %6896 = vmatprep.subr.bf16.mxu1 %v8022_v12  ;;  %v861_v12 = vld [vmem:[%s10255_s0 + $0x100] sm:$0xff]  ;;  %v898_v28 = vld [vmem:[%s10255_s0 + $0x228] sm:$0xff] }
  0xfd   : > { %3830 = vmatprep.mubr.bf16.mxu0 %v6482_v1  ;;  %4172 = vmatpush1.bf16.msra.mxu0 %v7485_v25  ;;  %v7527_v25 = vld [vmem:[%s7988_s19 + $0x2d0] ss:$8 sps:$4 sm:$0xff]   ;;  %v873_v1 = vld [vmem:[%s10255_s0 + $0x160] sm:$0xff]  ;;  %v6479_v32 = vcombine.low %v861_v12, %v865_v3 }
  0xfe   : > { %4173 = vmatprep.subr.bf16.mxu0 %v7496_v0  ;;  %3410 = vmatmul.mubr.bf16.gmra.mrb[8].mxu1 %v6463_v60  ;;  %v7532_v0 = vld [vmem:[%s7988_s19 + $0x2e4] ss:$8 sps:$4 sm:$0xff]  }
  0xff   : > { %3419 = vmatprep.mubr.bf16.mxu1 %v6472_v61  ;;  %6912 = vmatpush1.bf16.msra.mxu1 %v8026_v13  ;;  %v6480_v13 = vcombine.high %v861_v12, %v865_v3  ;;  %v917_v12 = vld [vmem:[%s10255_s0 + $0x2c0] sm:$0xff] }
 0x100   : > { %6897 = vmatprep.subr.bf16.mxu1 %v8030_v14  ;;  %v894_v14 = vld [vmem:[%s10255_s0 + $0x208] sm:$0xff]  ;;  %v921_v3 = vld [vmem:[%s10255_s0 + $0x2e0] sm:$0xff] }
 0x101   : > { %4174 = vmatpush1.bf16.msra.mxu0 %v7494_v36  ;;  %v6514_v2 = vcombine.high %v894_v14, %v898_v28  ;;  %v7533_v36 = vld [vmem:[%s7988_s19 + $0x2f0] ss:$8 sps:$4 sm:$0xff]  }
 0x102   : > { %4175 = vmatprep.subr.bf16.mxu0 %v7507_v37  ;;  %v906_v37 = vld [vmem:[%s10255_s0 + $0x268] sm:$0xff] }
 0x103   : > { %6913 = vmatpush1.bf16.msra.mxu1 %v8034_v15  ;;  %v6505_v15 = vcombine.low %v886_v9, %v890_v10  ;;  %v942_v10 = vld [vmem:[%s10255_s0 + $0x388] sm:$0xff] }
 0x104   : > { %3831 = vmatmul.mubr.bf16.gmra.mrb[16].mxu0 %v6481_v40  ;;  %6898 = vmatprep.subr.bf16.mxu1 %v8038_v16  ;;  %v869_v16 = vld [vmem:[%s10255_s0 + $0x140] sm:$0xff] }
 0x105   : > { %3840 = vmatprep.mubr.bf16.mxu0 %v6490_v44  ;;  %4176 = vmatpush1.bf16.msra.mxu0 %v7505_v4  ;;  %v6487_v40 = vcombine.low %v869_v16, %v873_v1  ;;  %v914_v44 = vld [vmem:[%s10255_s0 + $0x2a8] sm:$0xff] }
 0x106   : > { %4177 = vmatprep.subr.bf16.mxu0 %v7517_v41  ;;  %3420 = vmatmul.mubr.bf16.gmra.mrb[12].mxu1 %v6471_v22  ;;  %v6536_v22 = vcombine.high %v917_v12, %v921_v3 }
 0x107   : > { %3429 = vmatprep.mubr.bf16.mxu1 %v6480_v13  ;;  %6914 = vmatpush1.bf16.msra.mxu1 %v8042_v17  ;;  %v6488_v17 = vcombine.high %v869_v16, %v873_v1  ;;  %v954_v13 = vld [vmem:[%s10255_s0 + $0x3e8] sm:$0xff] }
 0x108   : > { %6899 = vmatprep.subr.bf16.mxu1 %v8046_v18  ;;  %v902_v18 = vld [vmem:[%s10255_s0 + $0x248] sm:$0xff] }
 0x109   : > { %4178 = vmatpush1.bf16.msra.mxu0 %v7515_v52  ;;  %v6522_v4 = vcombine.high %v902_v18, %v906_v37  ;;  %v958_v1 = vld [vmem:[%s10255_s0 + $0x408] sm:$0xff] }
 0x10a   : > { %4179 = vmatprep.subr.bf16.mxu0 %v7520_v6 }
 0x10b   : > { %6915 = vmatpush1.bf16.msra.mxu1 %v8052_v21  ;;  %v6513_v21 = vcombine.low %v894_v14, %v898_v28  ;;  %v925_v14 = vld [vmem:[%s10255_s0 + $0x300] sm:$0xff] }
 0x10c   : > { %3841 = vmatmul.mubr.bf16.gmra.mrb[20].mxu0 %v6489_v55  ;;  %6900 = vmatprep.subr.bf16.mxu1 %v8057_v23  ;;  %v877_v23 = vld [vmem:[%s10255_s0 + $0x180] sm:$0xff] }
 0x10d   : > { %3850 = vmatprep.mubr.bf16.mxu0 %v6498_v57  ;;  %4180 = vmatpush1.bf16.msra.mxu0 %v7518_v54  ;;  %v6496_v41 = vcombine.high %v877_v23, %v881_v59  ;;  %v6495_v48 = vcombine.low %v877_v23, %v881_v59  ;;  %v938_v57 = vld [vmem:[%s10255_s0 + $0x368] sm:$0xff]  ;;  %v929_v28 = vld [vmem:[%s10255_s0 + $0x320] sm:$0xff] }
 0x10e   : > { %4181 = vmatprep.subr.bf16.mxu0 %v7523_v8  ;;  %3430 = vmatmul.mubr.bf16.gmra.mrb[16].mxu1 %v6479_v32  ;;  %v6544_v16 = vcombine.high %v925_v14, %v929_v28  ;;  %v933_v32 = vld [vmem:[%s10255_s0 + $0x340] sm:$0xff] }
 0x10f   : > { %3439 = vmatprep.mubr.bf16.mxu1 %v6488_v17  ;;  %6916 = vmatpush1.bf16.msra.mxu1 %v8063_v26  ;;  %v910_v26 = vld [vmem:[%s10255_s0 + $0x288] sm:$0xff]  ;;  %v941_v23 = vld [vmem:[%s10255_s0 + $0x380] sm:$0xff] }
 0x110   : > { %6901 = vmatprep.subr.bf16.mxu1 %v8067_v27  ;;  %v6521_v27 = vcombine.low %v902_v18, %v906_v37  ;;  %v6530_v45 = vcombine.high %v910_v26, %v914_v44  ;;  %v966_v37 = vld [vmem:[%s10255_s0 + $0x448] sm:$0xff]  ;;  %v945_v59 = vld [vmem:[%s10255_s0 + $0x3a0] sm:$0xff] }
 0x111   : > { %4182 = vmatpush1.bf16.msra.mxu0 %v7521_v62 }
 0x112   : > { %4183 = vmatprep.subr.bf16.mxu0 %v7526_v63  ;;  %v946_v63 = vld [vmem:[%s10255_s0 + $0x3a8] sm:$0xff] }
 0x113   : > { %6917 = vmatpush1.bf16.msra.mxu1 %v8073_v30  ;;  %v885_v30 = vld [vmem:[%s10255_s0 + $0x1c0] sm:$0xff] }
 0x114   : > { %3851 = vmatmul.mubr.bf16.gmra.mrb[24].mxu0 %v6497_v11  ;;  %6902 = vmatprep.subr.bf16.mxu1 %v8077_v31  ;;  %v889_v31 = vld [vmem:[%s10255_s0 + $0x1e0] sm:$0xff] }
 0x115   : > { %3860 = vmatprep.mubr.bf16.mxu0 %v6506_v19  ;;  %4184 = vmatpush1.bf16.msra.mxu0 %v7524_v20  ;;  %v6504_v49 = vcombine.high %v885_v30, %v889_v31  ;;  %v6503_v6 = vcombine.low %v885_v30, %v889_v31  ;;  %v6562_v19 = vcombine.high %v942_v10, %v946_v63  ;;  %v949_v30 = vld [vmem:[%s10255_s0 + $0x3c0] sm:$0xff] }
 0x116   : > { %4185 = vmatprep.subr.bf16.mxu0 %v7529_v24  ;;  %3440 = vmatmul.mubr.bf16.gmra.mrb[20].mxu1 %v6487_v40  ;;  %v950_v24 = vld [vmem:[%s10255_s0 + $0x3c8] sm:$0xff]  ;;  %v953_v31 = vld [vmem:[%s10255_s0 + $0x3e0] sm:$0xff] }
 0x117   : > { %3449 = vmatprep.mubr.bf16.mxu1 %v6496_v41  ;;  %6918 = vmatpush1.bf16.msra.mxu1 %v8083_v34  ;;  %v918_v34 = vld [vmem:[%s10255_s0 + $0x2c8] sm:$0xff]  ;;  %v6560_v41 = vcombine.high %v941_v23, %v945_v59 }
 0x118   : > { %6903 = vmatprep.subr.bf16.mxu1 %v8087_v35  ;;  %v6529_v35 = vcombine.low %v910_v26, %v914_v44  ;;  %v6538_v52 = vcombine.high %v918_v34, %v922_v5  ;;  %v974_v26 = vld [vmem:[%s10255_s0 + $0x488] sm:$0xff] }
 0x119   : > { %4186 = vmatpush1.bf16.msra.mxu0 %v7527_v25  ;;  %v6561_v25 = vcombine.low %v942_v10, %v946_v63  ;;  %v978_v44 = vld [vmem:[%s10255_s0 + $0x4a8] sm:$0xff]  ;;  %v977_v10 = vld [vmem:[%s10255_s0 + $0x4a0] sm:$0xff] }
 0x11a   : > { %4187 = vmatprep.subr.bf16.mxu0 %v7532_v0  ;;  %v6570_v0 = vcombine.high %v950_v24, %v954_v13 }
 0x11b   : > { %6919 = vmatpush1.bf16.msra.mxu1 %v8093_v38  ;;  %v893_v38 = vld [vmem:[%s10255_s0 + $0x200] sm:$0xff] }
 0x11c   : > { %3861 = vmatmul.mubr.bf16.gmra.mrb[28].mxu0 %v6505_v15  ;;  %6904 = vmatprep.subr.bf16.mxu1 %v8097_v39  ;;  %v897_v39 = vld [vmem:[%s10255_s0 + $0x220] sm:$0xff]  ;;  %v6535_v15 = vcombine.low %v917_v12, %v921_v3  ;;  %v7547_v12 = vld [vmem:[%s7988_s19 + $0x334] ss:$8 sps:$4 sm:$0xff]  }
 0x11d   : > { %3870 = vmatprep.mubr.bf16.mxu0 %v6514_v2  ;;  %4188 = vmatpush1.bf16.msra.mxu0 %v7530_v29  ;;  %v6512_v7 = vcombine.high %v893_v38, %v897_v39  ;;  %v6511_v55 = vcombine.low %v893_v38, %v897_v39  ;;  %v962_v2 = vld [vmem:[%s10255_s0 + $0x428] sm:$0xff]  ;;  %v6569_v29 = vcombine.low %v950_v24, %v954_v13  ;;  %v957_v38 = vld [vmem:[%s10255_s0 + $0x400] sm:$0xff]  ;;  %v859_v24 = vld [vmem:[%s10255_s0 + $0xf0] sm:$0xff] }
 0x11e   : > { %4189 = vmatprep.subr.bf16.mxu0 %v7535_v33  ;;  %3450 = vmatmul.mubr.bf16.gmra.mrb[24].mxu1 %v6495_v48  ;;  %v937_v33 = vld [vmem:[%s10255_s0 + $0x360] sm:$0xff]  ;;  %v6578_v17 = vcombine.high %v958_v1, %v962_v2  ;;  %v6559_v48 = vcombine.low %v941_v23, %v945_v59  ;;  %v7559_v59 = vld [vmem:[%s7988_s19 + $0x374] ss:$8 sps:$4 sm:$0xff]  }
 0x11f   : > { %3459 = vmatprep.mubr.bf16.mxu1 %v6504_v49  ;;  %6920 = vmatpush1.bf16.msra.mxu1 %v8103_v42  ;;  %v926_v42 = vld [vmem:[%s10255_s0 + $0x308] sm:$0xff]  ;;  %v6552_v18 = vcombine.high %v933_v32, %v937_v33  ;;  %v6551_v40 = vcombine.low %v933_v32, %v937_v33  ;;  %v6568_v49 = vcombine.high %v949_v30, %v953_v31  ;;  %v961_v39 = vld [vmem:[%s10255_s0 + $0x420] sm:$0xff]  ;;  %v863_v32 = vld [vmem:[%s10255_s0 + $0x110] sm:$0xff] }
 0x120   : > { %6905 = vmatprep.subr.bf16.mxu1 %v8107_v43  ;;  %v6537_v43 = vcombine.low %v918_v34, %v922_v5  ;;  %v6546_v54 = vcombine.high %v926_v42, %v930_v53  ;;  %v6545_v60 = vcombine.low %v926_v42, %v930_v53  ;;  %v831_v34 = vld [vmem:[%s10255_s0 + $0x10] sm:$0xff]  ;;  %v7550_v13 = vld [vmem:[%s7988_s19 + $0x344] ss:$8 sps:$4 sm:$0xff]  }
 0x121   : > { %4190 = vmatpush1.bf16.msra.mxu0 %v7533_v36  ;;  %v6543_v36 = vcombine.low %v925_v14, %v929_v28  ;;  %v835_v5 = vld [vmem:[%s10255_s0 + $0x30] sm:$0xff]  ;;  %v981_v14 = vld [vmem:[%s10255_s0 + $0x4c0] sm:$0xff] }
 0x122   : > { %4560 = vmatprep.subr.bf16.mxu0 %v7538_v58  ;;  %v970_v58 = vld [vmem:[%s10255_s0 + $0x468] sm:$0xff]  ;;  %v839_v42 = vld [vmem:[%s10255_s0 + $0x50] sm:$0xff]  ;;  %v985_v28 = vld [vmem:[%s10255_s0 + $0x4e0] sm:$0xff] }
 0x123   : > { %6921 = vmatpush1.bf16.msra.mxu1 %v8113_v46  ;;  %v901_v46 = vld [vmem:[%s10255_s0 + $0x240] sm:$0xff]  ;;  %v843_v53 = vld [vmem:[%s10255_s0 + $0x70] sm:$0xff]  ;;  %v6599_v23 = vcombine.low %v981_v14, %v985_v28 }
 0x124   : > { %3871 = vmatmul.mubr.bf16.gmra.mrb[32].mxu0 %v6513_v21  ;;  %6906 = vmatprep.subr.bf16.mxu1 %v8117_v47  ;;  %v905_v47 = vld [vmem:[%s10255_s0 + $0x260] sm:$0xff]  ;;  %v6577_v21 = vcombine.low %v958_v1, %v962_v2  ;;  %v7553_v1 = vld [vmem:[%s7988_s19 + $0x354] ss:$8 sps:$4 sm:$0xff]   ;;  %v6600_v2 = vcombine.high %v981_v14, %v985_v28 }
 0x125   : > { %3880 = vmatprep.mubr.bf16.mxu0 %v6522_v4  ;;  %v6520_v8 = vcombine.high %v901_v46, %v905_v47  ;;  %v6519_v62 = vcombine.low %v901_v46, %v905_v47  ;;  %v6586_v4 = vcombine.high %v966_v37, %v970_v58  ;;  %v965_v46 = vld [vmem:[%s10255_s0 + $0x440] sm:$0xff]  ;;  %v867_v33 = vld [vmem:[%s10255_s0 + $0x130] sm:$0xff] }
 0x126   : > { %3460 = vmatmul.mubr.bf16.gmra.mrb[28].mxu1 %v6503_v6  ;;  %v6567_v6 = vcombine.low %v949_v30, %v953_v31  ;;  %v969_v47 = vld [vmem:[%s10255_s0 + $0x460] sm:$0xff] }
 0x127   : > { %3469 = vmatprep.mubr.bf16.mxu1 %v6512_v7  ;;  %6922 = vmatpush1.bf16.msra.mxu1 %v8123_v50  ;;  %v934_v50 = vld [vmem:[%s10255_s0 + $0x348] sm:$0xff]  ;;  %v6576_v7 = vcombine.high %v957_v38, %v961_v39  ;;  %v6583_v3 = vcombine.low %v965_v46, %v969_v47  ;;  %v997_v30 = vld [vmem:[%s10255_s0 + $0x540] sm:$0xff] }
 0x128   : > { %6907 = vmatprep.subr.bf16.mxu1 %v8127_v51  ;;  %v909_v51 = vld [vmem:[%s10255_s0 + $0x280] sm:$0xff]  ;;  %v6554_v61 = vcombine.high %v934_v50, %v938_v57  ;;  %v6553_v11 = vcombine.low %v934_v50, %v938_v57  ;;  %v6575_v50 = vcombine.low %v957_v38, %v961_v39  ;;  %v6584_v57 = vcombine.high %v965_v46, %v969_v47  ;;  %v879_v38 = vld [vmem:[%s10255_s0 + $0x190] sm:$0xff] }
 0x129   : > { %v1001_v31 = vld [vmem:[%s10255_s0 + $0x560] sm:$0xff]  ;;  %v883_v39 = vld [vmem:[%s10255_s0 + $0x1b0] sm:$0xff] }
 0x12a   : > { %v887_v46 = vld [vmem:[%s10255_s0 + $0x1d0] sm:$0xff] }
 0x12b   : > { %6923 = vmatpush1.bf16.msra.mxu1 %v8139_v56  ;;  %v913_v56 = vld [vmem:[%s10255_s0 + $0x2a0] sm:$0xff]  ;;  %v891_v47 = vld [vmem:[%s10255_s0 + $0x1f0] sm:$0xff] }
 0x12c   : > { %3881 = vmatmul.mubr.bf16.gmra.mrb[36].mxu0 %v6521_v27  ;;  %v6528_v9 = vcombine.high %v909_v51, %v913_v56  ;;  %v6527_v20 = vcombine.low %v909_v51, %v913_v56  ;;  %v6585_v27 = vcombine.low %v966_v37, %v970_v58  ;;  %v847_v51 = vld [vmem:[%s10255_s0 + $0x90] sm:$0xff]  ;;  %v993_v37 = vld [vmem:[%s10255_s0 + $0x520] sm:$0xff]  ;;  %v6484_v58 = vcombine.high %v863_v32, %v867_v33 }
 0x12d   : > { %3890 = vmatprep.mubr.bf16.mxu0 %v6530_v45  ;;  %v6594_v45 = vcombine.high %v974_v26, %v978_v44  ;;  %v851_v56 = vld [vmem:[%s10255_s0 + $0xb0] sm:$0xff] }
 0x12e   : > { %3470 = vmatmul.mubr.bf16.gmra.mrb[32].mxu1 %v6511_v55  ;;  %v6460_v55 = vcombine.high %v839_v42, %v843_v53  ;;  %v6468_v63 = vcombine.high %v847_v51, %v851_v56 }
 0x12f   : > { %3479 = vmatprep.mubr.bf16.mxu1 %v6520_v8  ;;  %v7541_v8 = vld [vmem:[%s7988_s19 + $0x314] ss:$8 sps:$4 sm:$0xff]  }
 0x134   : > { %3891 = vmatmul.mubr.bf16.gmra.mrb[40].mxu0 %v6529_v35  ;;  %v6593_v35 = vcombine.low %v974_v26, %v978_v44  ;;  %v875_v26 = vld [vmem:[%s10255_s0 + $0x170] sm:$0xff]  ;;  %v7562_v44 = vld [vmem:[%s7988_s19 + $0x384] ss:$8 sps:$4 sm:$0xff]  }
 0x135   : > { %3900 = vmatprep.mubr.bf16.mxu0 %v6538_v52  ;;  %v6452_v52 = vcombine.high %v831_v34, %v835_v5 }
 0x136   : > { %3480 = vmatmul.mubr.bf16.gmra.mrb[36].mxu1 %v6519_v62  ;;  %v6459_v62 = vcombine.low %v839_v42, %v843_v53  ;;  %v6500_v42 = vcombine.high %v879_v38, %v883_v39  ;;  %v6615_v53 = vcombine.low %v997_v30, %v1001_v31 }
 0x137   : > { %3489 = vmatprep.mubr.bf16.mxu1 %v6528_v9  ;;  %v973_v9 = vld [vmem:[%s10255_s0 + $0x480] sm:$0xff] }
 0x13c   : > { %3901 = vmatmul.mubr.bf16.gmra.mrb[44].mxu0 %v6537_v43  ;;  %v6451_v43 = vcombine.low %v831_v34, %v835_v5  ;;  %v6616_v34 = vcombine.high %v997_v30, %v1001_v31  ;;  %v7563_v5 = vld [vmem:[%s7988_s19 + $0x390] ss:$8 sps:$4 sm:$0xff]   ;;  %v1057_v30 = vld [vmem:[%s10255_s0 + $0x720] sm:$0xff] }
 0x13d   : > { %3910 = vmatprep.mubr.bf16.mxu0 %v6546_v54  ;;  %v7536_v54 = vld [vmem:[%s7988_s19 + $0x300] ss:$8 sps:$4 sm:$0xff]  }
 0x13e   : > { %3490 = vmatmul.mubr.bf16.gmra.mrb[40].mxu1 %v6527_v20  ;;  %v7545_v20 = vld [vmem:[%s7988_s19 + $0x330] ss:$8 sps:$4 sm:$0xff]  }
 0x13f   : > { %3499 = vmatprep.mubr.bf16.mxu1 %v6536_v22  ;;  %v855_v22 = vld [vmem:[%s10255_s0 + $0xd0] sm:$0xff] }
 0x144   : > { %3911 = vmatmul.mubr.bf16.gmra.mrb[48].mxu0 %v6545_v60  ;;  %v7539_v60 = vld [vmem:[%s7988_s19 + $0x310] ss:$8 sps:$4 sm:$0xff]  }
 0x145   : > { %3920 = vmatprep.mubr.bf16.mxu0 %v6554_v61  ;;  %v7544_v61 = vld [vmem:[%s7988_s19 + $0x324] ss:$8 sps:$4 sm:$0xff]  }
 0x146   : > { %3500 = vmatmul.mubr.bf16.gmra.mrb[44].mxu1 %v6535_v15  ;;  %v7548_v15 = vld [vmem:[%s7988_s19 + $0x340] ss:$8 sps:$4 sm:$0xff]  }
 0x147   : > { %3509 = vmatprep.mubr.bf16.mxu1 %v6544_v16  ;;  %v6591_v16 = vcombine.low %v973_v9, %v977_v10 }
 0x14c   : > { %3921 = vmatmul.mubr.bf16.gmra.mrb[52].mxu0 %v6553_v11  ;;  %v7542_v11 = vld [vmem:[%s7988_s19 + $0x320] ss:$8 sps:$4 sm:$0xff]  }
 0x14d   : > { %3930 = vmatprep.mubr.bf16.mxu0 %v6562_v19  ;;  %v6592_v19 = vcombine.high %v973_v9, %v977_v10  ;;  %v1025_v9 = vld [vmem:[%s10255_s0 + $0x620] sm:$0xff] }
 0x14e   : > { %3510 = vmatmul.mubr.bf16.gmra.mrb[48].mxu1 %v6543_v36  ;;  %v6475_v36 = vcombine.low %v855_v22, %v859_v24 }
 0x14f   : > { %3519 = vmatprep.mubr.bf16.mxu1 %v6552_v18  ;;  %v989_v18 = vld [vmem:[%s10255_s0 + $0x500] sm:$0xff] }
 0x154   : > { %3931 = vmatmul.mubr.bf16.gmra.mrb[56].mxu0 %v6561_v25  ;;  %v6467_v25 = vcombine.low %v847_v51, %v851_v56  ;;  %v895_v51 = vld [vmem:[%s10255_s0 + $0x210] sm:$0xff] }
 0x155   : > { %3940 = vmatprep.mubr.bf16.mxu0 %v6570_v0  ;;  %v6476_v0 = vcombine.high %v855_v22, %v859_v24  ;;  %v899_v56 = vld [vmem:[%s10255_s0 + $0x230] sm:$0xff]  ;;  %v1029_v24 = vld [vmem:[%s10255_s0 + $0x640] sm:$0xff] }
 0x156   : > { %3520 = vmatmul.mubr.bf16.gmra.mrb[52].mxu1 %v6551_v40  ;;  %v7557_v40 = vld [vmem:[%s7988_s19 + $0x370] ss:$8 sps:$4 sm:$0xff]   ;;  %v6516_v10 = vcombine.high %v895_v51, %v899_v56  ;;  %v6515_v22 = vcombine.low %v895_v51, %v899_v56  ;;  %v1077_v56 = vld [vmem:[%s10255_s0 + $0x7c0] sm:$0xff] }
 0x157   : > { %3529 = vmatprep.mubr.bf16.mxu1 %v6560_v41  ;;  %v871_v41 = vld [vmem:[%s10255_s0 + $0x150] sm:$0xff] }
 0x15c   : > { %3941 = vmatmul.mubr.bf16.gmra.mrb[60].mxu0 %v6569_v29  ;;  %v7551_v29 = vld [vmem:[%s7988_s19 + $0x350] ss:$8 sps:$4 sm:$0xff]  }
 0x15d   : > { %3950 = vmatprep.mubr.bf16.mxu0 %v6578_v17  ;;  %v7556_v17 = vld [vmem:[%s7988_s19 + $0x364] ss:$8 sps:$4 sm:$0xff]  }
 0x15e   : > { %3530 = vmatmul.mubr.bf16.gmra.mrb[56].mxu1 %v6559_v48  ;;  %v7560_v48 = vld [vmem:[%s7988_s19 + $0x380] ss:$8 sps:$4 sm:$0xff]  }
 0x15f   : > { %3539 = vmatprep.mubr.bf16.mxu1 %v6568_v49  ;;  %v6607_v49 = vcombine.low %v989_v18, %v993_v37 }
 0x164   : > { %3951 = vmatmul.mubr.bf16.gmra.mrb[64].mxu0 %v6577_v21  ;;  %v7554_v21 = vld [vmem:[%s7988_s19 + $0x360] ss:$8 sps:$4 sm:$0xff]  }
 0x165   : > { %3960 = vmatprep.mubr.bf16.mxu0 %v6586_v4  ;;  %v6608_v4 = vcombine.high %v989_v18, %v993_v37  ;;  %v919_v18 = vld [vmem:[%s10255_s0 + $0x2d0] sm:$0xff] }
 0x166   : > { %3540 = vmatmul.mubr.bf16.gmra.mrb[60].mxu1 %v6567_v6  ;;  %v1005_v6 = vld [vmem:[%s10255_s0 + $0x580] sm:$0xff]  ;;  %v923_v37 = vld [vmem:[%s10255_s0 + $0x2f0] sm:$0xff] }
 0x167   : > { %3549 = vmatprep.mubr.bf16.mxu1 %v6576_v7  ;;  %v1009_v7 = vld [vmem:[%s10255_s0 + $0x5a0] sm:$0xff] }
 0x16c   : > { %3961 = vmatmul.mubr.bf16.gmra.mrb[68].mxu0 %v6585_v27  ;;  %v6483_v27 = vcombine.low %v863_v32, %v867_v33 }
 0x16d   : > { %3970 = vmatprep.mubr.bf16.mxu0 %v6594_v45  ;;  %v6492_v45 = vcombine.high %v871_v41, %v875_v26 }
 0x16e   : > { %3550 = vmatmul.mubr.bf16.gmra.mrb[64].mxu1 %v6575_v50  ;;  %v6508_v50 = vcombine.high %v887_v46, %v891_v47 }
 0x16f   : > { %3559 = vmatprep.mubr.bf16.mxu1 %v6584_v57  ;;  %v6623_v57 = vcombine.low %v1005_v6, %v1009_v7 }
 0x174   : > { %3971 = vmatmul.mubr.bf16.gmra.mrb[72].mxu0 %v6593_v35  ;;  %v7565_v35 = vld [vmem:[%s7988_s19 + $0x394] ss:$8 sps:$4 sm:$0xff]  }
 0x175   : > { %4191 = vmatprep.mubr.bf16.mxu0 %v6452_v52  ;;  %v6491_v52 = vcombine.low %v871_v41, %v875_v26  ;;  %v927_v41 = vld [vmem:[%s10255_s0 + $0x310] sm:$0xff] }
 0x176   : > { %3560 = vmatmul.mubr.bf16.gmra.mrb[68].mxu1 %v6583_v3  ;;  %v7568_v3 = vld [vmem:[%s7988_s19 + $0x3a4] ss:$8 sps:$4 sm:$0xff]   ;;  %v931_v26 = vld [vmem:[%s10255_s0 + $0x330] sm:$0xff] }
 0x177   : > { %3569 = vmatprep.mubr.bf16.mxu1 %v6592_v19  ;;  %v903_v19 = vld [vmem:[%s10255_s0 + $0x250] sm:$0xff]  ;;  %v6548_v31 = vcombine.high %v927_v41, %v931_v26 }
 0x17c   : > { %4192 = vmatmul.mubr.bf16.vlgmr.msra.gmra.mrb[0].mxu0 %v6451_v43  ;;  %v6624_v43 = vcombine.high %v1005_v6, %v1009_v7 }
 0x17d   : > { %4561 = vmatpush1.bf16.msra.mxu0 %v7536_v54  ;;  %4201 = vmatprep.mubr.bf16.mxu0 %v6460_v55  ;;  %v6499_v54 = vcombine.low %v879_v38, %v883_v39  ;;  %v1013_v55 = vld [vmem:[%s10255_s0 + $0x5c0] sm:$0xff]  ;;  %v6547_v38 = vcombine.low %v927_v41, %v931_v26 }
 0x17e   : > { %4562 = vmatprep.subr.bf16.mxu0 %v7541_v8  ;;  %3570 = vmatmul.mubr.bf16.gmra.mrb[72].mxu1 %v6591_v16  ;;  %v1017_v8 = vld [vmem:[%s10255_s0 + $0x5e0] sm:$0xff] }
 0x17f   : > { %3579 = vmatprep.mubr.bf16.mxu1 %v6600_v2  ;;  %v1041_v2 = vld [vmem:[%s10255_s0 + $0x6a0] sm:$0xff] }
 0x180   : > { %v1061_v39 = vld [vmem:[%s10255_s0 + $0x740] sm:$0xff] }
 0x181   : > { %4563 = vmatpush1.bf16.msra.mxu0 %v7539_v60  ;;  %v6632_v60 = vcombine.high %v1013_v55, %v1017_v8  ;;  %v1109_v26 = vld [vmem:[%s10255_s0 + $0x8c0] sm:$0xff] }
 0x182   : > { %4564 = vmatprep.subr.bf16.mxu0 %v7544_v61  ;;  %v6507_v61 = vcombine.low %v887_v46, %v891_v47  ;;  %v1069_v47 = vld [vmem:[%s10255_s0 + $0x780] sm:$0xff] }
 0x184   : > { %4202 = vmatmul.mubr.bf16.gmra.mrb[4].mxu0 %v6459_v62  ;;  %v1021_v62 = vld [vmem:[%s10255_s0 + $0x600] sm:$0xff] }
 0x185   : > { %4211 = vmatprep.mubr.bf16.mxu0 %v6468_v63  ;;  %4565 = vmatpush1.bf16.msra.mxu0 %v7542_v11  ;;  %v6631_v63 = vcombine.low %v1013_v55, %v1017_v8  ;;  %v6640_v11 = vcombine.high %v1021_v62, %v1025_v9  ;;  %v6639_v14 = vcombine.low %v1021_v62, %v1025_v9 }
 0x186   : > { %4566 = vmatprep.subr.bf16.mxu0 %v7547_v12  ;;  %3580 = vmatmul.mubr.bf16.gmra.mrb[76].mxu1 %v6599_v23  ;;  %v7566_v12 = vld [vmem:[%s7988_s19 + $0x3a0] ss:$8 sps:$4 sm:$0xff]  }
 0x187   : > { %3589 = vmatprep.mubr.bf16.mxu1 %v6608_v4  ;;  %v1049_v23 = vld [vmem:[%s10255_s0 + $0x6e0] sm:$0xff] }
 0x189   : > { %4567 = vmatpush1.bf16.msra.mxu0 %v7545_v20  ;;  %v907_v20 = vld [vmem:[%s10255_s0 + $0x270] sm:$0xff] }
 0x18a   : > { %4568 = vmatprep.subr.bf16.mxu0 %v7550_v13  ;;  %v1033_v13 = vld [vmem:[%s10255_s0 + $0x660] sm:$0xff]  ;;  %v6523_v16 = vcombine.low %v903_v19, %v907_v20 }
 0x18b   : > { %v6648_v28 = vcombine.high %v1029_v24, %v1033_v13  ;;  %v6647_v32 = vcombine.low %v1029_v24, %v1033_v13 }
 0x18c   : > { %4212 = vmatmul.mubr.bf16.gmra.mrb[8].mxu0 %v6467_v25  ;;  %v6524_v25 = vcombine.high %v903_v19, %v907_v20  ;;  %v1085_v20 = vld [vmem:[%s10255_s0 + $0x800] sm:$0xff] }
 0x18d   : > { %4221 = vmatprep.mubr.bf16.mxu0 %v6476_v0  ;;  %4569 = vmatpush1.bf16.msra.mxu0 %v7548_v15  ;;  %v911_v0 = vld [vmem:[%s10255_s0 + $0x290] sm:$0xff] }
 0x18e   : > { %4570 = vmatprep.subr.bf16.mxu0 %v7553_v1  ;;  %3590 = vmatmul.mubr.bf16.gmra.mrb[80].mxu1 %v6607_v49  ;;  %v915_v15 = vld [vmem:[%s10255_s0 + $0x2b0] sm:$0xff]  ;;  %v1037_v1 = vld [vmem:[%s10255_s0 + $0x680] sm:$0xff] }
 0x18f   : > { %3599 = vmatprep.mubr.bf16.mxu1 %v6616_v34  ;;  %v6656_v33 = vcombine.high %v1037_v1, %v1041_v2  ;;  %v6655_v4 = vcombine.low %v1037_v1, %v1041_v2  ;;  %v7572_v49 = vld [vmem:[%s7988_s19 + $0x3c0] ss:$8 sps:$4 sm:$0xff]   ;;  %v7574_v34 = vld [vmem:[%s7988_s19 + $0x3c4] ss:$8 sps:$4 sm:$0xff]  }
 0x191   : > { %4571 = vmatpush1.bf16.msra.mxu0 %v7551_v29  ;;  %v6532_v29 = vcombine.high %v911_v0, %v915_v15 }
 0x192   : > { %4572 = vmatprep.subr.bf16.mxu0 %v7556_v17  ;;  %v7569_v17 = vld [vmem:[%s7988_s19 + $0x3b0] ss:$8 sps:$4 sm:$0xff]  }
 0x194   : > { %4222 = vmatmul.mubr.bf16.gmra.mrb[12].mxu0 %v6475_v36  ;;  %v7571_v36 = vld [vmem:[%s7988_s19 + $0x3b4] ss:$8 sps:$4 sm:$0xff]  }
 0x195   : > { %4231 = vmatprep.mubr.bf16.mxu0 %v6484_v58  ;;  %4573 = vmatpush1.bf16.msra.mxu0 %v7554_v21  ;;  %v6531_v58 = vcombine.low %v911_v0, %v915_v15  ;;  %v1045_v21 = vld [vmem:[%s10255_s0 + $0x6c0] sm:$0xff] }
 0x196   : > { %4574 = vmatprep.subr.bf16.mxu0 %v7559_v59  ;;  %3600 = vmatmul.mubr.bf16.gmra.mrb[84].mxu1 %v6615_v53  ;;  %v6540_v59 = vcombine.high %v919_v18, %v923_v37  ;;  %v943_v53 = vld [vmem:[%s10255_s0 + $0x390] sm:$0xff]  ;;  %v1093_v15 = vld [vmem:[%s10255_s0 + $0x840] sm:$0xff] }
 0x197   : > { %3609 = vmatprep.mubr.bf16.mxu1 %v6624_v43  ;;  %v947_v43 = vld [vmem:[%s10255_s0 + $0x3b0] sm:$0xff] }
 0x198   : > { %v6564_v55 = vcombine.high %v943_v53, %v947_v43  ;;  %v6563_v51 = vcombine.low %v943_v53, %v947_v43  ;;  %v982_v53 = vld [vmem:[%s10255_s0 + $0x4c8] sm:$0xff] }
 0x199   : > { %4575 = vmatpush1.bf16.msra.mxu0 %v7557_v40  ;;  %v6664_v40 = vcombine.high %v1045_v21, %v1049_v23  ;;  %v986_v43 = vld [vmem:[%s10255_s0 + $0x4e8] sm:$0xff] }
 0x19a   : > { %4576 = vmatprep.subr.bf16.mxu0 %v7562_v44  ;;  %v6539_v44 = vcombine.low %v919_v18, %v923_v37  ;;  %v1101_v37 = vld [vmem:[%s10255_s0 + $0x880] sm:$0xff] }
 0x19c   : > { %4232 = vmatmul.mubr.bf16.gmra.mrb[16].mxu0 %v6483_v27  ;;  %v1053_v27 = vld [vmem:[%s10255_s0 + $0x700] sm:$0xff] }
 0x19d   : > { %4241 = vmatprep.mubr.bf16.mxu0 %v6492_v45  ;;  %4577 = vmatpush1.bf16.msra.mxu0 %v7560_v48  ;;  %v6663_v45 = vcombine.low %v1045_v21, %v1049_v23  ;;  %v6672_v48 = vcombine.high %v1053_v27, %v1057_v30  ;;  %v6671_v7 = vcombine.low %v1053_v27, %v1057_v30 }
 0x19e   : > { %4578 = vmatprep.subr.bf16.mxu0 %v7565_v35  ;;  %3610 = vmatmul.mubr.bf16.gmra.mrb[88].mxu1 %v6623_v57  ;;  %v939_v35 = vld [vmem:[%s10255_s0 + $0x370] sm:$0xff] }
 0x19f   : > { %3619 = vmatprep.mubr.bf16.mxu1 %v6632_v60  ;;  %v951_v57 = vld [vmem:[%s10255_s0 + $0x3d0] sm:$0xff] }
 0x1a0   : > { %v955_v60 = vld [vmem:[%s10255_s0 + $0x3f0] sm:$0xff] }
 0x1a1   : > { %4579 = vmatpush1.bf16.msra.mxu0 %v7563_v5  ;;  %v935_v5 = vld [vmem:[%s10255_s0 + $0x350] sm:$0xff]  ;;  %v6572_v62 = vcombine.high %v951_v57, %v955_v60  ;;  %v6571_v19 = vcombine.low %v951_v57, %v955_v60 }
 0x1a2   : > { %4580 = vmatprep.subr.bf16.mxu0 %v7568_v3  ;;  %v6556_v6 = vcombine.high %v935_v5, %v939_v35  ;;  %v6555_v46 = vcombine.low %v935_v5, %v939_v35  ;;  %v963_v3 = vld [vmem:[%s10255_s0 + $0x430] sm:$0xff]  ;;  %v1117_v35 = vld [vmem:[%s10255_s0 + $0x900] sm:$0x11] }
 0x1a3   : > { %v1011_v57 = vld [vmem:[%s10255_s0 + $0x5b0] sm:$0xff] }
 0x1a4   : > { %4242 = vmatmul.mubr.bf16.gmra.mrb[20].mxu0 %v6491_v52  ;;  %v1065_v52 = vld [vmem:[%s10255_s0 + $0x760] sm:$0xff] }
 0x1a5   : > { %4251 = vmatprep.mubr.bf16.mxu0 %v6500_v42  ;;  %4581 = vmatpush1.bf16.msra.mxu0 %v7566_v12  ;;  %v6680_v42 = vcombine.high %v1061_v39, %v1065_v52  ;;  %v6679_v8 = vcombine.low %v1061_v39, %v1065_v52  ;;  %v959_v12 = vld [vmem:[%s10255_s0 + $0x410] sm:$0xff]  ;;  %v6736_v52 = vcombine.high %v1117_v35, %v1117_v35 }
 0x1a6   : > { %3620 = vmatmul.mubr.bf16.gmra.mrb[92].mxu1 %v6631_v63  ;;  %4582 = vmatprep.subr.bf16.mxu0 %v7571_v36  ;;  %v7577_v63 = vld [vmem:[%s7988_s19 + $0x3d0] ss:$8 sps:$4 sm:$0xff]   ;;  %v6580_v24 = vcombine.high %v959_v12, %v963_v3  ;;  %v6579_v0 = vcombine.low %v959_v12, %v963_v3 }
 0x1a7   : > { %3629 = vmatprep.mubr.bf16.mxu1 %v6640_v11  ;;  %v7579_v11 = vld [vmem:[%s7988_s19 + $0x3d4] ss:$8 sps:$4 sm:$0xff]  }
 0x1a8   : > { %v979_v36 = vld [vmem:[%s10255_s0 + $0x4b0] sm:$0xff] }
 0x1a9   : > { %4583 = vmatpush1.bf16.msra.mxu0 %v7569_v17  ;;  %v975_v17 = vld [vmem:[%s10255_s0 + $0x490] sm:$0xff] }
 0x1aa   : > { %4584 = vmatprep.subr.bf16.mxu0 %v7574_v34  ;;  %v6596_v21 = vcombine.high %v975_v17, %v979_v36  ;;  %v6595_v41 = vcombine.low %v975_v17, %v979_v36  ;;  %v995_v34 = vld [vmem:[%s10255_s0 + $0x530] sm:$0xff]  ;;  %v1006_v17 = vld [vmem:[%s10255_s0 + $0x588] sm:$0xff] }
 0x1ab   : > { %v1015_v3 = vld [vmem:[%s10255_s0 + $0x5d0] sm:$0xff]  ;;  %v1010_v36 = vld [vmem:[%s10255_s0 + $0x5a8] sm:$0xff] }
 0x1ac   : > { %4252 = vmatmul.mubr.bf16.gmra.mrb[24].mxu0 %v6499_v54  ;;  %v1073_v54 = vld [vmem:[%s10255_s0 + $0x7a0] sm:$0xff] }
 0x1ad   : > { %4261 = vmatprep.mubr.bf16.mxu0 %v6508_v50  ;;  %4585 = vmatpush1.bf16.msra.mxu0 %v7572_v49  ;;  %v6688_v50 = vcombine.high %v1069_v47, %v1073_v54  ;;  %v6687_v9 = vcombine.low %v1069_v47, %v1073_v54  ;;  %v991_v49 = vld [vmem:[%s10255_s0 + $0x510] sm:$0xff]  ;;  %v6735_v47 = vcombine.low %v1117_v35, %v1117_v35 }
 0x1ae   : > { %3630 = vmatmul.mubr.bf16.gmra.mrb[96].mxu1 %v6639_v14  ;;  %4586 = vmatprep.subr.bf16.mxu0 %v7579_v11  ;;  %v967_v14 = vld [vmem:[%s10255_s0 + $0x450] sm:$0xff]  ;;  %v6602_v54 = vcombine.high %v982_v53, %v986_v43 }
 0x1af   : > { %3639 = vmatprep.mubr.bf16.mxu1 %v6648_v28  ;;  %v971_v28 = vld [vmem:[%s10255_s0 + $0x470] sm:$0xff] }
 0x1b0   : > { %v6588_v1 = vcombine.high %v967_v14, %v971_v28  ;;  %v6587_v18 = vcombine.low %v967_v14, %v971_v28 }
 0x1b1   : > { %4587 = vmatpush1.bf16.msra.mxu0 %v7577_v63 }
 0x1b4   : > { %4262 = vmatmul.mubr.bf16.gmra.mrb[28].mxu0 %v6507_v61  ;;  %v1081_v61 = vld [vmem:[%s10255_s0 + $0x7e0] sm:$0xff] }
 0x1b5   : > { %4271 = vmatprep.mubr.bf16.mxu0 %v6516_v10  ;;  %v6696_v10 = vcombine.high %v1077_v56, %v1081_v61  ;;  %v6695_v13 = vcombine.low %v1077_v56, %v1081_v61  ;;  %v990_v61 = vld [vmem:[%s10255_s0 + $0x508] sm:$0xff] }
 0x1b6   : > { %3640 = vmatmul.mubr.bf16.gmra.mrb[100].mxu1 %v6647_v32  ;;  %v7580_v32 = vld [vmem:[%s7988_s19 + $0x3e0] ss:$8 sps:$4 sm:$0xff]  }
 0x1b7   : > { %3649 = vmatprep.mubr.bf16.mxu1 %v6656_v33  ;;  %v7582_v33 = vld [vmem:[%s7988_s19 + $0x3e4] ss:$8 sps:$4 sm:$0xff]  }
 0x1b8   : > { %4588 = vmatprep.subr.bf16.mxu0 %v7582_v33 }
 0x1b9   : > { %4589 = vmatpush1.bf16.msra.mxu0 %v7580_v32 }
 0x1bc   : > { %4272 = vmatmul.mubr.bf16.gmra.mrb[32].mxu0 %v6515_v22  ;;  %v1089_v22 = vld [vmem:[%s10255_s0 + $0x820] sm:$0xff] }
 0x1bd   : > { %4281 = vmatprep.mubr.bf16.mxu0 %v6524_v25  ;;  %v6704_v25 = vcombine.high %v1085_v20, %v1089_v22  ;;  %v6703_v2 = vcombine.low %v1085_v20, %v1089_v22 }
 0x1be   : > { %3650 = vmatmul.mubr.bf16.gmra.mrb[104].mxu1 %v6655_v4  ;;  %v983_v4 = vld [vmem:[%s10255_s0 + $0x4d0] sm:$0xff] }
 0x1bf   : > { %3659 = vmatprep.mubr.bf16.mxu1 %v6664_v40  ;;  %v987_v40 = vld [vmem:[%s10255_s0 + $0x4f0] sm:$0xff] }
 0x1c0   : > { %v6604_v27 = vcombine.high %v983_v4, %v987_v40  ;;  %v6603_v5 = vcombine.low %v983_v4, %v987_v40  ;;  %v1035_v4 = vld [vmem:[%s10255_s0 + $0x670] sm:$0xff] }
 0x1c4   : > { %4282 = vmatmul.mubr.bf16.gmra.mrb[36].mxu0 %v6523_v16  ;;  %v1097_v16 = vld [vmem:[%s10255_s0 + $0x860] sm:$0xff] }
 0x1c5   : > { %4291 = vmatprep.mubr.bf16.mxu0 %v6532_v29  ;;  %v6712_v29 = vcombine.high %v1093_v15, %v1097_v16  ;;  %v6711_v23 = vcombine.low %v1093_v15, %v1097_v16 }
 0x1c6   : > { %3660 = vmatmul.mubr.bf16.gmra.mrb[108].mxu1 %v6663_v45  ;;  %v7583_v45 = vld [vmem:[%s7988_s19 + $0x3f0] ss:$8 sps:$4 sm:$0xff]  }
 0x1c7   : > { %3669 = vmatprep.mubr.bf16.mxu1 %v6672_v48  ;;  %v7585_v48 = vld [vmem:[%s7988_s19 + $0x3f4] ss:$8 sps:$4 sm:$0xff]  }
 0x1c8   : > { %4590 = vmatprep.subr.bf16.mxu0 %v7585_v48 }
 0x1c9   : > { %4591 = vmatpush1.bf16.msra.mxu0 %v7583_v45 }
 0x1cc   : > { %4292 = vmatmul.mubr.bf16.gmra.mrb[40].mxu0 %v6531_v58  ;;  %v1105_v58 = vld [vmem:[%s10255_s0 + $0x8a0] sm:$0xff] }
 0x1cd   : > { %4301 = vmatprep.mubr.bf16.mxu0 %v6540_v59  ;;  %v6720_v59 = vcombine.high %v1101_v37, %v1105_v58  ;;  %v6719_v30 = vcombine.low %v1101_v37, %v1105_v58  ;;  %v6626_v58 = vcombine.high %v1006_v17, %v1010_v36 }
 0x1ce   : > { %3670 = vmatmul.mubr.bf16.gmra.mrb[112].mxu1 %v6671_v7  ;;  %v1003_v7 = vld [vmem:[%s10255_s0 + $0x570] sm:$0xff] }
 0x1cf   : > { %3679 = vmatprep.mubr.bf16.mxu1 %v6680_v42  ;;  %v6611_v42 = vcombine.low %v991_v49, %v995_v34 }
 0x1d4   : > { %4302 = vmatmul.mubr.bf16.gmra.mrb[44].mxu0 %v6539_v44  ;;  %v1113_v44 = vld [vmem:[%s10255_s0 + $0x8e0] sm:$0xff] }
 0x1d5   : > { %4311 = vmatprep.mubr.bf16.mxu0 %v6548_v31  ;;  %v6728_v31 = vcombine.high %v1109_v26, %v1113_v44  ;;  %v6727_v39 = vcombine.low %v1109_v26, %v1113_v44  ;;  %v1014_v44 = vld [vmem:[%s10255_s0 + $0x5c8] sm:$0xff] }
 0x1d6   : > { %3680 = vmatmul.mubr.bf16.gmra.mrb[116].mxu1 %v6679_v8 }
 0x1d7   : > { %3689 = vmatprep.mubr.bf16.mxu1 %v6688_v50  ;;  %v1007_v50 = vld [vmem:[%s10255_s0 + $0x590] sm:$0xff] }
 0x1dc   : > { %4312 = vmatmul.mubr.bf16.gmra.mrb[48].mxu0 %v6547_v38  ;;  %v6612_v38 = vcombine.high %v991_v49, %v995_v34  ;;  %v1039_v34 = vld [vmem:[%s10255_s0 + $0x690] sm:$0xff] }
 0x1dd   : > { %4321 = vmatprep.mubr.bf16.mxu0 %v6556_v6  ;;  %v999_v6 = vld [vmem:[%s10255_s0 + $0x550] sm:$0xff] }
 0x1de   : > { %3690 = vmatmul.mubr.bf16.gmra.mrb[120].mxu1 %v6687_v9  ;;  %v6619_v56 = vcombine.low %v999_v6, %v1003_v7  ;;  %v6628_v9 = vcombine.high %v1007_v50, %v1011_v57 }
 0x1df   : > { %3699 = vmatprep.mubr.bf16.mxu1 %v6696_v10  ;;  %v6601_v10 = vcombine.low %v982_v53, %v986_v43 }
 0x1e4   : > { %4322 = vmatmul.mubr.bf16.gmra.mrb[52].mxu0 %v6555_v46  ;;  %v6620_v46 = vcombine.high %v999_v6, %v1003_v7  ;;  %v1026_v6 = vld [vmem:[%s10255_s0 + $0x628] sm:$0xff] }
 0x1e5   : > { %4331 = vmatprep.mubr.bf16.mxu0 %v6564_v55  ;;  %v8722_v55 = vpop.f32.mrb[0].mxu1 }
 0x1e6   : > { %3700 = vmatmul.mubr.bf16.gmra.mrb[124].mxu1 %v6695_v13  ;;  %v8724_v8 = vpop.f32.mrb[1].mxu1  ;;  %v998_v13 = vld [vmem:[%s10255_s0 + $0x548] sm:$0xff] }
 0x1e7   : > { %3709 = vmatprep.mubr.bf16.mxu1 %v6704_v25  ;;  %v8732_v60 = vpop.f32.mrb[2].mxu1  ;;  %v1002_v25 = vld [vmem:[%s10255_s0 + $0x568] sm:$0xff] }
 0x1e8   : > { %v6617_v37 = vcombine.low %v998_v13, %v1002_v25 }
 0x1ec   : > { %4332 = vmatmul.mubr.bf16.gmra.mrb[56].mxu0 %v6563_v51  ;;  %v8734_v51 = vpop.f32.mrb[3].mxu1 }
 0x1ed   : > { %4341 = vmatprep.mubr.bf16.mxu0 %v6572_v62  ;;  %v994_v62 = vld [vmem:[%s10255_s0 + $0x528] sm:$0xff]  ;;  %v8742_v11 = vpop.f32.mrb[4].mxu1 }
 0x1ee   : > { %3710 = vmatmul.mubr.bf16.gmra.mrb[128].mxu1 %v6703_v2  ;;  %v6610_v63 = vcombine.high %v990_v61, %v994_v62  ;;  %v8744_v12 = vpop.f32.mrb[5].mxu1  ;;  %v6609_v28 = vcombine.low %v990_v61, %v994_v62  ;;  %v1027_v2 = vld [vmem:[%s10255_s0 + $0x630] sm:$0xff]  ;;  %v1030_v61 = vld [vmem:[%s10255_s0 + $0x648] sm:$0xff] }
 0x1ef   : > { %3719 = vmatprep.mubr.bf16.mxu1 %v6712_v29  ;;  %v8752_v20 = vpop.f32.mrb[6].mxu1  ;;  %v1034_v62 = vld [vmem:[%s10255_s0 + $0x668] sm:$0xff] }
 0x1f0   : > { %v8754_v22 = vpop.f32.mrb[7].mxu1 }
 0x1f1   : > { %v8762_v15 = vpop.f32.mrb[8].mxu1 }
 0x1f2   : > { %v8764_v16 = vpop.f32.mrb[9].mxu1 }
 0x1f3   : > { %v8772_v29 = vpop.f32.mrb[10].mxu1 }
 0x1f4   : > { %4342 = vmatmul.mubr.bf16.gmra.mrb[60].mxu0 %v6571_v19  ;;  %v1019_v19 = vld [vmem:[%s10255_s0 + $0x5f0] sm:$0xff]  ;;  %v8774_v32 = vpop.f32.mrb[11].mxu1 }
 0x1f5   : > { %4351 = vmatprep.mubr.bf16.mxu0 %v6580_v24  ;;  %v6627_v24 = vcombine.low %v1007_v50, %v1011_v57  ;;  %v6636_v14 = vcombine.high %v1015_v3, %v1019_v19  ;;  %v6635_v33 = vcombine.low %v1015_v3, %v1019_v19 }
 0x1f6   : > { %3720 = vmatmul.mubr.bf16.gmra.mrb[132].mxu1 %v6711_v23 }
 0x1f7   : > { %3729 = vmatprep.mubr.bf16.mxu1 %v6720_v59  ;;  %v1031_v59 = vld [vmem:[%s10255_s0 + $0x650] sm:$0xff] }
 0x1fc   : > { %4352 = vmatmul.mubr.bf16.gmra.mrb[64].mxu0 %v6579_v0  ;;  %v6618_v0 = vcombine.high %v998_v13, %v1002_v25  ;;  %v1059_v13 = vld [vmem:[%s10255_s0 + $0x730] sm:$0xff] }
 0x1fd   : > { %4361 = vmatprep.mubr.bf16.mxu0 %v6588_v1  ;;  %v1023_v1 = vld [vmem:[%s10255_s0 + $0x610] sm:$0xff] }
 0x1fe   : > { %3730 = vmatmul.mubr.bf16.gmra.mrb[136].mxu1 %v6719_v30  ;;  %v6643_v26 = vcombine.low %v1023_v1, %v1027_v2  ;;  %v6652_v30 = vcombine.high %v1031_v59, %v1035_v4 }
 0x1ff   : > { %3739 = vmatprep.mubr.bf16.mxu1 %v6728_v31  ;;  %v6625_v31 = vcombine.low %v1006_v17, %v1010_v36 }
 0x204   : > { %4362 = vmatmul.mubr.bf16.gmra.mrb[68].mxu0 %v6587_v18  ;;  %v6644_v18 = vcombine.high %v1023_v1, %v1027_v2  ;;  %v1042_v1 = vld [vmem:[%s10255_s0 + $0x6a8] sm:$0xff] }
 0x205   : > { %4371 = vmatprep.mubr.bf16.mxu0 %v6596_v21  ;;  %v8782_v21 = vpop.f32.mrb[12].mxu1 }
 0x206   : > { %3740 = vmatmul.mubr.bf16.gmra.mrb[140].mxu1 %v6727_v39  ;;  %v8784_v23 = vpop.f32.mrb[13].mxu1  ;;  %v6651_v39 = vcombine.low %v1031_v59, %v1035_v4 }
 0x207   : > { %3749 = vmatprep.mubr.bf16.mxu1 %v6736_v52  ;;  %v8792_v40 = vpop.f32.mrb[14].mxu1  ;;  %v1022_v52 = vld [vmem:[%s10255_s0 + $0x608] sm:$0xff] }
 0x208   : > { %v6642_v53 = vcombine.high %v1022_v52, %v1026_v6 }
 0x20c   : > { %4372 = vmatmul.mubr.bf16.gmra.mrb[72].mxu0 %v6595_v41  ;;  %v8794_v41 = vpop.f32.mrb[15].mxu1 }
 0x20d   : > { %4381 = vmatprep.mubr.bf16.mxu0 %v6604_v27  ;;  %v1018_v27 = vld [vmem:[%s10255_s0 + $0x5e8] sm:$0xff]  ;;  %v8802_v48 = vpop.f32.mrb[16].mxu1 }
 0x20e   : > { %3750 = vmatmul.mubr.bf16.gmra.mrb[144].mxu1 %v6735_v47  ;;  %v6634_v45 = vcombine.high %v1014_v44, %v1018_v27  ;;  %v8804_v49 = vpop.f32.mrb[17].mxu1  ;;  %v1047_v47 = vld [vmem:[%s10255_s0 + $0x6d0] sm:$0xff] }
 0x20f   : > { %3980 = vmatprep.mubr.bf16.mxu1 %v6602_v54  ;;  %v8812_v35 = vpop.f32.mrb[18].mxu1  ;;  %v1051_v54 = vld [vmem:[%s10255_s0 + $0x6f0] sm:$0xff] }
 0x214   : > { %4382 = vmatmul.mubr.bf16.gmra.mrb[76].mxu0 %v6603_v5  ;;  %v1043_v5 = vld [vmem:[%s10255_s0 + $0x6b0] sm:$0xff] }
 0x215   : > { %4391 = vmatprep.mubr.bf16.mxu0 %v6612_v38  ;;  %v8814_v38 = vpop.f32.mrb[19].mxu1  ;;  %v6660_v7 = vcombine.high %v1039_v34, %v1043_v5 }
 0x216   : > { %3981 = vmatmul.mubr.bf16.vlgmr.msra.gmra.mrb[76].mxu1 %v6601_v10  ;;  %v8822_v43 = vpop.f32.mrb[20].mxu1  ;;  %v6641_v10 = vcombine.low %v1022_v52, %v1026_v6  ;;  %v1075_v52 = vld [vmem:[%s10255_s0 + $0x7b0] sm:$0xff] }
 0x217   : > { %3990 = vmatprep.mubr.bf16.mxu1 %v6610_v63  ;;  %v6650_v63 = vcombine.high %v1030_v61, %v1034_v62 }
 0x21c   : > { %4392 = vmatmul.mubr.bf16.gmra.mrb[80].mxu0 %v6611_v42  ;;  %v6633_v42 = vcombine.low %v1014_v44, %v1018_v27  ;;  %v1046_v44 = vld [vmem:[%s10255_s0 + $0x6c8] sm:$0xff] }
 0x21d   : > { %4401 = vmatprep.mubr.bf16.mxu0 %v6620_v46  ;;  %v8824_v46 = vpop.f32.mrb[21].mxu1  ;;  %v1050_v27 = vld [vmem:[%s10255_s0 + $0x6e8] sm:$0xff] }
 0x21e   : > { %3991 = vmatmul.mubr.bf16.gmra.mrb[80].mxu1 %v6609_v28  ;;  %v8832_v50 = vpop.f32.mrb[22].mxu1  ;;  %v6667_v28 = vcombine.low %v1047_v47, %v1051_v54 }
 0x21f   : > { %4000 = vmatprep.mubr.bf16.mxu1 %v6618_v0  ;;  %v8834_v57 = vpop.f32.mrb[23].mxu1  ;;  %v1038_v0 = vld [vmem:[%s10255_s0 + $0x688] sm:$0xff] }
 0x220   : > { %v8842_v3 = vpop.f32.mrb[24].mxu1  ;;  %v6658_v17 = vcombine.high %v1038_v0, %v1042_v1 }
 0x221   : > { %v8844_v19 = vpop.f32.mrb[25].mxu1 }
 0x222   : > { %v8852_v25 = vpop.f32.mrb[26].mxu1 }
 0x224   : > { %4402 = vmatmul.mubr.bf16.gmra.mrb[84].mxu0 %v6619_v56  ;;  %v6659_v56 = vcombine.low %v1039_v34, %v1043_v5 }
 0x225   : > { %4411 = vmatprep.mubr.bf16.mxu0 %v6628_v9  ;;  %v6668_v9 = vcombine.high %v1047_v47, %v1051_v54  ;;  %v1058_v47 = vld [vmem:[%s10255_s0 + $0x728] sm:$0xff] }
 0x226   : > { %4001 = vmatmul.mubr.bf16.gmra.mrb[84].mxu1 %v6617_v37  ;;  %v1063_v37 = vld [vmem:[%s10255_s0 + $0x750] sm:$0xff] }
 0x227   : > { %4010 = vmatprep.mubr.bf16.mxu1 %v6626_v58  ;;  %v1067_v58 = vld [vmem:[%s10255_s0 + $0x770] sm:$0xff] }
 0x22c   : > { %4412 = vmatmul.mubr.bf16.gmra.mrb[88].mxu0 %v6627_v24  ;;  %v1055_v24 = vld [vmem:[%s10255_s0 + $0x710] sm:$0xff] }
 0x22d   : > { %4421 = vmatprep.mubr.bf16.mxu0 %v6636_v14  ;;  %v8854_v14 = vpop.f32.mrb[27].mxu1  ;;  %v6676_v2 = vcombine.high %v1055_v24, %v1059_v13 }
 0x22e   : > { %4011 = vmatmul.mubr.bf16.gmra.mrb[88].mxu1 %v6625_v31  ;;  %v8862_v36 = vpop.f32.mrb[28].mxu1  ;;  %v6657_v31 = vcombine.low %v1038_v0, %v1042_v1  ;;  %v1062_v0 = vld [vmem:[%s10255_s0 + $0x748] sm:$0xff] }
 0x22f   : > { %4020 = vmatprep.mubr.bf16.mxu1 %v6634_v45  ;;  %v6666_v45 = vcombine.high %v1046_v44, %v1050_v27  ;;  %v1066_v1 = vld [vmem:[%s10255_s0 + $0x768] sm:$0xff] }
 0x234   : > { %4422 = vmatmul.mubr.bf16.gmra.mrb[92].mxu0 %v6635_v33  ;;  %v6649_v33 = vcombine.low %v1030_v61, %v1034_v62 }
 0x235   : > { %4431 = vmatprep.mubr.bf16.mxu0 %v6644_v18  ;;  %v8864_v18 = vpop.f32.mrb[29].mxu1 }
 0x236   : > { %4021 = vmatmul.mubr.bf16.gmra.mrb[92].mxu1 %v6633_v42  ;;  %v8872_v59 = vpop.f32.mrb[30].mxu1  ;;  %v6683_v42 = vcombine.low %v1063_v37, %v1067_v58 }
 0x237   : > { %4030 = vmatprep.mubr.bf16.mxu1 %v6642_v53  ;;  %v8874_v4 = vpop.f32.mrb[31].mxu1  ;;  %v1054_v53 = vld [vmem:[%s10255_s0 + $0x708] sm:$0xff] }
 0x238   : > { %v8882_v34 = vpop.f32.mrb[32].mxu1  ;;  %v6674_v61 = vcombine.high %v1054_v53, %v1058_v47 }
 0x239   : > { %v8884_v5 = vpop.f32.mrb[33].mxu1 }
 0x23a   : > { %v8892_v6 = vpop.f32.mrb[34].mxu1 }
 0x23c   : > { %4432 = vmatmul.mubr.bf16.gmra.mrb[96].mxu0 %v6643_v26  ;;  %v6675_v26 = vcombine.low %v1055_v24, %v1059_v13 }
 0x23d   : > { %4441 = vmatprep.mubr.bf16.mxu0 %v6652_v30  ;;  %v6684_v30 = vcombine.high %v1063_v37, %v1067_v58 }
 0x23e   : > { %4031 = vmatmul.mubr.bf16.gmra.mrb[96].mxu1 %v6641_v10  ;;  %v1079_v10 = vld [vmem:[%s10255_s0 + $0x7d0] sm:$0xff] }
 0x23f   : > { %4040 = vmatprep.mubr.bf16.mxu1 %v6650_v63  ;;  %v1083_v63 = vld [vmem:[%s10255_s0 + $0x7f0] sm:$0xff] }
 0x244   : > { %4442 = vmatmul.mubr.bf16.gmra.mrb[100].mxu0 %v6651_v39  ;;  %v1071_v39 = vld [vmem:[%s10255_s0 + $0x790] sm:$0xff] }
 0x245   : > { %4451 = vmatprep.mubr.bf16.mxu0 %v6660_v7  ;;  %v8894_v7 = vpop.f32.mrb[35].mxu1  ;;  %v6692_v54 = vcombine.high %v1071_v39, %v1075_v52 }
 0x246   : > { %4041 = vmatmul.mubr.bf16.gmra.mrb[100].mxu1 %v6649_v33  ;;  %v8902_v62 = vpop.f32.mrb[36].mxu1  ;;  %v6673_v33 = vcombine.low %v1054_v53, %v1058_v47 }
 0x247   : > { %4050 = vmatprep.mubr.bf16.mxu1 %v6658_v17  ;;  %v6682_v17 = vcombine.high %v1062_v0, %v1066_v1 }
 0x24c   : > { %4452 = vmatmul.mubr.bf16.gmra.mrb[104].mxu0 %v6659_v56  ;;  %v6665_v56 = vcombine.low %v1046_v44, %v1050_v27  ;;  %v1091_v44 = vld [vmem:[%s10255_s0 + $0x830] sm:$0xff] }
 0x24d   : > { %4461 = vmatprep.mubr.bf16.mxu0 %v6668_v9  ;;  %v8904_v9 = vpop.f32.mrb[37].mxu1 }
 0x24e   : > { %4051 = vmatmul.mubr.bf16.gmra.mrb[104].mxu1 %v6657_v31  ;;  %v8912_v24 = vpop.f32.mrb[38].mxu1  ;;  %v6699_v31 = vcombine.low %v1079_v10, %v1083_v63 }
 0x24f   : > { %4060 = vmatprep.mubr.bf16.mxu1 %v6666_v45  ;;  %v8914_v13 = vpop.f32.mrb[39].mxu1  ;;  %v1070_v45 = vld [vmem:[%s10255_s0 + $0x788] sm:$0xff] }
 0x250   : > { %v8922_v37 = vpop.f32.mrb[40].mxu1 }
 0x251   : > { %10265 = vst [vmem:[#allocation4_spill] sm:$0xff] %v8922_v37  ;;  %v8924_v58 = vpop.f32.mrb[41].mxu1 }
 0x252   : > { %10266 = vst [vmem:[#allocation5_spill] sm:$0xff] %v8924_v58  ;;  %v8932_v27 = vpop.f32.mrb[42].mxu1 }
 0x253   : > { %10267 = vst [vmem:[#allocation6_spill] sm:$0xff] %v8932_v27 }
 0x254   : > { %4462 = vmatmul.mubr.bf16.gmra.mrb[108].mxu0 %v6667_v28  ;;  %v6691_v28 = vcombine.low %v1071_v39, %v1075_v52  ;;  %v1074_v39 = vld [vmem:[%s10255_s0 + $0x7a8] sm:$0xff] }
 0x255   : > { %4471 = vmatprep.mubr.bf16.mxu0 %v6676_v2  ;;  %v6700_v2 = vcombine.high %v1079_v10, %v1083_v63  ;;  %v6690_v53 = vcombine.high %v1070_v45, %v1074_v39  ;;  %v1095_v10 = vld [vmem:[%s10255_s0 + $0x850] sm:$0xff] }
 0x256   : > { %4061 = vmatmul.mubr.bf16.gmra.mrb[108].mxu1 %v6665_v56  ;;  %v10262_v56 = vmov 0   ;;  %v1099_v63 = vld [vmem:[%s10255_s0 + $0x870] sm:$0xff] }
 0x257   : > { %4070 = vmatprep.mubr.bf16.mxu1 %v6674_v61  ;;  %5632 = vmatprep.subr.bf16.mxu1 %v10262_v56 }
 0x25c   : > { %4472 = vmatmul.mubr.bf16.gmra.mrb[112].mxu0 %v6675_v26  ;;  %v1087_v26 = vld [vmem:[%s10255_s0 + $0x810] sm:$0xff] }
 0x25d   : > { %4481 = vmatprep.mubr.bf16.mxu0 %v6684_v30  ;;  %v8934_v30 = vpop.f32.mrb[43].mxu1  ;;  %v6708_v52 = vcombine.high %v1087_v26, %v1091_v44 }
 0x25e   : > { %4071 = vmatmul.mubr.bf16.gmra.mrb[112].mxu1 %v6673_v33  ;;  %10268 = vst [vmem:[#allocation7_spill] sm:$0xff] %v8934_v30  ;;  %v8942_v47 = vpop.f32.mrb[44].mxu1  ;;  %v1082_v33 = vld [vmem:[%s10255_s0 + $0x7e8] sm:$0xff] }
 0x25f   : > { %4080 = vmatprep.mubr.bf16.mxu1 %v6682_v17  ;;  %10269 = vst [vmem:[#allocation8_spill] sm:$0xff] %v8942_v47  ;;  %v8948_v61 = vpop.f32.mrb[45].mxu1  ;;  %v6716_v17 = vcombine.high %v1095_v10, %v1099_v63 }
 0x260   : > { %10270 = vst [vmem:[#allocation9_spill] sm:$0xff] %v8948_v61 }
 0x264   : > { %4482 = vmatmul.mubr.bf16.gmra.mrb[116].mxu0 %v6683_v42  ;;  %v6681_v42 = vcombine.low %v1062_v0, %v1066_v1  ;;  %v6707_v1 = vcombine.low %v1087_v26, %v1091_v44  ;;  %v7591_v26 = vld [vmem:[%s10259_s4 + $0x8] sm:$0xff]  }
 0x265   : > { %4491 = vmatprep.mubr.bf16.mxu0 %v6692_v54  ;;  %v7590_v54 = vld [vmem:[%s10259_s4] sm:$0xff]  }
 0x266   : > { %4081 = vmatmul.mubr.bf16.gmra.mrb[116].mxu1 %v6681_v42 }
 0x267   : > { %4090 = vmatprep.mubr.bf16.mxu1 %v6690_v53  ;;  %5633 = vmatpush1.bf16.msra.mxu1 %v7590_v54  ;;  %v1103_v53 = vld [vmem:[%s10255_s0 + $0x890] sm:$0xff] }
 0x268   : > { %5634 = vmatprep.subr.bf16.mxu1 %v10262_v56  ;;  %v1107_v54 = vld [vmem:[%s10255_s0 + $0x8b0] sm:$0xff]  ;;  %v1090_v56 = vld [vmem:[%s10255_s0 + $0x828] sm:$0xff] }
 0x26b   : > { %5635 = vmatpush1.bf16.msra.mxu1 %v7591_v26  ;;  %v1115_v26 = vld [vmem:[%s10255_s0 + $0x8f0] sm:$0xff] }
 0x26c   : > { %4492 = vmatmul.mubr.bf16.gmra.mrb[120].mxu0 %v6691_v28  ;;  %v8956_v28 = vpop.f32.mrb[46].mxu1 }
 0x26d   : > { %4501 = vmatprep.mubr.bf16.mxu0 %v6700_v2  ;;  %10271 = vst [vmem:[#allocation10_spill] sm:$0xff] %v8956_v28  ;;  %v8958_v0 = vpop.f32.mrb[47].mxu1  ;;  %v1078_v2 = vld [vmem:[%s10255_s0 + $0x7c8] sm:$0xff] }
 0x26e   : > { %10272 = vst [vmem:[#allocation11_spill] sm:$0xff] %v8958_v0  ;;  %v8967_v42 = vpop.f32.mrb[48].mxu1  ;;  %v6697_v0 = vcombine.low %v1078_v2, %v1082_v33 }
 0x26f   : > { %10273 = vst [vmem:[#allocation12_spill] sm:$0xff] %v8967_v42  ;;  %v8972_v44 = vpop.f32.mrb[49].mxu1  ;;  %v6724_v42 = vcombine.high %v1103_v53, %v1107_v54 }
 0x270   : > { %10274 = vst [vmem:[#allocation13_spill] sm:$0xff] %v8972_v44  ;;  %v10277_v44 = vmov 0  }
 0x271   : > { %5636 = vmatprep.subr.bf16.mxu1 %v10277_v44 }
 0x274   : > { %4502 = vmatmul.mubr.bf16.gmra.mrb[124].mxu0 %v6699_v31  ;;  %v6689_v31 = vcombine.low %v1070_v45, %v1074_v39  ;;  %v8980_v45 = vpop.f32.mrb[50].mxu1 }
 0x275   : > { %4511 = vmatprep.mubr.bf16.mxu0 %v6708_v52  ;;  %v6698_v52 = vcombine.high %v1078_v2, %v1082_v33  ;;  %10275 = vst [vmem:[#allocation14_spill] sm:$0xff] %v8980_v45  ;;  %v8982_v39 = vpop.f32.mrb[51].mxu1 }
 0x276   : > { %4091 = vmatmul.mubr.bf16.gmra.mrb[120].mxu1 %v6689_v31  ;;  %10276 = vst [vmem:[#allocation15_spill] sm:$0xff] %v8982_v39  ;;  %v8991_v45 = vpop.f32.mrb[52].mxu1 }
 0x277   : > { %4100 = vmatprep.mubr.bf16.mxu1 %v6698_v52  ;;  %10278 = vst [vmem:[#allocation16_spill] sm:$0xff] %v8991_v45  ;;  %v1111_v52 = vld [vmem:[%s10255_s0 + $0x8d0] sm:$0xff] }
 0x278   : > { %v6732_v45 = vcombine.high %v1111_v52, %v1115_v26 }
 0x27c   : > { %4512 = vmatmul.mubr.bf16.gmra.mrb[128].mxu0 %v6707_v1  ;;  %v6715_v1 = vcombine.low %v1095_v10, %v1099_v63  ;;  %v7592_v10 = vld [vmem:[%s10259_s4 + $0x10] sm:$0xff]   ;;  %v8996_v63 = vpop.f32.mrb[53].mxu1 }
 0x27d   : > { %4521 = vmatprep.mubr.bf16.mxu0 %v6716_v17  ;;  %v1086_v17 = vld [vmem:[%s10255_s0 + $0x808] sm:$0xff]  ;;  %10279 = vst [vmem:[#allocation17_spill] sm:$0xff] %v8996_v63  ;;  %v9004_v2 = vpop.f32.mrb[54].mxu1  ;;  %5637 = vmatpush1.bf16.msra.mxu1 %v7592_v10 }
 0x27e   : > { %v6706_v31 = vcombine.high %v1086_v17, %v1090_v56  ;;  %4101 = vmatmul.mubr.bf16.gmra.mrb[124].mxu1 %v6697_v0  ;;  %10280 = vst [vmem:[#allocation18_spill] sm:$0xff] %v9004_v2  ;;  %v9006_v33 = vpop.f32.mrb[55].mxu1  ;;  %v1098_v63 = vld [vmem:[%s10255_s0 + $0x868] sm:$0xff]  ;;  %5638 = vmatprep.subr.bf16.mxu1 %v10277_v44  ;;  %v6705_v39 = vcombine.low %v1086_v17, %v1090_v56 }
 0x27f   : > { %10281 = vst [vmem:[#allocation19_spill] sm:$0xff] %v9006_v33  ;;  %v9015_v2 = vpop.f32.mrb[56].mxu1  ;;  %v6731_v17 = vcombine.low %v1111_v52, %v1115_v26  ;;  %v7594_v52 = vld [vmem:[%s10259_s4 + $0x20] sm:$0xff]   ;;  %v832_v26 = vld [vmem:[%s10255_s0 + $0x18] sm:$0xff]  ;;  %v7595_v33 = vld [vmem:[%s10259_s4 + $0x28] sm:$0xff]  }
 0x280   : > { %4110 = vmatprep.mubr.bf16.mxu1 %v6706_v31  ;;  %10282 = vst [vmem:[#allocation20_spill] sm:$0xff] %v9015_v2  ;;  %v1119_v31 = vld [vmem:[%s10255_s0 + $0x910] sm:$0x11] }
 0x284   : > { %4522 = vmatmul.mubr.bf16.gmra.mrb[132].mxu0 %v6715_v1  ;;  %v6723_v1 = vcombine.low %v1103_v53, %v1107_v54  ;;  %v7593_v53 = vld [vmem:[%s10259_s4 + $0x18] sm:$0xff]   ;;  %v9020_v54 = vpop.f32.mrb[57].mxu1 }
 0x285   : > { %4531 = vmatprep.mubr.bf16.mxu0 %v6724_v42  ;;  %v1094_v42 = vld [vmem:[%s10255_s0 + $0x848] sm:$0xff]  ;;  %10283 = vst [vmem:[#allocation21_spill] sm:$0xff] %v9020_v54  ;;  %v9025_v10 = vpop.f32.mrb[58].mxu1  ;;  %5639 = vmatpush1.bf16.msra.mxu1 %v7593_v53  ;;  %v6740_v54 = vcombine.high %v1119_v31, %v1119_v31  ;;  %v836_v53 = vld [vmem:[%s10255_s0 + $0x38] sm:$0xff] }
 0x286   : > { %v6714_v0 = vcombine.high %v1094_v42, %v1098_v63  ;;  %4111 = vmatmul.mubr.bf16.gmra.mrb[128].mxu1 %v6705_v39  ;;  %10284 = vst [vmem:[#allocation22_spill] sm:$0xff] %v9025_v10  ;;  %v9027_v56 = vpop.f32.mrb[59].mxu1  ;;  %5640 = vmatprep.subr.bf16.mxu1 %v10277_v44  ;;  %v6713_v2 = vcombine.low %v1094_v42, %v1098_v63 }
 0x287   : > { %10285 = vst [vmem:[#allocation23_spill] sm:$0xff] %v9027_v56  ;;  %v9036_v10 = vpop.f32.mrb[60].mxu1 }
 0x288   : > { %4120 = vmatprep.mubr.bf16.mxu1 %v6714_v0  ;;  %10286 = vst [vmem:[#allocation24_spill] sm:$0xff] %v9036_v10  ;;  %v9038_v0 = vpop.f32.mrb[61].mxu1  ;;  %v6454_v10 = vcombine.high %v832_v26, %v836_v53 }
 0x289   : > { %10287 = vst [vmem:[#allocation25_spill] sm:$0xff] %v9038_v0  ;;  %v9049_v63 = vpop.f32.mrb[62].mxu1  ;;  %5641 = vmatpush1.bf16.msra.mxu1 %v7594_v52  ;;  %v1114_v0 = vld [vmem:[%s10255_s0 + $0x8e8] sm:$0xff]  ;;  %v844_v52 = vld [vmem:[%s10255_s0 + $0x78] sm:$0xff] }
 0x28a   : > { %10288 = vst [vmem:[#allocation26_spill] sm:$0xff] %v9049_v63  ;;  %v9051_v42 = vpop.f32.mrb[63].mxu1  ;;  %5642 = vmatprep.subr.bf16.mxu1 %v10277_v44 }
 0x28b   : > { %10289 = vst [vmem:[#allocation27_spill] sm:$0xff] %v9051_v42  ;;  %v9060_v63 = vpop.f32.mrb[64].mxu1 }
 0x28c   : > { %4532 = vmatmul.mubr.bf16.gmra.mrb[136].mxu0 %v6723_v1  ;;  %v1102_v1 = vld [vmem:[%s10255_s0 + $0x888] sm:$0xff]  ;;  %10290 = vst [vmem:[#allocation28_spill] sm:$0xff] %v9060_v63 }
 0x28d   : > { %4541 = vmatprep.mubr.bf16.mxu0 %v6732_v45  ;;  %v1106_v45 = vld [vmem:[%s10255_s0 + $0x8a8] sm:$0xff]  ;;  %5643 = vmatpush1.bf16.msra.mxu1 %v7595_v33  ;;  %v856_v33 = vld [vmem:[%s10255_s0 + $0xd8] sm:$0xff] }
 0x28e   : > { %v6722_v39 = vcombine.high %v1102_v1, %v1106_v45  ;;  %4121 = vmatmul.mubr.bf16.gmra.mrb[132].mxu1 %v6713_v2  ;;  %v6721_v56 = vcombine.low %v1102_v1, %v1106_v45  ;;  %v6453_v45 = vcombine.low %v832_v26, %v836_v53  ;;  %v848_v26 = vld [vmem:[%s10255_s0 + $0x98] sm:$0xff]  ;;  %5644 = vmatprep.subr.bf16.mxu1 %v10277_v44 }
 0x28f   : > { %v852_v53 = vld [vmem:[%s10255_s0 + $0xb8] sm:$0xff] }
 0x290   : > { %4130 = vmatprep.mubr.bf16.mxu1 %v6722_v39  ;;  %v9062_v39 = vpop.f32.mrb[65].mxu1 }
 0x291   : > { %10291 = vst [vmem:[#allocation29_spill] sm:$0xff] %v9062_v39  ;;  %v9070_v42 = vpop.f32.mrb[66].mxu1 }
 0x292   : > { %10292 = vst [vmem:[#allocation30_spill] sm:$0xff] %v9070_v42  ;;  %v9072_v1 = vpop.f32.mrb[67].mxu1 }
 0x293   : > { %10293 = vst [vmem:[#allocation31_spill] sm:$0xff] %v9072_v1  ;;  %v9080_v28 = vpop.f32.mrb[68].mxu1 }
 0x294   : > { %4542 = vmatmul.mubr.bf16.gmra.mrb[140].mxu0 %v6731_v17  ;;  %v1110_v17 = vld [vmem:[%s10255_s0 + $0x8c8] sm:$0xff]  ;;  %10294 = vst [vmem:[#allocation32_spill] sm:$0xff] %v9080_v28 }
 0x295   : > { %4551 = vmatprep.mubr.bf16.mxu0 %v6740_v54  ;;  %v6739_v54 = vcombine.low %v1119_v31, %v1119_v31  ;;  %v6730_v2 = vcombine.high %v1110_v17, %v1114_v0  ;;  %v840_v31 = vld [vmem:[%s10255_s0 + $0x58] sm:$0xff]  ;;  %v6729_v39 = vcombine.low %v1110_v17, %v1114_v0 }
 0x296   : > { %4131 = vmatmul.mubr.bf16.gmra.mrb[136].mxu1 %v6721_v56  ;;  %v9082_v56 = vpop.f32.mrb[69].mxu1 }
 0x297   : > { %4140 = vmatprep.mubr.bf16.mxu1 %v6730_v2  ;;  %10295 = vst [vmem:[#allocation33_spill] sm:$0xff] %v9082_v56  ;;  %v9090_v0 = vpop.f32.mrb[70].mxu1  ;;  %v6461_v2 = vcombine.low %v840_v31, %v844_v52  ;;  %v7596_v56 = vld [vmem:[%s10259_s4 + $0x30] sm:$0xff]  }
 0x298   : > { %10296 = vst [vmem:[#allocation34_spill] sm:$0xff] %v9090_v0  ;;  %v9092_v17 = vpop.f32.mrb[71].mxu1  ;;  %5645 = vmatpush1.bf16.msra.mxu1 %v7596_v56  ;;  %v868_v56 = vld [vmem:[%s10255_s0 + $0x138] sm:$0xff] }
 0x299   : > { %10297 = vst [vmem:[#allocation35_spill] sm:$0xff] %v9092_v17  ;;  %v9098_v28 = vpop.f32.mrb[72].mxu1  ;;  %5646 = vmatprep.subr.bf16.mxu1 %v10277_v44  ;;  %v1060_v17 = vld [vmem:[%s10255_s0 + $0x738] sm:$0xff] }
 0x29a   : > { %10298 = vst [vmem:[#allocation36_spill] sm:$0xff] %v9098_v28 }
 0x29c   : > { %4552 = vmatmul.mubr.bf16.gmra.mrb[144].mxu0 %v6739_v54  ;;  %v6462_v54 = vcombine.high %v840_v31, %v844_v52 }
 0x29d   : > { %4592 = vmatprep.mubr.bf16.mxu0 %v6454_v10  ;;  %v1118_v10 = vld [vmem:[%s10255_s0 + $0x908] sm:$0x11] }
 0x29e   : > { %v6738_v63 = vcombine.high %v1118_v10, %v1118_v10  ;;  %4141 = vmatmul.mubr.bf16.gmra.mrb[140].mxu1 %v6729_v39  ;;  %v9100_v39 = vpop.f32.mrb[73].mxu1 }
 0x29f   : > { %10299 = vst [vmem:[#allocation37_spill] sm:$0xff] %v9100_v39  ;;  %v9108_v31 = vpop.f32.mrb[74].mxu1  ;;  %v864_v39 = vld [vmem:[%s10255_s0 + $0x118] sm:$0xff] }
 0x2a0   : > { %4150 = vmatprep.mubr.bf16.mxu1 %v6738_v63  ;;  %v860_v63 = vld [vmem:[%s10255_s0 + $0xf8] sm:$0xff]  ;;  %10300 = vst [vmem:[#allocation38_spill] sm:$0xff] %v9108_v31  ;;  %v9110_v52 = vpop.f32.mrb[75].mxu1 }
 0x2a1   : > { %10301 = vst [vmem:[#allocation39_spill] sm:$0xff] %v9110_v52  ;;  %v936_v31 = vld [vmem:[%s10255_s0 + $0x358] sm:$0xff] }
 0x2a4   : > { %4593 = vmatmul.mubr.bf16.vlgmr.msra.gmra.mrb[0].mxu0 %v6453_v45  ;;  %v6470_v45 = vcombine.high %v848_v26, %v852_v53 }
 0x2a5   : > { %4602 = vmatprep.mubr.bf16.mxu0 %v6462_v54  ;;  %v6737_v54 = vcombine.low %v1118_v10, %v1118_v10  ;;  %v6469_v10 = vcombine.low %v848_v26, %v852_v53  ;;  %v6477_v26 = vcombine.low %v856_v33, %v860_v63  ;;  %v6486_v53 = vcombine.high %v864_v39, %v868_v56 }
 0x2a7   : > { %4151 = vmatmul.mubr.bf16.gmra.mrb[144].mxu1 %v6737_v54  ;;  %v7598_v54 = vld [vmem:[%s10259_s4 + $0x40] sm:$0xff]  }
 0x2ac   : > { %4603 = vmatmul.mubr.bf16.gmra.mrb[4].mxu0 %v6461_v2  ;;  %v6478_v2 = vcombine.high %v856_v33, %v860_v63  ;;  %v7599_v63 = vld [vmem:[%s10259_s4 + $0x48] sm:$0xff]  }
 0x2ad   : > { %4612 = vmatprep.mubr.bf16.mxu0 %v6470_v45  ;;  %v7597_v45 = vld [vmem:[%s10259_s4 + $0x38] sm:$0xff]  }
 0x2ae   : > { %5647 = vmatpush1.bf16.msra.mxu1 %v7597_v45  ;;  %v6485_v45 = vcombine.low %v864_v39, %v868_v56  ;;  %v7600_v56 = vld [vmem:[%s10259_s4 + $0x50] sm:$0xff]  }
 0x2af   : > { %5648 = vmatprep.subr.bf16.mxu1 %v10277_v44 }
 0x2b2   : > { %5649 = vmatpush1.bf16.msra.mxu1 %v7598_v54 }
 0x2b3   : > { %5650 = vmatprep.subr.bf16.mxu1 %v10277_v44 }
 0x2b4   : > { %4613 = vmatmul.mubr.bf16.gmra.mrb[8].mxu0 %v6469_v10  ;;  %v872_v10 = vld [vmem:[%s10255_s0 + $0x158] sm:$0xff] }
 0x2b5   : > { %4622 = vmatprep.mubr.bf16.mxu0 %v6478_v2  ;;  %v876_v2 = vld [vmem:[%s10255_s0 + $0x178] sm:$0xff] }
 0x2b6   : > { %v6494_v33 = vcombine.high %v872_v10, %v876_v2  ;;  %5651 = vmatpush1.bf16.msra.mxu1 %v7599_v63  ;;  %v6493_v54 = vcombine.low %v872_v10, %v876_v2  ;;  %v7601_v2 = vld [vmem:[%s10259_s4 + $0x58] sm:$0xff]  }
 0x2b7   : > { %5652 = vmatprep.subr.bf16.mxu1 %v10277_v44 }
 0x2ba   : > { %5653 = vmatpush1.bf16.msra.mxu1 %v7600_v56 }
 0x2bb   : > { %5654 = vmatprep.subr.bf16.mxu1 %v10277_v44 }
 0x2bc   : > { %4623 = vmatmul.mubr.bf16.gmra.mrb[12].mxu0 %v6477_v26  ;;  %v880_v26 = vld [vmem:[%s10255_s0 + $0x198] sm:$0xff] }
 0x2bd   : > { %4632 = vmatprep.mubr.bf16.mxu0 %v6486_v53  ;;  %v884_v53 = vld [vmem:[%s10255_s0 + $0x1b8] sm:$0xff] }
 0x2be   : > { %v6502_v39 = vcombine.high %v880_v26, %v884_v53  ;;  %v6501_v63 = vcombine.low %v880_v26, %v884_v53  ;;  %5655 = vmatpush1.bf16.msra.mxu1 %v7601_v2  ;;  %v7602_v53 = vld [vmem:[%s10259_s4 + $0x60] sm:$0xff]  }
 0x2bf   : > { %5656 = vmatprep.subr.bf16.mxu1 %v10277_v44 }
 0x2c2   : > { %5657 = vmatpush1.bf16.msra.mxu1 %v7602_v53  ;;  %v924_v53 = vld [vmem:[%s10255_s0 + $0x2f8] sm:$0xff] }
 0x2c3   : > { %5658 = vmatprep.subr.bf16.mxu1 %v10277_v44 }
 0x2c4   : > { %4633 = vmatmul.mubr.bf16.gmra.mrb[16].mxu0 %v6485_v45  ;;  %v888_v45 = vld [vmem:[%s10255_s0 + $0x1d8] sm:$0xff] }
 0x2c5   : > { %4642 = vmatprep.mubr.bf16.mxu0 %v6494_v33  ;;  %v892_v33 = vld [vmem:[%s10255_s0 + $0x1f8] sm:$0xff] }
 0x2c6   : > { %v6510_v10 = vcombine.high %v888_v45, %v892_v33  ;;  %v6509_v56 = vcombine.low %v888_v45, %v892_v33  ;;  %v912_v33 = vld [vmem:[%s10255_s0 + $0x298] sm:$0xff] }
 0x2cc   : > { %4643 = vmatmul.mubr.bf16.gmra.mrb[20].mxu0 %v6493_v54  ;;  %v896_v54 = vld [vmem:[%s10255_s0 + $0x218] sm:$0xff] }
 0x2cd   : > { %4652 = vmatprep.mubr.bf16.mxu0 %v6502_v39  ;;  %v900_v39 = vld [vmem:[%s10255_s0 + $0x238] sm:$0xff] }
 0x2ce   : > { %v6518_v26 = vcombine.high %v896_v54, %v900_v39  ;;  %v6517_v2 = vcombine.low %v896_v54, %v900_v39  ;;  %v7603_v54 = vld [vmem:[%s10259_s4 + $0x68] sm:$0xff]   ;;  %v920_v39 = vld [vmem:[%s10255_s0 + $0x2d8] sm:$0xff] }
 0x2cf   : > { %5659 = vmatpush1.bf16.msra.mxu1 %v7603_v54 }
 0x2d0   : > { %5660 = vmatprep.subr.bf16.mxu1 %v10277_v44 }
 0x2d4   : > { %4653 = vmatmul.mubr.bf16.gmra.mrb[24].mxu0 %v6501_v63  ;;  %v904_v63 = vld [vmem:[%s10255_s0 + $0x258] sm:$0xff] }
 0x2d5   : > { %4662 = vmatprep.mubr.bf16.mxu0 %v6510_v10  ;;  %v908_v10 = vld [vmem:[%s10255_s0 + $0x278] sm:$0xff] }
 0x2d6   : > { %v6526_v45 = vcombine.high %v904_v63, %v908_v10 }
 0x2dc   : > { %4663 = vmatmul.mubr.bf16.gmra.mrb[28].mxu0 %v6509_v56  ;;  %v916_v56 = vld [vmem:[%s10255_s0 + $0x2b8] sm:$0xff] }
 0x2dd   : > { %4672 = vmatprep.mubr.bf16.mxu0 %v6518_v26  ;;  %v6525_v26 = vcombine.low %v904_v63, %v908_v10  ;;  %v6534_v52 = vcombine.high %v912_v33, %v916_v56  ;;  %v6542_v63 = vcombine.high %v920_v39, %v924_v53  ;;  %v7604_v10 = vld [vmem:[%s10259_s4 + $0x70] sm:$0xff]  }
 0x2de   : > { %5661 = vmatpush1.bf16.msra.mxu1 %v7604_v10 }
 0x2df   : > { %5662 = vmatprep.subr.bf16.mxu1 %v10277_v44  ;;  %v940_v44 = vld [vmem:[%s10255_s0 + $0x378] sm:$0xff] }
 0x2e4   : > { %4673 = vmatmul.mubr.bf16.gmra.mrb[32].mxu0 %v6517_v2  ;;  %v6533_v2 = vcombine.low %v912_v33, %v916_v56 }
 0x2e5   : > { %4682 = vmatprep.mubr.bf16.mxu0 %v6526_v45  ;;  %v932_v45 = vld [vmem:[%s10255_s0 + $0x338] sm:$0xff] }
 0x2e9   : > { %v9199_v56 = vpop.f32.mrb[76].mxu1 }
 0x2ea   : > { %10302 = vst [vmem:[#allocation40_spill] sm:$0xff] %v9199_v56  ;;  %v9201_v54 = vpop.f32.mrb[77].mxu1 }
 0x2eb   : > { %10303 = vst [vmem:[#allocation41_spill] sm:$0xff] %v9201_v54 }
 0x2ec   : > { %4683 = vmatmul.mubr.bf16.gmra.mrb[36].mxu0 %v6525_v26  ;;  %v6541_v26 = vcombine.low %v920_v39, %v924_v53  ;;  %v6558_v53 = vcombine.high %v936_v31, %v940_v44 }
 0x2ed   : > { %4692 = vmatprep.mubr.bf16.mxu0 %v6534_v52  ;;  %v928_v52 = vld [vmem:[%s10255_s0 + $0x318] sm:$0xff] }
 0x2ee   : > { %v6550_v33 = vcombine.high %v928_v52, %v932_v45  ;;  %v6549_v39 = vcombine.low %v928_v52, %v932_v45  ;;  %v944_v52 = vld [vmem:[%s10255_s0 + $0x398] sm:$0xff] }
 0x2ef   : > { %v948_v45 = vld [vmem:[%s10255_s0 + $0x3b8] sm:$0xff] }
 0x2f0   : > { %v6566_v54 = vcombine.high %v944_v52, %v948_v45 }
 0x2f4   : > { %4693 = vmatmul.mubr.bf16.gmra.mrb[40].mxu0 %v6533_v2  ;;  %v9203_v2 = vpop.f32.mrb[78].mxu1 }
 0x2f5   : > { %4702 = vmatprep.mubr.bf16.mxu0 %v6542_v63  ;;  %10304 = vst [vmem:[#allocation42_spill] sm:$0xff] %v9203_v2  ;;  %v9205_v63 = vpop.f32.mrb[79].mxu1  ;;  %v7605_v2 = vld [vmem:[%s10259_s4 + $0x78] sm:$0xff]  }
 0x2f6   : > { %10305 = vst [vmem:[#allocation43_spill] sm:$0xff] %v9205_v63  ;;  %v9213_v10 = vpop.f32.mrb[80].mxu1  ;;  %5663 = vmatpush1.bf16.msra.mxu1 %v7605_v2 }
 0x2f7   : > { %10306 = vst [vmem:[#allocation44_spill] sm:$0xff] %v9213_v10  ;;  %v6557_v10 = vcombine.low %v936_v31, %v940_v44  ;;  %v6565_v31 = vcombine.low %v944_v52, %v948_v45 }
 0x2fc   : > { %4703 = vmatmul.mubr.bf16.gmra.mrb[44].mxu0 %v6541_v26  ;;  %v9218_v26 = vpop.f32.mrb[81].mxu1 }
 0x2fd   : > { %4712 = vmatprep.mubr.bf16.mxu0 %v6550_v33  ;;  %10307 = vst [vmem:[#allocation45_spill] sm:$0xff] %v9218_v26  ;;  %v9220_v63 = vpop.f32.mrb[82].mxu1 }
 0x2fe   : > { %10308 = vst [vmem:[#allocation46_spill] sm:$0xff] %v9220_v63  ;;  %v9222_v33 = vpop.f32.mrb[83].mxu1 }
 0x2ff   : > { %10309 = vst [vmem:[#allocation47_spill] sm:$0xff] %v9222_v33  ;;  %v9230_v56 = vpop.f32.mrb[84].mxu1 }
 0x300   : > { %10310 = vst [vmem:[#allocation48_spill] sm:$0xff] %v9230_v56  ;;  %v9232_v26 = vpop.f32.mrb[85].mxu1 }
 0x301   : > { %10311 = vst [vmem:[#allocation49_spill] sm:$0xff] %v9232_v26  ;;  %v9234_v63 = vpop.f32.mrb[86].mxu1 }
 0x302   : > { %10312 = vst [vmem:[#allocation50_spill] sm:$0xff] %v9234_v63  ;;  %v9236_v2 = vpop.f32.mrb[87].mxu1 }
 0x303   : > { %10313 = vst [vmem:[#allocation51_spill] sm:$0xff] %v9236_v2  ;;  %v9244_v33 = vpop.f32.mrb[88].mxu1  ;;  %v964_v2 = vld [vmem:[%s10255_s0 + $0x438] sm:$0xff] }
 0x304   : > { %4713 = vmatmul.mubr.bf16.gmra.mrb[48].mxu0 %v6549_v39  ;;  %v952_v39 = vld [vmem:[%s10255_s0 + $0x3d8] sm:$0xff]  ;;  %10314 = vst [vmem:[#allocation52_spill] sm:$0xff] %v9244_v33  ;;  %v9246_v56 = vpop.f32.mrb[89].mxu1 }
 0x305   : > { %4722 = vmatprep.mubr.bf16.mxu0 %v6558_v53  ;;  %v956_v53 = vld [vmem:[%s10255_s0 + $0x3f8] sm:$0xff]  ;;  %10315 = vst [vmem:[#allocation53_spill] sm:$0xff] %v9246_v56  ;;  %v9248_v26 = vpop.f32.mrb[90].mxu1 }
 0x306   : > { %v6574_v44 = vcombine.high %v952_v39, %v956_v53  ;;  %10316 = vst [vmem:[#allocation54_spill] sm:$0xff] %v9248_v26  ;;  %v6573_v52 = vcombine.low %v952_v39, %v956_v53 }
 0x30c   : > { %4723 = vmatmul.mubr.bf16.gmra.mrb[52].mxu0 %v6557_v10  ;;  %v9250_v10 = vpop.f32.mrb[91].mxu1 }
 0x30d   : > { %4732 = vmatprep.mubr.bf16.mxu0 %v6566_v54  ;;  %10317 = vst [vmem:[#allocation55_spill] sm:$0xff] %v9250_v10  ;;  %v960_v54 = vld [vmem:[%s10255_s0 + $0x418] sm:$0xff]  ;;  %v9258_v63 = vpop.f32.mrb[92].mxu1 }
 0x30e   : > { %v6582_v45 = vcombine.high %v960_v54, %v964_v2  ;;  %10318 = vst [vmem:[#allocation56_spill] sm:$0xff] %v9258_v63  ;;  %v9260_v33 = vpop.f32.mrb[93].mxu1  ;;  %v972_v10 = vld [vmem:[%s10255_s0 + $0x478] sm:$0xff]  ;;  %v6581_v39 = vcombine.low %v960_v54, %v964_v2 }
 0x30f   : > { %10319 = vst [vmem:[#allocation57_spill] sm:$0xff] %v9260_v33  ;;  %v9262_v56 = vpop.f32.mrb[94].mxu1 }
 0x310   : > { %10320 = vst [vmem:[#allocation58_spill] sm:$0xff] %v9262_v56 }
 0x314   : > { %4733 = vmatmul.mubr.bf16.gmra.mrb[56].mxu0 %v6565_v31  ;;  %v9264_v31 = vpop.f32.mrb[95].mxu1 }
 0x315   : > { %4742 = vmatprep.mubr.bf16.mxu0 %v6574_v44  ;;  %10321 = vst [vmem:[#allocation59_spill] sm:$0xff] %v9264_v31  ;;  %v968_v44 = vld [vmem:[%s10255_s0 + $0x458] sm:$0xff]  ;;  %v9272_v26 = vpop.f32.mrb[96].mxu1 }
 0x316   : > { %v6590_v53 = vcombine.high %v968_v44, %v972_v10  ;;  %10322 = vst [vmem:[#allocation60_spill] sm:$0xff] %v9272_v26  ;;  %v9274_v63 = vpop.f32.mrb[97].mxu1  ;;  %v980_v31 = vld [vmem:[%s10255_s0 + $0x4b8] sm:$0xff]  ;;  %v6589_v2 = vcombine.low %v968_v44, %v972_v10 }
 0x317   : > { %10323 = vst [vmem:[#allocation61_spill] sm:$0xff] %v9274_v63  ;;  %v9276_v33 = vpop.f32.mrb[98].mxu1 }
 0x318   : > { %10324 = vst [vmem:[#allocation62_spill] sm:$0xff] %v9276_v33 }
 0x31c   : > { %4743 = vmatmul.mubr.bf16.gmra.mrb[60].mxu0 %v6573_v52  ;;  %v9278_v52 = vpop.f32.mrb[99].mxu1 }
 0x31d   : > { %4752 = vmatprep.mubr.bf16.mxu0 %v6582_v45  ;;  %10325 = vst [vmem:[#allocation63_spill] sm:$0xff] %v9278_v52  ;;  %v976_v45 = vld [vmem:[%s10255_s0 + $0x498] sm:$0xff]  ;;  %v9286_v56 = vpop.f32.mrb[100].mxu1 }
 0x31e   : > { %v6598_v54 = vcombine.high %v976_v45, %v980_v31  ;;  %10326 = vst [vmem:[#allocation64_spill] sm:$0xff] %v9286_v56  ;;  %v9288_v26 = vpop.f32.mrb[101].mxu1  ;;  %v988_v52 = vld [vmem:[%s10255_s0 + $0x4f8] sm:$0xff]  ;;  %v6597_v10 = vcombine.low %v976_v45, %v980_v31 }
 0x31f   : > { %10327 = vst [vmem:[#allocation65_spill] sm:$0xff] %v9288_v26  ;;  %v9290_v63 = vpop.f32.mrb[102].mxu1 }
 0x320   : > { %10328 = vst [vmem:[#allocation66_spill] sm:$0xff] %v9290_v63 }
 0x324   : > { %4753 = vmatmul.mubr.bf16.gmra.mrb[64].mxu0 %v6581_v39  ;;  %v9292_v39 = vpop.f32.mrb[103].mxu1 }
 0x325   : > { %4762 = vmatprep.mubr.bf16.mxu0 %v6590_v53  ;;  %10329 = vst [vmem:[#allocation67_spill] sm:$0xff] %v9292_v39  ;;  %v984_v53 = vld [vmem:[%s10255_s0 + $0x4d8] sm:$0xff]  ;;  %v9300_v33 = vpop.f32.mrb[104].mxu1 }
 0x326   : > { %v6606_v44 = vcombine.high %v984_v53, %v988_v52  ;;  %10330 = vst [vmem:[#allocation68_spill] sm:$0xff] %v9300_v33  ;;  %v9302_v56 = vpop.f32.mrb[105].mxu1  ;;  %v996_v39 = vld [vmem:[%s10255_s0 + $0x538] sm:$0xff]  ;;  %v6605_v31 = vcombine.low %v984_v53, %v988_v52 }
 0x327   : > { %10331 = vst [vmem:[#allocation69_spill] sm:$0xff] %v9302_v56  ;;  %v9304_v26 = vpop.f32.mrb[106].mxu1 }
 0x328   : > { %10332 = vst [vmem:[#allocation70_spill] sm:$0xff] %v9304_v26 }
 0x32c   : > { %4763 = vmatmul.mubr.bf16.gmra.mrb[68].mxu0 %v6589_v2  ;;  %v9306_v2 = vpop.f32.mrb[107].mxu1 }
 0x32d   : > { %4772 = vmatprep.mubr.bf16.mxu0 %v6598_v54  ;;  %10333 = vst [vmem:[#allocation71_spill] sm:$0xff] %v9306_v2  ;;  %v992_v54 = vld [vmem:[%s10255_s0 + $0x518] sm:$0xff]  ;;  %v9314_v63 = vpop.f32.mrb[108].mxu1 }
 0x32e   : > { %v6614_v45 = vcombine.high %v992_v54, %v996_v39  ;;  %10334 = vst [vmem:[#allocation72_spill] sm:$0xff] %v9314_v63  ;;  %v9316_v33 = vpop.f32.mrb[109].mxu1  ;;  %v1004_v2 = vld [vmem:[%s10255_s0 + $0x578] sm:$0xff]  ;;  %v6613_v52 = vcombine.low %v992_v54, %v996_v39 }
 0x32f   : > { %10335 = vst [vmem:[#allocation73_spill] sm:$0xff] %v9316_v33  ;;  %v9318_v56 = vpop.f32.mrb[110].mxu1 }
 0x330   : > { %10336 = vst [vmem:[#allocation74_spill] sm:$0xff] %v9318_v56 }
 0x334   : > { %4773 = vmatmul.mubr.bf16.gmra.mrb[72].mxu0 %v6597_v10  ;;  %v9320_v10 = vpop.f32.mrb[111].mxu1 }
 0x335   : > { %4782 = vmatprep.mubr.bf16.mxu0 %v6606_v44  ;;  %10337 = vst [vmem:[#allocation75_spill] sm:$0xff] %v9320_v10  ;;  %v1000_v44 = vld [vmem:[%s10255_s0 + $0x558] sm:$0xff]  ;;  %v9328_v26 = vpop.f32.mrb[112].mxu1 }
 0x336   : > { %v6622_v53 = vcombine.high %v1000_v44, %v1004_v2  ;;  %10338 = vst [vmem:[#allocation76_spill] sm:$0xff] %v9328_v26  ;;  %v9330_v63 = vpop.f32.mrb[113].mxu1  ;;  %v1012_v10 = vld [vmem:[%s10255_s0 + $0x5b8] sm:$0xff]  ;;  %v6621_v39 = vcombine.low %v1000_v44, %v1004_v2 }
 0x337   : > { %10339 = vst [vmem:[#allocation77_spill] sm:$0xff] %v9330_v63  ;;  %v9332_v33 = vpop.f32.mrb[114].mxu1 }
 0x338   : > { %10340 = vst [vmem:[#allocation78_spill] sm:$0xff] %v9332_v33 }
 0x33c   : > { %4783 = vmatmul.mubr.bf16.gmra.mrb[76].mxu0 %v6605_v31  ;;  %v9334_v31 = vpop.f32.mrb[115].mxu1 }
 0x33d   : > { %4792 = vmatprep.mubr.bf16.mxu0 %v6614_v45  ;;  %10341 = vst [vmem:[#allocation79_spill] sm:$0xff] %v9334_v31  ;;  %v1008_v45 = vld [vmem:[%s10255_s0 + $0x598] sm:$0xff]  ;;  %v9342_v56 = vpop.f32.mrb[116].mxu1 }
 0x33e   : > { %v6630_v54 = vcombine.high %v1008_v45, %v1012_v10  ;;  %10342 = vst [vmem:[#allocation80_spill] sm:$0xff] %v9342_v56  ;;  %v9344_v26 = vpop.f32.mrb[117].mxu1  ;;  %v1020_v31 = vld [vmem:[%s10255_s0 + $0x5f8] sm:$0xff]  ;;  %v6629_v2 = vcombine.low %v1008_v45, %v1012_v10 }
 0x33f   : > { %10343 = vst [vmem:[#allocation81_spill] sm:$0xff] %v9344_v26  ;;  %v9346_v63 = vpop.f32.mrb[118].mxu1 }
 0x340   : > { %10344 = vst [vmem:[#allocation82_spill] sm:$0xff] %v9346_v63 }
 0x344   : > { %4793 = vmatmul.mubr.bf16.gmra.mrb[80].mxu0 %v6613_v52  ;;  %v9348_v52 = vpop.f32.mrb[119].mxu1 }
 0x345   : > { %4802 = vmatprep.mubr.bf16.mxu0 %v6622_v53  ;;  %10345 = vst [vmem:[#allocation83_spill] sm:$0xff] %v9348_v52  ;;  %v1016_v53 = vld [vmem:[%s10255_s0 + $0x5d8] sm:$0xff] }
 0x346   : > { %v6638_v44 = vcombine.high %v1016_v53, %v1020_v31  ;;  %v1028_v52 = vld [vmem:[%s10255_s0 + $0x638] sm:$0xff]  ;;  %v6637_v10 = vcombine.low %v1016_v53, %v1020_v31 }
 0x347   : > { %v1036_v31 = vld [vmem:[%s10255_s0 + $0x678] sm:$0xff] }
 0x349   : > { %v9356_v33 = vpop.f32.mrb[120].mxu1 }
 0x34a   : > { %10346 = vst [vmem:[#allocation84_spill] sm:$0xff] %v9356_v33  ;;  %v9358_v56 = vpop.f32.mrb[121].mxu1 }
 0x34b   : > { %10347 = vst [vmem:[#allocation85_spill] sm:$0xff] %v9358_v56  ;;  %v9360_v26 = vpop.f32.mrb[122].mxu1 }
 0x34c   : > { %4803 = vmatmul.mubr.bf16.gmra.mrb[84].mxu0 %v6621_v39  ;;  %10348 = vst [vmem:[#allocation86_spill] sm:$0xff] %v9360_v26  ;;  %v9362_v39 = vpop.f32.mrb[123].mxu1 }
 0x34d   : > { %4812 = vmatprep.mubr.bf16.mxu0 %v6630_v54  ;;  %10349 = vst [vmem:[#allocation87_spill] sm:$0xff] %v9362_v39  ;;  %v1024_v54 = vld [vmem:[%s10255_s0 + $0x618] sm:$0xff] }
 0x34e   : > { %v6646_v45 = vcombine.high %v1024_v54, %v1028_v52  ;;  %v6645_v53 = vcombine.low %v1024_v54, %v1028_v52  ;;  %v1044_v52 = vld [vmem:[%s10255_s0 + $0x6b8] sm:$0xff] }
 0x351   : > { %v9370_v63 = vpop.f32.mrb[124].mxu1 }
 0x352   : > { %10350 = vst [vmem:[#allocation88_spill] sm:$0xff] %v9370_v63  ;;  %v9372_v56 = vpop.f32.mrb[125].mxu1 }
 0x353   : > { %10351 = vst [vmem:[#allocation89_spill] sm:$0xff] %v9372_v56  ;;  %v9374_v26 = vpop.f32.mrb[126].mxu1 }
 0x354   : > { %4813 = vmatmul.mubr.bf16.gmra.mrb[88].mxu0 %v6629_v2  ;;  %10352 = vst [vmem:[#allocation90_spill] sm:$0xff] %v9374_v26  ;;  %v9376_v2 = vpop.f32.mrb[127].mxu1  ;;  %v1048_v26 = vld [vmem:[%s10255_s0 + $0x6d8] sm:$0xff] }
 0x355   : > { %4822 = vmatprep.mubr.bf16.mxu0 %v6638_v44  ;;  %10353 = vst [vmem:[#allocation91_spill] sm:$0xff] %v9376_v2  ;;  %v1032_v44 = vld [vmem:[%s10255_s0 + $0x658] sm:$0xff] }
 0x356   : > { %v6654_v39 = vcombine.high %v1032_v44, %v1036_v31  ;;  %v6653_v54 = vcombine.low %v1032_v44, %v1036_v31  ;;  %v1052_v44 = vld [vmem:[%s10255_s0 + $0x6f8] sm:$0xff] }
 0x359   : > { %v9384_v63 = vpop.f32.mrb[128].mxu1 }
 0x35a   : > { %10354 = vst [vmem:[#allocation92_spill] sm:$0xff] %v9384_v63  ;;  %v9386_v33 = vpop.f32.mrb[129].mxu1 }
 0x35b   : > { %10355 = vst [vmem:[#allocation93_spill] sm:$0xff] %v9386_v33  ;;  %v9388_v56 = vpop.f32.mrb[130].mxu1  ;;  %v4963_v33 = vlaneseq }
 0x35c   : > { %4823 = vmatmul.mubr.bf16.gmra.mrb[92].mxu0 %v6637_v10  ;;  %10356 = vst [vmem:[#allocation94_spill] sm:$0xff] %v9388_v56  ;;  %v9390_v10 = vpop.f32.mrb[131].mxu1 }
 0x35d   : > { %4832 = vmatprep.mubr.bf16.mxu0 %v6646_v45  ;;  %10357 = vst [vmem:[#allocation95_spill] sm:$0xff] %v9390_v10  ;;  %v1040_v45 = vld [vmem:[%s10255_s0 + $0x698] sm:$0xff]  ;;  %v4964_v10 = vshrl.u32 %v4963_v33, 7 }
 0x35e   : > { %v6662_v63 = vcombine.high %v1040_v45, %v1044_v52  ;;  %v6661_v31 = vcombine.low %v1040_v45, %v1044_v52  ;;  %v5119_v52 = vld [vmem:[%s826_s9] sm:$0x3] }
 0x361   : > { %v9399_v2 = vpop.f32.mrb[132].mxu1 }
 0x362   : > { %10358 = vst [vmem:[#allocation96_spill] sm:$0xff] %v9399_v2  ;;  %v9401_v56 = vpop.f32.mrb[133].mxu1 }
 0x363   : > { %10359 = vst [vmem:[#allocation97_spill] sm:$0xff] %v9401_v56  ;;  %v4969_v56 = vsub.s32 1, %v4964_v10 }
 0x364   : > { %4833 = vmatmul.mubr.bf16.gmra.mrb[96].mxu0 %v6645_v53  ;;  %v9403_v53 = vpop.f32.mrb[134].mxu1 }
 0x365   : > { %4842 = vmatprep.mubr.bf16.mxu0 %v6654_v39  ;;  %10360 = vst [vmem:[#allocation98_spill] sm:$0xff] %v9403_v53  ;;  %v9405_v39 = vpop.f32.mrb[135].mxu1  ;;  %v6670_v53 = vcombine.high %v1048_v26, %v1052_v44  ;;  %v9441_v1 = vrot.slane %v5119_v52, %v4969_v56 }
 0x366   : > { %10361 = vst [vmem:[#allocation99_spill] sm:$0xff] %v9405_v39  ;;  %v4961_v39 = vld [vmem:[%s821_s30] sm:$0x3] }
 0x367   : > { %v9435_v0 = vrot.slane %v4961_v39, %v4969_v56 }
 0x36c   : > { %4843 = vmatmul.mubr.bf16.gmra.mrb[100].mxu0 %v6653_v54  ;;  %v9416_v54 = vpop.f32.mrb[136].mxu1 }
 0x36d   : > { %4852 = vmatprep.mubr.bf16.mxu0 %v6662_v63  ;;  %10362 = vst [vmem:[#allocation100_spill] sm:$0xff] %v9416_v54  ;;  %v4965_v63 = vsub.s32 0, %v4964_v10  ;;  %v9421_v33 = vpop.f32.mrb[137].mxu1  ;;  %v1056_v54 = vld [vmem:[%s10255_s0 + $0x718] sm:$0xff] }
 0x36e   : > { %10363 = vst [vmem:[#allocation101_spill] sm:$0xff] %v9421_v33  ;;  %v9423_v2 = vpop.f32.mrb[138].mxu1  ;;  %v6678_v61 = vcombine.high %v1056_v54, %v1060_v17 }
 0x36f   : > { %10364 = vst [vmem:[#allocation102_spill] sm:$0xff] %v9423_v2  ;;  %v9425_v45 = vpop.f32.mrb[139].mxu1  ;;  %v9427_v28 = vrot.slane %v4961_v39, %v4965_v63  ;;  %v6669_v2 = vcombine.low %v1048_v26, %v1052_v44 }
 0x370   : > { %10365 = vst [vmem:[#allocation103_spill] sm:$0xff] %v9425_v45 }
 0x371   : > { %v9443_v47 = vpop.f32.mrb[140].mxu1 }
 0x372   : > { %10366 = vst [vmem:[#allocation104_spill] sm:$0xff] %v9443_v47  ;;  %v9447_v58 = vpop.f32.mrb[141].mxu1 }
 0x373   : > { %10367 = vst [vmem:[#allocation105_spill] sm:$0xff] %v9447_v58  ;;  %v9451_v26 = vpop.f32.mrb[142].mxu1 }
 0x374   : > { %4853 = vmatmul.mubr.bf16.gmra.mrb[104].mxu0 %v6661_v31  ;;  %v9438_v31 = vrot.slane %v5119_v52, %v4965_v63  ;;  %10368 = vst [vmem:[#allocation106_spill] sm:$0xff] %v9451_v26  ;;  %v9455_v44 = vpop.f32.mrb[143].mxu1 }
 0x375   : > { %4862 = vmatprep.mubr.bf16.mxu0 %v6670_v53  ;;  %10369 = vst [vmem:[#allocation107_spill] sm:$0xff] %v9455_v44 }
 0x377   : > { %v4594_v33 = vpop.f32.mrb[0].mxu0 }
 0x378   : > { %v6924_v10 = vadd.f32 %v4594_v33, %v8722_v55  ;;  %v4596_v45 = vpop.f32.mrb[1].mxu0 }
 0x379   : > { %v6925_v53 = vadd.f32 %v4596_v45, %v8724_v8  ;;  %v4598_v42 = vpop.f32.mrb[2].mxu0 }
 0x37a   : > { %v4973_v30 = vmul.f32 %v6924_v10, %v9427_v28  ;;  %v6926_v27 = vadd.f32 %v4598_v42, %v8732_v60  ;;  %v4600_v39 = vpop.f32.mrb[3].mxu0  ;;  %v9469_v26 = vpop.f32.mrb[144].mxu1 }
 0x37b   : > { %v4974_v55 = vmul.f32 %v6925_v53, %v9435_v0  ;;  %v6927_v63 = vadd.f32 %v4600_v39, %v8734_v51  ;;  %v1064_v51 = vld [vmem:[%s10255_s0 + $0x758] sm:$0xff]  ;;  %v6677_v39 = vcombine.low %v1056_v54, %v1060_v17 }
 0x37c   : > { %v5131_v8 = vadd.f32 %v9438_v31, %v4973_v30  ;;  %v4975_v56 = vmul.f32 %v6926_v27, %v9427_v28  ;;  %4863 = vmatmul.mubr.bf16.gmra.mrb[108].mxu0 %v6669_v2  ;;  %v1068_v30 = vld [vmem:[%s10255_s0 + $0x778] sm:$0xff] }
 0x37d   : > { %v5132_v33 = vadd.f32 %v9441_v1, %v4974_v55  ;;  %v4976_v60 = vmul.f32 %v6927_v63, %v9435_v0  ;;  %4872 = vmatprep.mubr.bf16.mxu0 %v6678_v61  ;;  %v6686_v44 = vcombine.high %v1064_v51, %v1068_v30 }
 0x37e   : > { %v5133_v42 = vadd.f32 %v9438_v31, %v4975_v56  ;;  %v5277_v45 = vmax.f32 %v5131_v8, 0.0  ;;  %v9473_v8 = vpop.f32.mrb[145].mxu1 }
 0x37f   : > { %v5134_v27 = vadd.f32 %v9441_v1, %v4976_v60  ;;  %v4604_v2 = vpop.f32.mrb[4].mxu0  ;;  %v5278_v61 = vmax.f32 %v5132_v33, 0.0  ;;  %v4156_v33 = vpop.f32.mrb[146].mxu1 }
 0x380   : > { %v5279_v52 = vmax.f32 %v5133_v42, 0.0  ;;  %v6928_v10 = vadd.f32 %v4604_v2, %v8742_v11  ;;  %v4606_v53 = vpop.f32.mrb[5].mxu0 }
 0x381   : > { %v5280_v55 = vmax.f32 %v5134_v27, 0.0  ;;  %v6929_v63 = vadd.f32 %v4606_v53, %v8744_v12  ;;  %v4608_v56 = vpop.f32.mrb[6].mxu0  ;;  %v4157_v27 = vpop.f32.mrb[147].mxu1 }
 0x382   : > { %v5423_v58 = vpack.c.bf16 %v5279_v52, %v5277_v45  ;;  %v4977_v47 = vmul.f32 %v6928_v10, %v9427_v28  ;;  %v6930_v60 = vadd.f32 %v4608_v56, %v8752_v20  ;;  %v4610_v37 = vpop.f32.mrb[7].mxu0 }
 0x383   : > { %v4978_v11 = vmul.f32 %v6929_v63, %v9435_v0  ;;  %v6931_v17 = vadd.f32 %v4610_v37, %v8754_v22  ;;  %v5424_v54 = vpack.c.bf16 %v5280_v55, %v5278_v61  ;;  %v1072_v22 = vld [vmem:[%s10255_s0 + $0x798] sm:$0xff] }
 0x384   : > { %v5135_v12 = vadd.f32 %v9438_v31, %v4977_v47  ;;  %v4979_v42 = vmul.f32 %v6930_v60, %v9427_v28  ;;  %4873 = vmatmul.mubr.bf16.gmra.mrb[112].mxu0 %v6677_v39  ;;  %v1076_v37 = vld [vmem:[%s10255_s0 + $0x7b8] sm:$0xff] }
 0x385   : > { %v5136_v2 = vadd.f32 %v9441_v1, %v4978_v11  ;;  %v4980_v45 = vmul.f32 %v6931_v17, %v9435_v0  ;;  %5664 = vmatprep.mubr.bf16.mxu1 %v5424_v54  ;;  %4882 = vmatprep.mubr.bf16.mxu0 %v6686_v44  ;;  %v6685_v44 = vcombine.low %v1064_v51, %v1068_v30 }
 0x386   : > { %v5137_v20 = vadd.f32 %v9438_v31, %v4979_v42  ;;  %5665 = vmatmul.mubr.bf16.vlgmr.msra.gmra.mrb[148].mxu1 %v5423_v58  ;;  %v5281_v10 = vmax.f32 %v5135_v12, 0.0  ;;  %v6694_v60 = vcombine.high %v1072_v22, %v1076_v37 }
 0x387   : > { %v5138_v47 = vadd.f32 %v9441_v1, %v4980_v45  ;;  %v4614_v52 = vpop.f32.mrb[8].mxu0  ;;  %v5282_v55 = vmax.f32 %v5136_v2, 0.0  ;;  %v1080_v2 = vld [vmem:[%s10255_s0 + $0x7d8] sm:$0xff] }
 0x388   : > { %v5283_v53 = vmax.f32 %v5137_v20, 0.0  ;;  %v6932_v39 = vadd.f32 %v4614_v52, %v8762_v15  ;;  %v4616_v61 = vpop.f32.mrb[9].mxu0 }
 0x389   : > { %v5284_v63 = vmax.f32 %v5138_v47, 0.0  ;;  %v6933_v58 = vadd.f32 %v4616_v61, %v8764_v16  ;;  %v4618_v56 = vpop.f32.mrb[10].mxu0 }
 0x38a   : > { %v4981_v11 = vmul.f32 %v6932_v39, %v9427_v28  ;;  %v6934_v17 = vadd.f32 %v4618_v56, %v8772_v29  ;;  %v4620_v54 = vpop.f32.mrb[11].mxu0  ;;  %v5425_v33 = vpack.c.bf16 %v5283_v53, %v5281_v10  ;;  %v6693_v39 = vcombine.low %v1072_v22, %v1076_v37 }
 0x38b   : > { %v4982_v42 = vmul.f32 %v6933_v58, %v9435_v0  ;;  %v6935_v12 = vadd.f32 %v4620_v54, %v8774_v32  ;;  %v5426_v27 = vpack.c.bf16 %v5284_v63, %v5282_v55  ;;  %v1084_v32 = vld [vmem:[%s10255_s0 + $0x7f8] sm:$0xff] }
 0x38c   : > { %v5139_v15 = vadd.f32 %v9438_v31, %v4981_v11  ;;  %v4983_v51 = vmul.f32 %v6934_v17, %v9427_v28  ;;  %4883 = vmatmul.mubr.bf16.gmra.mrb[116].mxu0 %v6685_v44  ;;  %v6702_v58 = vcombine.high %v1080_v2, %v1084_v32 }
 0x38d   : > { %v5140_v16 = vadd.f32 %v9441_v1, %v4982_v42  ;;  %v4984_v30 = vmul.f32 %v6935_v12, %v9435_v0  ;;  %5672 = vmatprep.mubr.bf16.mxu1 %v5426_v27  ;;  %4892 = vmatprep.mubr.bf16.mxu0 %v6694_v60  ;;  %v1088_v12 = vld [vmem:[%s10255_s0 + $0x818] sm:$0xff] }
 0x38e   : > { %v5141_v29 = vadd.f32 %v9438_v31, %v4983_v51  ;;  %5673 = vmatmul.mubr.bf16.gmra.mrb[152].mxu1 %v5425_v33  ;;  %v5285_v47 = vmax.f32 %v5139_v15, 0.0 }
 0x38f   : > { %v5142_v45 = vadd.f32 %v9441_v1, %v4984_v30  ;;  %v4624_v20 = vpop.f32.mrb[12].mxu0  ;;  %v5286_v61 = vmax.f32 %v5140_v16, 0.0 }
 0x390   : > { %v5287_v52 = vmax.f32 %v5141_v29, 0.0  ;;  %v6936_v10 = vadd.f32 %v4624_v20, %v8782_v21  ;;  %v4626_v53 = vpop.f32.mrb[13].mxu0 }
 0x391   : > { %v5288_v44 = vmax.f32 %v5142_v45, 0.0  ;;  %v6937_v55 = vadd.f32 %v4626_v53, %v8784_v23  ;;  %v4628_v63 = vpop.f32.mrb[14].mxu0  ;;  %v6701_v45 = vcombine.low %v1080_v2, %v1084_v32 }
 0x392   : > { %v4985_v56 = vmul.f32 %v6936_v10, %v9427_v28  ;;  %v6938_v60 = vadd.f32 %v4628_v63, %v8792_v40  ;;  %v4630_v11 = vpop.f32.mrb[15].mxu0  ;;  %v5427_v17 = vpack.c.bf16 %v5287_v52, %v5285_v47 }
 0x393   : > { %v4986_v54 = vmul.f32 %v6937_v55, %v9435_v0  ;;  %v6939_v33 = vadd.f32 %v4630_v11, %v8794_v41  ;;  %v5428_v42 = vpack.c.bf16 %v5288_v44, %v5286_v61  ;;  %v1092_v41 = vld [vmem:[%s10255_s0 + $0x838] sm:$0xff] }
 0x394   : > { %v5143_v21 = vadd.f32 %v9438_v31, %v4985_v56  ;;  %v4987_v22 = vmul.f32 %v6938_v60, %v9427_v28  ;;  %4893 = vmatmul.mubr.bf16.gmra.mrb[120].mxu0 %v6693_v39  ;;  %v6710_v53 = vcombine.high %v1088_v12, %v1092_v41  ;;  %v1096_v60 = vld [vmem:[%s10255_s0 + $0x858] sm:$0xff] }
 0x395   : > { %v5144_v23 = vadd.f32 %v9441_v1, %v4986_v54  ;;  %v4988_v37 = vmul.f32 %v6939_v33, %v9435_v0  ;;  %5680 = vmatprep.mubr.bf16.mxu1 %v5428_v42  ;;  %4902 = vmatprep.mubr.bf16.mxu0 %v6702_v58 }
 0x396   : > { %v5145_v40 = vadd.f32 %v9438_v31, %v4987_v22  ;;  %5681 = vmatmul.mubr.bf16.gmra.mrb[156].mxu1 %v5427_v17  ;;  %v5289_v51 = vmax.f32 %v5143_v21, 0.0  ;;  %v6709_v22 = vcombine.low %v1088_v12, %v1092_v41 }
 0x397   : > { %v5146_v27 = vadd.f32 %v9441_v1, %v4988_v37  ;;  %v4634_v15 = vpop.f32.mrb[16].mxu0  ;;  %v5290_v20 = vmax.f32 %v5144_v23, 0.0 }
 0x398   : > { %v5291_v16 = vmax.f32 %v5145_v40, 0.0  ;;  %v6940_v30 = vadd.f32 %v4634_v15, %v8802_v48  ;;  %v4636_v29 = vpop.f32.mrb[17].mxu0 }
 0x399   : > { %v5292_v47 = vmax.f32 %v5146_v27, 0.0  ;;  %v6941_v52 = vadd.f32 %v4636_v29, %v8804_v49  ;;  %v4638_v10 = vpop.f32.mrb[18].mxu0 }
 0x39a   : > { %v4989_v39 = vmul.f32 %v6940_v30, %v9427_v28  ;;  %v6942_v61 = vadd.f32 %v4638_v10, %v8812_v35  ;;  %v4640_v44 = vpop.f32.mrb[19].mxu0  ;;  %v5429_v55 = vpack.c.bf16 %v5291_v16, %v5289_v51 }
 0x39b   : > { %v4990_v63 = vmul.f32 %v6941_v52, %v9435_v0  ;;  %v6943_v58 = vadd.f32 %v4640_v44, %v8814_v38  ;;  %v5430_v56 = vpack.c.bf16 %v5292_v47, %v5290_v20  ;;  %v1100_v38 = vld [vmem:[%s10255_s0 + $0x878] sm:$0xff] }
 0x39c   : > { %v5147_v48 = vadd.f32 %v9438_v31, %v4989_v39  ;;  %v4991_v2 = vmul.f32 %v6942_v61, %v9427_v28  ;;  %4903 = vmatmul.mubr.bf16.gmra.mrb[124].mxu0 %v6701_v45  ;;  %v6718_v15 = vcombine.high %v1096_v60, %v1100_v38  ;;  %v1104_v52 = vld [vmem:[%s10255_s0 + $0x898] sm:$0xff] }
 0x39d   : > { %v5148_v49 = vadd.f32 %v9441_v1, %v4990_v63  ;;  %v4992_v32 = vmul.f32 %v6943_v58, %v9435_v0  ;;  %5688 = vmatprep.mubr.bf16.mxu1 %v5430_v56  ;;  %4912 = vmatprep.mubr.bf16.mxu0 %v6710_v53  ;;  %v6717_v63 = vcombine.low %v1096_v60, %v1100_v38 }
 0x39e   : > { %v5149_v35 = vadd.f32 %v9438_v31, %v4991_v2  ;;  %5689 = vmatmul.mubr.bf16.gmra.mrb[160].mxu1 %v5429_v55  ;;  %v5293_v54 = vmax.f32 %v5147_v48, 0.0 }
 0x39f   : > { %v5150_v11 = vadd.f32 %v9441_v1, %v4992_v32  ;;  %v4644_v17 = vpop.f32.mrb[20].mxu0  ;;  %v5294_v23 = vmax.f32 %v5148_v49, 0.0 }
 0x3a0   : > { %v5295_v33 = vmax.f32 %v5149_v35, 0.0  ;;  %v6944_v42 = vadd.f32 %v4644_v17, %v8822_v43  ;;  %v4646_v21 = vpop.f32.mrb[21].mxu0 }
 0x3a1   : > { %v5296_v37 = vmax.f32 %v5150_v11, 0.0  ;;  %v6945_v40 = vadd.f32 %v4646_v21, %v8824_v46  ;;  %v4648_v27 = vpop.f32.mrb[22].mxu0  ;;  %v1112_v21 = vld [vmem:[%s10255_s0 + $0x8d8] sm:$0xff] }
 0x3a2   : > { %v4993_v51 = vmul.f32 %v6944_v42, %v9427_v28  ;;  %v6946_v16 = vadd.f32 %v4648_v27, %v8832_v50  ;;  %v4650_v30 = vpop.f32.mrb[23].mxu0  ;;  %v5431_v29 = vpack.c.bf16 %v5295_v33, %v5293_v54 }
 0x3a3   : > { %v4994_v45 = vmul.f32 %v6945_v40, %v9435_v0  ;;  %v6947_v20 = vadd.f32 %v4650_v30, %v8834_v57  ;;  %v5432_v47 = vpack.c.bf16 %v5296_v37, %v5294_v23  ;;  %v1108_v57 = vld [vmem:[%s10255_s0 + $0x8b8] sm:$0xff] }
 0x3a4   : > { %v5151_v43 = vadd.f32 %v9438_v31, %v4993_v51  ;;  %v4995_v12 = vmul.f32 %v6946_v16, %v9427_v28  ;;  %4913 = vmatmul.mubr.bf16.gmra.mrb[128].mxu0 %v6709_v22  ;;  %v6726_v49 = vcombine.high %v1104_v52, %v1108_v57  ;;  %v6725_v51 = vcombine.low %v1104_v52, %v1108_v57 }
 0x3a5   : > { %v5152_v46 = vadd.f32 %v9441_v1, %v4994_v45  ;;  %v4996_v41 = vmul.f32 %v6947_v20, %v9435_v0  ;;  %5696 = vmatprep.mubr.bf16.mxu1 %v5432_v47  ;;  %4922 = vmatprep.mubr.bf16.mxu0 %v6718_v15 }
 0x3a6   : > { %v5153_v50 = vadd.f32 %v9438_v31, %v4995_v12  ;;  %5697 = vmatmul.mubr.bf16.gmra.mrb[164].mxu1 %v5431_v29  ;;  %v5297_v39 = vmax.f32 %v5151_v43, 0.0 }
 0x3a7   : > { %v5154_v10 = vadd.f32 %v9441_v1, %v4996_v41  ;;  %v4654_v53 = vpop.f32.mrb[24].mxu0  ;;  %v5298_v58 = vmax.f32 %v5152_v46, 0.0 }
 0x3a8   : > { %v5299_v61 = vmax.f32 %v5153_v50, 0.0  ;;  %v6948_v44 = vadd.f32 %v4654_v53, %v8842_v3  ;;  %v4656_v55 = vpop.f32.mrb[25].mxu0  ;;  %v1120_v53 = vld [vmem:[%s10255_s0 + $0x918] sm:$0x11] }
 0x3a9   : > { %v5300_v56 = vmax.f32 %v5154_v10, 0.0  ;;  %v6949_v48 = vadd.f32 %v4656_v55, %v8844_v19  ;;  %v4658_v2 = vpop.f32.mrb[26].mxu0 }
 0x3aa   : > { %v4997_v32 = vmul.f32 %v6948_v44, %v9427_v28  ;;  %v6950_v35 = vadd.f32 %v4658_v2, %v8852_v25  ;;  %v4660_v11 = vpop.f32.mrb[27].mxu0  ;;  %v5433_v17 = vpack.c.bf16 %v5299_v61, %v5297_v39 }
 0x3ab   : > { %v4998_v54 = vmul.f32 %v6949_v48, %v9435_v0  ;;  %v6951_v33 = vadd.f32 %v4660_v11, %v8854_v14  ;;  %v5434_v42 = vpack.c.bf16 %v5300_v56, %v5298_v58  ;;  %v1116_v14 = vld [vmem:[%s10255_s0 + $0x8f8] sm:$0xff] }
 0x3ac   : > { %v5155_v3 = vadd.f32 %v9438_v31, %v4997_v32  ;;  %v4999_v60 = vmul.f32 %v6950_v35, %v9427_v28  ;;  %4923 = vmatmul.mubr.bf16.gmra.mrb[132].mxu0 %v6717_v63  ;;  %v6734_v20 = vcombine.high %v1112_v21, %v1116_v14  ;;  %v6733_v58 = vcombine.low %v1112_v21, %v1116_v14 }
 0x3ad   : > { %v5156_v19 = vadd.f32 %v9441_v1, %v4998_v54  ;;  %v5000_v38 = vmul.f32 %v6951_v33, %v9435_v0  ;;  %5704 = vmatprep.mubr.bf16.mxu1 %v5434_v42  ;;  %4932 = vmatprep.mubr.bf16.mxu0 %v6726_v49  ;;  %v6742_v32 = vcombine.high %v1120_v53, %v1120_v53 }
 0x3ae   : > { %v5157_v25 = vadd.f32 %v9438_v31, %v4999_v60  ;;  %5705 = vmatmul.mubr.bf16.gmra.mrb[168].mxu1 %v5433_v17  ;;  %v5301_v37 = vmax.f32 %v5155_v3, 0.0 }
 0x3af   : > { %v5158_v22 = vadd.f32 %v9441_v1, %v5000_v38  ;;  %v4664_v23 = vpop.f32.mrb[28].mxu0  ;;  %v5302_v16 = vmax.f32 %v5156_v19, 0.0 }
 0x3b0   : > { %v5303_v40 = vmax.f32 %v5157_v25, 0.0  ;;  %v6952_v27 = vadd.f32 %v4664_v23, %v8862_v36  ;;  %v4666_v15 = vpop.f32.mrb[29].mxu0  ;;  %v6741_v23 = vcombine.low %v1120_v53, %v1120_v53 }
 0x3b1   : > { %v5304_v30 = vmax.f32 %v5158_v22, 0.0  ;;  %v6953_v29 = vadd.f32 %v4666_v15, %v8864_v18  ;;  %v4668_v45 = vpop.f32.mrb[30].mxu0 }
 0x3b2   : > { %v5001_v47 = vmul.f32 %v6952_v27, %v9427_v28  ;;  %v6954_v43 = vadd.f32 %v4668_v45, %v8872_v59  ;;  %v4670_v12 = vpop.f32.mrb[31].mxu0  ;;  %v5435_v46 = vpack.c.bf16 %v5303_v40, %v5301_v37 }
 0x3b3   : > { %v5002_v41 = vmul.f32 %v6953_v29, %v9435_v0  ;;  %v6955_v50 = vadd.f32 %v4670_v12, %v8874_v4  ;;  %v5436_v10 = vpack.c.bf16 %v5304_v30, %v5302_v16 }
 0x3b4   : > { %v5159_v36 = vadd.f32 %v9438_v31, %v5001_v47  ;;  %v5003_v52 = vmul.f32 %v6954_v43, %v9427_v28  ;;  %4933 = vmatmul.mubr.bf16.gmra.mrb[136].mxu0 %v6725_v51 }
 0x3b5   : > { %v5160_v18 = vadd.f32 %v9441_v1, %v5002_v41  ;;  %v5004_v57 = vmul.f32 %v6955_v50, %v9435_v0  ;;  %5712 = vmatprep.mubr.bf16.mxu1 %v5436_v10  ;;  %4942 = vmatprep.mubr.bf16.mxu0 %v6734_v20 }
 0x3b6   : > { %v5161_v59 = vadd.f32 %v9438_v31, %v5003_v52  ;;  %5713 = vmatmul.mubr.bf16.gmra.mrb[172].mxu1 %v5435_v46  ;;  %v5305_v61 = vmax.f32 %v5159_v36, 0.0 }
 0x3b7   : > { %v5162_v4 = vadd.f32 %v9441_v1, %v5004_v57  ;;  %v4674_v39 = vpop.f32.mrb[32].mxu0  ;;  %v5306_v56 = vmax.f32 %v5160_v18, 0.0 }
 0x3b8   : > { %v5307_v44 = vmax.f32 %v5161_v59, 0.0  ;;  %v6956_v55 = vadd.f32 %v4674_v39, %v8882_v34  ;;  %v4676_v63 = vpop.f32.mrb[33].mxu0  ;;  %v10371_v59 = vld [vmem:[#allocation5_spill] sm:$0xff] }
 0x3b9   : > { %v5308_v48 = vmax.f32 %v5162_v4, 0.0  ;;  %v6957_v2 = vadd.f32 %v4676_v63, %v8884_v5  ;;  %v4678_v49 = vpop.f32.mrb[34].mxu0 }
 0x3ba   : > { %v5005_v35 = vmul.f32 %v6956_v55, %v9427_v28  ;;  %v6958_v11 = vadd.f32 %v4678_v49, %v8892_v6  ;;  %v4680_v17 = vpop.f32.mrb[35].mxu0  ;;  %v5437_v54 = vpack.c.bf16 %v5307_v44, %v5305_v61  ;;  %v10372_v61 = vld [vmem:[#allocation6_spill] sm:$0xff] }
 0x3bb   : > { %v5006_v33 = vmul.f32 %v6957_v2, %v9435_v0  ;;  %v6959_v42 = vadd.f32 %v4680_v17, %v8894_v7  ;;  %v5438_v3 = vpack.c.bf16 %v5308_v48, %v5306_v56  ;;  %v10373_v56 = vld [vmem:[#allocation7_spill] sm:$0xff] }
 0x3bc   : > { %v5163_v34 = vadd.f32 %v9438_v31, %v5005_v35  ;;  %v5007_v60 = vmul.f32 %v6958_v11, %v9427_v28  ;;  %4943 = vmatmul.mubr.bf16.gmra.mrb[140].mxu0 %v6733_v58 }
 0x3bd   : > { %v5164_v5 = vadd.f32 %v9441_v1, %v5006_v33  ;;  %v5008_v19 = vmul.f32 %v6959_v42, %v9435_v0  ;;  %5720 = vmatprep.mubr.bf16.mxu1 %v5438_v3  ;;  %4952 = vmatprep.mubr.bf16.mxu0 %v6742_v32 }
 0x3be   : > { %v5165_v6 = vadd.f32 %v9438_v31, %v5007_v60  ;;  %5721 = vmatmul.mubr.bf16.gmra.mrb[176].mxu1 %v5437_v54  ;;  %v5309_v21 = vmax.f32 %v5163_v34, 0.0  ;;  %v10374_v34 = vld [vmem:[#allocation8_spill] sm:$0xff] }
 0x3bf   : > { %v5166_v38 = vadd.f32 %v9441_v1, %v5008_v19  ;;  %v4684_v25 = vpop.f32.mrb[36].mxu0  ;;  %v5310_v37 = vmax.f32 %v5164_v5, 0.0 }
 0x3c0   : > { %v5311_v7 = vmax.f32 %v5165_v6, 0.0  ;;  %v6960_v14 = vadd.f32 %v4684_v25, %v8902_v62  ;;  %v4686_v22 = vpop.f32.mrb[37].mxu0 }
 0x3c1   : > { %v5312_v40 = vmax.f32 %v5166_v38, 0.0  ;;  %v6961_v27 = vadd.f32 %v4686_v22, %v8904_v9  ;;  %v4688_v15 = vpop.f32.mrb[38].mxu0  ;;  %v10375_v38 = vld [vmem:[#allocation9_spill] sm:$0xff] }
 0x3c2   : > { %v5009_v51 = vmul.f32 %v6960_v14, %v9427_v28  ;;  %v6962_v16 = vadd.f32 %v4688_v15, %v8912_v24  ;;  %v4690_v30 = vpop.f32.mrb[39].mxu0  ;;  %v5439_v29 = vpack.c.bf16 %v5311_v7, %v5309_v21  ;;  %v10376_v14 = vld [vmem:[#allocation10_spill] sm:$0xff] }
 0x3c3   : > { %v5010_v45 = vmul.f32 %v6961_v27, %v9435_v0  ;;  %v6963_v20 = vadd.f32 %v4690_v30, %v8914_v13  ;;  %v5440_v47 = vpack.c.bf16 %v5312_v40, %v5310_v37  ;;  %v10370_v13 = vld [vmem:[#allocation4_spill] sm:$0xff]  ;;  %v10377_v27 = vld [vmem:[#allocation11_spill] sm:$0xff] }
 0x3c4   : > { %v5167_v62 = vadd.f32 %v9438_v31, %v5009_v51  ;;  %v5011_v43 = vmul.f32 %v6962_v16, %v9427_v28  ;;  %4953 = vmatmul.mubr.bf16.gmra.mrb[144].mxu0 %v6741_v23 }
 0x3c5   : > { %v5168_v12 = vadd.f32 %v9441_v1, %v5010_v45  ;;  %v5012_v9 = vmul.f32 %v6963_v20, %v9435_v0  ;;  %5728 = vmatprep.mubr.bf16.mxu1 %v5440_v47 }
 0x3c6   : > { %v5169_v46 = vadd.f32 %v9438_v31, %v5011_v43  ;;  %5729 = vmatmul.mubr.bf16.gmra.mrb[180].mxu1 %v5439_v29  ;;  %v5313_v50 = vmax.f32 %v5167_v62, 0.0 }
 0x3c7   : > { %v5170_v24 = vadd.f32 %v9441_v1, %v5012_v9  ;;  %v4694_v41 = vpop.f32.mrb[40].mxu0  ;;  %v5314_v18 = vmax.f32 %v5168_v12, 0.0  ;;  %v10378_v9 = vld [vmem:[#allocation12_spill] sm:$0xff] }
 0x3c8   : > { %v5315_v10 = vmax.f32 %v5169_v46, 0.0  ;;  %v6964_v36 = vadd.f32 %v4694_v41, %v10370_v13  ;;  %v4696_v52 = vpop.f32.mrb[41].mxu0 }
 0x3c9   : > { %v5316_v57 = vmax.f32 %v5170_v24, 0.0  ;;  %v6965_v53 = vadd.f32 %v4696_v52, %v10371_v59  ;;  %v4698_v4 = vpop.f32.mrb[42].mxu0 }
 0x3ca   : > { %v5013_v39 = vmul.f32 %v6964_v36, %v9427_v28  ;;  %v6966_v44 = vadd.f32 %v4698_v4, %v10372_v61  ;;  %v4700_v55 = vpop.f32.mrb[43].mxu0  ;;  %v5441_v63 = vpack.c.bf16 %v5315_v10, %v5313_v50  ;;  %v10379_v10 = vld [vmem:[#allocation13_spill] sm:$0xff] }
 0x3cb   : > { %v5014_v58 = vmul.f32 %v6965_v53, %v9435_v0  ;;  %v6967_v48 = vadd.f32 %v4700_v55, %v10373_v56  ;;  %v5442_v2 = vpack.c.bf16 %v5316_v57, %v5314_v18  ;;  %v10380_v18 = vld [vmem:[#allocation14_spill] sm:$0xff] }
 0x3cc   : > { %v5171_v49 = vadd.f32 %v9438_v31, %v5013_v39  ;;  %v5015_v32 = vmul.f32 %v6966_v44, %v9427_v28  ;;  %v10381_v39 = vld [vmem:[#allocation15_spill] sm:$0xff] }
 0x3cd   : > { %v5172_v35 = vadd.f32 %v9441_v1, %v5014_v58  ;;  %v5016_v11 = vmul.f32 %v6967_v48, %v9435_v0  ;;  %5736 = vmatprep.mubr.bf16.mxu1 %v5442_v2 }
 0x3ce   : > { %v5173_v17 = vadd.f32 %v9438_v31, %v5015_v32  ;;  %5737 = vmatmul.mubr.bf16.gmra.mrb[184].mxu1 %v5441_v63  ;;  %v5317_v42 = vmax.f32 %v5171_v49, 0.0 }
 0x3cf   : > { %v5174_v54 = vadd.f32 %v9441_v1, %v5016_v11  ;;  %v4704_v33 = vpop.f32.mrb[44].mxu0  ;;  %v5318_v19 = vmax.f32 %v5172_v35, 0.0  ;;  %v10382_v11 = vld [vmem:[#allocation16_spill] sm:$0xff] }
 0x3d0   : > { %v5319_v3 = vmax.f32 %v5173_v17, 0.0  ;;  %v6968_v60 = vadd.f32 %v4704_v33, %v10374_v34  ;;  %v4706_v5 = vpop.f32.mrb[45].mxu0 }
 0x3d1   : > { %v5320_v6 = vmax.f32 %v5174_v54, 0.0  ;;  %v6969_v25 = vadd.f32 %v4706_v5, %v10375_v38  ;;  %v4708_v21 = vpop.f32.mrb[46].mxu0 }
 0x3d2   : > { %v5017_v7 = vmul.f32 %v6968_v60, %v9427_v28  ;;  %v6970_v22 = vadd.f32 %v4708_v21, %v10376_v14  ;;  %v4710_v23 = vpop.f32.mrb[47].mxu0  ;;  %v5443_v37 = vpack.c.bf16 %v5319_v3, %v5317_v42  ;;  %v10383_v3 = vld [vmem:[#allocation17_spill] sm:$0xff] }
 0x3d3   : > { %v5018_v40 = vmul.f32 %v6969_v25, %v9435_v0  ;;  %v6971_v15 = vadd.f32 %v4710_v23, %v10377_v27  ;;  %v5444_v51 = vpack.c.bf16 %v5320_v6, %v5318_v19  ;;  %v10384_v19 = vld [vmem:[#allocation18_spill] sm:$0xff] }
 0x3d4   : > { %v5175_v16 = vadd.f32 %v9438_v31, %v5017_v7  ;;  %v5019_v30 = vmul.f32 %v6970_v22, %v9427_v28  ;;  %v10385_v7 = vld [vmem:[#allocation19_spill] sm:$0xff] }
 0x3d5   : > { %v5176_v29 = vadd.f32 %v9441_v1, %v5018_v40  ;;  %v5020_v45 = vmul.f32 %v6971_v15, %v9435_v0  ;;  %5744 = vmatprep.mubr.bf16.mxu1 %v5444_v51 }
 0x3d6   : > { %v5177_v20 = vadd.f32 %v9438_v31, %v5019_v30  ;;  %5745 = vmatmul.mubr.bf16.gmra.mrb[188].mxu1 %v5443_v37  ;;  %v5321_v43 = vmax.f32 %v5175_v16, 0.0 }
 0x3d7   : > { %v5178_v47 = vadd.f32 %v9441_v1, %v5020_v45  ;;  %v4714_v62 = vpop.f32.mrb[48].mxu0  ;;  %v5322_v41 = vmax.f32 %v5176_v29, 0.0  ;;  %v10386_v45 = vld [vmem:[#allocation20_spill] sm:$0xff] }
 0x3d8   : > { %v5323_v12 = vmax.f32 %v5177_v20, 0.0  ;;  %v6972_v46 = vadd.f32 %v4714_v62, %v10378_v9  ;;  %v4716_v24 = vpop.f32.mrb[49].mxu0 }
 0x3d9   : > { %v5324_v50 = vmax.f32 %v5178_v47, 0.0  ;;  %v6973_v13 = vadd.f32 %v4716_v24, %v10379_v10  ;;  %v4718_v36 = vpop.f32.mrb[50].mxu0 }
 0x3da   : > { %v5021_v52 = vmul.f32 %v6972_v46, %v9427_v28  ;;  %v6974_v57 = vadd.f32 %v4718_v36, %v10380_v18  ;;  %v4720_v59 = vpop.f32.mrb[51].mxu0  ;;  %v5445_v53 = vpack.c.bf16 %v5323_v12, %v5321_v43  ;;  %v10387_v12 = vld [vmem:[#allocation21_spill] sm:$0xff] }
 0x3db   : > { %v5022_v4 = vmul.f32 %v6973_v13, %v9435_v0  ;;  %v6975_v61 = vadd.f32 %v4720_v59, %v10381_v39  ;;  %v5446_v44 = vpack.c.bf16 %v5324_v50, %v5322_v41  ;;  %v10388_v41 = vld [vmem:[#allocation22_spill] sm:$0xff] }
 0x3dc   : > { %v5179_v55 = vadd.f32 %v9438_v31, %v5021_v52  ;;  %v5023_v63 = vmul.f32 %v6974_v57, %v9427_v28  ;;  %v10389_v52 = vld [vmem:[#allocation23_spill] sm:$0xff] }
 0x3dd   : > { %v5180_v58 = vadd.f32 %v9441_v1, %v5022_v4  ;;  %v5024_v56 = vmul.f32 %v6975_v61, %v9435_v0  ;;  %5752 = vmatprep.mubr.bf16.mxu1 %v5446_v44 }
 0x3de   : > { %v5181_v48 = vadd.f32 %v9438_v31, %v5023_v63  ;;  %5753 = vmatmul.mubr.bf16.gmra.mrb[192].mxu1 %v5445_v53  ;;  %v5325_v32 = vmax.f32 %v5179_v55, 0.0 }
 0x3df   : > { %v5182_v2 = vadd.f32 %v9441_v1, %v5024_v56  ;;  %v4724_v49 = vpop.f32.mrb[52].mxu0  ;;  %v5326_v33 = vmax.f32 %v5180_v58, 0.0  ;;  %v10390_v56 = vld [vmem:[#allocation24_spill] sm:$0xff] }
 0x3e0   : > { %v5327_v35 = vmax.f32 %v5181_v48, 0.0  ;;  %v6976_v17 = vadd.f32 %v4724_v49, %v10382_v11  ;;  %v4726_v54 = vpop.f32.mrb[53].mxu0 }
 0x3e1   : > { %v5328_v42 = vmax.f32 %v5182_v2, 0.0  ;;  %v6977_v34 = vadd.f32 %v4726_v54, %v10383_v3  ;;  %v4728_v60 = vpop.f32.mrb[54].mxu0 }
 0x3e2   : > { %v5025_v5 = vmul.f32 %v6976_v17, %v9427_v28  ;;  %v6978_v6 = vadd.f32 %v4728_v60, %v10384_v19  ;;  %v4730_v38 = vpop.f32.mrb[55].mxu0  ;;  %v5447_v25 = vpack.c.bf16 %v5327_v35, %v5325_v32  ;;  %v10391_v35 = vld [vmem:[#allocation25_spill] sm:$0xff] }
 0x3e3   : > { %v5026_v21 = vmul.f32 %v6977_v34, %v9435_v0  ;;  %v6979_v14 = vadd.f32 %v4730_v38, %v10385_v7  ;;  %v5448_v22 = vpack.c.bf16 %v5328_v42, %v5326_v33  ;;  %v10392_v33 = vld [vmem:[#allocation26_spill] sm:$0xff] }
 0x3e4   : > { %v5183_v23 = vadd.f32 %v9438_v31, %v5025_v5  ;;  %v5027_v37 = vmul.f32 %v6978_v6, %v9427_v28  ;;  %v10393_v5 = vld [vmem:[#allocation27_spill] sm:$0xff] }
 0x3e5   : > { %v5184_v40 = vadd.f32 %v9441_v1, %v5026_v21  ;;  %v5028_v27 = vmul.f32 %v6979_v14, %v9435_v0  ;;  %5760 = vmatprep.mubr.bf16.mxu1 %v5448_v22 }
 0x3e6   : > { %v5185_v15 = vadd.f32 %v9438_v31, %v5027_v37  ;;  %5761 = vmatmul.mubr.bf16.gmra.mrb[196].mxu1 %v5447_v25  ;;  %v5329_v30 = vmax.f32 %v5183_v23, 0.0 }
 0x3e7   : > { %v5186_v51 = vadd.f32 %v9441_v1, %v5028_v27  ;;  %v4734_v16 = vpop.f32.mrb[56].mxu0  ;;  %v5330_v62 = vmax.f32 %v5184_v40, 0.0  ;;  %v10394_v27 = vld [vmem:[#allocation28_spill] sm:$0xff] }
 0x3e8   : > { %v5331_v29 = vmax.f32 %v5185_v15, 0.0  ;;  %v6980_v20 = vadd.f32 %v4734_v16, %v10386_v45  ;;  %v4736_v47 = vpop.f32.mrb[57].mxu0 }
 0x3e9   : > { %v5332_v43 = vmax.f32 %v5186_v51, 0.0  ;;  %v6981_v9 = vadd.f32 %v4736_v47, %v10387_v12  ;;  %v4738_v46 = vpop.f32.mrb[58].mxu0 }
 0x3ea   : > { %v5029_v24 = vmul.f32 %v6980_v20, %v9427_v28  ;;  %v6982_v50 = vadd.f32 %v4738_v46, %v10388_v41  ;;  %v4740_v10 = vpop.f32.mrb[59].mxu0  ;;  %v5449_v13 = vpack.c.bf16 %v5331_v29, %v5329_v30  ;;  %v10395_v29 = vld [vmem:[#allocation29_spill] sm:$0xff] }
 0x3eb   : > { %v5030_v36 = vmul.f32 %v6981_v9, %v9435_v0  ;;  %v6983_v18 = vadd.f32 %v4740_v10, %v10389_v52  ;;  %v5450_v57 = vpack.c.bf16 %v5332_v43, %v5330_v62  ;;  %v10396_v62 = vld [vmem:[#allocation30_spill] sm:$0xff] }
 0x3ec   : > { %v5187_v59 = vadd.f32 %v9438_v31, %v5029_v24  ;;  %v5031_v53 = vmul.f32 %v6982_v50, %v9427_v28  ;;  %v10397_v24 = vld [vmem:[#allocation31_spill] sm:$0xff] }
 0x3ed   : > { %v5188_v4 = vadd.f32 %v9441_v1, %v5030_v36  ;;  %v5032_v39 = vmul.f32 %v6983_v18, %v9435_v0  ;;  %5768 = vmatprep.mubr.bf16.mxu1 %v5450_v57 }
 0x3ee   : > { %v5189_v61 = vadd.f32 %v9438_v31, %v5031_v53  ;;  %5769 = vmatmul.mubr.bf16.gmra.mrb[200].mxu1 %v5449_v13  ;;  %v5333_v63 = vmax.f32 %v5187_v59, 0.0 }
 0x3ef   : > { %v5190_v44 = vadd.f32 %v9441_v1, %v5032_v39  ;;  %v4744_v55 = vpop.f32.mrb[60].mxu0  ;;  %v5334_v49 = vmax.f32 %v5188_v4, 0.0  ;;  %v10398_v39 = vld [vmem:[#allocation32_spill] sm:$0xff] }
 0x3f0   : > { %v5335_v58 = vmax.f32 %v5189_v61, 0.0  ;;  %v6984_v48 = vadd.f32 %v4744_v55, %v10390_v56  ;;  %v4746_v2 = vpop.f32.mrb[61].mxu0 }
 0x3f1   : > { %v5336_v32 = vmax.f32 %v5190_v44, 0.0  ;;  %v6985_v11 = vadd.f32 %v4746_v2, %v10391_v35  ;;  %v4748_v17 = vpop.f32.mrb[62].mxu0 }
 0x3f2   : > { %v5033_v54 = vmul.f32 %v6984_v48, %v9427_v28  ;;  %v6986_v42 = vadd.f32 %v4748_v17, %v10392_v33  ;;  %v4750_v3 = vpop.f32.mrb[63].mxu0  ;;  %v5451_v34 = vpack.c.bf16 %v5335_v58, %v5333_v63  ;;  %v10399_v58 = vld [vmem:[#allocation33_spill] sm:$0xff] }
 0x3f3   : > { %v5034_v60 = vmul.f32 %v6985_v11, %v9435_v0  ;;  %v6987_v19 = vadd.f32 %v4750_v3, %v10393_v5  ;;  %v5452_v6 = vpack.c.bf16 %v5336_v32, %v5334_v49  ;;  %v10400_v49 = vld [vmem:[#allocation34_spill] sm:$0xff] }
 0x3f4   : > { %v5191_v38 = vadd.f32 %v9438_v31, %v5033_v54  ;;  %v5035_v25 = vmul.f32 %v6986_v42, %v9427_v28  ;;  %v10401_v54 = vld [vmem:[#allocation35_spill] sm:$0xff] }
 0x3f5   : > { %v5192_v21 = vadd.f32 %v9441_v1, %v5034_v60  ;;  %v5036_v7 = vmul.f32 %v6987_v19, %v9435_v0  ;;  %5776 = vmatprep.mubr.bf16.mxu1 %v5452_v6 }
 0x3f6   : > { %v5193_v14 = vadd.f32 %v9438_v31, %v5035_v25  ;;  %5777 = vmatmul.mubr.bf16.gmra.mrb[204].mxu1 %v5451_v34  ;;  %v5337_v37 = vmax.f32 %v5191_v38, 0.0 }
 0x3f7   : > { %v5194_v22 = vadd.f32 %v9441_v1, %v5036_v7  ;;  %v4754_v23 = vpop.f32.mrb[64].mxu0  ;;  %v5338_v16 = vmax.f32 %v5192_v21, 0.0  ;;  %v10402_v7 = vld [vmem:[#allocation36_spill] sm:$0xff] }
 0x3f8   : > { %v5339_v40 = vmax.f32 %v5193_v14, 0.0  ;;  %v6988_v15 = vadd.f32 %v4754_v23, %v10394_v27  ;;  %v4756_v51 = vpop.f32.mrb[65].mxu0 }
 0x3f9   : > { %v5340_v30 = vmax.f32 %v5194_v22, 0.0  ;;  %v6989_v45 = vadd.f32 %v4756_v51, %v10395_v29  ;;  %v4758_v20 = vpop.f32.mrb[66].mxu0 }
 0x3fa   : > { %v5037_v47 = vmul.f32 %v6988_v15, %v9427_v28  ;;  %v6990_v43 = vadd.f32 %v4758_v20, %v10396_v62  ;;  %v4760_v12 = vpop.f32.mrb[67].mxu0  ;;  %v5453_v9 = vpack.c.bf16 %v5339_v40, %v5337_v37  ;;  %v10403_v40 = vld [vmem:[#allocation37_spill] sm:$0xff] }
 0x3fb   : > { %v5038_v46 = vmul.f32 %v6989_v45, %v9435_v0  ;;  %v6991_v41 = vadd.f32 %v4760_v12, %v10397_v24  ;;  %v5454_v50 = vpack.c.bf16 %v5340_v30, %v5338_v16  ;;  %v10404_v16 = vld [vmem:[#allocation38_spill] sm:$0xff] }
 0x3fc   : > { %v5195_v10 = vadd.f32 %v9438_v31, %v5037_v47  ;;  %v5039_v13 = vmul.f32 %v6990_v43, %v9427_v28  ;;  %v10405_v47 = vld [vmem:[#allocation39_spill] sm:$0xff] }
 0x3fd   : > { %v5196_v36 = vadd.f32 %v9441_v1, %v5038_v46  ;;  %v5040_v52 = vmul.f32 %v6991_v41, %v9435_v0  ;;  %5784 = vmatprep.mubr.bf16.mxu1 %v5454_v50 }
 0x3fe   : > { %v5197_v18 = vadd.f32 %v9438_v31, %v5039_v13  ;;  %5785 = vmatmul.mubr.bf16.gmra.mrb[208].mxu1 %v5453_v9  ;;  %v5341_v53 = vmax.f32 %v5195_v10, 0.0 }
 0x3ff   : > { %v5198_v57 = vadd.f32 %v9441_v1, %v5040_v52  ;;  %v4764_v59 = vpop.f32.mrb[68].mxu0  ;;  %v5342_v55 = vmax.f32 %v5196_v36, 0.0  ;;  %v10406_v52 = vld [vmem:[#allocation40_spill] sm:$0xff] }
 0x400   : > { %v5343_v4 = vmax.f32 %v5197_v18, 0.0  ;;  %v6992_v61 = vadd.f32 %v4764_v59, %v10398_v39  ;;  %v4766_v44 = vpop.f32.mrb[69].mxu0 }
 0x401   : > { %v5344_v63 = vmax.f32 %v5198_v57, 0.0  ;;  %v6993_v56 = vadd.f32 %v4766_v44, %v10399_v58  ;;  %v4768_v48 = vpop.f32.mrb[70].mxu0 }
 0x402   : > { %v5041_v2 = vmul.f32 %v6992_v61, %v9427_v28  ;;  %v6994_v32 = vadd.f32 %v4768_v48, %v10400_v49  ;;  %v4770_v35 = vpop.f32.mrb[71].mxu0  ;;  %v5455_v11 = vpack.c.bf16 %v5343_v4, %v5341_v53  ;;  %v10407_v4 = vld [vmem:[#allocation41_spill] sm:$0xff] }
 0x403   : > { %v5042_v17 = vmul.f32 %v6993_v56, %v9435_v0  ;;  %v6995_v33 = vadd.f32 %v4770_v35, %v10401_v54  ;;  %v5456_v42 = vpack.c.bf16 %v5344_v63, %v5342_v55  ;;  %v10408_v55 = vld [vmem:[#allocation42_spill] sm:$0xff] }
 0x404   : > { %v5199_v3 = vadd.f32 %v9438_v31, %v5041_v2  ;;  %v5043_v34 = vmul.f32 %v6994_v32, %v9427_v28  ;;  %v10409_v2 = vld [vmem:[#allocation43_spill] sm:$0xff] }
 0x405   : > { %v5200_v60 = vadd.f32 %v9441_v1, %v5042_v17  ;;  %v5044_v5 = vmul.f32 %v6995_v33, %v9435_v0  ;;  %5792 = vmatprep.mubr.bf16.mxu1 %v5456_v42 }
 0x406   : > { %v5201_v19 = vadd.f32 %v9438_v31, %v5043_v34  ;;  %5793 = vmatmul.mubr.bf16.gmra.mrb[212].mxu1 %v5455_v11  ;;  %v5345_v25 = vmax.f32 %v5199_v3, 0.0 }
 0x407   : > { %v5202_v6 = vadd.f32 %v9441_v1, %v5044_v5  ;;  %v4774_v38 = vpop.f32.mrb[72].mxu0  ;;  %v5346_v23 = vmax.f32 %v5200_v60, 0.0  ;;  %v10410_v5 = vld [vmem:[#allocation44_spill] sm:$0xff] }
 0x408   : > { %v5347_v21 = vmax.f32 %v5201_v19, 0.0  ;;  %v6996_v14 = vadd.f32 %v4774_v38, %v10402_v7  ;;  %v4776_v22 = vpop.f32.mrb[73].mxu0 }
 0x409   : > { %v5348_v37 = vmax.f32 %v5202_v6, 0.0  ;;  %v6997_v27 = vadd.f32 %v4776_v22, %v10403_v40  ;;  %v4778_v15 = vpop.f32.mrb[74].mxu0 }
 0x40a   : > { %v5045_v51 = vmul.f32 %v6996_v14, %v9427_v28  ;;  %v6998_v30 = vadd.f32 %v4778_v15, %v10404_v16  ;;  %v4780_v29 = vpop.f32.mrb[75].mxu0  ;;  %v5457_v45 = vpack.c.bf16 %v5347_v21, %v5345_v25  ;;  %v10411_v21 = vld [vmem:[#allocation45_spill] sm:$0xff] }
 0x40b   : > { %v5046_v20 = vmul.f32 %v6997_v27, %v9435_v0  ;;  %v6999_v62 = vadd.f32 %v4780_v29, %v10405_v47  ;;  %v5458_v43 = vpack.c.bf16 %v5348_v37, %v5346_v23  ;;  %v10412_v23 = vld [vmem:[#allocation46_spill] sm:$0xff] }
 0x40c   : > { %v5203_v12 = vadd.f32 %v9438_v31, %v5045_v51  ;;  %v5047_v9 = vmul.f32 %v6998_v30, %v9427_v28  ;;  %v10413_v51 = vld [vmem:[#allocation47_spill] sm:$0xff] }
 0x40d   : > { %v5204_v46 = vadd.f32 %v9441_v1, %v5046_v20  ;;  %v5048_v24 = vmul.f32 %v6999_v62, %v9435_v0  ;;  %5800 = vmatprep.mubr.bf16.mxu1 %v5458_v43 }
 0x40e   : > { %v5205_v41 = vadd.f32 %v9438_v31, %v5047_v9  ;;  %5801 = vmatmul.mubr.bf16.gmra.mrb[216].mxu1 %v5457_v45  ;;  %v5349_v13 = vmax.f32 %v5203_v12, 0.0 }
 0x40f   : > { %v5206_v50 = vadd.f32 %v9441_v1, %v5048_v24  ;;  %v4784_v10 = vpop.f32.mrb[76].mxu0  ;;  %v5350_v59 = vmax.f32 %v5204_v46, 0.0  ;;  %v10414_v24 = vld [vmem:[#allocation48_spill] sm:$0xff] }
 0x410   : > { %v5351_v36 = vmax.f32 %v5205_v41, 0.0  ;;  %v7000_v18 = vadd.f32 %v4784_v10, %v10406_v52  ;;  %v4786_v57 = vpop.f32.mrb[77].mxu0 }
 0x411   : > { %v5352_v53 = vmax.f32 %v5206_v50, 0.0  ;;  %v7001_v39 = vadd.f32 %v4786_v57, %v10407_v4  ;;  %v4788_v61 = vpop.f32.mrb[78].mxu0 }
 0x412   : > { %v5049_v44 = vmul.f32 %v7000_v18, %v9427_v28  ;;  %v7002_v63 = vadd.f32 %v4788_v61, %v10408_v55  ;;  %v4790_v58 = vpop.f32.mrb[79].mxu0  ;;  %v5459_v56 = vpack.c.bf16 %v5351_v36, %v5349_v13  ;;  %v10415_v36 = vld [vmem:[#allocation49_spill] sm:$0xff] }
 0x413   : > { %v5050_v48 = vmul.f32 %v7001_v39, %v9435_v0  ;;  %v7003_v49 = vadd.f32 %v4790_v58, %v10409_v2  ;;  %v5460_v32 = vpack.c.bf16 %v5352_v53, %v5350_v59  ;;  %v10416_v59 = vld [vmem:[#allocation50_spill] sm:$0xff] }
 0x414   : > { %v5207_v35 = vadd.f32 %v9438_v31, %v5049_v44  ;;  %v5051_v11 = vmul.f32 %v7002_v63, %v9427_v28  ;;  %v10417_v44 = vld [vmem:[#allocation51_spill] sm:$0xff] }
 0x415   : > { %v5208_v17 = vadd.f32 %v9441_v1, %v5050_v48  ;;  %v5052_v54 = vmul.f32 %v7003_v49, %v9435_v0  ;;  %5808 = vmatprep.mubr.bf16.mxu1 %v5460_v32 }
 0x416   : > { %v5209_v33 = vadd.f32 %v9438_v31, %v5051_v11  ;;  %5809 = vmatmul.mubr.bf16.gmra.mrb[220].mxu1 %v5459_v56  ;;  %v5353_v34 = vmax.f32 %v5207_v35, 0.0 }
 0x417   : > { %v5210_v42 = vadd.f32 %v9441_v1, %v5052_v54  ;;  %v4794_v3 = vpop.f32.mrb[80].mxu0  ;;  %v5354_v38 = vmax.f32 %v5208_v17, 0.0  ;;  %v10418_v54 = vld [vmem:[#allocation52_spill] sm:$0xff] }
 0x418   : > { %v5355_v60 = vmax.f32 %v5209_v33, 0.0  ;;  %v7004_v19 = vadd.f32 %v4794_v3, %v10410_v5  ;;  %v4796_v6 = vpop.f32.mrb[81].mxu0 }
 0x419   : > { %v5356_v25 = vmax.f32 %v5210_v42, 0.0  ;;  %v7005_v7 = vadd.f32 %v4796_v6, %v10411_v21  ;;  %v4798_v14 = vpop.f32.mrb[82].mxu0 }
 0x41a   : > { %v5053_v22 = vmul.f32 %v7004_v19, %v9427_v28  ;;  %v7006_v37 = vadd.f32 %v4798_v14, %v10412_v23  ;;  %v4800_v40 = vpop.f32.mrb[83].mxu0  ;;  %v5461_v27 = vpack.c.bf16 %v5355_v60, %v5353_v34  ;;  %v10419_v60 = vld [vmem:[#allocation53_spill] sm:$0xff] }
 0x41b   : > { %v5054_v15 = vmul.f32 %v7005_v7, %v9435_v0  ;;  %v7007_v16 = vadd.f32 %v4800_v40, %v10413_v51  ;;  %v5462_v30 = vpack.c.bf16 %v5356_v25, %v5354_v38  ;;  %v10420_v38 = vld [vmem:[#allocation54_spill] sm:$0xff] }
 0x41c   : > { %v5211_v29 = vadd.f32 %v9438_v31, %v5053_v22  ;;  %v5055_v45 = vmul.f32 %v7006_v37, %v9427_v28  ;;  %v10421_v22 = vld [vmem:[#allocation55_spill] sm:$0xff] }
 0x41d   : > { %v5212_v20 = vadd.f32 %v9441_v1, %v5054_v15  ;;  %v5056_v47 = vmul.f32 %v7007_v16, %v9435_v0  ;;  %5816 = vmatprep.mubr.bf16.mxu1 %v5462_v30 }
 0x41e   : > { %v5213_v62 = vadd.f32 %v9438_v31, %v5055_v45  ;;  %5817 = vmatmul.mubr.bf16.gmra.mrb[224].mxu1 %v5461_v27  ;;  %v5357_v9 = vmax.f32 %v5211_v29, 0.0 }
 0x41f   : > { %v5214_v43 = vadd.f32 %v9441_v1, %v5056_v47  ;;  %v4804_v12 = vpop.f32.mrb[84].mxu0  ;;  %v5358_v10 = vmax.f32 %v5212_v20, 0.0  ;;  %v10422_v47 = vld [vmem:[#allocation56_spill] sm:$0xff] }
 0x420   : > { %v5359_v46 = vmax.f32 %v5213_v62, 0.0  ;;  %v7008_v41 = vadd.f32 %v4804_v12, %v10414_v24  ;;  %v4806_v50 = vpop.f32.mrb[85].mxu0 }
 0x421   : > { %v5360_v13 = vmax.f32 %v5214_v43, 0.0  ;;  %v7009_v52 = vadd.f32 %v4806_v50, %v10415_v36  ;;  %v4808_v18 = vpop.f32.mrb[86].mxu0 }
 0x422   : > { %v5057_v57 = vmul.f32 %v7008_v41, %v9427_v28  ;;  %v7010_v53 = vadd.f32 %v4808_v18, %v10416_v59  ;;  %v4810_v4 = vpop.f32.mrb[87].mxu0  ;;  %v5463_v39 = vpack.c.bf16 %v5359_v46, %v5357_v9  ;;  %v10423_v46 = vld [vmem:[#allocation57_spill] sm:$0xff] }
 0x423   : > { %v5058_v61 = vmul.f32 %v7009_v52, %v9435_v0  ;;  %v7011_v55 = vadd.f32 %v4810_v4, %v10417_v44  ;;  %v5464_v63 = vpack.c.bf16 %v5360_v13, %v5358_v10  ;;  %v10424_v10 = vld [vmem:[#allocation58_spill] sm:$0xff] }
 0x424   : > { %v5215_v58 = vadd.f32 %v9438_v31, %v5057_v57  ;;  %v5059_v56 = vmul.f32 %v7010_v53, %v9427_v28  ;;  %v10425_v57 = vld [vmem:[#allocation59_spill] sm:$0xff] }
 0x425   : > { %v5216_v48 = vadd.f32 %v9441_v1, %v5058_v61  ;;  %v5060_v2 = vmul.f32 %v7011_v55, %v9435_v0  ;;  %5824 = vmatprep.mubr.bf16.mxu1 %v5464_v63 }
 0x426   : > { %v5217_v49 = vadd.f32 %v9438_v31, %v5059_v56  ;;  %5825 = vmatmul.mubr.bf16.gmra.mrb[228].mxu1 %v5463_v39  ;;  %v5361_v11 = vmax.f32 %v5215_v58, 0.0 }
 0x427   : > { %v5218_v32 = vadd.f32 %v9441_v1, %v5060_v2  ;;  %v4814_v35 = vpop.f32.mrb[88].mxu0  ;;  %v5362_v3 = vmax.f32 %v5216_v48, 0.0  ;;  %v10426_v2 = vld [vmem:[#allocation60_spill] sm:$0xff] }
 0x428   : > { %v5363_v17 = vmax.f32 %v5217_v49, 0.0  ;;  %v7012_v33 = vadd.f32 %v4814_v35, %v10418_v54  ;;  %v4816_v42 = vpop.f32.mrb[89].mxu0 }
 0x429   : > { %v5364_v34 = vmax.f32 %v5218_v32, 0.0  ;;  %v7013_v5 = vadd.f32 %v4816_v42, %v10419_v60  ;;  %v4818_v19 = vpop.f32.mrb[90].mxu0 }
 0x42a   : > { %v5061_v6 = vmul.f32 %v7012_v33, %v9427_v28  ;;  %v7014_v25 = vadd.f32 %v4818_v19, %v10420_v38  ;;  %v4820_v21 = vpop.f32.mrb[91].mxu0  ;;  %v5465_v7 = vpack.c.bf16 %v5363_v17, %v5361_v11  ;;  %v10427_v17 = vld [vmem:[#allocation61_spill] sm:$0xff] }
 0x42b   : > { %v5062_v14 = vmul.f32 %v7013_v5, %v9435_v0  ;;  %v7015_v23 = vadd.f32 %v4820_v21, %v10421_v22  ;;  %v5466_v37 = vpack.c.bf16 %v5364_v34, %v5362_v3  ;;  %v10428_v3 = vld [vmem:[#allocation62_spill] sm:$0xff] }
 0x42c   : > { %v5219_v40 = vadd.f32 %v9438_v31, %v5061_v6  ;;  %v5063_v27 = vmul.f32 %v7014_v25, %v9427_v28  ;;  %v10429_v6 = vld [vmem:[#allocation63_spill] sm:$0xff] }
 0x42d   : > { %v5220_v15 = vadd.f32 %v9441_v1, %v5062_v14  ;;  %v5064_v51 = vmul.f32 %v7015_v23, %v9435_v0  ;;  %5832 = vmatprep.mubr.bf16.mxu1 %v5466_v37 }
 0x42e   : > { %v5221_v16 = vadd.f32 %v9438_v31, %v5063_v27  ;;  %5833 = vmatmul.mubr.bf16.gmra.mrb[232].mxu1 %v5465_v7  ;;  %v5365_v45 = vmax.f32 %v5219_v40, 0.0 }
 0x42f   : > { %v5222_v30 = vadd.f32 %v9441_v1, %v5064_v51  ;;  %v4824_v29 = vpop.f32.mrb[92].mxu0  ;;  %v5366_v12 = vmax.f32 %v5220_v15, 0.0  ;;  %v10430_v51 = vld [vmem:[#allocation64_spill] sm:$0xff] }
 0x430   : > { %v5367_v20 = vmax.f32 %v5221_v16, 0.0  ;;  %v7016_v62 = vadd.f32 %v4824_v29, %v10422_v47  ;;  %v4826_v43 = vpop.f32.mrb[93].mxu0 }
 0x431   : > { %v5368_v9 = vmax.f32 %v5222_v30, 0.0  ;;  %v7017_v24 = vadd.f32 %v4826_v43, %v10423_v46  ;;  %v4828_v41 = vpop.f32.mrb[94].mxu0 }
 0x432   : > { %v5065_v50 = vmul.f32 %v7016_v62, %v9427_v28  ;;  %v7018_v13 = vadd.f32 %v4828_v41, %v10424_v10  ;;  %v4830_v36 = vpop.f32.mrb[95].mxu0  ;;  %v5467_v52 = vpack.c.bf16 %v5367_v20, %v5365_v45  ;;  %v10431_v20 = vld [vmem:[#allocation65_spill] sm:$0xff] }
 0x433   : > { %v5066_v18 = vmul.f32 %v7017_v24, %v9435_v0  ;;  %v7019_v59 = vadd.f32 %v4830_v36, %v10425_v57  ;;  %v5468_v53 = vpack.c.bf16 %v5368_v9, %v5366_v12  ;;  %v10432_v12 = vld [vmem:[#allocation66_spill] sm:$0xff] }
 0x434   : > { %v5223_v4 = vadd.f32 %v9438_v31, %v5065_v50  ;;  %v5067_v39 = vmul.f32 %v7018_v13, %v9427_v28  ;;  %v10433_v50 = vld [vmem:[#allocation67_spill] sm:$0xff] }
 0x435   : > { %v5224_v61 = vadd.f32 %v9441_v1, %v5066_v18  ;;  %v5068_v44 = vmul.f32 %v7019_v59, %v9435_v0  ;;  %5840 = vmatprep.mubr.bf16.mxu1 %v5468_v53 }
 0x436   : > { %v5225_v55 = vadd.f32 %v9438_v31, %v5067_v39  ;;  %5841 = vmatmul.mubr.bf16.gmra.mrb[236].mxu1 %v5467_v52  ;;  %v5369_v56 = vmax.f32 %v5223_v4, 0.0 }
 0x437   : > { %v5226_v63 = vadd.f32 %v9441_v1, %v5068_v44  ;;  %v4834_v58 = vpop.f32.mrb[96].mxu0  ;;  %v5370_v35 = vmax.f32 %v5224_v61, 0.0  ;;  %v10434_v44 = vld [vmem:[#allocation68_spill] sm:$0xff] }
 0x438   : > { %v5371_v48 = vmax.f32 %v5225_v55, 0.0  ;;  %v7020_v49 = vadd.f32 %v4834_v58, %v10426_v2  ;;  %v4836_v32 = vpop.f32.mrb[97].mxu0 }
 0x439   : > { %v5372_v11 = vmax.f32 %v5226_v63, 0.0  ;;  %v7021_v54 = vadd.f32 %v4836_v32, %v10427_v17  ;;  %v4838_v33 = vpop.f32.mrb[98].mxu0 }
 0x43a   : > { %v5069_v42 = vmul.f32 %v7020_v49, %v9427_v28  ;;  %v7022_v34 = vadd.f32 %v4838_v33, %v10428_v3  ;;  %v4840_v60 = vpop.f32.mrb[99].mxu0  ;;  %v5469_v5 = vpack.c.bf16 %v5371_v48, %v5369_v56  ;;  %v10435_v48 = vld [vmem:[#allocation69_spill] sm:$0xff] }
 0x43b   : > { %v5070_v19 = vmul.f32 %v7021_v54, %v9435_v0  ;;  %v7023_v38 = vadd.f32 %v4840_v60, %v10429_v6  ;;  %v5470_v25 = vpack.c.bf16 %v5372_v11, %v5370_v35  ;;  %v10436_v35 = vld [vmem:[#allocation70_spill] sm:$0xff] }
 0x43c   : > { %v5227_v21 = vadd.f32 %v9438_v31, %v5069_v42  ;;  %v5071_v7 = vmul.f32 %v7022_v34, %v9427_v28  ;;  %v10437_v42 = vld [vmem:[#allocation71_spill] sm:$0xff] }
 0x43d   : > { %v5228_v14 = vadd.f32 %v9441_v1, %v5070_v19  ;;  %v5072_v22 = vmul.f32 %v7023_v38, %v9435_v0  ;;  %5848 = vmatprep.mubr.bf16.mxu1 %v5470_v25 }
 0x43e   : > { %v5229_v23 = vadd.f32 %v9438_v31, %v5071_v7  ;;  %5849 = vmatmul.mubr.bf16.gmra.mrb[240].mxu1 %v5469_v5  ;;  %v5373_v27 = vmax.f32 %v5227_v21, 0.0 }
 0x43f   : > { %v5230_v37 = vadd.f32 %v9441_v1, %v5072_v22  ;;  %v4844_v40 = vpop.f32.mrb[100].mxu0  ;;  %v5374_v29 = vmax.f32 %v5228_v14, 0.0  ;;  %v10438_v22 = vld [vmem:[#allocation72_spill] sm:$0xff] }
 0x440   : > { %v5375_v15 = vmax.f32 %v5229_v23, 0.0  ;;  %v7024_v16 = vadd.f32 %v4844_v40, %v10430_v51  ;;  %v4846_v30 = vpop.f32.mrb[101].mxu0 }
 0x441   : > { %v5376_v45 = vmax.f32 %v5230_v37, 0.0  ;;  %v7025_v47 = vadd.f32 %v4846_v30, %v10431_v20  ;;  %v4848_v62 = vpop.f32.mrb[102].mxu0 }
 0x442   : > { %v5073_v43 = vmul.f32 %v7024_v16, %v9427_v28  ;;  %v7026_v9 = vadd.f32 %v4848_v62, %v10432_v12  ;;  %v4850_v46 = vpop.f32.mrb[103].mxu0  ;;  %v5471_v24 = vpack.c.bf16 %v5375_v15, %v5373_v27  ;;  %v10439_v15 = vld [vmem:[#allocation73_spill] sm:$0xff] }
 0x443   : > { %v5074_v41 = vmul.f32 %v7025_v47, %v9435_v0  ;;  %v7027_v10 = vadd.f32 %v4850_v46, %v10433_v50  ;;  %v5472_v13 = vpack.c.bf16 %v5376_v45, %v5374_v29  ;;  %v10440_v29 = vld [vmem:[#allocation74_spill] sm:$0xff] }
 0x444   : > { %v5231_v36 = vadd.f32 %v9438_v31, %v5073_v43  ;;  %v5075_v52 = vmul.f32 %v7026_v9, %v9427_v28  ;;  %v10441_v43 = vld [vmem:[#allocation75_spill] sm:$0xff] }
 0x445   : > { %v5232_v18 = vadd.f32 %v9441_v1, %v5074_v41  ;;  %v5076_v57 = vmul.f32 %v7027_v10, %v9435_v0  ;;  %5856 = vmatprep.mubr.bf16.mxu1 %v5472_v13 }
 0x446   : > { %v5233_v59 = vadd.f32 %v9438_v31, %v5075_v52  ;;  %5857 = vmatmul.mubr.bf16.gmra.mrb[244].mxu1 %v5471_v24  ;;  %v5377_v39 = vmax.f32 %v5231_v36, 0.0  ;;  %v9839_v52 = vld [vmem:[%s10260_s5] ss:$0 sm:$0xff] }
 0x447   : > { %v5234_v53 = vadd.f32 %v9441_v1, %v5076_v57  ;;  %v4854_v4 = vpop.f32.mrb[104].mxu0  ;;  %v5378_v58 = vmax.f32 %v5232_v18, 0.0 }
 0x448   : > { %v5379_v61 = vmax.f32 %v5233_v59, 0.0  ;;  %v7028_v55 = vadd.f32 %v4854_v4, %v10434_v44  ;;  %v4856_v63 = vpop.f32.mrb[105].mxu0  ;;  %v10442_v59 = vld [vmem:[#allocation76_spill] sm:$0xff]  ;;  %v10443_v44 = vld [vmem:[#allocation77_spill] sm:$0xff] }
 0x449   : > { %v5380_v56 = vmax.f32 %v5234_v53, 0.0  ;;  %v7029_v2 = vadd.f32 %v4856_v63, %v10435_v48  ;;  %v4858_v49 = vpop.f32.mrb[106].mxu0 }
 0x44a   : > { %v5077_v32 = vmul.f32 %v7028_v55, %v9427_v28  ;;  %v7030_v11 = vadd.f32 %v4858_v49, %v10436_v35  ;;  %v4860_v17 = vpop.f32.mrb[107].mxu0  ;;  %v5473_v54 = vpack.c.bf16 %v5379_v61, %v5377_v39 }
 0x44b   : > { %v5078_v33 = vmul.f32 %v7029_v2, %v9435_v0  ;;  %v7031_v3 = vadd.f32 %v4860_v17, %v10437_v42  ;;  %v5474_v34 = vpack.c.bf16 %v5380_v56, %v5378_v58  ;;  %v10444_v2 = vld [vmem:[#allocation78_spill] sm:$0xff] }
 0x44c   : > { %v5235_v60 = vadd.f32 %v9438_v31, %v5077_v32  ;;  %v5079_v5 = vmul.f32 %v7030_v11, %v9427_v28 }
 0x44d   : > { %v5236_v19 = vadd.f32 %v9441_v1, %v5078_v33  ;;  %v5080_v6 = vmul.f32 %v7031_v3, %v9435_v0  ;;  %5864 = vmatprep.mubr.bf16.mxu1 %v5474_v34 }
 0x44e   : > { %v5237_v38 = vadd.f32 %v9438_v31, %v5079_v5  ;;  %5865 = vmatmul.mubr.bf16.gmra.mrb[248].mxu1 %v5473_v54  ;;  %v5381_v7 = vmax.f32 %v5235_v60, 0.0  ;;  %v10445_v54 = vld [vmem:[#allocation79_spill] sm:$0xff] }
 0x44f   : > { %v5238_v25 = vadd.f32 %v9441_v1, %v5080_v6  ;;  %v4864_v21 = vpop.f32.mrb[108].mxu0  ;;  %v5382_v40 = vmax.f32 %v5236_v19, 0.0 }
 0x450   : > { %v5383_v14 = vmax.f32 %v5237_v38, 0.0  ;;  %v7032_v23 = vadd.f32 %v4864_v21, %v10438_v22  ;;  %v4866_v37 = vpop.f32.mrb[109].mxu0 }
 0x451   : > { %v5384_v27 = vmax.f32 %v5238_v25, 0.0  ;;  %v7033_v51 = vadd.f32 %v4866_v37, %v10439_v15  ;;  %v4868_v16 = vpop.f32.mrb[110].mxu0 }
 0x452   : > { %v5081_v30 = vmul.f32 %v7032_v23, %v9427_v28  ;;  %v7034_v45 = vadd.f32 %v4868_v16, %v10440_v29  ;;  %v4870_v20 = vpop.f32.mrb[111].mxu0  ;;  %v5475_v47 = vpack.c.bf16 %v5383_v14, %v5381_v7  ;;  %v10446_v23 = vld [vmem:[#allocation80_spill] sm:$0xff] }
 0x453   : > { %v5082_v62 = vmul.f32 %v7033_v51, %v9435_v0  ;;  %v7035_v12 = vadd.f32 %v4870_v20, %v10441_v43  ;;  %v5476_v9 = vpack.c.bf16 %v5384_v27, %v5382_v40  ;;  %v10447_v51 = vld [vmem:[#allocation81_spill] sm:$0xff] }
 0x454   : > { %v5239_v46 = vadd.f32 %v9438_v31, %v5081_v30  ;;  %v5083_v24 = vmul.f32 %v7034_v45, %v9427_v28 }
 0x455   : > { %v5240_v41 = vadd.f32 %v9441_v1, %v5082_v62  ;;  %v5084_v50 = vmul.f32 %v7035_v12, %v9435_v0  ;;  %5872 = vmatprep.mubr.bf16.mxu1 %v5476_v9 }
 0x456   : > { %v5241_v10 = vadd.f32 %v9438_v31, %v5083_v24  ;;  %5873 = vmatmul.mubr.bf16.gmra.mrb[252].mxu1 %v5475_v47  ;;  %v5385_v18 = vmax.f32 %v5239_v46, 0.0  ;;  %v10448_v47 = vld [vmem:[#allocation82_spill] sm:$0xff]  ;;  %v10449_v24 = vld [vmem:[#allocation83_spill] sm:$0xff] }
 0x457   : > { %v5242_v13 = vadd.f32 %v9441_v1, %v5084_v50  ;;  %v4874_v36 = vpop.f32.mrb[112].mxu0  ;;  %v5386_v39 = vmax.f32 %v5240_v41, 0.0 }
 0x458   : > { %v5387_v57 = vmax.f32 %v5241_v10, 0.0  ;;  %v7036_v53 = vadd.f32 %v4874_v36, %v10442_v59  ;;  %v4876_v4 = vpop.f32.mrb[113].mxu0 }
 0x459   : > { %v5388_v61 = vmax.f32 %v5242_v13, 0.0  ;;  %v7037_v55 = vadd.f32 %v4876_v4, %v10443_v44  ;;  %v4878_v63 = vpop.f32.mrb[114].mxu0  ;;  %v5666_v58 = vpop.f32.mrb[148].mxu1 }
 0x45a   : > { %v5477_v56 = vpack.c.bf16 %v5387_v57, %v5385_v18  ;;  %v5085_v48 = vmul.f32 %v7036_v53, %v9427_v28  ;;  %v7038_v49 = vadd.f32 %v4878_v63, %v10444_v2  ;;  %v5667_v32 = vadd.f32 %v9839_v52, %v5666_v58  ;;  %v4880_v35 = vpop.f32.mrb[115].mxu0  ;;  %v5668_v11 = vpop.f32.mrb[149].mxu1  ;;  %v10450_v63 = vld [vmem:[#allocation84_spill] sm:$0xff] }
 0x45b   : > { %v5086_v17 = vmul.f32 %v7037_v55, %v9435_v0  ;;  %v7039_v33 = vadd.f32 %v4880_v35, %v10445_v54  ;;  %v5669_v42 = vpop.f32.mrb[150].mxu1  ;;  %v5478_v3 = vpack.c.bf16 %v5388_v61, %v5386_v39 }
 0x45c   : > { %v5243_v34 = vadd.f32 %v9438_v31, %v5085_v48  ;;  %v5087_v60 = vmul.f32 %v7038_v49, %v9427_v28  ;;  %5960 = vst [vmem:[%s9850_s21] sm:$0xff] %v5667_v32  ;;  %v5670_v5 = vadd.f32 %v9839_v52, %v5669_v42  ;;  %v5671_v19 = vpop.f32.mrb[151].mxu1  ;;  %v10451_v49 = vld [vmem:[#allocation85_spill] sm:$0xff] }
 0x45d   : > { %v5244_v6 = vadd.f32 %v9441_v1, %v5086_v17  ;;  %v5088_v38 = vmul.f32 %v7039_v33, %v9435_v0  ;;  %5880 = vmatprep.mubr.bf16.mxu1 %v5478_v3  ;;  %v10452_v33 = vld [vmem:[#allocation86_spill] sm:$0xff]  ;;  %v10453_v19 = vld [vmem:[#allocation87_spill] sm:$0xff] }
 0x45e   : > { %v5245_v25 = vadd.f32 %v9438_v31, %v5087_v60  ;;  %5961 = vst [vmem:[%s9850_s21 + $0x8] sm:$0xff] %v5670_v5  ;;  %5881 = vmatmul.mubr.bf16.gmra.mrb[0].mxu1 %v5477_v56  ;;  %v5389_v14 = vmax.f32 %v5243_v34, 0.0 }
 0x45f   : > { %v5246_v21 = vadd.f32 %v9441_v1, %v5088_v38  ;;  %v4884_v7 = vpop.f32.mrb[116].mxu0  ;;  %v5390_v27 = vmax.f32 %v5244_v6, 0.0 }
 0x460   : > { %v5391_v22 = vmax.f32 %v5245_v25, 0.0  ;;  %v7040_v37 = vadd.f32 %v4884_v7, %v10446_v23  ;;  %v4886_v40 = vpop.f32.mrb[117].mxu0 }
 0x461   : > { %v5392_v15 = vmax.f32 %v5246_v21, 0.0  ;;  %v7041_v16 = vadd.f32 %v4886_v40, %v10447_v51  ;;  %v4888_v30 = vpop.f32.mrb[118].mxu0  ;;  %v5674_v29 = vpop.f32.mrb[152].mxu1 }
 0x462   : > { %v5479_v45 = vpack.c.bf16 %v5391_v22, %v5389_v14  ;;  %v5089_v20 = vmul.f32 %v7040_v37, %v9427_v28  ;;  %v7042_v62 = vadd.f32 %v4888_v30, %v10448_v47  ;;  %v5675_v43 = vadd.f32 %v9839_v52, %v5674_v29  ;;  %v4890_v12 = vpop.f32.mrb[119].mxu0  ;;  %v5676_v9 = vpop.f32.mrb[153].mxu1  ;;  %v10454_v30 = vld [vmem:[#allocation88_spill] sm:$0xff] }
 0x463   : > { %v5090_v46 = vmul.f32 %v7041_v16, %v9435_v0  ;;  %v7043_v41 = vadd.f32 %v4890_v12, %v10449_v24  ;;  %v5677_v50 = vpop.f32.mrb[154].mxu1  ;;  %v5480_v10 = vpack.c.bf16 %v5392_v15, %v5390_v27 }
 0x464   : > { %v5247_v13 = vadd.f32 %v9438_v31, %v5089_v20  ;;  %v5091_v36 = vmul.f32 %v7042_v62, %v9427_v28  ;;  %5962 = vst [vmem:[%s9850_s21 + $0x10] sm:$0xff] %v5675_v43  ;;  %v5678_v18 = vadd.f32 %v9839_v52, %v5677_v50  ;;  %v5679_v57 = vpop.f32.mrb[155].mxu1  ;;  %v10455_v62 = vld [vmem:[#allocation89_spill] sm:$0xff] }
 0x465   : > { %v5248_v59 = vadd.f32 %v9441_v1, %v5090_v46  ;;  %v5092_v53 = vmul.f32 %v7043_v41, %v9435_v0  ;;  %5888 = vmatprep.mubr.bf16.mxu1 %v5480_v10  ;;  %v10456_v41 = vld [vmem:[#allocation90_spill] sm:$0xff]  ;;  %v10457_v57 = vld [vmem:[#allocation91_spill] sm:$0xff] }
 0x466   : > { %v5249_v4 = vadd.f32 %v9438_v31, %v5091_v36  ;;  %5963 = vst [vmem:[%s9850_s21 + $0x18] sm:$0xff] %v5678_v18  ;;  %5889 = vmatmul.mubr.bf16.gmra.mrb[4].mxu1 %v5479_v45  ;;  %v5393_v44 = vmax.f32 %v5247_v13, 0.0 }
 0x467   : > { %v5250_v39 = vadd.f32 %v9441_v1, %v5092_v53  ;;  %v4894_v61 = vpop.f32.mrb[120].mxu0  ;;  %v5394_v48 = vmax.f32 %v5248_v59, 0.0 }
 0x468   : > { %v5395_v55 = vmax.f32 %v5249_v4, 0.0  ;;  %v7044_v58 = vadd.f32 %v4894_v61, %v10450_v63  ;;  %v4896_v56 = vpop.f32.mrb[121].mxu0 }
 0x469   : > { %v5396_v2 = vmax.f32 %v5250_v39, 0.0  ;;  %v7045_v32 = vadd.f32 %v4896_v56, %v10451_v49  ;;  %v4898_v35 = vpop.f32.mrb[122].mxu0  ;;  %v5682_v11 = vpop.f32.mrb[156].mxu1 }
 0x46a   : > { %v5481_v17 = vpack.c.bf16 %v5395_v55, %v5393_v44  ;;  %v5093_v54 = vmul.f32 %v7044_v58, %v9427_v28  ;;  %v7046_v42 = vadd.f32 %v4898_v35, %v10452_v33  ;;  %v5683_v3 = vadd.f32 %v9839_v52, %v5682_v11  ;;  %v4900_v34 = vpop.f32.mrb[123].mxu0  ;;  %v5684_v60 = vpop.f32.mrb[157].mxu1  ;;  %v10458_v35 = vld [vmem:[#allocation92_spill] sm:$0xff] }
 0x46b   : > { %v5094_v5 = vmul.f32 %v7045_v32, %v9435_v0  ;;  %v7047_v6 = vadd.f32 %v4900_v34, %v10453_v19  ;;  %v5685_v38 = vpop.f32.mrb[158].mxu1  ;;  %v5482_v25 = vpack.c.bf16 %v5396_v2, %v5394_v48 }
 0x46c   : > { %v5251_v21 = vadd.f32 %v9438_v31, %v5093_v54  ;;  %v5095_v7 = vmul.f32 %v7046_v42, %v9427_v28  ;;  %5964 = vst [vmem:[%s9850_s21 + $0x20] sm:$0xff] %v5683_v3  ;;  %v5686_v14 = vadd.f32 %v9839_v52, %v5685_v38  ;;  %v5687_v22 = vpop.f32.mrb[159].mxu1  ;;  %v10459_v42 = vld [vmem:[#allocation93_spill] sm:$0xff] }
 0x46d   : > { %v5252_v23 = vadd.f32 %v9441_v1, %v5094_v5  ;;  %v5096_v37 = vmul.f32 %v7047_v6, %v9435_v0  ;;  %5896 = vmatprep.mubr.bf16.mxu1 %v5482_v25  ;;  %v10460_v6 = vld [vmem:[#allocation94_spill] sm:$0xff]  ;;  %v10461_v22 = vld [vmem:[#allocation95_spill] sm:$0xff] }
 0x46e   : > { %v5253_v40 = vadd.f32 %v9438_v31, %v5095_v7  ;;  %5965 = vst [vmem:[%s9850_s21 + $0x28] sm:$0xff] %v5686_v14  ;;  %5897 = vmatmul.mubr.bf16.gmra.mrb[8].mxu1 %v5481_v17  ;;  %v5397_v51 = vmax.f32 %v5251_v21, 0.0 }
 0x46f   : > { %v5254_v27 = vadd.f32 %v9441_v1, %v5096_v37  ;;  %v4904_v15 = vpop.f32.mrb[124].mxu0  ;;  %v5398_v20 = vmax.f32 %v5252_v23, 0.0 }
 0x470   : > { %v5399_v16 = vmax.f32 %v5253_v40, 0.0  ;;  %v7048_v29 = vadd.f32 %v4904_v15, %v10454_v30  ;;  %v4906_v45 = vpop.f32.mrb[125].mxu0 }
 0x471   : > { %v5400_v47 = vmax.f32 %v5254_v27, 0.0  ;;  %v7049_v43 = vadd.f32 %v4906_v45, %v10455_v62  ;;  %v4908_v12 = vpop.f32.mrb[126].mxu0  ;;  %v5690_v9 = vpop.f32.mrb[160].mxu1 }
 0x472   : > { %v5483_v46 = vpack.c.bf16 %v5399_v16, %v5397_v51  ;;  %v5097_v24 = vmul.f32 %v7048_v29, %v9427_v28  ;;  %v7050_v50 = vadd.f32 %v4908_v12, %v10456_v41  ;;  %v5691_v10 = vadd.f32 %v9839_v52, %v5690_v9  ;;  %v4910_v13 = vpop.f32.mrb[127].mxu0  ;;  %v5692_v36 = vpop.f32.mrb[161].mxu1  ;;  %v10462_v12 = vld [vmem:[#allocation96_spill] sm:$0xff] }
 0x473   : > { %v5098_v18 = vmul.f32 %v7049_v43, %v9435_v0  ;;  %v7051_v59 = vadd.f32 %v4910_v13, %v10457_v57  ;;  %v5693_v53 = vpop.f32.mrb[162].mxu1  ;;  %v5484_v4 = vpack.c.bf16 %v5400_v47, %v5398_v20 }
 0x474   : > { %v5255_v39 = vadd.f32 %v9438_v31, %v5097_v24  ;;  %v5099_v61 = vmul.f32 %v7050_v50, %v9427_v28  ;;  %5966 = vst [vmem:[%s9850_s21 + $0x30] sm:$0xff] %v5691_v10  ;;  %v5694_v44 = vadd.f32 %v9839_v52, %v5693_v53  ;;  %v5695_v55 = vpop.f32.mrb[163].mxu1  ;;  %v10463_v50 = vld [vmem:[#allocation97_spill] sm:$0xff] }
 0x475   : > { %v5256_v63 = vadd.f32 %v9441_v1, %v5098_v18  ;;  %v5100_v58 = vmul.f32 %v7051_v59, %v9435_v0  ;;  %5904 = vmatprep.mubr.bf16.mxu1 %v5484_v4  ;;  %v10464_v59 = vld [vmem:[#allocation98_spill] sm:$0xff]  ;;  %v10465_v55 = vld [vmem:[#allocation99_spill] sm:$0xff] }
 0x476   : > { %v5257_v56 = vadd.f32 %v9438_v31, %v5099_v61  ;;  %5967 = vst [vmem:[%s9850_s21 + $0x38] sm:$0xff] %v5694_v44  ;;  %5905 = vmatmul.mubr.bf16.gmra.mrb[12].mxu1 %v5483_v46  ;;  %v5401_v49 = vmax.f32 %v5255_v39, 0.0 }
 0x477   : > { %v5258_v48 = vadd.f32 %v9441_v1, %v5100_v58  ;;  %v4914_v2 = vpop.f32.mrb[128].mxu0  ;;  %v5402_v54 = vmax.f32 %v5256_v63, 0.0 }
 0x478   : > { %v5403_v32 = vmax.f32 %v5257_v56, 0.0  ;;  %v7052_v11 = vadd.f32 %v4914_v2, %v10458_v35  ;;  %v4916_v17 = vpop.f32.mrb[129].mxu0 }
 0x479   : > { %v5404_v33 = vmax.f32 %v5258_v48, 0.0  ;;  %v7053_v3 = vadd.f32 %v4916_v17, %v10459_v42  ;;  %v4918_v34 = vpop.f32.mrb[130].mxu0  ;;  %v5698_v60 = vpop.f32.mrb[164].mxu1 }
 0x47a   : > { %v5485_v5 = vpack.c.bf16 %v5403_v32, %v5401_v49  ;;  %v5101_v19 = vmul.f32 %v7052_v11, %v9427_v28  ;;  %v7054_v38 = vadd.f32 %v4918_v34, %v10460_v6  ;;  %v5699_v25 = vadd.f32 %v9839_v52, %v5698_v60  ;;  %v4920_v21 = vpop.f32.mrb[131].mxu0  ;;  %v5700_v7 = vpop.f32.mrb[165].mxu1  ;;  %v10466_v34 = vld [vmem:[#allocation100_spill] sm:$0xff] }
 0x47b   : > { %v5102_v14 = vmul.f32 %v7053_v3, %v9435_v0  ;;  %v7055_v23 = vadd.f32 %v4920_v21, %v10461_v22  ;;  %v5701_v37 = vpop.f32.mrb[166].mxu1  ;;  %v5486_v40 = vpack.c.bf16 %v5404_v33, %v5402_v54 }
 0x47c   : > { %v5259_v27 = vadd.f32 %v9438_v31, %v5101_v19  ;;  %v5103_v15 = vmul.f32 %v7054_v38, %v9427_v28  ;;  %5968 = vst [vmem:[%s9850_s21 + $0x40] sm:$0xff] %v5699_v25  ;;  %v5702_v51 = vadd.f32 %v9839_v52, %v5701_v37  ;;  %v5703_v16 = vpop.f32.mrb[167].mxu1  ;;  %v10467_v38 = vld [vmem:[#allocation101_spill] sm:$0xff] }
 0x47d   : > { %v5260_v30 = vadd.f32 %v9441_v1, %v5102_v14  ;;  %v5104_v29 = vmul.f32 %v7055_v23, %v9435_v0  ;;  %5912 = vmatprep.mubr.bf16.mxu1 %v5486_v40  ;;  %v10468_v23 = vld [vmem:[#allocation102_spill] sm:$0xff]  ;;  %v10469_v16 = vld [vmem:[#allocation103_spill] sm:$0xff] }
 0x47e   : > { %v5261_v45 = vadd.f32 %v9438_v31, %v5103_v15  ;;  %5969 = vst [vmem:[%s9850_s21 + $0x48] sm:$0xff] %v5702_v51  ;;  %5913 = vmatmul.mubr.bf16.gmra.mrb[16].mxu1 %v5485_v5  ;;  %v5405_v62 = vmax.f32 %v5259_v27, 0.0 }
 0x47f   : > { %v5262_v20 = vadd.f32 %v9441_v1, %v5104_v29  ;;  %v4924_v47 = vpop.f32.mrb[132].mxu0  ;;  %v5406_v24 = vmax.f32 %v5260_v30, 0.0 }
 0x480   : > { %v5407_v43 = vmax.f32 %v5261_v45, 0.0  ;;  %v7056_v9 = vadd.f32 %v4924_v47, %v10462_v12  ;;  %v4926_v46 = vpop.f32.mrb[133].mxu0 }
 0x481   : > { %v5408_v41 = vmax.f32 %v5262_v20, 0.0  ;;  %v7057_v10 = vadd.f32 %v4926_v46, %v10463_v50  ;;  %v4928_v13 = vpop.f32.mrb[134].mxu0  ;;  %v5706_v36 = vpop.f32.mrb[168].mxu1 }
 0x482   : > { %v5487_v18 = vpack.c.bf16 %v5407_v43, %v5405_v62  ;;  %v5105_v57 = vmul.f32 %v7056_v9, %v9427_v28  ;;  %v7058_v53 = vadd.f32 %v4928_v13, %v10464_v59  ;;  %v5707_v4 = vadd.f32 %v9839_v52, %v5706_v36  ;;  %v4930_v39 = vpop.f32.mrb[135].mxu0  ;;  %v5708_v61 = vpop.f32.mrb[169].mxu1  ;;  %v10470_v13 = vld [vmem:[#allocation104_spill] sm:$0xff] }
 0x483   : > { %v5106_v44 = vmul.f32 %v7057_v10, %v9435_v0  ;;  %v7059_v63 = vadd.f32 %v4930_v39, %v10465_v55  ;;  %v5709_v58 = vpop.f32.mrb[170].mxu1  ;;  %v5488_v56 = vpack.c.bf16 %v5408_v41, %v5406_v24 }
 0x484   : > { %v5263_v48 = vadd.f32 %v9438_v31, %v5105_v57  ;;  %v5107_v2 = vmul.f32 %v7058_v53, %v9427_v28  ;;  %5970 = vst [vmem:[%s9850_s21 + $0x50] sm:$0xff] %v5707_v4  ;;  %v5710_v49 = vadd.f32 %v9839_v52, %v5709_v58  ;;  %v5711_v32 = vpop.f32.mrb[171].mxu1  ;;  %v10471_v53 = vld [vmem:[#allocation105_spill] sm:$0xff] }
 0x485   : > { %v5264_v35 = vadd.f32 %v9441_v1, %v5106_v44  ;;  %v5108_v11 = vmul.f32 %v7059_v63, %v9435_v0  ;;  %5920 = vmatprep.mubr.bf16.mxu1 %v5488_v56  ;;  %v10472_v63 = vld [vmem:[#allocation106_spill] sm:$0xff]  ;;  %v10473_v32 = vld [vmem:[#allocation107_spill] sm:$0xff] }
 0x486   : > { %v5265_v17 = vadd.f32 %v9438_v31, %v5107_v2  ;;  %5971 = vst [vmem:[%s9850_s21 + $0x58] sm:$0xff] %v5710_v49  ;;  %5921 = vmatmul.mubr.bf16.gmra.mrb[20].mxu1 %v5487_v18  ;;  %v5409_v42 = vmax.f32 %v5263_v48, 0.0 }
 0x487   : > { %v5266_v54 = vadd.f32 %v9441_v1, %v5108_v11  ;;  %v4934_v33 = vpop.f32.mrb[136].mxu0  ;;  %v5410_v19 = vmax.f32 %v5264_v35, 0.0 }
 0x488   : > { %v5411_v3 = vmax.f32 %v5265_v17, 0.0  ;;  %v7060_v60 = vadd.f32 %v4934_v33, %v10466_v34  ;;  %v4936_v5 = vpop.f32.mrb[137].mxu0 }
 0x489   : > { %v5412_v6 = vmax.f32 %v5266_v54, 0.0  ;;  %v7061_v25 = vadd.f32 %v4936_v5, %v10467_v38  ;;  %v4938_v21 = vpop.f32.mrb[138].mxu0  ;;  %v5714_v7 = vpop.f32.mrb[172].mxu1 }
 0x48a   : > { %v5489_v14 = vpack.c.bf16 %v5411_v3, %v5409_v42  ;;  %v5109_v22 = vmul.f32 %v7060_v60, %v9427_v28  ;;  %v7062_v37 = vadd.f32 %v4938_v21, %v10468_v23  ;;  %v5715_v40 = vadd.f32 %v9839_v52, %v5714_v7  ;;  %v4940_v27 = vpop.f32.mrb[139].mxu0  ;;  %v5716_v15 = vpop.f32.mrb[173].mxu1 }
 0x48b   : > { %v5110_v51 = vmul.f32 %v7061_v25, %v9435_v0  ;;  %v7063_v30 = vadd.f32 %v4940_v27, %v10469_v16  ;;  %v5717_v29 = vpop.f32.mrb[174].mxu1  ;;  %v5490_v45 = vpack.c.bf16 %v5412_v6, %v5410_v19 }
 0x48c   : > { %v5267_v20 = vadd.f32 %v9438_v31, %v5109_v22  ;;  %v5111_v47 = vmul.f32 %v7062_v37, %v9427_v28  ;;  %5972 = vst [vmem:[%s9850_s21 + $0x60] sm:$0xff] %v5715_v40  ;;  %v5718_v62 = vadd.f32 %v9839_v52, %v5717_v29  ;;  %v5719_v43 = vpop.f32.mrb[175].mxu1 }
 0x48d   : > { %v5268_v12 = vadd.f32 %v9441_v1, %v5110_v51  ;;  %v5112_v9 = vmul.f32 %v7063_v30, %v9435_v0  ;;  %5928 = vmatprep.mubr.bf16.mxu1 %v5490_v45 }
 0x48e   : > { %v5269_v46 = vadd.f32 %v9438_v31, %v5111_v47  ;;  %5973 = vst [vmem:[%s9850_s21 + $0x68] sm:$0xff] %v5718_v62  ;;  %5929 = vmatmul.mubr.bf16.gmra.mrb[24].mxu1 %v5489_v14  ;;  %v5413_v50 = vmax.f32 %v5267_v20, 0.0 }
 0x48f   : > { %v5270_v24 = vadd.f32 %v9441_v1, %v5112_v9  ;;  %v4944_v41 = vpop.f32.mrb[140].mxu0  ;;  %v5414_v57 = vmax.f32 %v5268_v12, 0.0 }
 0x490   : > { %v5415_v10 = vmax.f32 %v5269_v46, 0.0  ;;  %v7064_v36 = vadd.f32 %v4944_v41, %v10470_v13  ;;  %v4946_v18 = vpop.f32.mrb[141].mxu0 }
 0x491   : > { %v5416_v59 = vmax.f32 %v5270_v24, 0.0  ;;  %v7065_v4 = vadd.f32 %v4946_v18, %v10471_v53  ;;  %v4948_v39 = vpop.f32.mrb[142].mxu0  ;;  %v5722_v61 = vpop.f32.mrb[176].mxu1 }
 0x492   : > { %v5491_v44 = vpack.c.bf16 %v5415_v10, %v5413_v50  ;;  %v5113_v55 = vmul.f32 %v7064_v36, %v9427_v28  ;;  %v7066_v58 = vadd.f32 %v4948_v39, %v10472_v63  ;;  %v5723_v56 = vadd.f32 %v9839_v52, %v5722_v61  ;;  %v4950_v48 = vpop.f32.mrb[143].mxu0  ;;  %v5724_v2 = vpop.f32.mrb[177].mxu1 }
 0x493   : > { %v5114_v49 = vmul.f32 %v7065_v4, %v9435_v0  ;;  %v7067_v35 = vadd.f32 %v4950_v48, %v10473_v32  ;;  %v5725_v11 = vpop.f32.mrb[178].mxu1  ;;  %v5492_v17 = vpack.c.bf16 %v5416_v59, %v5414_v57 }
 0x494   : > { %v5271_v54 = vadd.f32 %v9438_v31, %v5113_v55  ;;  %v5115_v33 = vmul.f32 %v7066_v58, %v9427_v28  ;;  %5974 = vst [vmem:[%s9850_s21 + $0x70] sm:$0xff] %v5723_v56  ;;  %v5726_v42 = vadd.f32 %v9839_v52, %v5725_v11  ;;  %v5727_v3 = vpop.f32.mrb[179].mxu1 }
 0x495   : > { %v5272_v34 = vadd.f32 %v9441_v1, %v5114_v49  ;;  %v5116_v60 = vmul.f32 %v7067_v35, %v9435_v0  ;;  %5936 = vmatprep.mubr.bf16.mxu1 %v5492_v17 }
 0x496   : > { %v5273_v5 = vadd.f32 %v9438_v31, %v5115_v33  ;;  %5975 = vst [vmem:[%s9850_s21 + $0x78] sm:$0xff] %v5726_v42  ;;  %5937 = vmatmul.mubr.bf16.gmra.mrb[28].mxu1 %v5491_v44  ;;  %v5417_v38 = vmax.f32 %v5271_v54, 0.0 }
 0x497   : > { %v5274_v19 = vadd.f32 %v9441_v1, %v5116_v60  ;;  %v4954_v6 = vpop.f32.mrb[144].mxu0  ;;  %v5418_v14 = vmax.f32 %v5272_v34, 0.0 }
 0x498   : > { %v5419_v25 = vmax.f32 %v5273_v5, 0.0  ;;  %v7068_v21 = vadd.f32 %v4954_v6, %v9469_v26  ;;  %v4956_v7 = vpop.f32.mrb[145].mxu0 }
 0x499   : > { %v5420_v22 = vmax.f32 %v5274_v19, 0.0  ;;  %v7069_v23 = vadd.f32 %v4956_v7, %v9473_v8  ;;  %v4958_v37 = vpop.f32.mrb[146].mxu0  ;;  %v5730_v40 = vpop.f32.mrb[180].mxu1 }
 0x49a   : > { %v5493_v27 = vpack.c.bf16 %v5419_v25, %v5417_v38  ;;  %v5117_v15 = vmul.f32 %v7068_v21, %v9427_v28  ;;  %v5731_v51 = vadd.f32 %v9839_v52, %v5730_v40  ;;  %v4959_v16 = vpop.f32.mrb[147].mxu0  ;;  %v5732_v30 = vpop.f32.mrb[181].mxu1 }
 0x49b   : > { %v5118_v29 = vmul.f32 %v7069_v23, %v9435_v0  ;;  %v5733_v45 = vpop.f32.mrb[182].mxu1  ;;  %v5494_v26 = vpack.c.bf16 %v5420_v22, %v5418_v14 }
 0x49c   : > { %v5275_v20 = vadd.f32 %v9438_v31, %v5117_v15  ;;  %5976 = vst [vmem:[%s9850_s21 + $0x80] sm:$0xff] %v5731_v51  ;;  %v5734_v8 = vadd.f32 %v9839_v52, %v5733_v45  ;;  %v5735_v47 = vpop.f32.mrb[183].mxu1 }
 0x49d   : > { %v5276_v62 = vadd.f32 %v9441_v1, %v5118_v29  ;;  %5944 = vmatprep.mubr.bf16.mxu1 %v5494_v26 }
 0x49e   : > { %5977 = vst [vmem:[%s9850_s21 + $0x88] sm:$0xff] %v5734_v8  ;;  %5945 = vmatmul.mubr.bf16.gmra.mrb[32].mxu1 %v5493_v27  ;;  %v5421_v43 = vmax.f32 %v5275_v20, 0.0 }
 0x49f   : > { %v5422_v28 = vmax.f32 %v5276_v62, 0.0 }
 0x4a0   : > { %v5495_v24 = vpack.c.bf16 %v5421_v43, %v5421_v43 }
 0x4a1   : > { %v5738_v12 = vpop.f32.mrb[184].mxu1  ;;  %v5496_v0 = vpack.c.bf16 %v5422_v28, %v5422_v28 }
 0x4a2   : > { %v5739_v9 = vadd.f32 %v9839_v52, %v5738_v12  ;;  %v5740_v46 = vpop.f32.mrb[185].mxu1 }
 0x4a3   : > { %v5741_v31 = vpop.f32.mrb[186].mxu1  ;;  %5952 = vmatprep.mubr.bf16.mxu1 %v5496_v0 }
 0x4a4   : > { %5978 = vst [vmem:[%s9850_s21 + $0x90] sm:$0xff] %v5739_v9  ;;  %v5742_v41 = vadd.f32 %v9839_v52, %v5741_v31  ;;  %v5743_v1 = vpop.f32.mrb[187].mxu1 }
 0x4a6   : > { %5979 = vst [vmem:[%s9850_s21 + $0x98] sm:$0xff] %v5742_v41  ;;  %5953 = vmatmul.mubr.bf16.gmra.mrb[36].mxu1 %v5495_v24 }
 0x4a9   : > { %v5746_v50 = vpop.f32.mrb[188].mxu1 }
 0x4aa   : > { %v5747_v10 = vadd.f32 %v9839_v52, %v5746_v50  ;;  %v5748_v13 = vpop.f32.mrb[189].mxu1 }
 0x4ab   : > { %v5749_v36 = vpop.f32.mrb[190].mxu1 }
 0x4ac   : > { %5980 = vst [vmem:[%s9850_s21 + $0xa0] sm:$0xff] %v5747_v10  ;;  %v5750_v18 = vadd.f32 %v9839_v52, %v5749_v36  ;;  %v5751_v57 = vpop.f32.mrb[191].mxu1 }
 0x4ae   : > { %5981 = vst [vmem:[%s9850_s21 + $0xa8] sm:$0xff] %v5750_v18 }
 0x4b1   : > { %v5754_v59 = vpop.f32.mrb[192].mxu1 }
 0x4b2   : > { %v5755_v53 = vadd.f32 %v9839_v52, %v5754_v59  ;;  %v5756_v4 = vpop.f32.mrb[193].mxu1 }
 0x4b3   : > { %v5757_v39 = vpop.f32.mrb[194].mxu1 }
 0x4b4   : > { %5982 = vst [vmem:[%s9850_s21 + $0xb0] sm:$0xff] %v5755_v53  ;;  %v5758_v61 = vadd.f32 %v9839_v52, %v5757_v39  ;;  %v5759_v44 = vpop.f32.mrb[195].mxu1 }
 0x4b6   : > { %5983 = vst [vmem:[%s9850_s21 + $0xb8] sm:$0xff] %v5758_v61 }
 0x4b9   : > { %v5762_v55 = vpop.f32.mrb[196].mxu1 }
 0x4ba   : > { %v5763_v63 = vadd.f32 %v9839_v52, %v5762_v55  ;;  %v5764_v58 = vpop.f32.mrb[197].mxu1 }
 0x4bb   : > { %v5765_v56 = vpop.f32.mrb[198].mxu1 }
 0x4bc   : > { %5984 = vst [vmem:[%s9850_s21 + $0xc0] sm:$0xff] %v5763_v63  ;;  %v5766_v48 = vadd.f32 %v9839_v52, %v5765_v56  ;;  %v5767_v2 = vpop.f32.mrb[199].mxu1 }
 0x4be   : > { %5985 = vst [vmem:[%s9850_s21 + $0xc8] sm:$0xff] %v5766_v48 }
 0x4c1   : > { %v5770_v49 = vpop.f32.mrb[200].mxu1 }
 0x4c2   : > { %v5771_v32 = vadd.f32 %v9839_v52, %v5770_v49  ;;  %v5772_v35 = vpop.f32.mrb[201].mxu1 }
 0x4c3   : > { %v5773_v11 = vpop.f32.mrb[202].mxu1 }
 0x4c4   : > { %5986 = vst [vmem:[%s9850_s21 + $0xd0] sm:$0xff] %v5771_v32  ;;  %v5774_v17 = vadd.f32 %v9839_v52, %v5773_v11  ;;  %v5775_v54 = vpop.f32.mrb[203].mxu1 }
 0x4c6   : > { %5987 = vst [vmem:[%s9850_s21 + $0xd8] sm:$0xff] %v5774_v17 }
 0x4c9   : > { %v5778_v33 = vpop.f32.mrb[204].mxu1 }
 0x4ca   : > { %v5779_v42 = vadd.f32 %v9839_v52, %v5778_v33  ;;  %v5780_v3 = vpop.f32.mrb[205].mxu1 }
 0x4cb   : > { %v5781_v34 = vpop.f32.mrb[206].mxu1 }
 0x4cc   : > { %5988 = vst [vmem:[%s9850_s21 + $0xe0] sm:$0xff] %v5779_v42  ;;  %v5782_v60 = vadd.f32 %v9839_v52, %v5781_v34  ;;  %v5783_v5 = vpop.f32.mrb[207].mxu1 }
 0x4ce   : > { %5989 = vst [vmem:[%s9850_s21 + $0xe8] sm:$0xff] %v5782_v60 }
 0x4d1   : > { %v5786_v19 = vpop.f32.mrb[208].mxu1 }
 0x4d2   : > { %v5787_v6 = vadd.f32 %v9839_v52, %v5786_v19  ;;  %v5788_v38 = vpop.f32.mrb[209].mxu1 }
 0x4d3   : > { %v5789_v25 = vpop.f32.mrb[210].mxu1 }
 0x4d4   : > { %5990 = vst [vmem:[%s9850_s21 + $0xf0] sm:$0xff] %v5787_v6  ;;  %v5790_v21 = vadd.f32 %v9839_v52, %v5789_v25  ;;  %v5791_v7 = vpop.f32.mrb[211].mxu1 }
 0x4d6   : > { %5991 = vst [vmem:[%s9850_s21 + $0xf8] sm:$0xff] %v5790_v21 }
 0x4d9   : > { %v5794_v14 = vpop.f32.mrb[212].mxu1 }
 0x4da   : > { %v5795_v22 = vadd.f32 %v9839_v52, %v5794_v14  ;;  %v5796_v23 = vpop.f32.mrb[213].mxu1 }
 0x4db   : > { %v5797_v37 = vpop.f32.mrb[214].mxu1 }
 0x4dc   : > { %5992 = vst [vmem:[%s9850_s21 + $0x100] sm:$0xff] %v5795_v22  ;;  %v5798_v40 = vadd.f32 %v9839_v52, %v5797_v37  ;;  %v5799_v27 = vpop.f32.mrb[215].mxu1 }
 0x4de   : > { %5993 = vst [vmem:[%s9850_s21 + $0x108] sm:$0xff] %v5798_v40 }
 0x4e1   : > { %v5802_v15 = vpop.f32.mrb[216].mxu1 }
 0x4e2   : > { %v5803_v51 = vadd.f32 %v9839_v52, %v5802_v15  ;;  %v5804_v16 = vpop.f32.mrb[217].mxu1 }
 0x4e3   : > { %v5805_v30 = vpop.f32.mrb[218].mxu1 }
 0x4e4   : > { %5994 = vst [vmem:[%s9850_s21 + $0x110] sm:$0xff] %v5803_v51  ;;  %v5806_v29 = vadd.f32 %v9839_v52, %v5805_v30  ;;  %v5807_v45 = vpop.f32.mrb[219].mxu1 }
 0x4e6   : > { %5995 = vst [vmem:[%s9850_s21 + $0x118] sm:$0xff] %v5806_v29 }
 0x4e9   : > { %v5810_v26 = vpop.f32.mrb[220].mxu1 }
 0x4ea   : > { %v5811_v20 = vadd.f32 %v9839_v52, %v5810_v26  ;;  %v5812_v8 = vpop.f32.mrb[221].mxu1 }
 0x4eb   : > { %v5813_v47 = vpop.f32.mrb[222].mxu1 }
 0x4ec   : > { %5996 = vst [vmem:[%s9850_s21 + $0x120] sm:$0xff] %v5811_v20  ;;  %v5814_v62 = vadd.f32 %v9839_v52, %v5813_v47  ;;  %v5815_v28 = vpop.f32.mrb[223].mxu1 }
 0x4ee   : > { %5997 = vst [vmem:[%s9850_s21 + $0x128] sm:$0xff] %v5814_v62 }
 0x4f1   : > { %v5818_v43 = vpop.f32.mrb[224].mxu1 }
 0x4f2   : > { %v5819_v12 = vadd.f32 %v9839_v52, %v5818_v43  ;;  %v5820_v0 = vpop.f32.mrb[225].mxu1 }
 0x4f3   : > { %v5821_v9 = vpop.f32.mrb[226].mxu1 }
 0x4f4   : > { %5998 = vst [vmem:[%s9850_s21 + $0x130] sm:$0xff] %v5819_v12  ;;  %v5822_v46 = vadd.f32 %v9839_v52, %v5821_v9  ;;  %v5823_v31 = vpop.f32.mrb[227].mxu1 }
 0x4f6   : > { %5999 = vst [vmem:[%s9850_s21 + $0x138] sm:$0xff] %v5822_v46 }
 0x4f9   : > { %v5826_v24 = vpop.f32.mrb[228].mxu1 }
 0x4fa   : > { %v5827_v41 = vadd.f32 %v9839_v52, %v5826_v24  ;;  %v5828_v1 = vpop.f32.mrb[229].mxu1 }
 0x4fb   : > { %v5829_v50 = vpop.f32.mrb[230].mxu1 }
 0x4fc   : > { %6000 = vst [vmem:[%s9850_s21 + $0x140] sm:$0xff] %v5827_v41  ;;  %v5830_v10 = vadd.f32 %v9839_v52, %v5829_v50  ;;  %v5831_v13 = vpop.f32.mrb[231].mxu1 }
 0x4fe   : > { %6001 = vst [vmem:[%s9850_s21 + $0x148] sm:$0xff] %v5830_v10 }
 0x501   : > { %v5834_v36 = vpop.f32.mrb[232].mxu1 }
 0x502   : > { %v5835_v18 = vadd.f32 %v9839_v52, %v5834_v36  ;;  %v5836_v57 = vpop.f32.mrb[233].mxu1 }
 0x503   : > { %v5837_v59 = vpop.f32.mrb[234].mxu1 }
 0x504   : > { %6002 = vst [vmem:[%s9850_s21 + $0x150] sm:$0xff] %v5835_v18  ;;  %v5838_v53 = vadd.f32 %v9839_v52, %v5837_v59  ;;  %v5839_v4 = vpop.f32.mrb[235].mxu1 }
 0x506   : > { %6003 = vst [vmem:[%s9850_s21 + $0x158] sm:$0xff] %v5838_v53 }
 0x509   : > { %v5842_v39 = vpop.f32.mrb[236].mxu1 }
 0x50a   : > { %v5843_v61 = vadd.f32 %v9839_v52, %v5842_v39  ;;  %v5844_v44 = vpop.f32.mrb[237].mxu1 }
 0x50b   : > { %v5845_v55 = vpop.f32.mrb[238].mxu1 }
 0x50c   : > { %6004 = vst [vmem:[%s9850_s21 + $0x160] sm:$0xff] %v5843_v61  ;;  %v5846_v63 = vadd.f32 %v9839_v52, %v5845_v55  ;;  %v5847_v58 = vpop.f32.mrb[239].mxu1 }
 0x50e   : > { %6005 = vst [vmem:[%s9850_s21 + $0x168] sm:$0xff] %v5846_v63 }
 0x511   : > { %v5850_v56 = vpop.f32.mrb[240].mxu1 }
 0x512   : > { %v5851_v48 = vadd.f32 %v9839_v52, %v5850_v56  ;;  %v5852_v2 = vpop.f32.mrb[241].mxu1 }
 0x513   : > { %v5853_v49 = vpop.f32.mrb[242].mxu1 }
 0x514   : > { %6006 = vst [vmem:[%s9850_s21 + $0x170] sm:$0xff] %v5851_v48  ;;  %v5854_v32 = vadd.f32 %v9839_v52, %v5853_v49  ;;  %v5855_v35 = vpop.f32.mrb[243].mxu1 }
 0x516   : > { %6007 = vst [vmem:[%s9850_s21 + $0x178] sm:$0xff] %v5854_v32 }
 0x519   : > { %v5858_v11 = vpop.f32.mrb[244].mxu1 }
 0x51a   : > { %v5859_v17 = vadd.f32 %v9839_v52, %v5858_v11  ;;  %v5860_v54 = vpop.f32.mrb[245].mxu1 }
 0x51b   : > { %v5861_v33 = vpop.f32.mrb[246].mxu1 }
 0x51c   : > { %6008 = vst [vmem:[%s9850_s21 + $0x180] sm:$0xff] %v5859_v17  ;;  %v5862_v42 = vadd.f32 %v9839_v52, %v5861_v33  ;;  %v5863_v3 = vpop.f32.mrb[247].mxu1 }
 0x51e   : > { %6009 = vst [vmem:[%s9850_s21 + $0x188] sm:$0xff] %v5862_v42 }
 0x521   : > { %v5866_v34 = vpop.f32.mrb[248].mxu1 }
 0x522   : > { %v5867_v60 = vadd.f32 %v9839_v52, %v5866_v34  ;;  %v5868_v5 = vpop.f32.mrb[249].mxu1 }
 0x523   : > { %v5869_v19 = vpop.f32.mrb[250].mxu1 }
 0x524   : > { %6010 = vst [vmem:[%s9850_s21 + $0x190] sm:$0xff] %v5867_v60  ;;  %v5870_v6 = vadd.f32 %v9839_v52, %v5869_v19  ;;  %v5871_v38 = vpop.f32.mrb[251].mxu1 }
 0x526   : > { %6011 = vst [vmem:[%s9850_s21 + $0x198] sm:$0xff] %v5870_v6 }
 0x529   : > { %v5874_v25 = vpop.f32.mrb[252].mxu1 }
 0x52a   : > { %v5875_v21 = vadd.f32 %v9839_v52, %v5874_v25  ;;  %v5876_v7 = vpop.f32.mrb[253].mxu1 }
 0x52b   : > { %v5877_v14 = vpop.f32.mrb[254].mxu1  ;;  %v6213_v7 = vld [vmem:[%s9850_s21] sm:$0xff] (%p7699_p5) }
 0x52c   : > { %6012 = vst [vmem:[%s9850_s21 + $0x1a0] sm:$0xff] %v5875_v21  ;;  %v5878_v22 = vadd.f32 %v9839_v52, %v5877_v14  ;;  %v5879_v23 = vpop.f32.mrb[255].mxu1  ;;  %v6217_v14 = vld [vmem:[%s9850_s21 + $0x10] sm:$0xff] (%p7699_p5)  ;;  %6214 = vst [vmem:[%s10100_s16] sm:$0xff] (%p7699_p5), %v6213_v7 }
 0x52d   : > { %v6221_v23 = vld [vmem:[%s9850_s21 + $0x20] sm:$0xff] (%p7699_p5)  ;;  %6218 = vst [vmem:[%s10100_s16 + $0x40] sm:$0xff] (%p7699_p5), %v6217_v14 }
 0x52e   : > { %6013 = vst [vmem:[%s9850_s21 + $0x1a8] sm:$0xff] %v5878_v22  ;;  %v6219_v22 = vld [vmem:[%s9850_s21 + $0x18] sm:$0xff] (%p7699_p5)  ;;  %6222 = vst [vmem:[%s10100_s16 + $0x80] sm:$0xff] (%p7699_p5), %v6221_v23 }
 0x52f   : > { %6220 = vst [vmem:[%s10100_s16 + $0x60] sm:$0xff] (%p7699_p5), %v6219_v22 }
 0x531   : > { %v5882_v37 = vpop.f32.mrb[0].mxu1 }
 0x532   : > { %v5883_v40 = vadd.f32 %v9839_v52, %v5882_v37  ;;  %v5884_v27 = vpop.f32.mrb[1].mxu1  ;;  %v6223_v37 = vld [vmem:[%s9850_s21 + $0x28] sm:$0xff] (%p7699_p5) }
 0x533   : > { %v5885_v15 = vpop.f32.mrb[2].mxu1  ;;  %6224 = vst [vmem:[%s10100_s16 + $0xa0] sm:$0xff] (%p7699_p5), %v6223_v37  ;;  %v6227_v27 = vld [vmem:[%s9850_s21 + $0x38] sm:$0xff] (%p7699_p5) }
 0x534   : > { %6014 = vst [vmem:[%s9850_s21 + $0x1b0] sm:$0xff] %v5883_v40  ;;  %v5886_v51 = vadd.f32 %v9839_v52, %v5885_v15  ;;  %v5887_v16 = vpop.f32.mrb[3].mxu1  ;;  %v6225_v40 = vld [vmem:[%s9850_s21 + $0x30] sm:$0xff] (%p7699_p5)  ;;  %v6229_v15 = vld [vmem:[%s9850_s21 + $0x40] sm:$0xff] (%p7699_p5)  ;;  %6228 = vst [vmem:[%s10100_s16 + $0xe0] sm:$0xff] (%p7699_p5), %v6227_v27 }
 0x535   : > { %6226 = vst [vmem:[%s10100_s16 + $0xc0] sm:$0xff] (%p7699_p5), %v6225_v40  ;;  %6230 = vst [vmem:[%s10100_s16 + $0x100] sm:$0xff] (%p7699_p5), %v6229_v15  ;;  %v6233_v16 = vld [vmem:[%s9850_s21 + $0x50] sm:$0xff] (%p7699_p5) }
 0x536   : > { %6015 = vst [vmem:[%s9850_s21 + $0x1b8] sm:$0xff] %v5886_v51  ;;  %v6231_v51 = vld [vmem:[%s9850_s21 + $0x48] sm:$0xff] (%p7699_p5)  ;;  %6234 = vst [vmem:[%s10100_s16 + $0x140] sm:$0xff] (%p7699_p5), %v6233_v16 }
 0x537   : > { %6232 = vst [vmem:[%s10100_s16 + $0x120] sm:$0xff] (%p7699_p5), %v6231_v51 }
 0x539   : > { %v5890_v30 = vpop.f32.mrb[4].mxu1 }
 0x53a   : > { %v5891_v29 = vadd.f32 %v9839_v52, %v5890_v30  ;;  %v5892_v45 = vpop.f32.mrb[5].mxu1  ;;  %v6235_v30 = vld [vmem:[%s9850_s21 + $0x58] sm:$0xff] (%p7699_p5) }
 0x53b   : > { %v5893_v26 = vpop.f32.mrb[6].mxu1  ;;  %6236 = vst [vmem:[%s10100_s16 + $0x160] sm:$0xff] (%p7699_p5), %v6235_v30  ;;  %v6239_v45 = vld [vmem:[%s9850_s21 + $0x68] sm:$0xff] (%p7699_p5) }
 0x53c   : > { %6016 = vst [vmem:[%s9850_s21 + $0x1c0] sm:$0xff] %v5891_v29  ;;  %v5894_v20 = vadd.f32 %v9839_v52, %v5893_v26  ;;  %v5895_v8 = vpop.f32.mrb[7].mxu1  ;;  %v6237_v29 = vld [vmem:[%s9850_s21 + $0x60] sm:$0xff] (%p7699_p5)  ;;  %v6241_v26 = vld [vmem:[%s9850_s21 + $0x70] sm:$0xff] (%p7699_p5)  ;;  %6240 = vst [vmem:[%s10100_s16 + $0x1a0] sm:$0xff] (%p7699_p5), %v6239_v45 }
 0x53d   : > { %6238 = vst [vmem:[%s10100_s16 + $0x180] sm:$0xff] (%p7699_p5), %v6237_v29  ;;  %6242 = vst [vmem:[%s10100_s16 + $0x1c0] sm:$0xff] (%p7699_p5), %v6241_v26  ;;  %v6245_v8 = vld [vmem:[%s9850_s21 + $0x80] sm:$0xff] (%p7699_p5) }
 0x53e   : > { %6017 = vst [vmem:[%s9850_s21 + $0x1c8] sm:$0xff] %v5894_v20  ;;  %v6243_v20 = vld [vmem:[%s9850_s21 + $0x78] sm:$0xff] (%p7699_p5)  ;;  %6246 = vst [vmem:[%s10100_s16 + $0x200] sm:$0xff] (%p7699_p5), %v6245_v8 }
 0x53f   : > { %6244 = vst [vmem:[%s10100_s16 + $0x1e0] sm:$0xff] (%p7699_p5), %v6243_v20 }
 0x541   : > { %v5898_v47 = vpop.f32.mrb[8].mxu1 }
 0x542   : > { %v5899_v62 = vadd.f32 %v9839_v52, %v5898_v47  ;;  %v5900_v28 = vpop.f32.mrb[9].mxu1  ;;  %v6247_v47 = vld [vmem:[%s9850_s21 + $0x88] sm:$0xff] (%p7699_p5) }
 0x543   : > { %v5901_v43 = vpop.f32.mrb[10].mxu1  ;;  %6248 = vst [vmem:[%s10100_s16 + $0x220] sm:$0xff] (%p7699_p5), %v6247_v47  ;;  %v6251_v28 = vld [vmem:[%s9850_s21 + $0x98] sm:$0xff] (%p7699_p5) }
 0x544   : > { %6018 = vst [vmem:[%s9850_s21 + $0x1d0] sm:$0xff] %v5899_v62  ;;  %v5902_v12 = vadd.f32 %v9839_v52, %v5901_v43  ;;  %v5903_v0 = vpop.f32.mrb[11].mxu1  ;;  %v6249_v62 = vld [vmem:[%s9850_s21 + $0x90] sm:$0xff] (%p7699_p5)  ;;  %v6253_v43 = vld [vmem:[%s9850_s21 + $0xa0] sm:$0xff] (%p7699_p5)  ;;  %6252 = vst [vmem:[%s10100_s16 + $0x260] sm:$0xff] (%p7699_p5), %v6251_v28 }
 0x545   : > { %6250 = vst [vmem:[%s10100_s16 + $0x240] sm:$0xff] (%p7699_p5), %v6249_v62  ;;  %6254 = vst [vmem:[%s10100_s16 + $0x280] sm:$0xff] (%p7699_p5), %v6253_v43  ;;  %v6257_v0 = vld [vmem:[%s9850_s21 + $0xb0] sm:$0xff] (%p7699_p5) }
 0x546   : > { %6019 = vst [vmem:[%s9850_s21 + $0x1d8] sm:$0xff] %v5902_v12  ;;  %v6255_v12 = vld [vmem:[%s9850_s21 + $0xa8] sm:$0xff] (%p7699_p5)  ;;  %6258 = vst [vmem:[%s10100_s16 + $0x2c0] sm:$0xff] (%p7699_p5), %v6257_v0 }
 0x547   : > { %6256 = vst [vmem:[%s10100_s16 + $0x2a0] sm:$0xff] (%p7699_p5), %v6255_v12 }
 0x549   : > { %v5906_v9 = vpop.f32.mrb[12].mxu1 }
 0x54a   : > { %v5907_v46 = vadd.f32 %v9839_v52, %v5906_v9  ;;  %v5908_v31 = vpop.f32.mrb[13].mxu1  ;;  %v6259_v9 = vld [vmem:[%s9850_s21 + $0xb8] sm:$0xff] (%p7699_p5) }
 0x54b   : > { %v5909_v24 = vpop.f32.mrb[14].mxu1  ;;  %6260 = vst [vmem:[%s10100_s16 + $0x2e0] sm:$0xff] (%p7699_p5), %v6259_v9  ;;  %v6263_v31 = vld [vmem:[%s9850_s21 + $0xc8] sm:$0xff] (%p7699_p5) }
 0x54c   : > { %6020 = vst [vmem:[%s9850_s21 + $0x1e0] sm:$0xff] %v5907_v46  ;;  %v5910_v41 = vadd.f32 %v9839_v52, %v5909_v24  ;;  %v5911_v1 = vpop.f32.mrb[15].mxu1  ;;  %v6261_v46 = vld [vmem:[%s9850_s21 + $0xc0] sm:$0xff] (%p7699_p5)  ;;  %v6265_v24 = vld [vmem:[%s9850_s21 + $0xd0] sm:$0xff] (%p7699_p5)  ;;  %6264 = vst [vmem:[%s10100_s16 + $0x320] sm:$0xff] (%p7699_p5), %v6263_v31 }
 0x54d   : > { %6262 = vst [vmem:[%s10100_s16 + $0x300] sm:$0xff] (%p7699_p5), %v6261_v46  ;;  %6266 = vst [vmem:[%s10100_s16 + $0x340] sm:$0xff] (%p7699_p5), %v6265_v24  ;;  %v6269_v1 = vld [vmem:[%s9850_s21 + $0xe0] sm:$0xff] (%p7699_p5) }
 0x54e   : > { %6021 = vst [vmem:[%s9850_s21 + $0x1e8] sm:$0xff] %v5910_v41  ;;  %v6267_v41 = vld [vmem:[%s9850_s21 + $0xd8] sm:$0xff] (%p7699_p5)  ;;  %6270 = vst [vmem:[%s10100_s16 + $0x380] sm:$0xff] (%p7699_p5), %v6269_v1 }
 0x54f   : > { %6268 = vst [vmem:[%s10100_s16 + $0x360] sm:$0xff] (%p7699_p5), %v6267_v41 }
 0x551   : > { %v5914_v50 = vpop.f32.mrb[16].mxu1 }
 0x552   : > { %v5915_v10 = vadd.f32 %v9839_v52, %v5914_v50  ;;  %v5916_v13 = vpop.f32.mrb[17].mxu1  ;;  %v6271_v50 = vld [vmem:[%s9850_s21 + $0xe8] sm:$0xff] (%p7699_p5) }
 0x553   : > { %v5917_v36 = vpop.f32.mrb[18].mxu1  ;;  %6272 = vst [vmem:[%s10100_s16 + $0x3a0] sm:$0xff] (%p7699_p5), %v6271_v50  ;;  %v6275_v13 = vld [vmem:[%s9850_s21 + $0xf8] sm:$0xff] (%p7699_p5) }
 0x554   : > { %6022 = vst [vmem:[%s9850_s21 + $0x1f0] sm:$0xff] %v5915_v10  ;;  %v5918_v18 = vadd.f32 %v9839_v52, %v5917_v36  ;;  %v5919_v57 = vpop.f32.mrb[19].mxu1  ;;  %v6273_v10 = vld [vmem:[%s9850_s21 + $0xf0] sm:$0xff] (%p7699_p5)  ;;  %v6277_v36 = vld [vmem:[%s9850_s21 + $0x100] sm:$0xff] (%p7699_p5)  ;;  %6276 = vst [vmem:[%s10100_s16 + $0x3e0] sm:$0xff] (%p7699_p5), %v6275_v13 }
 0x555   : > { %6274 = vst [vmem:[%s10100_s16 + $0x3c0] sm:$0xff] (%p7699_p5), %v6273_v10  ;;  %6278 = vst [vmem:[%s10100_s16 + $0x400] sm:$0xff] (%p7699_p5), %v6277_v36  ;;  %v6281_v57 = vld [vmem:[%s9850_s21 + $0x110] sm:$0xff] (%p7699_p5) }
 0x556   : > { %6023 = vst [vmem:[%s9850_s21 + $0x1f8] sm:$0xff] %v5918_v18  ;;  %v6279_v18 = vld [vmem:[%s9850_s21 + $0x108] sm:$0xff] (%p7699_p5)  ;;  %6282 = vst [vmem:[%s10100_s16 + $0x440] sm:$0xff] (%p7699_p5), %v6281_v57 }
 0x557   : > { %6280 = vst [vmem:[%s10100_s16 + $0x420] sm:$0xff] (%p7699_p5), %v6279_v18 }
 0x559   : > { %v5922_v59 = vpop.f32.mrb[20].mxu1 }
 0x55a   : > { %v5923_v53 = vadd.f32 %v9839_v52, %v5922_v59  ;;  %v5924_v4 = vpop.f32.mrb[21].mxu1  ;;  %v6283_v59 = vld [vmem:[%s9850_s21 + $0x118] sm:$0xff] (%p7699_p5) }
 0x55b   : > { %v5925_v39 = vpop.f32.mrb[22].mxu1  ;;  %6284 = vst [vmem:[%s10100_s16 + $0x460] sm:$0xff] (%p7699_p5), %v6283_v59  ;;  %v6287_v4 = vld [vmem:[%s9850_s21 + $0x128] sm:$0xff] (%p7699_p5) }
 0x55c   : > { %6024 = vst [vmem:[%s9850_s21 + $0x200] sm:$0xff] %v5923_v53  ;;  %v5926_v61 = vadd.f32 %v9839_v52, %v5925_v39  ;;  %v5927_v44 = vpop.f32.mrb[23].mxu1  ;;  %v6285_v53 = vld [vmem:[%s9850_s21 + $0x120] sm:$0xff] (%p7699_p5)  ;;  %v6289_v39 = vld [vmem:[%s9850_s21 + $0x130] sm:$0xff] (%p7699_p5)  ;;  %6288 = vst [vmem:[%s10100_s16 + $0x4a0] sm:$0xff] (%p7699_p5), %v6287_v4 }
 0x55d   : > { %6286 = vst [vmem:[%s10100_s16 + $0x480] sm:$0xff] (%p7699_p5), %v6285_v53  ;;  %6290 = vst [vmem:[%s10100_s16 + $0x4c0] sm:$0xff] (%p7699_p5), %v6289_v39  ;;  %v6293_v44 = vld [vmem:[%s9850_s21 + $0x140] sm:$0xff] (%p7699_p5) }
 0x55e   : > { %6025 = vst [vmem:[%s9850_s21 + $0x208] sm:$0xff] %v5926_v61  ;;  %v6291_v61 = vld [vmem:[%s9850_s21 + $0x138] sm:$0xff] (%p7699_p5)  ;;  %6294 = vst [vmem:[%s10100_s16 + $0x500] sm:$0xff] (%p7699_p5), %v6293_v44 }
 0x55f   : > { %6292 = vst [vmem:[%s10100_s16 + $0x4e0] sm:$0xff] (%p7699_p5), %v6291_v61 }
 0x561   : > { %v5930_v55 = vpop.f32.mrb[24].mxu1 }
 0x562   : > { %v5931_v63 = vadd.f32 %v9839_v52, %v5930_v55  ;;  %v5932_v58 = vpop.f32.mrb[25].mxu1  ;;  %v6295_v55 = vld [vmem:[%s9850_s21 + $0x148] sm:$0xff] (%p7699_p5) }
 0x563   : > { %v5933_v56 = vpop.f32.mrb[26].mxu1  ;;  %6296 = vst [vmem:[%s10100_s16 + $0x520] sm:$0xff] (%p7699_p5), %v6295_v55  ;;  %v6299_v58 = vld [vmem:[%s9850_s21 + $0x158] sm:$0xff] (%p7699_p5)  ;;  %v6341_v7 = vld [vmem:[%s9850_s21 + $0x200] sm:$0xff] (%p7699_p5) }
 0x564   : > { %6026 = vst [vmem:[%s9850_s21 + $0x210] sm:$0xff] %v5931_v63  ;;  %v5934_v48 = vadd.f32 %v9839_v52, %v5933_v56  ;;  %v5935_v2 = vpop.f32.mrb[27].mxu1  ;;  %v6297_v63 = vld [vmem:[%s9850_s21 + $0x150] sm:$0xff] (%p7699_p5)  ;;  %v6301_v56 = vld [vmem:[%s9850_s21 + $0x160] sm:$0xff] (%p7699_p5)  ;;  %6300 = vst [vmem:[%s10100_s16 + $0x560] sm:$0xff] (%p7699_p5), %v6299_v58 }
 0x565   : > { %6298 = vst [vmem:[%s10100_s16 + $0x540] sm:$0xff] (%p7699_p5), %v6297_v63  ;;  %6302 = vst [vmem:[%s10100_s16 + $0x580] sm:$0xff] (%p7699_p5), %v6301_v56  ;;  %v6305_v2 = vld [vmem:[%s9850_s21 + $0x170] sm:$0xff] (%p7699_p5) }
 0x566   : > { %6027 = vst [vmem:[%s9850_s21 + $0x218] sm:$0xff] %v5934_v48  ;;  %v6303_v48 = vld [vmem:[%s9850_s21 + $0x168] sm:$0xff] (%p7699_p5)  ;;  %6306 = vst [vmem:[%s10100_s16 + $0x5c0] sm:$0xff] (%p7699_p5), %v6305_v2 }
 0x567   : > { %6304 = vst [vmem:[%s10100_s16 + $0x5a0] sm:$0xff] (%p7699_p5), %v6303_v48  ;;  %6342 = vst [vmem:[%s10100_s16 + $0x800] sm:$0xff] (%p7699_p5), %v6341_v7 }
 0x569   : > { %v5938_v49 = vpop.f32.mrb[28].mxu1 }
 0x56a   : > { %v5939_v32 = vadd.f32 %v9839_v52, %v5938_v49  ;;  %v5940_v35 = vpop.f32.mrb[29].mxu1  ;;  %v6307_v49 = vld [vmem:[%s9850_s21 + $0x178] sm:$0xff] (%p7699_p5) }
 0x56b   : > { %v5941_v11 = vpop.f32.mrb[30].mxu1  ;;  %6308 = vst [vmem:[%s10100_s16 + $0x5e0] sm:$0xff] (%p7699_p5), %v6307_v49  ;;  %v6311_v35 = vld [vmem:[%s9850_s21 + $0x188] sm:$0xff] (%p7699_p5)  ;;  %v6345_v14 = vld [vmem:[%s9850_s21 + $0x210] sm:$0xff] (%p7699_p5) }
 0x56c   : > { %6028 = vst [vmem:[%s9850_s21 + $0x220] sm:$0xff] %v5939_v32  ;;  %v5942_v17 = vadd.f32 %v9839_v52, %v5941_v11  ;;  %v5943_v54 = vpop.f32.mrb[31].mxu1  ;;  %v6309_v32 = vld [vmem:[%s9850_s21 + $0x180] sm:$0xff] (%p7699_p5)  ;;  %v6313_v11 = vld [vmem:[%s9850_s21 + $0x190] sm:$0xff] (%p7699_p5)  ;;  %6312 = vst [vmem:[%s10100_s16 + $0x620] sm:$0xff] (%p7699_p5), %v6311_v35 }
 0x56d   : > { %6310 = vst [vmem:[%s10100_s16 + $0x600] sm:$0xff] (%p7699_p5), %v6309_v32  ;;  %6314 = vst [vmem:[%s10100_s16 + $0x640] sm:$0xff] (%p7699_p5), %v6313_v11  ;;  %v6317_v54 = vld [vmem:[%s9850_s21 + $0x1a0] sm:$0xff] (%p7699_p5)  ;;  %v6347_v22 = vld [vmem:[%s9850_s21 + $0x218] sm:$0xff] (%p7699_p5) }
 0x56e   : > { %6029 = vst [vmem:[%s9850_s21 + $0x228] sm:$0xff] %v5942_v17  ;;  %v6315_v17 = vld [vmem:[%s9850_s21 + $0x198] sm:$0xff] (%p7699_p5)  ;;  %6318 = vst [vmem:[%s10100_s16 + $0x680] sm:$0xff] (%p7699_p5), %v6317_v54 }
 0x56f   : > { %6316 = vst [vmem:[%s10100_s16 + $0x660] sm:$0xff] (%p7699_p5), %v6315_v17  ;;  %6346 = vst [vmem:[%s10100_s16 + $0x840] sm:$0xff] (%p7699_p5), %v6345_v14 }
 0x570   : > { %6348 = vst [vmem:[%s10100_s16 + $0x860] sm:$0xff] (%p7699_p5), %v6347_v22 }
 0x571   : > { %v5946_v33 = vpop.f32.mrb[32].mxu1 }
 0x572   : > { %v5947_v42 = vadd.f32 %v9839_v52, %v5946_v33  ;;  %v5948_v3 = vpop.f32.mrb[33].mxu1  ;;  %v6319_v33 = vld [vmem:[%s9850_s21 + $0x1a8] sm:$0xff] (%p7699_p5) }
 0x573   : > { %v5949_v34 = vpop.f32.mrb[34].mxu1  ;;  %6320 = vst [vmem:[%s10100_s16 + $0x6a0] sm:$0xff] (%p7699_p5), %v6319_v33  ;;  %v6323_v3 = vld [vmem:[%s9850_s21 + $0x1b8] sm:$0xff] (%p7699_p5)  ;;  %v6349_v23 = vld [vmem:[%s9850_s21 + $0x220] sm:$0xff] (%p7699_p5) }
 0x574   : > { %6030 = vst [vmem:[%s9850_s21 + $0x230] sm:$0xff] %v5947_v42  ;;  %v5950_v60 = vadd.f32 %v9839_v52, %v5949_v34  ;;  %v5951_v5 = vpop.f32.mrb[35].mxu1  ;;  %v6321_v42 = vld [vmem:[%s9850_s21 + $0x1b0] sm:$0xff] (%p7699_p5)  ;;  %v6325_v34 = vld [vmem:[%s9850_s21 + $0x1c0] sm:$0xff] (%p7699_p5)  ;;  %6324 = vst [vmem:[%s10100_s16 + $0x6e0] sm:$0xff] (%p7699_p5), %v6323_v3 }
 0x575   : > { %6322 = vst [vmem:[%s10100_s16 + $0x6c0] sm:$0xff] (%p7699_p5), %v6321_v42  ;;  %6326 = vst [vmem:[%s10100_s16 + $0x700] sm:$0xff] (%p7699_p5), %v6325_v34  ;;  %v6329_v5 = vld [vmem:[%s9850_s21 + $0x1d0] sm:$0xff] (%p7699_p5)  ;;  %v6351_v37 = vld [vmem:[%s9850_s21 + $0x228] sm:$0xff] (%p7699_p5) }
 0x576   : > { %6031 = vst [vmem:[%s9850_s21 + $0x238] sm:$0xff] %v5950_v60  ;;  %6039 = sbr.rel (!%p7699_p5) target bundleno = 1413 (0x585), region = 86  ;;  %v6327_v60 = vld [vmem:[%s9850_s21 + $0x1c8] sm:$0xff] (%p7699_p5)  ;;  %6330 = vst [vmem:[%s10100_s16 + $0x740] sm:$0xff] (%p7699_p5), %v6329_v5 }
 0x577   : > { %6328 = vst [vmem:[%s10100_s16 + $0x720] sm:$0xff] (%p7699_p5), %v6327_v60  ;;  %6350 = vst [vmem:[%s10100_s16 + $0x880] sm:$0xff] (%p7699_p5), %v6349_v23 }
 0x578   : > { %6352 = vst [vmem:[%s10100_s16 + $0x8a0] sm:$0xff] (%p7699_p5), %v6351_v37 }
 0x579   : > { %v5954_v19 = vpop.f32.mrb[36].mxu1 }
 0x57a   : > { %v5955_v6 = vadd.f32 %v9839_v52, %v5954_v19  ;;  %v5956_v38 = vpop.f32.mrb[37].mxu1  ;;  %v6215_v52 = vld [vmem:[%s9850_s21 + $0x8] sm:$0xff] (%p7699_p5)  ;;  %v6331_v19 = vld [vmem:[%s9850_s21 + $0x1d8] sm:$0xff] (%p7699_p5) }
 0x57b   : > { %v5957_v25 = vpop.f32.mrb[38].mxu1  ;;  %6216 = vst [vmem:[%s10100_s16 + $0x20] sm:$0xff] (%p7699_p5), %v6215_v52  ;;  %6332 = vst [vmem:[%s10100_s16 + $0x760] sm:$0xff] (%p7699_p5), %v6331_v19  ;;  %v6335_v38 = vld [vmem:[%s9850_s21 + $0x1e8] sm:$0xff] (%p7699_p5)  ;;  %v6353_v40 = vld [vmem:[%s9850_s21 + $0x230] sm:$0xff] (%p7699_p5) }
 0x57c   : > { %6032 = vst [vmem:[%s9850_s21 + $0x240] sm:$0x3] %v5955_v6  ;;  %v5958_v21 = vpop.f32.mrb[39].mxu1  ;;  %v6333_v6 = vld [vmem:[%s9850_s21 + $0x1e0] sm:$0xff] (%p7699_p5)  ;;  %v6337_v25 = vld [vmem:[%s9850_s21 + $0x1f0] sm:$0xff] (%p7699_p5)  ;;  %6336 = vst [vmem:[%s10100_s16 + $0x7a0] sm:$0xff] (%p7699_p5), %v6335_v38 }
 0x57d   : > { %6334 = vst [vmem:[%s10100_s16 + $0x780] sm:$0xff] %v6333_v6  ;;  %6338 = vst [vmem:[%s10100_s16 + $0x7c0] sm:$0xff] %v6337_v25  ;;  %v6339_v21 = vld [vmem:[%s9850_s21 + $0x1f8] sm:$0xff]  ;;  %v6343_v52 = vld [vmem:[%s9850_s21 + $0x208] sm:$0xff] }
 0x57e   : > { %6340 = vst [vmem:[%s10100_s16 + $0x7e0] sm:$0xff] %v6339_v21  ;;  %6344 = vst [vmem:[%s10100_s16 + $0x820] sm:$0xff] %v6343_v52  ;;  %v6355_v27 = vld [vmem:[%s9850_s21 + $0x238] sm:$0xff] }
 0x57f   : > { %6354 = vst [vmem:[%s10100_s16 + $0x8c0] sm:$0xff] %v6353_v40  ;;  %6356 = vst [vmem:[%s10100_s16 + $0x8e0] sm:$0xff] %v6355_v27 }
 0x583   : > { %v6357_v15 = vld [vmem:[%s9850_s21 + $0x240] sm:$0xff] }
 0x584   : > { %6358 = vst [vmem:[%s10100_s16 + $0x900] sm:$0xff] %v6357_v15 }
 0x585 PF: > { %p13_p11 = scmp.ge.s32.totalorder %s7687_s25, 6   ;;  %s10474_s21 = smov %s7626_s22 }
 0x586   : > { %s10475_s22 = smov %s7697_s28  ;;  %s10476_s23 = smov %s7687_s25 }
 0x587   :  { %15 = sbr.rel (!%p13_p11) target bundleno = 2 (0x2), region = 161 }

</bundles_post_ra>
